<compile_context>
chip_gen: v6e
topology: v6e:2x2x1
jax: 0.10.0
libtpu: 0.0.40
codegen_flags: <defaults>
</compile_context>

<pallas_src>
import jax
import jax.numpy as jnp
from jax.experimental import pallas as pl
from jax.experimental.pallas import tpu as pltpu


# ----------------------------- static layer plan ----------------------------

def _layer_dims(H, W, channels):
    """Static per-layer geometry for conv(k=2, valid) + maxpool(2)."""
    dims = []
    h, w = H, W
    for li in range(len(channels) - 1):
        hp, wp = (h - 1) // 2, (w - 1) // 2
        dims.append(dict(Hin=h, Win=w, Cin=channels[li], Cout=channels[li + 1],
                         Hp=hp, Wp=wp, N=h * w))
        h, w = hp, wp
    return dims


# ------------------------------ fused kernel --------------------------------

def _make_fused_kernel(layers):
    n = len(layers)

    def kernel(*refs):
        x_ref = refs[0]
        w_refs = refs[1:1 + n]                  # (4*Cin, Cout) matmul matrices
        b_refs = refs[1 + n:1 + 2 * n]          # (1, Cout)
        o_ref = refs[1 + 2 * n]                 # (1, Cout_last)
        scratch = refs[2 + 2 * n:]
        buf_refs = scratch[:n]                  # per-layer conv/pool workspace
        act_refs = scratch[n:]                  # n-1 inter-layer activations

        # Zero the shift-padding rows of the inter-layer activation buffers so
        # the shifted matmul reads below never touch uninitialised VMEM.
        for li in range(n - 1):
            d = layers[li + 1]
            pad = d["Win"] + 1
            act_refs[li][pl.ds(d["N"], pad), :] = jnp.zeros(
                (pad, d["Cin"]), jnp.float32)

        in_ref = x_ref
        for li, d in enumerate(layers):
            Hin, Win = d["Hin"], d["Win"]
            Cin, Cout = d["Cin"], d["Cout"]
            Hp, Wp, N = d["Hp"], d["Wp"], d["N"]
            w_ref, b_ref, buf = w_refs[li], b_refs[li], buf_refs[li]
            last = li == n - 1

            # ---- Conv(k=2, valid) as 4 shifted matmuls on the flat activation.
            # in_ref holds the (Hin*Win [+pad], Cin) row-major activation; the
            # (dh, dw) tap contribution is the activation shifted by dh*Win+dw.
            z = None
            for dh in range(2):
                for dw in range(2):
                    t = 2 * dh + dw
                    a = in_ref[pl.ds(dh * Win + dw, N), :]        # (N, Cin)
                    if Cin == 1:
                        part = a * w_ref[pl.ds(t, 1), :]          # VPU path
                    else:
                        part = jnp.dot(a, w_ref[pl.ds(t * Cin, Cin), :],
                                       preferred_element_type=jnp.float32)
                    z = part if z is None else z + part
            buf[...] = z                                          # (N, Cout)

            # ---- 2x2 max-pool: neighbour max along W, then along H, then a
            # stride-2 row selection.  Garbage at right/bottom conv edges never
            # reaches the selected rows.
            m1 = jnp.maximum(buf[pl.ds(0, N - 1), :], buf[pl.ds(1, N - 1), :])
            buf[pl.ds(0, N - 1), :] = m1
            nr = N - 1 - Win
            m2 = jnp.maximum(buf[pl.ds(0, nr), :], buf[pl.ds(Win, nr), :])
            buf[pl.ds(0, nr), :] = m2

            bias = b_ref[...]                                     # (1, Cout)
            acc = None
            for i in range(Hp):
                start = 2 * i * Win
                if Wp > 1:
                    row = buf[pl.ds(start, Wp, stride=2), :]      # (Wp, Cout)
                else:
                    row = buf[pl.ds(start, 1), :]
                y = jnp.maximum(row + bias, 0.0)                  # bias+ReLU once
                if last:                                          # fused GAP
                    s = jnp.sum(y, axis=0, keepdims=True)
                    acc = s if acc is None else acc + s
                else:
                    act_refs[li][pl.ds(i * Wp, Wp), :] = y
            if last:
                o_ref[...] = (acc * (1.0 / float(Hp * Wp))).astype(o_ref.dtype)
            else:
                in_ref = act_refs[li]

    return kernel


# ------------------------------- JAX wrapper ---------------------------------

def spt_cnn_forward(x_nchw, params):
    """x_nchw: (B, 1, H, W) float32.  Returns spt_feature_x: (B, 128, 1, 1)."""
    B, cin0, H, W = x_nchw.shape
    channels = [cin0] + [w.shape[0] for w, _ in params]
    layers = _layer_dims(H, W, channels)
    assert layers[-1]["Hp"] >= 1 and layers[-1]["Wp"] >= 1, "input too small"
    cout_last = layers[-1]["Cout"]

    # Flatten spatial row-major (channels last) and pad rows so shifted reads
    # of up to W+1 extra rows stay in bounds (pad rows are zero).
    x_flat = jnp.transpose(x_nchw, (0, 2, 3, 1)).reshape(B, H * W, cin0)
    x_pad = jnp.pad(x_flat, ((0, 0), (0, W + 1), (0, 0)))

    # Conv weights (Cout, Cin, 2, 2) -> (4*Cin, Cout), row order (dh, dw, cin).
    w_mats, b_rows = [], []
    for w, b in params:
        cout, cin = w.shape[0], w.shape[1]
        w_mats.append(jnp.transpose(w, (2, 3, 1, 0)).reshape(4 * cin, cout))
        b_rows.append(b.reshape(1, cout))

    in_specs = [pl.BlockSpec((None, H * W + W + 1, cin0),
                             lambda b_: (b_, 0, 0))]
    for d in layers:
        in_specs.append(pl.BlockSpec((4 * d["Cin"], d["Cout"]),
                                     lambda b_: (0, 0)))
    for d in layers:
        in_specs.append(pl.BlockSpec((1, d["Cout"]), lambda b_: (0, 0)))

    scratch_shapes = [pltpu.VMEM((d["N"], d["Cout"]), jnp.float32)
                      for d in layers]
    scratch_shapes += [pltpu.VMEM((d["N"] + d["Win"] + 1, d["Cin"]),
                                  jnp.float32) for d in layers[1:]]

    out = pl.pallas_call(
        _make_fused_kernel(layers),
        out_shape=jax.ShapeDtypeStruct((B, 1, cout_last), jnp.float32),
        grid_spec=pltpu.PrefetchScalarGridSpec(
            num_scalar_prefetch=0,
            grid=(B,),
            in_specs=in_specs,
            out_specs=pl.BlockSpec((None, 1, cout_last), lambda b_: (b_, 0, 0)),
            scratch_shapes=scratch_shapes,
        ),
        compiler_params=pltpu.CompilerParams(
            dimension_semantics=("parallel",)),   # spans both TCs on v7x
    )(x_pad, *w_mats, *b_rows)

    return out.reshape(B, cout_last, 1, 1)        # PyTorch-style (B, C, 1, 1)


# ------------------------------ params / reference ---------------------------

def init_params(key):
    """Deterministic Conv2d params (PyTorch-style uniform fan-in init)."""
    layer_dims = [(16, 1), (32, 16), (64, 32), (128, 64)]
    params = []
    for cout, cin in layer_dims:
        key, kw, kb = jax.random.split(key, 3)
        bound = 1.0 / jnp.sqrt(jnp.float32(cin * 2 * 2))
        w = jax.random.uniform(kw, (cout, cin, 2, 2), jnp.float32,
                               -bound, bound)
        b = jax.random.uniform(kb, (cout,), jnp.float32, -bound, bound)
        params.append((w, b))
    return params


def reference_forward(x_nchw, params):
    x = jnp.transpose(x_nchw, (0, 2, 3, 1))
    for w, b in params:
        wt = jnp.transpose(w, (2, 3, 1, 0))        # HWIO
        y = jax.lax.conv_general_dilated(
            x, wt, window_strides=(1, 1), padding="VALID",
            dimension_numbers=("NHWC", "HWIO", "NHWC")) + b
        y = jnp.maximum(y, 0.0)
        B, Ho, Wo, C = y.shape
        Hp, Wp = Ho // 2, Wo // 2
        y = y[:, :2 * Hp, :2 * Wp, :].reshape(B, Hp, 2, Wp, 2, C)
        x = y.max(axis=(2, 4))
    feat = jnp.mean(x, axis=(1, 2))
    return feat.reshape(feat.shape[0], -1, 1, 1)


# --------------------------------- main --------------------------------------

if __name__ == "__main__":
    key = jax.random.PRNGKey(0)
    kx, kp = jax.random.split(key)

    # 32x32 single-channel spectrogram-like input: survives 4 conv+pool stages
    # (32 -> 15 -> 7 -> 3 -> 1 spatial).
    x = jax.random.normal(kx, (2, 1, 32, 32), jnp.float32)
    params = init_params(kp)

    fwd = jax.jit(spt_cnn_forward)
    out = jax.block_until_ready(fwd(x, params))

    assert out.shape == (2, 128, 1, 1), out.shape
    ref = reference_forward(x, params)
    if not bool(jnp.allclose(out, ref, rtol=1e-4, atol=1e-4)):
        raise AssertionError("Pallas result does not match JAX reference")

    print("KERNEL_OK")
</pallas_src>

<mosaic_0001>
module attributes {stable_mosaic.version = 11 : i64} {
  func.func @kernel(%arg0: i32, %arg1: memref<1x1057x1xf32, #tpu.memory_space<vmem>>, %arg2: memref<4x16xf32, #tpu.memory_space<vmem>>, %arg3: memref<64x32xf32, #tpu.memory_space<vmem>>, %arg4: memref<128x64xf32, #tpu.memory_space<vmem>>, %arg5: memref<256x128xf32, #tpu.memory_space<vmem>>, %arg6: memref<1x16xf32, #tpu.memory_space<vmem>>, %arg7: memref<1x32xf32, #tpu.memory_space<vmem>>, %arg8: memref<1x64xf32, #tpu.memory_space<vmem>>, %arg9: memref<1x128xf32, #tpu.memory_space<vmem>>, %arg10: memref<1x1x128xf32, #tpu.memory_space<vmem>>, %arg11: memref<1024x16xf32, #tpu.memory_space<vmem>>, %arg12: memref<225x32xf32, #tpu.memory_space<vmem>>, %arg13: memref<49x64xf32, #tpu.memory_space<vmem>>, %arg14: memref<9x128xf32, #tpu.memory_space<vmem>>, %arg15: memref<241x16xf32, #tpu.memory_space<vmem>>, %arg16: memref<57x32xf32, #tpu.memory_space<vmem>>, %arg17: memref<13x64xf32, #tpu.memory_space<vmem>>) attributes {dimension_semantics = [#tpu.dimension_semantics<parallel>], iteration_bounds = array<i64: 2>, scalar_prefetch = 0 : i64, scratch_operands = 7 : i64, tpu.core_type = #tpu.core_type<tc>, window_params = [{transform_indices = @transform_0, window_bounds = array<i64: 1, 1057, 1>}, {pipeline_mode = #tpu.pipeline_mode<synchronous>, transform_indices = @transform_1, window_bounds = array<i64: 4, 16>}, {pipeline_mode = #tpu.pipeline_mode<synchronous>, transform_indices = @transform_2, window_bounds = array<i64: 64, 32>}, {pipeline_mode = #tpu.pipeline_mode<synchronous>, transform_indices = @transform_3, window_bounds = array<i64: 128, 64>}, {pipeline_mode = #tpu.pipeline_mode<synchronous>, transform_indices = @transform_4, window_bounds = array<i64: 256, 128>}, {pipeline_mode = #tpu.pipeline_mode<synchronous>, transform_indices = @transform_5, window_bounds = array<i64: 1, 16>}, {pipeline_mode = #tpu.pipeline_mode<synchronous>, transform_indices = @transform_6, window_bounds = array<i64: 1, 32>}, {pipeline_mode = #tpu.pipeline_mode<synchronous>, transform_indices = @transform_7, window_bounds = array<i64: 1, 64>}, {pipeline_mode = #tpu.pipeline_mode<synchronous>, transform_indices = @transform_8, window_bounds = array<i64: 1, 128>}, {transform_indices = @transform_9, window_bounds = array<i64: 1, 1, 128>}]} {
    %cst = arith.constant 0.000000e+00 : f32
    %0 = vector.broadcast %cst : f32 to vector<16x16xf32>
    %c225 = arith.constant 225 : index
    %c0 = arith.constant 0 : index
    %1 = vector.load %arg15[%c225, %c0] : memref<241x16xf32, #tpu.memory_space<vmem>>, vector<16x16xf32>
    tpu.vector_store %arg15[%c225, %c0], %0 {strides = array<i32>} : memref<241x16xf32, #tpu.memory_space<vmem>>, vector<16x16xf32>,
    %cst_0 = arith.constant 0.000000e+00 : f32
    %2 = vector.broadcast %cst_0 : f32 to vector<8x32xf32>
    %c49 = arith.constant 49 : index
    %c0_1 = arith.constant 0 : index
    %3 = vector.load %arg16[%c49, %c0_1] : memref<57x32xf32, #tpu.memory_space<vmem>>, vector<8x32xf32>
    tpu.vector_store %arg16[%c49, %c0_1], %2 {strides = array<i32>} : memref<57x32xf32, #tpu.memory_space<vmem>>, vector<8x32xf32>,
    %cst_2 = arith.constant 0.000000e+00 : f32
    %4 = vector.broadcast %cst_2 : f32 to vector<4x64xf32>
    %c9 = arith.constant 9 : index
    %c0_3 = arith.constant 0 : index
    %5 = vector.load %arg17[%c9, %c0_3] : memref<13x64xf32, #tpu.memory_space<vmem>>, vector<4x64xf32>
    tpu.vector_store %arg17[%c9, %c0_3], %4 {strides = array<i32>} : memref<13x64xf32, #tpu.memory_space<vmem>>, vector<4x64xf32>,
    %c0_4 = arith.constant 0 : index
    %c0_5 = arith.constant 0 : index
    %c0_6 = arith.constant 0 : index
    %6 = vector.load %arg1[%c0_4, %c0_5, %c0_6] : memref<1x1057x1xf32, #tpu.memory_space<vmem>>, vector<1x1024x1xf32>
    %7 = vector.shape_cast %6 : vector<1x1024x1xf32> to vector<1024x1xf32>
    %c0_7 = arith.constant 0 : index
    %c0_8 = arith.constant 0 : index
    %8 = vector.load %arg2[%c0_7, %c0_8] : memref<4x16xf32, #tpu.memory_space<vmem>>, vector<1x16xf32>
    %9 = vector.broadcast %7 : vector<1024x1xf32> to vector<1024x16xf32>
    %10 = vector.broadcast %8 : vector<1x16xf32> to vector<1024x16xf32>
    %11 = arith.mulf %9, %10 : vector<1024x16xf32>
    %c0_9 = arith.constant 0 : index
    %c1 = arith.constant 1 : index
    %c0_10 = arith.constant 0 : index
    %12 = vector.load %arg1[%c0_9, %c1, %c0_10] : memref<1x1057x1xf32, #tpu.memory_space<vmem>>, vector<1x1024x1xf32>
    %13 = vector.shape_cast %12 : vector<1x1024x1xf32> to vector<1024x1xf32>
    %c1_11 = arith.constant 1 : index
    %c0_12 = arith.constant 0 : index
    %14 = vector.load %arg2[%c1_11, %c0_12] : memref<4x16xf32, #tpu.memory_space<vmem>>, vector<1x16xf32>
    %15 = vector.broadcast %13 : vector<1024x1xf32> to vector<1024x16xf32>
    %16 = vector.broadcast %14 : vector<1x16xf32> to vector<1024x16xf32>
    %17 = arith.mulf %15, %16 : vector<1024x16xf32>
    %18 = arith.addf %11, %17 : vector<1024x16xf32>
    %c0_13 = arith.constant 0 : index
    %c32 = arith.constant 32 : index
    %c0_14 = arith.constant 0 : index
    %19 = vector.load %arg1[%c0_13, %c32, %c0_14] : memref<1x1057x1xf32, #tpu.memory_space<vmem>>, vector<1x1024x1xf32>
    %20 = vector.shape_cast %19 : vector<1x1024x1xf32> to vector<1024x1xf32>
    %c2 = arith.constant 2 : index
    %c0_15 = arith.constant 0 : index
    %21 = vector.load %arg2[%c2, %c0_15] : memref<4x16xf32, #tpu.memory_space<vmem>>, vector<1x16xf32>
    %22 = vector.broadcast %20 : vector<1024x1xf32> to vector<1024x16xf32>
    %23 = vector.broadcast %21 : vector<1x16xf32> to vector<1024x16xf32>
    %24 = arith.mulf %22, %23 : vector<1024x16xf32>
    %25 = arith.addf %18, %24 : vector<1024x16xf32>
    %c0_16 = arith.constant 0 : index
    %c33 = arith.constant 33 : index
    %c0_17 = arith.constant 0 : index
    %26 = vector.load %arg1[%c0_16, %c33, %c0_17] : memref<1x1057x1xf32, #tpu.memory_space<vmem>>, vector<1x1024x1xf32>
    %27 = vector.shape_cast %26 : vector<1x1024x1xf32> to vector<1024x1xf32>
    %c3 = arith.constant 3 : index
    %c0_18 = arith.constant 0 : index
    %28 = vector.load %arg2[%c3, %c0_18] : memref<4x16xf32, #tpu.memory_space<vmem>>, vector<1x16xf32>
    %29 = vector.broadcast %27 : vector<1024x1xf32> to vector<1024x16xf32>
    %30 = vector.broadcast %28 : vector<1x16xf32> to vector<1024x16xf32>
    %31 = arith.mulf %29, %30 : vector<1024x16xf32>
    %32 = arith.addf %25, %31 : vector<1024x16xf32>
    %c0_19 = arith.constant 0 : index
    %c0_20 = arith.constant 0 : index
    %33 = vector.load %arg11[%c0_19, %c0_20] : memref<1024x16xf32, #tpu.memory_space<vmem>>, vector<1024x16xf32>
    tpu.vector_store %arg11[%c0_19, %c0_20], %32 {strides = array<i32>} : memref<1024x16xf32, #tpu.memory_space<vmem>>, vector<1024x16xf32>,
    %c0_21 = arith.constant 0 : index
    %c0_22 = arith.constant 0 : index
    %34 = vector.load %arg11[%c0_21, %c0_22] : memref<1024x16xf32, #tpu.memory_space<vmem>>, vector<1023x16xf32>
    %c1_23 = arith.constant 1 : index
    %c0_24 = arith.constant 0 : index
    %35 = vector.load %arg11[%c1_23, %c0_24] : memref<1024x16xf32, #tpu.memory_space<vmem>>, vector<1023x16xf32>
    %36 = arith.maximumf %34, %35 : vector<1023x16xf32>
    %c0_25 = arith.constant 0 : index
    %c0_26 = arith.constant 0 : index
    %37 = vector.load %arg11[%c0_25, %c0_26] : memref<1024x16xf32, #tpu.memory_space<vmem>>, vector<1023x16xf32>
    tpu.vector_store %arg11[%c0_25, %c0_26], %36 {strides = array<i32>} : memref<1024x16xf32, #tpu.memory_space<vmem>>, vector<1023x16xf32>,
    %c0_27 = arith.constant 0 : index
    %c0_28 = arith.constant 0 : index
    %38 = vector.load %arg11[%c0_27, %c0_28] : memref<1024x16xf32, #tpu.memory_space<vmem>>, vector<991x16xf32>
    %c32_29 = arith.constant 32 : index
    %c0_30 = arith.constant 0 : index
    %39 = vector.load %arg11[%c32_29, %c0_30] : memref<1024x16xf32, #tpu.memory_space<vmem>>, vector<991x16xf32>
    %40 = arith.maximumf %38, %39 : vector<991x16xf32>
    %c0_31 = arith.constant 0 : index
    %c0_32 = arith.constant 0 : index
    %41 = vector.load %arg11[%c0_31, %c0_32] : memref<1024x16xf32, #tpu.memory_space<vmem>>, vector<991x16xf32>
    tpu.vector_store %arg11[%c0_31, %c0_32], %40 {strides = array<i32>} : memref<1024x16xf32, #tpu.memory_space<vmem>>, vector<991x16xf32>,
    %c0_33 = arith.constant 0 : index
    %c0_34 = arith.constant 0 : index
    %42 = vector.load %arg6[%c0_33, %c0_34] : memref<1x16xf32, #tpu.memory_space<vmem>>, vector<1x16xf32>
    %c0_35 = arith.constant 0 : index
    %c0_36 = arith.constant 0 : index
    %43 = tpu.strided_load %arg11[%c0_35, %c0_36] {strides = array<i32: 2, 1>} : memref<1024x16xf32, #tpu.memory_space<vmem>>, vector<15x16xf32>
    %44 = vector.broadcast %42 : vector<1x16xf32> to vector<15x16xf32>
    %45 = arith.addf %43, %44 : vector<15x16xf32>
    %cst_37 = arith.constant 0.000000e+00 : f32
    %46 = vector.broadcast %cst_37 : f32 to vector<15x16xf32>
    %47 = arith.maximumf %45, %46 : vector<15x16xf32>
    %c0_38 = arith.constant 0 : index
    %c0_39 = arith.constant 0 : index
    %48 = vector.load %arg15[%c0_38, %c0_39] : memref<241x16xf32, #tpu.memory_space<vmem>>, vector<15x16xf32>
    tpu.vector_store %arg15[%c0_38, %c0_39], %47 {strides = array<i32>} : memref<241x16xf32, #tpu.memory_space<vmem>>, vector<15x16xf32>,
    %c64 = arith.constant 64 : index
    %c0_40 = arith.constant 0 : index
    %49 = tpu.strided_load %arg11[%c64, %c0_40] {strides = array<i32: 2, 1>} : memref<1024x16xf32, #tpu.memory_space<vmem>>, vector<15x16xf32>
    %50 = vector.broadcast %42 : vector<1x16xf32> to vector<15x16xf32>
    %51 = arith.addf %49, %50 : vector<15x16xf32>
    %cst_41 = arith.constant 0.000000e+00 : f32
    %52 = vector.broadcast %cst_41 : f32 to vector<15x16xf32>
    %53 = arith.maximumf %51, %52 : vector<15x16xf32>
    %c15 = arith.constant 15 : index
    %c0_42 = arith.constant 0 : index
    %54 = vector.load %arg15[%c15, %c0_42] : memref<241x16xf32, #tpu.memory_space<vmem>>, vector<15x16xf32>
    tpu.vector_store %arg15[%c15, %c0_42], %53 {strides = array<i32>} : memref<241x16xf32, #tpu.memory_space<vmem>>, vector<15x16xf32>,
    %c128 = arith.constant 128 : index
    %c0_43 = arith.constant 0 : index
    %55 = tpu.strided_load %arg11[%c128, %c0_43] {strides = array<i32: 2, 1>} : memref<1024x16xf32, #tpu.memory_space<vmem>>, vector<15x16xf32>
    %56 = vector.broadcast %42 : vector<1x16xf32> to vector<15x16xf32>
    %57 = arith.addf %55, %56 : vector<15x16xf32>
    %cst_44 = arith.constant 0.000000e+00 : f32
    %58 = vector.broadcast %cst_44 : f32 to vector<15x16xf32>
    %59 = arith.maximumf %57, %58 : vector<15x16xf32>
    %c30 = arith.constant 30 : index
    %c0_45 = arith.constant 0 : index
    %60 = vector.load %arg15[%c30, %c0_45] : memref<241x16xf32, #tpu.memory_space<vmem>>, vector<15x16xf32>
    tpu.vector_store %arg15[%c30, %c0_45], %59 {strides = array<i32>} : memref<241x16xf32, #tpu.memory_space<vmem>>, vector<15x16xf32>,
    %c192 = arith.constant 192 : index
    %c0_46 = arith.constant 0 : index
    %61 = tpu.strided_load %arg11[%c192, %c0_46] {strides = array<i32: 2, 1>} : memref<1024x16xf32, #tpu.memory_space<vmem>>, vector<15x16xf32>
    %62 = vector.broadcast %42 : vector<1x16xf32> to vector<15x16xf32>
    %63 = arith.addf %61, %62 : vector<15x16xf32>
    %cst_47 = arith.constant 0.000000e+00 : f32
    %64 = vector.broadcast %cst_47 : f32 to vector<15x16xf32>
    %65 = arith.maximumf %63, %64 : vector<15x16xf32>
    %c45 = arith.constant 45 : index
    %c0_48 = arith.constant 0 : index
    %66 = vector.load %arg15[%c45, %c0_48] : memref<241x16xf32, #tpu.memory_space<vmem>>, vector<15x16xf32>
    tpu.vector_store %arg15[%c45, %c0_48], %65 {strides = array<i32>} : memref<241x16xf32, #tpu.memory_space<vmem>>, vector<15x16xf32>,
    %c256 = arith.constant 256 : index
    %c0_49 = arith.constant 0 : index
    %67 = tpu.strided_load %arg11[%c256, %c0_49] {strides = array<i32: 2, 1>} : memref<1024x16xf32, #tpu.memory_space<vmem>>, vector<15x16xf32>
    %68 = vector.broadcast %42 : vector<1x16xf32> to vector<15x16xf32>
    %69 = arith.addf %67, %68 : vector<15x16xf32>
    %cst_50 = arith.constant 0.000000e+00 : f32
    %70 = vector.broadcast %cst_50 : f32 to vector<15x16xf32>
    %71 = arith.maximumf %69, %70 : vector<15x16xf32>
    %c60 = arith.constant 60 : index
    %c0_51 = arith.constant 0 : index
    %72 = vector.load %arg15[%c60, %c0_51] : memref<241x16xf32, #tpu.memory_space<vmem>>, vector<15x16xf32>
    tpu.vector_store %arg15[%c60, %c0_51], %71 {strides = array<i32>} : memref<241x16xf32, #tpu.memory_space<vmem>>, vector<15x16xf32>,
    %c320 = arith.constant 320 : index
    %c0_52 = arith.constant 0 : index
    %73 = tpu.strided_load %arg11[%c320, %c0_52] {strides = array<i32: 2, 1>} : memref<1024x16xf32, #tpu.memory_space<vmem>>, vector<15x16xf32>
    %74 = vector.broadcast %42 : vector<1x16xf32> to vector<15x16xf32>
    %75 = arith.addf %73, %74 : vector<15x16xf32>
    %cst_53 = arith.constant 0.000000e+00 : f32
    %76 = vector.broadcast %cst_53 : f32 to vector<15x16xf32>
    %77 = arith.maximumf %75, %76 : vector<15x16xf32>
    %c75 = arith.constant 75 : index
    %c0_54 = arith.constant 0 : index
    %78 = vector.load %arg15[%c75, %c0_54] : memref<241x16xf32, #tpu.memory_space<vmem>>, vector<15x16xf32>
    tpu.vector_store %arg15[%c75, %c0_54], %77 {strides = array<i32>} : memref<241x16xf32, #tpu.memory_space<vmem>>, vector<15x16xf32>,
    %c384 = arith.constant 384 : index
    %c0_55 = arith.constant 0 : index
    %79 = tpu.strided_load %arg11[%c384, %c0_55] {strides = array<i32: 2, 1>} : memref<1024x16xf32, #tpu.memory_space<vmem>>, vector<15x16xf32>
    %80 = vector.broadcast %42 : vector<1x16xf32> to vector<15x16xf32>
    %81 = arith.addf %79, %80 : vector<15x16xf32>
    %cst_56 = arith.constant 0.000000e+00 : f32
    %82 = vector.broadcast %cst_56 : f32 to vector<15x16xf32>
    %83 = arith.maximumf %81, %82 : vector<15x16xf32>
    %c90 = arith.constant 90 : index
    %c0_57 = arith.constant 0 : index
    %84 = vector.load %arg15[%c90, %c0_57] : memref<241x16xf32, #tpu.memory_space<vmem>>, vector<15x16xf32>
    tpu.vector_store %arg15[%c90, %c0_57], %83 {strides = array<i32>} : memref<241x16xf32, #tpu.memory_space<vmem>>, vector<15x16xf32>,
    %c448 = arith.constant 448 : index
    %c0_58 = arith.constant 0 : index
    %85 = tpu.strided_load %arg11[%c448, %c0_58] {strides = array<i32: 2, 1>} : memref<1024x16xf32, #tpu.memory_space<vmem>>, vector<15x16xf32>
    %86 = vector.broadcast %42 : vector<1x16xf32> to vector<15x16xf32>
    %87 = arith.addf %85, %86 : vector<15x16xf32>
    %cst_59 = arith.constant 0.000000e+00 : f32
    %88 = vector.broadcast %cst_59 : f32 to vector<15x16xf32>
    %89 = arith.maximumf %87, %88 : vector<15x16xf32>
    %c105 = arith.constant 105 : index
    %c0_60 = arith.constant 0 : index
    %90 = vector.load %arg15[%c105, %c0_60] : memref<241x16xf32, #tpu.memory_space<vmem>>, vector<15x16xf32>
    tpu.vector_store %arg15[%c105, %c0_60], %89 {strides = array<i32>} : memref<241x16xf32, #tpu.memory_space<vmem>>, vector<15x16xf32>,
    %c512 = arith.constant 512 : index
    %c0_61 = arith.constant 0 : index
    %91 = tpu.strided_load %arg11[%c512, %c0_61] {strides = array<i32: 2, 1>} : memref<1024x16xf32, #tpu.memory_space<vmem>>, vector<15x16xf32>
    %92 = vector.broadcast %42 : vector<1x16xf32> to vector<15x16xf32>
    %93 = arith.addf %91, %92 : vector<15x16xf32>
    %cst_62 = arith.constant 0.000000e+00 : f32
    %94 = vector.broadcast %cst_62 : f32 to vector<15x16xf32>
    %95 = arith.maximumf %93, %94 : vector<15x16xf32>
    %c120 = arith.constant 120 : index
    %c0_63 = arith.constant 0 : index
    %96 = vector.load %arg15[%c120, %c0_63] : memref<241x16xf32, #tpu.memory_space<vmem>>, vector<15x16xf32>
    tpu.vector_store %arg15[%c120, %c0_63], %95 {strides = array<i32>} : memref<241x16xf32, #tpu.memory_space<vmem>>, vector<15x16xf32>,
    %c576 = arith.constant 576 : index
    %c0_64 = arith.constant 0 : index
    %97 = tpu.strided_load %arg11[%c576, %c0_64] {strides = array<i32: 2, 1>} : memref<1024x16xf32, #tpu.memory_space<vmem>>, vector<15x16xf32>
    %98 = vector.broadcast %42 : vector<1x16xf32> to vector<15x16xf32>
    %99 = arith.addf %97, %98 : vector<15x16xf32>
    %cst_65 = arith.constant 0.000000e+00 : f32
    %100 = vector.broadcast %cst_65 : f32 to vector<15x16xf32>
    %101 = arith.maximumf %99, %100 : vector<15x16xf32>
    %c135 = arith.constant 135 : index
    %c0_66 = arith.constant 0 : index
    %102 = vector.load %arg15[%c135, %c0_66] : memref<241x16xf32, #tpu.memory_space<vmem>>, vector<15x16xf32>
    tpu.vector_store %arg15[%c135, %c0_66], %101 {strides = array<i32>} : memref<241x16xf32, #tpu.memory_space<vmem>>, vector<15x16xf32>,
    %c640 = arith.constant 640 : index
    %c0_67 = arith.constant 0 : index
    %103 = tpu.strided_load %arg11[%c640, %c0_67] {strides = array<i32: 2, 1>} : memref<1024x16xf32, #tpu.memory_space<vmem>>, vector<15x16xf32>
    %104 = vector.broadcast %42 : vector<1x16xf32> to vector<15x16xf32>
    %105 = arith.addf %103, %104 : vector<15x16xf32>
    %cst_68 = arith.constant 0.000000e+00 : f32
    %106 = vector.broadcast %cst_68 : f32 to vector<15x16xf32>
    %107 = arith.maximumf %105, %106 : vector<15x16xf32>
    %c150 = arith.constant 150 : index
    %c0_69 = arith.constant 0 : index
    %108 = vector.load %arg15[%c150, %c0_69] : memref<241x16xf32, #tpu.memory_space<vmem>>, vector<15x16xf32>
    tpu.vector_store %arg15[%c150, %c0_69], %107 {strides = array<i32>} : memref<241x16xf32, #tpu.memory_space<vmem>>, vector<15x16xf32>,
    %c704 = arith.constant 704 : index
    %c0_70 = arith.constant 0 : index
    %109 = tpu.strided_load %arg11[%c704, %c0_70] {strides = array<i32: 2, 1>} : memref<1024x16xf32, #tpu.memory_space<vmem>>, vector<15x16xf32>
    %110 = vector.broadcast %42 : vector<1x16xf32> to vector<15x16xf32>
    %111 = arith.addf %109, %110 : vector<15x16xf32>
    %cst_71 = arith.constant 0.000000e+00 : f32
    %112 = vector.broadcast %cst_71 : f32 to vector<15x16xf32>
    %113 = arith.maximumf %111, %112 : vector<15x16xf32>
    %c165 = arith.constant 165 : index
    %c0_72 = arith.constant 0 : index
    %114 = vector.load %arg15[%c165, %c0_72] : memref<241x16xf32, #tpu.memory_space<vmem>>, vector<15x16xf32>
    tpu.vector_store %arg15[%c165, %c0_72], %113 {strides = array<i32>} : memref<241x16xf32, #tpu.memory_space<vmem>>, vector<15x16xf32>,
    %c768 = arith.constant 768 : index
    %c0_73 = arith.constant 0 : index
    %115 = tpu.strided_load %arg11[%c768, %c0_73] {strides = array<i32: 2, 1>} : memref<1024x16xf32, #tpu.memory_space<vmem>>, vector<15x16xf32>
    %116 = vector.broadcast %42 : vector<1x16xf32> to vector<15x16xf32>
    %117 = arith.addf %115, %116 : vector<15x16xf32>
    %cst_74 = arith.constant 0.000000e+00 : f32
    %118 = vector.broadcast %cst_74 : f32 to vector<15x16xf32>
    %119 = arith.maximumf %117, %118 : vector<15x16xf32>
    %c180 = arith.constant 180 : index
    %c0_75 = arith.constant 0 : index
    %120 = vector.load %arg15[%c180, %c0_75] : memref<241x16xf32, #tpu.memory_space<vmem>>, vector<15x16xf32>
    tpu.vector_store %arg15[%c180, %c0_75], %119 {strides = array<i32>} : memref<241x16xf32, #tpu.memory_space<vmem>>, vector<15x16xf32>,
    %c832 = arith.constant 832 : index
    %c0_76 = arith.constant 0 : index
    %121 = tpu.strided_load %arg11[%c832, %c0_76] {strides = array<i32: 2, 1>} : memref<1024x16xf32, #tpu.memory_space<vmem>>, vector<15x16xf32>
    %122 = vector.broadcast %42 : vector<1x16xf32> to vector<15x16xf32>
    %123 = arith.addf %121, %122 : vector<15x16xf32>
    %cst_77 = arith.constant 0.000000e+00 : f32
    %124 = vector.broadcast %cst_77 : f32 to vector<15x16xf32>
    %125 = arith.maximumf %123, %124 : vector<15x16xf32>
    %c195 = arith.constant 195 : index
    %c0_78 = arith.constant 0 : index
    %126 = vector.load %arg15[%c195, %c0_78] : memref<241x16xf32, #tpu.memory_space<vmem>>, vector<15x16xf32>
    tpu.vector_store %arg15[%c195, %c0_78], %125 {strides = array<i32>} : memref<241x16xf32, #tpu.memory_space<vmem>>, vector<15x16xf32>,
    %c896 = arith.constant 896 : index
    %c0_79 = arith.constant 0 : index
    %127 = tpu.strided_load %arg11[%c896, %c0_79] {strides = array<i32: 2, 1>} : memref<1024x16xf32, #tpu.memory_space<vmem>>, vector<15x16xf32>
    %128 = vector.broadcast %42 : vector<1x16xf32> to vector<15x16xf32>
    %129 = arith.addf %127, %128 : vector<15x16xf32>
    %cst_80 = arith.constant 0.000000e+00 : f32
    %130 = vector.broadcast %cst_80 : f32 to vector<15x16xf32>
    %131 = arith.maximumf %129, %130 : vector<15x16xf32>
    %c210 = arith.constant 210 : index
    %c0_81 = arith.constant 0 : index
    %132 = vector.load %arg15[%c210, %c0_81] : memref<241x16xf32, #tpu.memory_space<vmem>>, vector<15x16xf32>
    tpu.vector_store %arg15[%c210, %c0_81], %131 {strides = array<i32>} : memref<241x16xf32, #tpu.memory_space<vmem>>, vector<15x16xf32>,
    %c0_82 = arith.constant 0 : index
    %c0_83 = arith.constant 0 : index
    %133 = vector.load %arg15[%c0_82, %c0_83] : memref<241x16xf32, #tpu.memory_space<vmem>>, vector<225x16xf32>
    %c0_84 = arith.constant 0 : index
    %c0_85 = arith.constant 0 : index
    %134 = vector.load %arg3[%c0_84, %c0_85] : memref<64x32xf32, #tpu.memory_space<vmem>>, vector<16x32xf32>
    %cst_86 = arith.constant dense<0.000000e+00> : vector<225x32xf32>
    %135 = tpu.matmul %133, %134, %cst_86 {dimension_numbers = #tpu.dot_dimension_numbers<[1], [0], [0], [1], [0, 0, 1, 1], [], []>} : vector<225x16xf32>, vector<16x32xf32>, vector<225x32xf32> -> vector<225x32xf32>
    %c1_87 = arith.constant 1 : index
    %c0_88 = arith.constant 0 : index
    %136 = vector.load %arg15[%c1_87, %c0_88] : memref<241x16xf32, #tpu.memory_space<vmem>>, vector<225x16xf32>
    %c16 = arith.constant 16 : index
    %c0_89 = arith.constant 0 : index
    %137 = vector.load %arg3[%c16, %c0_89] : memref<64x32xf32, #tpu.memory_space<vmem>>, vector<16x32xf32>
    %cst_90 = arith.constant dense<0.000000e+00> : vector<225x32xf32>
    %138 = tpu.matmul %136, %137, %cst_90 {dimension_numbers = #tpu.dot_dimension_numbers<[1], [0], [0], [1], [0, 0, 1, 1], [], []>} : vector<225x16xf32>, vector<16x32xf32>, vector<225x32xf32> -> vector<225x32xf32>
    %139 = arith.addf %135, %138 : vector<225x32xf32>
    %c15_91 = arith.constant 15 : index
    %c0_92 = arith.constant 0 : index
    %140 = vector.load %arg15[%c15_91, %c0_92] : memref<241x16xf32, #tpu.memory_space<vmem>>, vector<225x16xf32>
    %c32_93 = arith.constant 32 : index
    %c0_94 = arith.constant 0 : index
    %141 = vector.load %arg3[%c32_93, %c0_94] : memref<64x32xf32, #tpu.memory_space<vmem>>, vector<16x32xf32>
    %cst_95 = arith.constant dense<0.000000e+00> : vector<225x32xf32>
    %142 = tpu.matmul %140, %141, %cst_95 {dimension_numbers = #tpu.dot_dimension_numbers<[1], [0], [0], [1], [0, 0, 1, 1], [], []>} : vector<225x16xf32>, vector<16x32xf32>, vector<225x32xf32> -> vector<225x32xf32>
    %143 = arith.addf %139, %142 : vector<225x32xf32>
    %c16_96 = arith.constant 16 : index
    %c0_97 = arith.constant 0 : index
    %144 = vector.load %arg15[%c16_96, %c0_97] : memref<241x16xf32, #tpu.memory_space<vmem>>, vector<225x16xf32>
    %c48 = arith.constant 48 : index
    %c0_98 = arith.constant 0 : index
    %145 = vector.load %arg3[%c48, %c0_98] : memref<64x32xf32, #tpu.memory_space<vmem>>, vector<16x32xf32>
    %cst_99 = arith.constant dense<0.000000e+00> : vector<225x32xf32>
    %146 = tpu.matmul %144, %145, %cst_99 {dimension_numbers = #tpu.dot_dimension_numbers<[1], [0], [0], [1], [0, 0, 1, 1], [], []>} : vector<225x16xf32>, vector<16x32xf32>, vector<225x32xf32> -> vector<225x32xf32>
    %147 = arith.addf %143, %146 : vector<225x32xf32>
    %c0_100 = arith.constant 0 : index
    %c0_101 = arith.constant 0 : index
    %148 = vector.load %arg12[%c0_100, %c0_101] : memref<225x32xf32, #tpu.memory_space<vmem>>, vector<225x32xf32>
    tpu.vector_store %arg12[%c0_100, %c0_101], %147 {strides = array<i32>} : memref<225x32xf32, #tpu.memory_space<vmem>>, vector<225x32xf32>,
    %c0_102 = arith.constant 0 : index
    %c0_103 = arith.constant 0 : index
    %149 = vector.load %arg12[%c0_102, %c0_103] : memref<225x32xf32, #tpu.memory_space<vmem>>, vector<224x32xf32>
    %c1_104 = arith.constant 1 : index
    %c0_105 = arith.constant 0 : index
    %150 = vector.load %arg12[%c1_104, %c0_105] : memref<225x32xf32, #tpu.memory_space<vmem>>, vector<224x32xf32>
    %151 = arith.maximumf %149, %150 : vector<224x32xf32>
    %c0_106 = arith.constant 0 : index
    %c0_107 = arith.constant 0 : index
    %152 = vector.load %arg12[%c0_106, %c0_107] : memref<225x32xf32, #tpu.memory_space<vmem>>, vector<224x32xf32>
    tpu.vector_store %arg12[%c0_106, %c0_107], %151 {strides = array<i32>} : memref<225x32xf32, #tpu.memory_space<vmem>>, vector<224x32xf32>,
    %c0_108 = arith.constant 0 : index
    %c0_109 = arith.constant 0 : index
    %153 = vector.load %arg12[%c0_108, %c0_109] : memref<225x32xf32, #tpu.memory_space<vmem>>, vector<209x32xf32>
    %c15_110 = arith.constant 15 : index
    %c0_111 = arith.constant 0 : index
    %154 = vector.load %arg12[%c15_110, %c0_111] : memref<225x32xf32, #tpu.memory_space<vmem>>, vector<209x32xf32>
    %155 = arith.maximumf %153, %154 : vector<209x32xf32>
    %c0_112 = arith.constant 0 : index
    %c0_113 = arith.constant 0 : index
    %156 = vector.load %arg12[%c0_112, %c0_113] : memref<225x32xf32, #tpu.memory_space<vmem>>, vector<209x32xf32>
    tpu.vector_store %arg12[%c0_112, %c0_113], %155 {strides = array<i32>} : memref<225x32xf32, #tpu.memory_space<vmem>>, vector<209x32xf32>,
    %c0_114 = arith.constant 0 : index
    %c0_115 = arith.constant 0 : index
    %157 = vector.load %arg7[%c0_114, %c0_115] : memref<1x32xf32, #tpu.memory_space<vmem>>, vector<1x32xf32>
    %c0_116 = arith.constant 0 : index
    %c0_117 = arith.constant 0 : index
    %158 = tpu.strided_load %arg12[%c0_116, %c0_117] {strides = array<i32: 2, 1>} : memref<225x32xf32, #tpu.memory_space<vmem>>, vector<7x32xf32>
    %159 = vector.broadcast %157 : vector<1x32xf32> to vector<7x32xf32>
    %160 = arith.addf %158, %159 : vector<7x32xf32>
    %cst_118 = arith.constant 0.000000e+00 : f32
    %161 = vector.broadcast %cst_118 : f32 to vector<7x32xf32>
    %162 = arith.maximumf %160, %161 : vector<7x32xf32>
    %c0_119 = arith.constant 0 : index
    %c0_120 = arith.constant 0 : index
    %163 = vector.load %arg16[%c0_119, %c0_120] : memref<57x32xf32, #tpu.memory_space<vmem>>, vector<7x32xf32>
    tpu.vector_store %arg16[%c0_119, %c0_120], %162 {strides = array<i32>} : memref<57x32xf32, #tpu.memory_space<vmem>>, vector<7x32xf32>,
    %c30_121 = arith.constant 30 : index
    %c0_122 = arith.constant 0 : index
    %164 = tpu.strided_load %arg12[%c30_121, %c0_122] {strides = array<i32: 2, 1>} : memref<225x32xf32, #tpu.memory_space<vmem>>, vector<7x32xf32>
    %165 = vector.broadcast %157 : vector<1x32xf32> to vector<7x32xf32>
    %166 = arith.addf %164, %165 : vector<7x32xf32>
    %cst_123 = arith.constant 0.000000e+00 : f32
    %167 = vector.broadcast %cst_123 : f32 to vector<7x32xf32>
    %168 = arith.maximumf %166, %167 : vector<7x32xf32>
    %c7 = arith.constant 7 : index
    %c0_124 = arith.constant 0 : index
    %169 = vector.load %arg16[%c7, %c0_124] : memref<57x32xf32, #tpu.memory_space<vmem>>, vector<7x32xf32>
    tpu.vector_store %arg16[%c7, %c0_124], %168 {strides = array<i32>} : memref<57x32xf32, #tpu.memory_space<vmem>>, vector<7x32xf32>,
    %c60_125 = arith.constant 60 : index
    %c0_126 = arith.constant 0 : index
    %170 = tpu.strided_load %arg12[%c60_125, %c0_126] {strides = array<i32: 2, 1>} : memref<225x32xf32, #tpu.memory_space<vmem>>, vector<7x32xf32>
    %171 = vector.broadcast %157 : vector<1x32xf32> to vector<7x32xf32>
    %172 = arith.addf %170, %171 : vector<7x32xf32>
    %cst_127 = arith.constant 0.000000e+00 : f32
    %173 = vector.broadcast %cst_127 : f32 to vector<7x32xf32>
    %174 = arith.maximumf %172, %173 : vector<7x32xf32>
    %c14 = arith.constant 14 : index
    %c0_128 = arith.constant 0 : index
    %175 = vector.load %arg16[%c14, %c0_128] : memref<57x32xf32, #tpu.memory_space<vmem>>, vector<7x32xf32>
    tpu.vector_store %arg16[%c14, %c0_128], %174 {strides = array<i32>} : memref<57x32xf32, #tpu.memory_space<vmem>>, vector<7x32xf32>,
    %c90_129 = arith.constant 90 : index
    %c0_130 = arith.constant 0 : index
    %176 = tpu.strided_load %arg12[%c90_129, %c0_130] {strides = array<i32: 2, 1>} : memref<225x32xf32, #tpu.memory_space<vmem>>, vector<7x32xf32>
    %177 = vector.broadcast %157 : vector<1x32xf32> to vector<7x32xf32>
    %178 = arith.addf %176, %177 : vector<7x32xf32>
    %cst_131 = arith.constant 0.000000e+00 : f32
    %179 = vector.broadcast %cst_131 : f32 to vector<7x32xf32>
    %180 = arith.maximumf %178, %179 : vector<7x32xf32>
    %c21 = arith.constant 21 : index
    %c0_132 = arith.constant 0 : index
    %181 = vector.load %arg16[%c21, %c0_132] : memref<57x32xf32, #tpu.memory_space<vmem>>, vector<7x32xf32>
    tpu.vector_store %arg16[%c21, %c0_132], %180 {strides = array<i32>} : memref<57x32xf32, #tpu.memory_space<vmem>>, vector<7x32xf32>,
    %c120_133 = arith.constant 120 : index
    %c0_134 = arith.constant 0 : index
    %182 = tpu.strided_load %arg12[%c120_133, %c0_134] {strides = array<i32: 2, 1>} : memref<225x32xf32, #tpu.memory_space<vmem>>, vector<7x32xf32>
    %183 = vector.broadcast %157 : vector<1x32xf32> to vector<7x32xf32>
    %184 = arith.addf %182, %183 : vector<7x32xf32>
    %cst_135 = arith.constant 0.000000e+00 : f32
    %185 = vector.broadcast %cst_135 : f32 to vector<7x32xf32>
    %186 = arith.maximumf %184, %185 : vector<7x32xf32>
    %c28 = arith.constant 28 : index
    %c0_136 = arith.constant 0 : index
    %187 = vector.load %arg16[%c28, %c0_136] : memref<57x32xf32, #tpu.memory_space<vmem>>, vector<7x32xf32>
    tpu.vector_store %arg16[%c28, %c0_136], %186 {strides = array<i32>} : memref<57x32xf32, #tpu.memory_space<vmem>>, vector<7x32xf32>,
    %c150_137 = arith.constant 150 : index
    %c0_138 = arith.constant 0 : index
    %188 = tpu.strided_load %arg12[%c150_137, %c0_138] {strides = array<i32: 2, 1>} : memref<225x32xf32, #tpu.memory_space<vmem>>, vector<7x32xf32>
    %189 = vector.broadcast %157 : vector<1x32xf32> to vector<7x32xf32>
    %190 = arith.addf %188, %189 : vector<7x32xf32>
    %cst_139 = arith.constant 0.000000e+00 : f32
    %191 = vector.broadcast %cst_139 : f32 to vector<7x32xf32>
    %192 = arith.maximumf %190, %191 : vector<7x32xf32>
    %c35 = arith.constant 35 : index
    %c0_140 = arith.constant 0 : index
    %193 = vector.load %arg16[%c35, %c0_140] : memref<57x32xf32, #tpu.memory_space<vmem>>, vector<7x32xf32>
    tpu.vector_store %arg16[%c35, %c0_140], %192 {strides = array<i32>} : memref<57x32xf32, #tpu.memory_space<vmem>>, vector<7x32xf32>,
    %c180_141 = arith.constant 180 : index
    %c0_142 = arith.constant 0 : index
    %194 = tpu.strided_load %arg12[%c180_141, %c0_142] {strides = array<i32: 2, 1>} : memref<225x32xf32, #tpu.memory_space<vmem>>, vector<7x32xf32>
    %195 = vector.broadcast %157 : vector<1x32xf32> to vector<7x32xf32>
    %196 = arith.addf %194, %195 : vector<7x32xf32>
    %cst_143 = arith.constant 0.000000e+00 : f32
    %197 = vector.broadcast %cst_143 : f32 to vector<7x32xf32>
    %198 = arith.maximumf %196, %197 : vector<7x32xf32>
    %c42 = arith.constant 42 : index
    %c0_144 = arith.constant 0 : index
    %199 = vector.load %arg16[%c42, %c0_144] : memref<57x32xf32, #tpu.memory_space<vmem>>, vector<7x32xf32>
    tpu.vector_store %arg16[%c42, %c0_144], %198 {strides = array<i32>} : memref<57x32xf32, #tpu.memory_space<vmem>>, vector<7x32xf32>,
    %c0_145 = arith.constant 0 : index
    %c0_146 = arith.constant 0 : index
    %200 = vector.load %arg16[%c0_145, %c0_146] : memref<57x32xf32, #tpu.memory_space<vmem>>, vector<49x32xf32>
    %c0_147 = arith.constant 0 : index
    %c0_148 = arith.constant 0 : index
    %201 = vector.load %arg4[%c0_147, %c0_148] : memref<128x64xf32, #tpu.memory_space<vmem>>, vector<32x64xf32>
    %cst_149 = arith.constant dense<0.000000e+00> : vector<49x64xf32>
    %202 = tpu.matmul %200, %201, %cst_149 {dimension_numbers = #tpu.dot_dimension_numbers<[1], [0], [0], [1], [0, 0, 1, 1], [], []>} : vector<49x32xf32>, vector<32x64xf32>, vector<49x64xf32> -> vector<49x64xf32>
    %c1_150 = arith.constant 1 : index
    %c0_151 = arith.constant 0 : index
    %203 = vector.load %arg16[%c1_150, %c0_151] : memref<57x32xf32, #tpu.memory_space<vmem>>, vector<49x32xf32>
    %c32_152 = arith.constant 32 : index
    %c0_153 = arith.constant 0 : index
    %204 = vector.load %arg4[%c32_152, %c0_153] : memref<128x64xf32, #tpu.memory_space<vmem>>, vector<32x64xf32>
    %cst_154 = arith.constant dense<0.000000e+00> : vector<49x64xf32>
    %205 = tpu.matmul %203, %204, %cst_154 {dimension_numbers = #tpu.dot_dimension_numbers<[1], [0], [0], [1], [0, 0, 1, 1], [], []>} : vector<49x32xf32>, vector<32x64xf32>, vector<49x64xf32> -> vector<49x64xf32>
    %206 = arith.addf %202, %205 : vector<49x64xf32>
    %c7_155 = arith.constant 7 : index
    %c0_156 = arith.constant 0 : index
    %207 = vector.load %arg16[%c7_155, %c0_156] : memref<57x32xf32, #tpu.memory_space<vmem>>, vector<49x32xf32>
    %c64_157 = arith.constant 64 : index
    %c0_158 = arith.constant 0 : index
    %208 = vector.load %arg4[%c64_157, %c0_158] : memref<128x64xf32, #tpu.memory_space<vmem>>, vector<32x64xf32>
    %cst_159 = arith.constant dense<0.000000e+00> : vector<49x64xf32>
    %209 = tpu.matmul %207, %208, %cst_159 {dimension_numbers = #tpu.dot_dimension_numbers<[1], [0], [0], [1], [0, 0, 1, 1], [], []>} : vector<49x32xf32>, vector<32x64xf32>, vector<49x64xf32> -> vector<49x64xf32>
    %210 = arith.addf %206, %209 : vector<49x64xf32>
    %c8 = arith.constant 8 : index
    %c0_160 = arith.constant 0 : index
    %211 = vector.load %arg16[%c8, %c0_160] : memref<57x32xf32, #tpu.memory_space<vmem>>, vector<49x32xf32>
    %c96 = arith.constant 96 : index
    %c0_161 = arith.constant 0 : index
    %212 = vector.load %arg4[%c96, %c0_161] : memref<128x64xf32, #tpu.memory_space<vmem>>, vector<32x64xf32>
    %cst_162 = arith.constant dense<0.000000e+00> : vector<49x64xf32>
    %213 = tpu.matmul %211, %212, %cst_162 {dimension_numbers = #tpu.dot_dimension_numbers<[1], [0], [0], [1], [0, 0, 1, 1], [], []>} : vector<49x32xf32>, vector<32x64xf32>, vector<49x64xf32> -> vector<49x64xf32>
    %214 = arith.addf %210, %213 : vector<49x64xf32>
    %c0_163 = arith.constant 0 : index
    %c0_164 = arith.constant 0 : index
    %215 = vector.load %arg13[%c0_163, %c0_164] : memref<49x64xf32, #tpu.memory_space<vmem>>, vector<49x64xf32>
    tpu.vector_store %arg13[%c0_163, %c0_164], %214 {strides = array<i32>} : memref<49x64xf32, #tpu.memory_space<vmem>>, vector<49x64xf32>,
    %c0_165 = arith.constant 0 : index
    %c0_166 = arith.constant 0 : index
    %216 = vector.load %arg13[%c0_165, %c0_166] : memref<49x64xf32, #tpu.memory_space<vmem>>, vector<48x64xf32>
    %c1_167 = arith.constant 1 : index
    %c0_168 = arith.constant 0 : index
    %217 = vector.load %arg13[%c1_167, %c0_168] : memref<49x64xf32, #tpu.memory_space<vmem>>, vector<48x64xf32>
    %218 = arith.maximumf %216, %217 : vector<48x64xf32>
    %c0_169 = arith.constant 0 : index
    %c0_170 = arith.constant 0 : index
    %219 = vector.load %arg13[%c0_169, %c0_170] : memref<49x64xf32, #tpu.memory_space<vmem>>, vector<48x64xf32>
    tpu.vector_store %arg13[%c0_169, %c0_170], %218 {strides = array<i32>} : memref<49x64xf32, #tpu.memory_space<vmem>>, vector<48x64xf32>,
    %c0_171 = arith.constant 0 : index
    %c0_172 = arith.constant 0 : index
    %220 = vector.load %arg13[%c0_171, %c0_172] : memref<49x64xf32, #tpu.memory_space<vmem>>, vector<41x64xf32>
    %c7_173 = arith.constant 7 : index
    %c0_174 = arith.constant 0 : index
    %221 = vector.load %arg13[%c7_173, %c0_174] : memref<49x64xf32, #tpu.memory_space<vmem>>, vector<41x64xf32>
    %222 = arith.maximumf %220, %221 : vector<41x64xf32>
    %c0_175 = arith.constant 0 : index
    %c0_176 = arith.constant 0 : index
    %223 = vector.load %arg13[%c0_175, %c0_176] : memref<49x64xf32, #tpu.memory_space<vmem>>, vector<41x64xf32>
    tpu.vector_store %arg13[%c0_175, %c0_176], %222 {strides = array<i32>} : memref<49x64xf32, #tpu.memory_space<vmem>>, vector<41x64xf32>,
    %c0_177 = arith.constant 0 : index
    %c0_178 = arith.constant 0 : index
    %224 = vector.load %arg8[%c0_177, %c0_178] : memref<1x64xf32, #tpu.memory_space<vmem>>, vector<1x64xf32>
    %c0_179 = arith.constant 0 : index
    %c0_180 = arith.constant 0 : index
    %225 = tpu.strided_load %arg13[%c0_179, %c0_180] {strides = array<i32: 2, 1>} : memref<49x64xf32, #tpu.memory_space<vmem>>, vector<3x64xf32>
    %226 = vector.broadcast %224 : vector<1x64xf32> to vector<3x64xf32>
    %227 = arith.addf %225, %226 : vector<3x64xf32>
    %cst_181 = arith.constant 0.000000e+00 : f32
    %228 = vector.broadcast %cst_181 : f32 to vector<3x64xf32>
    %229 = arith.maximumf %227, %228 : vector<3x64xf32>
    %c0_182 = arith.constant 0 : index
    %c0_183 = arith.constant 0 : index
    %230 = vector.load %arg17[%c0_182, %c0_183] : memref<13x64xf32, #tpu.memory_space<vmem>>, vector<3x64xf32>
    tpu.vector_store %arg17[%c0_182, %c0_183], %229 {strides = array<i32>} : memref<13x64xf32, #tpu.memory_space<vmem>>, vector<3x64xf32>,
    %c14_184 = arith.constant 14 : index
    %c0_185 = arith.constant 0 : index
    %231 = tpu.strided_load %arg13[%c14_184, %c0_185] {strides = array<i32: 2, 1>} : memref<49x64xf32, #tpu.memory_space<vmem>>, vector<3x64xf32>
    %232 = vector.broadcast %224 : vector<1x64xf32> to vector<3x64xf32>
    %233 = arith.addf %231, %232 : vector<3x64xf32>
    %cst_186 = arith.constant 0.000000e+00 : f32
    %234 = vector.broadcast %cst_186 : f32 to vector<3x64xf32>
    %235 = arith.maximumf %233, %234 : vector<3x64xf32>
    %c3_187 = arith.constant 3 : index
    %c0_188 = arith.constant 0 : index
    %236 = vector.load %arg17[%c3_187, %c0_188] : memref<13x64xf32, #tpu.memory_space<vmem>>, vector<3x64xf32>
    tpu.vector_store %arg17[%c3_187, %c0_188], %235 {strides = array<i32>} : memref<13x64xf32, #tpu.memory_space<vmem>>, vector<3x64xf32>,
    %c28_189 = arith.constant 28 : index
    %c0_190 = arith.constant 0 : index
    %237 = tpu.strided_load %arg13[%c28_189, %c0_190] {strides = array<i32: 2, 1>} : memref<49x64xf32, #tpu.memory_space<vmem>>, vector<3x64xf32>
    %238 = vector.broadcast %224 : vector<1x64xf32> to vector<3x64xf32>
    %239 = arith.addf %237, %238 : vector<3x64xf32>
    %cst_191 = arith.constant 0.000000e+00 : f32
    %240 = vector.broadcast %cst_191 : f32 to vector<3x64xf32>
    %241 = arith.maximumf %239, %240 : vector<3x64xf32>
    %c6 = arith.constant 6 : index
    %c0_192 = arith.constant 0 : index
    %242 = vector.load %arg17[%c6, %c0_192] : memref<13x64xf32, #tpu.memory_space<vmem>>, vector<3x64xf32>
    tpu.vector_store %arg17[%c6, %c0_192], %241 {strides = array<i32>} : memref<13x64xf32, #tpu.memory_space<vmem>>, vector<3x64xf32>,
    %c0_193 = arith.constant 0 : index
    %c0_194 = arith.constant 0 : index
    %243 = vector.load %arg17[%c0_193, %c0_194] : memref<13x64xf32, #tpu.memory_space<vmem>>, vector<9x64xf32>
    %c0_195 = arith.constant 0 : index
    %c0_196 = arith.constant 0 : index
    %244 = vector.load %arg5[%c0_195, %c0_196] : memref<256x128xf32, #tpu.memory_space<vmem>>, vector<64x128xf32>
    %cst_197 = arith.constant dense<0.000000e+00> : vector<9x128xf32>
    %245 = tpu.matmul %243, %244, %cst_197 {dimension_numbers = #tpu.dot_dimension_numbers<[1], [0], [0], [1], [0, 0, 1, 1], [], []>} : vector<9x64xf32>, vector<64x128xf32>, vector<9x128xf32> -> vector<9x128xf32>
    %c1_198 = arith.constant 1 : index
    %c0_199 = arith.constant 0 : index
    %246 = vector.load %arg17[%c1_198, %c0_199] : memref<13x64xf32, #tpu.memory_space<vmem>>, vector<9x64xf32>
    %c64_200 = arith.constant 64 : index
    %c0_201 = arith.constant 0 : index
    %247 = vector.load %arg5[%c64_200, %c0_201] : memref<256x128xf32, #tpu.memory_space<vmem>>, vector<64x128xf32>
    %cst_202 = arith.constant dense<0.000000e+00> : vector<9x128xf32>
    %248 = tpu.matmul %246, %247, %cst_202 {dimension_numbers = #tpu.dot_dimension_numbers<[1], [0], [0], [1], [0, 0, 1, 1], [], []>} : vector<9x64xf32>, vector<64x128xf32>, vector<9x128xf32> -> vector<9x128xf32>
    %249 = arith.addf %245, %248 : vector<9x128xf32>
    %c3_203 = arith.constant 3 : index
    %c0_204 = arith.constant 0 : index
    %250 = vector.load %arg17[%c3_203, %c0_204] : memref<13x64xf32, #tpu.memory_space<vmem>>, vector<9x64xf32>
    %c128_205 = arith.constant 128 : index
    %c0_206 = arith.constant 0 : index
    %251 = vector.load %arg5[%c128_205, %c0_206] : memref<256x128xf32, #tpu.memory_space<vmem>>, vector<64x128xf32>
    %cst_207 = arith.constant dense<0.000000e+00> : vector<9x128xf32>
    %252 = tpu.matmul %250, %251, %cst_207 {dimension_numbers = #tpu.dot_dimension_numbers<[1], [0], [0], [1], [0, 0, 1, 1], [], []>} : vector<9x64xf32>, vector<64x128xf32>, vector<9x128xf32> -> vector<9x128xf32>
    %253 = arith.addf %249, %252 : vector<9x128xf32>
    %c4 = arith.constant 4 : index
    %c0_208 = arith.constant 0 : index
    %254 = vector.load %arg17[%c4, %c0_208] : memref<13x64xf32, #tpu.memory_space<vmem>>, vector<9x64xf32>
    %c192_209 = arith.constant 192 : index
    %c0_210 = arith.constant 0 : index
    %255 = vector.load %arg5[%c192_209, %c0_210] : memref<256x128xf32, #tpu.memory_space<vmem>>, vector<64x128xf32>
    %cst_211 = arith.constant dense<0.000000e+00> : vector<9x128xf32>
    %256 = tpu.matmul %254, %255, %cst_211 {dimension_numbers = #tpu.dot_dimension_numbers<[1], [0], [0], [1], [0, 0, 1, 1], [], []>} : vector<9x64xf32>, vector<64x128xf32>, vector<9x128xf32> -> vector<9x128xf32>
    %257 = arith.addf %253, %256 : vector<9x128xf32>
    %c0_212 = arith.constant 0 : index
    %c0_213 = arith.constant 0 : index
    %258 = vector.load %arg14[%c0_212, %c0_213] : memref<9x128xf32, #tpu.memory_space<vmem>>, vector<9x128xf32>
    tpu.vector_store %arg14[%c0_212, %c0_213], %257 {strides = array<i32>} : memref<9x128xf32, #tpu.memory_space<vmem>>, vector<9x128xf32>,
    %c0_214 = arith.constant 0 : index
    %c0_215 = arith.constant 0 : index
    %259 = vector.load %arg14[%c0_214, %c0_215] : memref<9x128xf32, #tpu.memory_space<vmem>>, vector<8x128xf32>
    %c1_216 = arith.constant 1 : index
    %c0_217 = arith.constant 0 : index
    %260 = vector.load %arg14[%c1_216, %c0_217] : memref<9x128xf32, #tpu.memory_space<vmem>>, vector<8x128xf32>
    %261 = arith.maximumf %259, %260 : vector<8x128xf32>
    %c0_218 = arith.constant 0 : index
    %c0_219 = arith.constant 0 : index
    %262 = vector.load %arg14[%c0_218, %c0_219] : memref<9x128xf32, #tpu.memory_space<vmem>>, vector<8x128xf32>
    tpu.vector_store %arg14[%c0_218, %c0_219], %261 {strides = array<i32>} : memref<9x128xf32, #tpu.memory_space<vmem>>, vector<8x128xf32>,
    %c0_220 = arith.constant 0 : index
    %c0_221 = arith.constant 0 : index
    %263 = vector.load %arg14[%c0_220, %c0_221] : memref<9x128xf32, #tpu.memory_space<vmem>>, vector<5x128xf32>
    %c3_222 = arith.constant 3 : index
    %c0_223 = arith.constant 0 : index
    %264 = vector.load %arg14[%c3_222, %c0_223] : memref<9x128xf32, #tpu.memory_space<vmem>>, vector<5x128xf32>
    %265 = arith.maximumf %263, %264 : vector<5x128xf32>
    %c0_224 = arith.constant 0 : index
    %c0_225 = arith.constant 0 : index
    %266 = vector.load %arg14[%c0_224, %c0_225] : memref<9x128xf32, #tpu.memory_space<vmem>>, vector<5x128xf32>
    tpu.vector_store %arg14[%c0_224, %c0_225], %265 {strides = array<i32>} : memref<9x128xf32, #tpu.memory_space<vmem>>, vector<5x128xf32>,
    %c0_226 = arith.constant 0 : index
    %c0_227 = arith.constant 0 : index
    %267 = vector.load %arg9[%c0_226, %c0_227] : memref<1x128xf32, #tpu.memory_space<vmem>>, vector<1x128xf32>
    %c0_228 = arith.constant 0 : index
    %c0_229 = arith.constant 0 : index
    %268 = vector.load %arg14[%c0_228, %c0_229] : memref<9x128xf32, #tpu.memory_space<vmem>>, vector<1x128xf32>
    %269 = arith.addf %268, %267 : vector<1x128xf32>
    %cst_230 = arith.constant 0.000000e+00 : f32
    %270 = vector.broadcast %cst_230 : f32 to vector<1x128xf32>
    %271 = arith.maximumf %269, %270 : vector<1x128xf32>
    %cst_231 = arith.constant dense<0.000000e+00> : vector<128xf32>
    %272 = vector.multi_reduction <add>, %271, %cst_231 [0] : vector<1x128xf32> to vector<128xf32>
    %273 = vector.shape_cast %272 : vector<128xf32> to vector<1x128xf32>
    %cst_232 = arith.constant 1.000000e+00 : f32
    %274 = vector.broadcast %cst_232 : f32 to vector<1x128xf32>
    %275 = arith.mulf %273, %274 : vector<1x128xf32>
    %c0_233 = arith.constant 0 : index
    %c0_234 = arith.constant 0 : index
    %c0_235 = arith.constant 0 : index
    %276 = vector.load %arg10[%c0_233, %c0_234, %c0_235] : memref<1x1x128xf32, #tpu.memory_space<vmem>>, vector<1x1x128xf32>
    %277 = vector.shape_cast %276 : vector<1x1x128xf32> to vector<1x128xf32>
    %278 = vector.shape_cast %275 : vector<1x128xf32> to vector<1x1x128xf32>
    tpu.vector_store %arg10[%c0_233, %c0_234, %c0_235], %278 {strides = array<i32>} : memref<1x1x128xf32, #tpu.memory_space<vmem>>, vector<1x1x128xf32>,
    return
  }
  func.func @transform_0(%arg0: i32) -> (i32, i32, i32) {
    %c0_i32 = arith.constant 0 : i32
    %c0_i32_0 = arith.constant 0 : i32
    %c0_i32_1 = arith.constant 0 : i32
    return %arg0, %c0_i32, %c0_i32_0 : i32, i32, i32
  }
  func.func @transform_1(%arg0: i32) -> (i32, i32) {
    %c0_i32 = arith.constant 0 : i32
    %c0_i32_0 = arith.constant 0 : i32
    %c0_i32_1 = arith.constant 0 : i32
    return %c0_i32, %c0_i32_0 : i32, i32
  }
  func.func @transform_2(%arg0: i32) -> (i32, i32) {
    %c0_i32 = arith.constant 0 : i32
    %c0_i32_0 = arith.constant 0 : i32
    %c0_i32_1 = arith.constant 0 : i32
    return %c0_i32, %c0_i32_0 : i32, i32
  }
  func.func @transform_3(%arg0: i32) -> (i32, i32) {
    %c0_i32 = arith.constant 0 : i32
    %c0_i32_0 = arith.constant 0 : i32
    %c0_i32_1 = arith.constant 0 : i32
    return %c0_i32, %c0_i32_0 : i32, i32
  }
  func.func @transform_4(%arg0: i32) -> (i32, i32) {
    %c0_i32 = arith.constant 0 : i32
    %c0_i32_0 = arith.constant 0 : i32
    %c0_i32_1 = arith.constant 0 : i32
    return %c0_i32, %c0_i32_0 : i32, i32
  }
  func.func @transform_5(%arg0: i32) -> (i32, i32) {
    %c0_i32 = arith.constant 0 : i32
    %c0_i32_0 = arith.constant 0 : i32
    %c0_i32_1 = arith.constant 0 : i32
    return %c0_i32, %c0_i32_0 : i32, i32
  }
  func.func @transform_6(%arg0: i32) -> (i32, i32) {
    %c0_i32 = arith.constant 0 : i32
    %c0_i32_0 = arith.constant 0 : i32
    %c0_i32_1 = arith.constant 0 : i32
    return %c0_i32, %c0_i32_0 : i32, i32
  }
  func.func @transform_7(%arg0: i32) -> (i32, i32) {
    %c0_i32 = arith.constant 0 : i32
    %c0_i32_0 = arith.constant 0 : i32
    %c0_i32_1 = arith.constant 0 : i32
    return %c0_i32, %c0_i32_0 : i32, i32
  }
  func.func @transform_8(%arg0: i32) -> (i32, i32) {
    %c0_i32 = arith.constant 0 : i32
    %c0_i32_0 = arith.constant 0 : i32
    %c0_i32_1 = arith.constant 0 : i32
    return %c0_i32, %c0_i32_0 : i32, i32
  }
  func.func @transform_9(%arg0: i32) -> (i32, i32, i32) {
    %c0_i32 = arith.constant 0 : i32
    %c0_i32_0 = arith.constant 0 : i32
    %c0_i32_1 = arith.constant 0 : i32
    return %arg0, %c0_i32, %c0_i32_0 : i32, i32, i32
  }
}

</mosaic_0001>

<bundles_post_ra>
// kernel: spt_cnn_forward.1
= control target key start
LH: loop header
LB: loop body
LE: loop exit
PB: predicated region body
PF: predicated region fallthrough
CT: control target
= control target key end

     0   :  { %14 = vsyncpa [#allocation10], 0  ;;  %s13141_s0 = inlined_call_operand.vmem [shape: f32[2,1057,1], index: 0, kind: input, shape index: {}]   ;;  %s13142_s1 = inlined_call_operand.vmem [shape: f32[4,16], index: 1, kind: input, shape index: {}]   ;;  %s13143_s2 = inlined_call_operand.vmem [shape: f32[64,32], index: 2, kind: input, shape index: {}]   ;;  %s13144_s3 = inlined_call_operand.vmem [shape: f32[128,64], index: 3, kind: input, shape index: {}]   ;;  %s13145_s4 = inlined_call_operand.vmem [shape: f32[256,128], index: 4, kind: input, shape index: {}]   ;;  %s13146_s5 = inlined_call_operand.vmem [shape: f32[1,16], index: 5, kind: input, shape index: {}]   ;;  %s13147_s6 = inlined_call_operand.vmem [shape: f32[1,32], index: 6, kind: input, shape index: {}]   ;;  %s13148_s7 = inlined_call_operand.vmem [shape: f32[1,64], index: 7, kind: input, shape index: {}]   ;;  %s13149_s8 = inlined_call_operand.vmem [shape: f32[1,128], index: 8, kind: input, shape index: {}]   ;;  %s13150_s9 = inlined_call_operand.hbm [shape: f32[2,1,128], index: 9, kind: output, shape index: {}]  }
   0x1   :  { %16 = vsyncpa [#allocation10 + $0x1], 0  ;;  %s9351_s30 = smov 0   ;;  %s9353_s10 = smov 0  }
   0x2   :  { %s9355_s11 = smov 0   ;;  %s9357_s12 = smov 0  }
   0x3 LB: > { %s9372_s13 = sadd.s32 4294967295, %s9295_s12   ;;  %s8234_s14 = sadd.s32 4294967294, %s9295_s12   ;;  %s9295_s12 = sphi %s9357_s12, %s13563_s12   ;;  %s9291_s11 = sphi %s9355_s11, %s13562_s11   ;;  %s9287_s10 = sphi %s9353_s10, %s13561_s10   ;;  %s9283_s30 = sphi %s9351_s30, %s13560_s30  }
   0x4   : > { %s9376_s15 = sadd.s32 1, %s9295_s12   ;;  %s223_s16 = sadd.s32 1, %s9291_s11 }
   0x5   : > { %s220_s17 = ssub.s32 %s9295_s12, %s9376_s15  ;;  %p233_p0 = scmp.ne.s32.totalorder %s9291_s11, %s9287_s10 }
   0x6   : > { %p221_p1 = scmp.eq.s32.totalorder %s220_s17, 0  ;;  %p234_p2 = scmp.eq.s32.totalorder %s9372_s13, 1 }
   0x7   : > { %p239_p3 = scmp.ne.s32.totalorder %s9287_s10, %s9283_s30  ;;  %p240_p4 = scmp.eq.s32.totalorder %s8234_s14, 1 }
   0x8   : > { %s9387_s18 = scalar_select %p221_p1, %s9291_s11, %s223_s16  }
   0x9   : > { %p9389_p5 = por %p234_p2, %p233_p0  ;;  %p9393_p6 = por %p240_p4, %p239_p3 }
   0xa   : > { %p8237_p7 = scmp.ge.s32.totalorder %s9295_s12, 1  ;;  %p290_p8 = scmp.lt.s32.totalorder %s9295_s12, 3 }
   0xc   : > { %p291_p9 = pnand %p8237_p7, %p290_p8 }
   0xe   : > { %294 = sbr.rel (%p291_p9) target bundleno = 2067 (0x813), region = 56 }
  0x13   : > { %p325_p10 = scmp.lt.s32.totalorder %s9372_s13, 1  ;;  %v9297_v0 = vmov 0   ;;  %vm330_vm0 = vcmask 130048   ;;  %vm9299_vm1 = vmmov 0   ;;  %vm4964_vm2 = vcmask 129024   ;;  %s323_s24 = sand.u32 1, %s9287_s10  }
  0x14   : > { %9209 = vset.pattern.permute.xlu1 %v9297_v0  ;;  %9208 = vset.pattern.permute.xlu0 %v9297_v0  ;;  %vm333_vm3 = vcmask 261120   ;;  %vm7129_vm4 = vcmask 260096   ;;  %vm6897_vm5 = vcmask 253952   ;;  %vm335_vm6 = vcmask 519168   ;;  %s8398_s28 = sshll.u32 %s9372_s13, 4  ;;  %s324_s29 = scalar_lea.vmem [#allocation9], %s323_s24 }
  0x15   : > { %s326_s21 = scalar_select %p325_p10, %s9372_s13, 1  ;;  %vm7703_vm7 = vcmask 523264   ;;  %vm7710_vm8 = vcmask 516096   ;;  %vm7770_vm9 = vcmask 518144  }
  0x16   : > { %s8179_s14 = sshll.u32 %s324_s29, 4  ;;  %s9300_s23 = smov [#allocation9]   ;;  %s8180_s14 = int_to_ptr.vmem [resolvable:$true] %s8179_s14 }
  0x17   : > { %s9165_s22 = smul.u32 1064, %s326_s21  ;;  %s8177_s21 = scalar_lea.hbm %s13150_s9, %s8398_s28 }
  0x18   : > { %s9239_s26 = sshll.u32 %s9300_s23, 4  ;;  %s9240_s26 = int_to_ptr.vmem [resolvable:$false] %s9239_s26 }
  0x19   : > { %s9404_s25 = scalar_lea.vmem %s13141_s0, %s9165_s22  ;;  %s8167_s22 = scalar_lea.sflag [#allocation10], %s323_s24 }
  0x1a   : > { %v339_v1 = vld [vmem:[%s9404_s25 + $0x10] sm:$0xff]  ;;  %v337_v2 = vld [vmem:[%s9404_s25] sm:$0xff]  ;;  %v340_v3 = vld [vmem:[%s9404_s25 + $0x18] sm:$0xff]  ;;  %s9241_s13 = scalar_lea.vmem %s9240_s26, 32  ;;  %p9242_p0 = scmp.lt.s32.totalorder %s8180_s14, %s9240_s26 }
  0x1b   : > { %478 = vperm.xlu1 %9209, %v339_v1   ;;  %468 = vperm.xlu0 %9208, %v337_v2   ;;  %v338_v4 = vld [vmem:[%s9404_s25 + $0x8] sm:$0xff]  ;;  %v341_v6 = vld [vmem:[%s9404_s25 + $0x20] sm:$0xff]  ;;  %v344_v7 = vld [vmem:[%s9404_s25 + $0x38] sm:$0xff] }
  0x1c   : > { %v342_v5 = vld [vmem:[%s9404_s25 + $0x28] sm:$0xff]  ;;  %v343_v8 = vld [vmem:[%s9404_s25 + $0x30] sm:$0xff]  ;;  %v345_v10 = vld [vmem:[%s9404_s25 + $0x40] sm:$0xff] }
  0x1d   : > { %v346_v9 = vld [vmem:[%s9404_s25 + $0x48] sm:$0xff]  ;;  %v348_v11 = vld [vmem:[%s9404_s25 + $0x58] sm:$0xff]  ;;  %v347_v12 = vld [vmem:[%s9404_s25 + $0x50] sm:$0xff] }
  0x1e   : > { %v350_v13 = vld [vmem:[%s9404_s25 + $0x68] sm:$0xff]  ;;  %v349_v14 = vld [vmem:[%s9404_s25 + $0x60] sm:$0xff]  ;;  %v352_v15 = vld [vmem:[%s9404_s25 + $0x78] sm:$0xff] }
  0x1f   : > { %483 = vperm.xlu1 %9209, %v340_v3   ;;  %473 = vperm.xlu0 %9208, %v338_v4   ;;  %v351_v16 = vld [vmem:[%s9404_s25 + $0x70] sm:$0xff]  ;;  %v354_v17 = vld [vmem:[%s9404_s25 + $0x88] sm:$0xff]  ;;  %v353_v18 = vld [vmem:[%s9404_s25 + $0x80] sm:$0xff] }
  0x20   : > { %v356_v19 = vld [vmem:[%s9404_s25 + $0x98] sm:$0xff]  ;;  %v355_v20 = vld [vmem:[%s9404_s25 + $0x90] sm:$0xff]  ;;  %v358_v21 = vld [vmem:[%s9404_s25 + $0xa8] sm:$0xff] }
  0x21   : > { %v357_v22 = vld [vmem:[%s9404_s25 + $0xa0] sm:$0xff]  ;;  %v360_v23 = vld [vmem:[%s9404_s25 + $0xb8] sm:$0xff]  ;;  %v359_v24 = vld [vmem:[%s9404_s25 + $0xb0] sm:$0xff] }
  0x22   : > { %v362_v25 = vld [vmem:[%s9404_s25 + $0xc8] sm:$0xff]  ;;  %v361_v26 = vld [vmem:[%s9404_s25 + $0xc0] sm:$0xff]  ;;  %v364_v27 = vld [vmem:[%s9404_s25 + $0xd8] sm:$0xff] }
  0x23   : > { %493 = vperm.xlu1 %9209, %v342_v5   ;;  %488 = vperm.xlu0 %9208, %v341_v6   ;;  %v363_v28 = vld [vmem:[%s9404_s25 + $0xd0] sm:$0xff]  ;;  %v366_v29 = vld [vmem:[%s9404_s25 + $0xe8] sm:$0xff]  ;;  %v365_v30 = vld [vmem:[%s9404_s25 + $0xe0] sm:$0xff] }
  0x24   : > { %v368_v31 = vld [vmem:[%s9404_s25 + $0xf8] sm:$0xff]  ;;  %v367_v32 = vld [vmem:[%s9404_s25 + $0xf0] sm:$0xff]  ;;  %v370_v33 = vld [vmem:[%s9404_s25 + $0x108] sm:$0xff] }
  0x25   : > { %v369_v34 = vld [vmem:[%s9404_s25 + $0x100] sm:$0xff]  ;;  %v372_v35 = vld [vmem:[%s9404_s25 + $0x118] sm:$0xff]  ;;  %v371_v36 = vld [vmem:[%s9404_s25 + $0x110] sm:$0xff] }
  0x26   : > { %v374_v37 = vld [vmem:[%s9404_s25 + $0x128] sm:$0xff]  ;;  %v373_v38 = vld [vmem:[%s9404_s25 + $0x120] sm:$0xff]  ;;  %v376_v39 = vld [vmem:[%s9404_s25 + $0x138] sm:$0xff] }
  0x27   : > { %503 = vperm.xlu1 %9209, %v344_v7   ;;  %498 = vperm.xlu0 %9208, %v343_v8   ;;  %v375_v40 = vld [vmem:[%s9404_s25 + $0x130] sm:$0xff]  ;;  %v378_v41 = vld [vmem:[%s9404_s25 + $0x148] sm:$0xff]  ;;  %v377_v42 = vld [vmem:[%s9404_s25 + $0x140] sm:$0xff] }
  0x28   : > { %v380_v43 = vld [vmem:[%s9404_s25 + $0x158] sm:$0xff]  ;;  %v379_v44 = vld [vmem:[%s9404_s25 + $0x150] sm:$0xff]  ;;  %v382_v45 = vld [vmem:[%s9404_s25 + $0x168] sm:$0xff] }
  0x29   : > { %v381_v46 = vld [vmem:[%s9404_s25 + $0x160] sm:$0xff]  ;;  %v384_v47 = vld [vmem:[%s9404_s25 + $0x178] sm:$0xff]  ;;  %v383_v48 = vld [vmem:[%s9404_s25 + $0x170] sm:$0xff] }
  0x2a   : > { %v386_v49 = vld [vmem:[%s9404_s25 + $0x188] sm:$0xff]  ;;  %v385_v50 = vld [vmem:[%s9404_s25 + $0x180] sm:$0xff]  ;;  %v388_v51 = vld [vmem:[%s9404_s25 + $0x198] sm:$0xff] }
  0x2b   : > { %513 = vperm.xlu1 %9209, %v346_v9   ;;  %508 = vperm.xlu0 %9208, %v345_v10   ;;  %v387_v52 = vld [vmem:[%s9404_s25 + $0x190] sm:$0xff]  ;;  %v390_v53 = vld [vmem:[%s9404_s25 + $0x1a8] sm:$0xff]  ;;  %v389_v54 = vld [vmem:[%s9404_s25 + $0x1a0] sm:$0xff] }
  0x2c   : > { %v392_v55 = vld [vmem:[%s9404_s25 + $0x1b8] sm:$0xff]  ;;  %v391_v56 = vld [vmem:[%s9404_s25 + $0x1b0] sm:$0xff]  ;;  %v394_v57 = vld [vmem:[%s9404_s25 + $0x1c8] sm:$0xff] }
  0x2d   : > { %v393_v58 = vld [vmem:[%s9404_s25 + $0x1c0] sm:$0xff]  ;;  %v396_v59 = vld [vmem:[%s9404_s25 + $0x1d8] sm:$0xff]  ;;  %v395_v60 = vld [vmem:[%s9404_s25 + $0x1d0] sm:$0xff] }
  0x2e   : > { %v398_v61 = vld [vmem:[%s9404_s25 + $0x1e8] sm:$0xff]  ;;  %v397_v62 = vld [vmem:[%s9404_s25 + $0x1e0] sm:$0xff]  ;;  %v400_v63 = vld [vmem:[%s9404_s25 + $0x1f8] sm:$0xff] }
  0x2f   : > { %523 = vperm.xlu1 %9209, %v348_v11   ;;  %518 = vperm.xlu0 %9208, %v347_v12   ;;  %v399_v0 = vld [vmem:[%s9404_s25 + $0x1f0] sm:$0xff]  ;;  %v402_v3 = vld [vmem:[%s9404_s25 + $0x208] sm:$0xff]  ;;  %v401_v4 = vld [vmem:[%s9404_s25 + $0x200] sm:$0xff] }
  0x30   : > { %v404_v7 = vld [vmem:[%s9404_s25 + $0x218] sm:$0xff]  ;;  %v403_v8 = vld [vmem:[%s9404_s25 + $0x210] sm:$0xff]  ;;  %v406_v11 = vld [vmem:[%s9404_s25 + $0x228] sm:$0xff] }
  0x31   : > { %v405_v12 = vld [vmem:[%s9404_s25 + $0x220] sm:$0xff] }
  0x33   : > { %533 = vperm.xlu1 %9209, %v350_v13   ;;  %528 = vperm.xlu0 %9208, %v349_v14  }
  0x37   : > { %543 = vperm.xlu1 %9209, %v352_v15   ;;  %538 = vperm.xlu0 %9208, %v351_v16   ;;  %v408_v15 = vld [vmem:[%s9404_s25 + $0x238] sm:$0xff]  ;;  %v407_v16 = vld [vmem:[%s9404_s25 + $0x230] sm:$0xff] }
  0x3b   : > { %553 = vperm.xlu1 %9209, %v354_v17   ;;  %548 = vperm.xlu0 %9208, %v353_v18  }
  0x3f   : > { %563 = vperm.xlu1 %9209, %v356_v19   ;;  %558 = vperm.xlu0 %9208, %v355_v20   ;;  %v410_v19 = vld [vmem:[%s9404_s25 + $0x248] sm:$0xff]  ;;  %v409_v20 = vld [vmem:[%s9404_s25 + $0x240] sm:$0xff] }
  0x43   : > { %573 = vperm.xlu1 %9209, %v358_v21   ;;  %568 = vperm.xlu0 %9208, %v357_v22  }
  0x47   : > { %583 = vperm.xlu1 %9209, %v360_v23   ;;  %578 = vperm.xlu0 %9208, %v359_v24   ;;  %v412_v23 = vld [vmem:[%s9404_s25 + $0x258] sm:$0xff]  ;;  %v411_v24 = vld [vmem:[%s9404_s25 + $0x250] sm:$0xff] }
  0x4b   : > { %593 = vperm.xlu1 %9209, %v362_v25   ;;  %588 = vperm.xlu0 %9208, %v361_v26  }
  0x4f   : > { %603 = vperm.xlu1 %9209, %v364_v27   ;;  %598 = vperm.xlu0 %9208, %v363_v28   ;;  %v414_v27 = vld [vmem:[%s9404_s25 + $0x268] sm:$0xff]  ;;  %v413_v28 = vld [vmem:[%s9404_s25 + $0x260] sm:$0xff] }
  0x53   : > { %613 = vperm.xlu1 %9209, %v366_v29   ;;  %608 = vperm.xlu0 %9208, %v365_v30  }
  0x57   : > { %623 = vperm.xlu1 %9209, %v368_v31   ;;  %618 = vperm.xlu0 %9208, %v367_v32   ;;  %v416_v31 = vld [vmem:[%s9404_s25 + $0x278] sm:$0xff]  ;;  %v415_v32 = vld [vmem:[%s9404_s25 + $0x270] sm:$0xff] }
  0x5b   : > { %633 = vperm.xlu1 %9209, %v370_v33   ;;  %628 = vperm.xlu0 %9208, %v369_v34  }
  0x5f   : > { %643 = vperm.xlu1 %9209, %v372_v35   ;;  %638 = vperm.xlu0 %9208, %v371_v36   ;;  %v418_v35 = vld [vmem:[%s9404_s25 + $0x288] sm:$0xff]  ;;  %v417_v36 = vld [vmem:[%s9404_s25 + $0x280] sm:$0xff] }
  0x63   : > { %653 = vperm.xlu1 %9209, %v374_v37   ;;  %648 = vperm.xlu0 %9208, %v373_v38  }
  0x67   : > { %663 = vperm.xlu1 %9209, %v376_v39   ;;  %658 = vperm.xlu0 %9208, %v375_v40   ;;  %v420_v39 = vld [vmem:[%s9404_s25 + $0x298] sm:$0xff]  ;;  %v419_v40 = vld [vmem:[%s9404_s25 + $0x290] sm:$0xff] }
  0x6b   : > { %673 = vperm.xlu1 %9209, %v378_v41   ;;  %668 = vperm.xlu0 %9208, %v377_v42  }
  0x6f   : > { %683 = vperm.xlu1 %9209, %v380_v43   ;;  %678 = vperm.xlu0 %9208, %v379_v44   ;;  %v422_v43 = vld [vmem:[%s9404_s25 + $0x2a8] sm:$0xff]  ;;  %v421_v44 = vld [vmem:[%s9404_s25 + $0x2a0] sm:$0xff] }
  0x73   : > { %693 = vperm.xlu1 %9209, %v382_v45   ;;  %688 = vperm.xlu0 %9208, %v381_v46  }
  0x77   : > { %703 = vperm.xlu1 %9209, %v384_v47   ;;  %698 = vperm.xlu0 %9208, %v383_v48   ;;  %v424_v47 = vld [vmem:[%s9404_s25 + $0x2b8] sm:$0xff]  ;;  %v423_v48 = vld [vmem:[%s9404_s25 + $0x2b0] sm:$0xff] }
  0x7b   : > { %713 = vperm.xlu1 %9209, %v386_v49   ;;  %708 = vperm.xlu0 %9208, %v385_v50  }
  0x7f   : > { %723 = vperm.xlu1 %9209, %v388_v51   ;;  %718 = vperm.xlu0 %9208, %v387_v52   ;;  %v426_v51 = vld [vmem:[%s9404_s25 + $0x2c8] sm:$0xff]  ;;  %v425_v52 = vld [vmem:[%s9404_s25 + $0x2c0] sm:$0xff] }
  0x83   : > { %733 = vperm.xlu1 %9209, %v390_v53   ;;  %728 = vperm.xlu0 %9208, %v389_v54  }
  0x87   : > { %743 = vperm.xlu1 %9209, %v392_v55   ;;  %738 = vperm.xlu0 %9208, %v391_v56   ;;  %v428_v55 = vld [vmem:[%s9404_s25 + $0x2d8] sm:$0xff]  ;;  %v427_v56 = vld [vmem:[%s9404_s25 + $0x2d0] sm:$0xff] }
  0x8b   : > { %753 = vperm.xlu1 %9209, %v394_v57   ;;  %748 = vperm.xlu0 %9208, %v393_v58  }
  0x8f   : > { %763 = vperm.xlu1 %9209, %v396_v59   ;;  %758 = vperm.xlu0 %9208, %v395_v60   ;;  %v430_v59 = vld [vmem:[%s9404_s25 + $0x2e8] sm:$0xff]  ;;  %v429_v60 = vld [vmem:[%s9404_s25 + $0x2e0] sm:$0xff] }
  0x93   : > { %773 = vperm.xlu1 %9209, %v398_v61   ;;  %768 = vperm.xlu0 %9208, %v397_v62  }
  0x96   : > { %v9470_v1 = vpop.permute.xlu1 %478  ;;  %v9472_v2 = vpop.permute.xlu0 %468 }
  0x97   : > { %783 = vperm.xlu1 %9209, %v400_v63   ;;  %778 = vperm.xlu0 %9208, %v399_v0   ;;  %v432_v63 = vld [vmem:[%s9404_s25 + $0x2f8] sm:$0xff]  ;;  %v431_v0 = vld [vmem:[%s9404_s25 + $0x2f0] sm:$0xff] }
  0x9a   : > { %v9476_v5 = vpop.permute.xlu1 %483  ;;  %v9478_v6 = vpop.permute.xlu0 %473 }
  0x9b   : > { %793 = vperm.xlu1 %9209, %v402_v3   ;;  %788 = vperm.xlu0 %9208, %v401_v4  }
  0x9e   : > { %v9482_v9 = vpop.permute.xlu1 %493  ;;  %v9484_v10 = vpop.permute.xlu0 %488 }
  0x9f   : > { %803 = vperm.xlu1 %9209, %v404_v7   ;;  %798 = vperm.xlu0 %9208, %v403_v8   ;;  %v434_v7 = vld [vmem:[%s9404_s25 + $0x308] sm:$0xff]  ;;  %v433_v8 = vld [vmem:[%s9404_s25 + $0x300] sm:$0xff] }
  0xa2   : > { %v9488_v13 = vpop.permute.xlu1 %503  ;;  %v9490_v14 = vpop.permute.xlu0 %498 }
  0xa3   : > { %813 = vperm.xlu1 %9209, %v406_v11   ;;  %808 = vperm.xlu0 %9208, %v405_v12  }
  0xa6   : > { %v9494_v17 = vpop.permute.xlu1 %513  ;;  %v9496_v18 = vpop.permute.xlu0 %508 }
  0xa7   : > { %823 = vperm.xlu1 %9209, %v408_v15   ;;  %818 = vperm.xlu0 %9208, %v407_v16   ;;  %v436_v15 = vld [vmem:[%s9404_s25 + $0x318] sm:$0xff]  ;;  %v435_v16 = vld [vmem:[%s9404_s25 + $0x310] sm:$0xff] }
  0xaa   : > { %v9500_v21 = vpop.permute.xlu1 %523  ;;  %v9502_v22 = vpop.permute.xlu0 %518 }
  0xab   : > { %833 = vperm.xlu1 %9209, %v410_v19   ;;  %828 = vperm.xlu0 %9208, %v409_v20  }
  0xae   : > { %v9506_v25 = vpop.permute.xlu1 %533  ;;  %v9508_v26 = vpop.permute.xlu0 %528 }
  0xaf   : > { %843 = vperm.xlu1 %9209, %v412_v23   ;;  %838 = vperm.xlu0 %9208, %v411_v24   ;;  %v438_v23 = vld [vmem:[%s9404_s25 + $0x328] sm:$0xff]  ;;  %v437_v24 = vld [vmem:[%s9404_s25 + $0x320] sm:$0xff] }
  0xb2   : > { %v9512_v29 = vpop.permute.xlu1 %543  ;;  %v9514_v30 = vpop.permute.xlu0 %538 }
  0xb3   : > { %853 = vperm.xlu1 %9209, %v414_v27   ;;  %848 = vperm.xlu0 %9208, %v413_v28  }
  0xb6   : > { %v9518_v33 = vpop.permute.xlu1 %553  ;;  %v9520_v34 = vpop.permute.xlu0 %548 }
  0xb7   : > { %863 = vperm.xlu1 %9209, %v416_v31   ;;  %858 = vperm.xlu0 %9208, %v415_v32   ;;  %v440_v31 = vld [vmem:[%s9404_s25 + $0x338] sm:$0xff]  ;;  %v439_v32 = vld [vmem:[%s9404_s25 + $0x330] sm:$0xff] }
  0xba   : > { %v9524_v37 = vpop.permute.xlu1 %563  ;;  %v9526_v38 = vpop.permute.xlu0 %558 }
  0xbb   : > { %13155 = vst [vmem:[#allocation12_spill] sm:$0xff] %v9524_v37  ;;  %873 = vperm.xlu1 %9209, %v418_v35   ;;  %868 = vperm.xlu0 %9208, %v417_v36  }
  0xbe   : > { %v9530_v41 = vpop.permute.xlu1 %573  ;;  %v9532_v42 = vpop.permute.xlu0 %568 }
  0xbf   : > { %13156 = vst [vmem:[#allocation13_spill] sm:$0xff] %v9530_v41  ;;  %13157 = vst [vmem:[#allocation14_spill] sm:$0xff] %v9532_v42  ;;  %883 = vperm.xlu1 %9209, %v420_v39   ;;  %878 = vperm.xlu0 %9208, %v419_v40   ;;  %v442_v39 = vld [vmem:[%s9404_s25 + $0x348] sm:$0xff]  ;;  %v441_v40 = vld [vmem:[%s9404_s25 + $0x340] sm:$0xff] }
  0xc0   : > { %v2302_v41 = vld [vmem:[%s9404_s25 + $0x138] sm:$0xff] }
  0xc2   : > { %v9536_v45 = vpop.permute.xlu1 %583  ;;  %v9538_v46 = vpop.permute.xlu0 %578 }
  0xc3   : > { %13158 = vst [vmem:[#allocation15_spill] sm:$0xff] %v9536_v45  ;;  %13159 = vst [vmem:[#allocation16_spill] sm:$0xff] %v9538_v46  ;;  %893 = vperm.xlu1 %9209, %v422_v43   ;;  %888 = vperm.xlu0 %9208, %v421_v44  }
  0xc6   : > { %v9542_v49 = vpop.permute.xlu1 %593  ;;  %v9544_v50 = vpop.permute.xlu0 %588 }
  0xc7   : > { %13160 = vst [vmem:[#allocation17_spill] sm:$0xff] %v9542_v49  ;;  %13161 = vst [vmem:[#allocation18_spill] sm:$0xff] %v9544_v50  ;;  %903 = vperm.xlu1 %9209, %v424_v47   ;;  %898 = vperm.xlu0 %9208, %v423_v48   ;;  %v444_v47 = vld [vmem:[%s9404_s25 + $0x358] sm:$0xff]  ;;  %v443_v48 = vld [vmem:[%s9404_s25 + $0x350] sm:$0xff] }
  0xc8   : > { %v2303_v49 = vld [vmem:[%s9404_s25 + $0x140] sm:$0xff]  ;;  %v2304_v50 = vld [vmem:[%s9404_s25 + $0x148] sm:$0xff] }
  0xca   : > { %v9548_v53 = vpop.permute.xlu1 %603  ;;  %v9550_v54 = vpop.permute.xlu0 %598 }
  0xcb   : > { %13162 = vst [vmem:[#allocation19_spill] sm:$0xff] %v9548_v53  ;;  %13163 = vst [vmem:[#allocation20_spill] sm:$0xff] %v9550_v54  ;;  %913 = vperm.xlu1 %9209, %v426_v51   ;;  %908 = vperm.xlu0 %9208, %v425_v52  }
  0xce   : > { %v9554_v57 = vpop.permute.xlu1 %613  ;;  %v9556_v58 = vpop.permute.xlu0 %608 }
  0xcf   : > { %13164 = vst [vmem:[#allocation21_spill] sm:$0xff] %v9554_v57  ;;  %13165 = vst [vmem:[#allocation22_spill] sm:$0xff] %v9556_v58  ;;  %923 = vperm.xlu1 %9209, %v428_v55   ;;  %918 = vperm.xlu0 %9208, %v427_v56   ;;  %v446_v55 = vld [vmem:[%s9404_s25 + $0x368] sm:$0xff]  ;;  %v445_v56 = vld [vmem:[%s9404_s25 + $0x360] sm:$0xff] }
  0xd2   : > { %v9560_v61 = vpop.permute.xlu1 %623  ;;  %v9562_v62 = vpop.permute.xlu0 %618 }
  0xd3   : > { %13166 = vst [vmem:[#allocation23_spill] sm:$0xff] %v9560_v61  ;;  %13167 = vst [vmem:[#allocation24_spill] sm:$0xff] %v9562_v62  ;;  %933 = vperm.xlu1 %9209, %v430_v59   ;;  %928 = vperm.xlu0 %9208, %v429_v60  }
  0xd6   : > { %v9566_v3 = vpop.permute.xlu1 %633  ;;  %v9568_v4 = vpop.permute.xlu0 %628 }
  0xd7   : > { %13168 = vst [vmem:[#allocation25_spill] sm:$0xff] %v9566_v3  ;;  %13169 = vst [vmem:[#allocation26_spill] sm:$0xff] %v9568_v4  ;;  %943 = vperm.xlu1 %9209, %v432_v63   ;;  %938 = vperm.xlu0 %9208, %v431_v0   ;;  %v448_v63 = vld [vmem:[%s9404_s25 + $0x378] sm:$0xff]  ;;  %v447_v0 = vld [vmem:[%s9404_s25 + $0x370] sm:$0xff] }
  0xda   : > { %v9572_v11 = vpop.permute.xlu1 %643  ;;  %v9574_v12 = vpop.permute.xlu0 %638 }
  0xdb   : > { %13170 = vst [vmem:[#allocation27_spill] sm:$0xff] %v9572_v11  ;;  %13171 = vst [vmem:[#allocation28_spill] sm:$0xff] %v9574_v12  ;;  %953 = vperm.xlu1 %9209, %v434_v7   ;;  %948 = vperm.xlu0 %9208, %v433_v8  }
  0xde   : > { %v9578_v19 = vpop.permute.xlu1 %653  ;;  %v9580_v20 = vpop.permute.xlu0 %648 }
  0xdf   : > { %13172 = vst [vmem:[#allocation29_spill] sm:$0xff] %v9578_v19  ;;  %13173 = vst [vmem:[#allocation30_spill] sm:$0xff] %v9580_v20  ;;  %963 = vperm.xlu1 %9209, %v436_v15   ;;  %958 = vperm.xlu0 %9208, %v435_v16   ;;  %v450_v15 = vld [vmem:[%s9404_s25 + $0x388] sm:$0xff]  ;;  %v449_v16 = vld [vmem:[%s9404_s25 + $0x380] sm:$0xff] }
  0xe2   : > { %v9584_v27 = vpop.permute.xlu1 %663  ;;  %v9586_v28 = vpop.permute.xlu0 %658 }
  0xe3   : > { %13174 = vst [vmem:[#allocation31_spill] sm:$0xff] %v9584_v27  ;;  %13175 = vst [vmem:[#allocation32_spill] sm:$0xff] %v9586_v28  ;;  %973 = vperm.xlu1 %9209, %v438_v23   ;;  %968 = vperm.xlu0 %9208, %v437_v24  }
  0xe6   : > { %v9590_v35 = vpop.permute.xlu1 %673  ;;  %v9592_v36 = vpop.permute.xlu0 %668 }
  0xe7   : > { %13176 = vst [vmem:[#allocation33_spill] sm:$0xff] %v9590_v35  ;;  %13177 = vst [vmem:[#allocation34_spill] sm:$0xff] %v9592_v36  ;;  %983 = vperm.xlu1 %9209, %v440_v31   ;;  %978 = vperm.xlu0 %9208, %v439_v32   ;;  %v452_v31 = vld [vmem:[%s9404_s25 + $0x398] sm:$0xff]  ;;  %v451_v32 = vld [vmem:[%s9404_s25 + $0x390] sm:$0xff] }
  0xea   : > { %v9596_v43 = vpop.permute.xlu1 %683  ;;  %v9598_v44 = vpop.permute.xlu0 %678 }
  0xeb   : > { %13178 = vst [vmem:[#allocation35_spill] sm:$0xff] %v9596_v43  ;;  %13179 = vst [vmem:[#allocation36_spill] sm:$0xff] %v9598_v44  ;;  %993 = vperm.xlu1 %9209, %v442_v39   ;;  %988 = vperm.xlu0 %9208, %v441_v40  }
  0xee   : > { %v9602_v51 = vpop.permute.xlu1 %693  ;;  %v9604_v52 = vpop.permute.xlu0 %688 }
  0xef   : > { %13180 = vst [vmem:[#allocation37_spill] sm:$0xff] %v9602_v51  ;;  %13181 = vst [vmem:[#allocation38_spill] sm:$0xff] %v9604_v52  ;;  %1003 = vperm.xlu1 %9209, %v444_v47   ;;  %998 = vperm.xlu0 %9208, %v443_v48   ;;  %v454_v47 = vld [vmem:[%s9404_s25 + $0x3a8] sm:$0xff]  ;;  %v453_v48 = vld [vmem:[%s9404_s25 + $0x3a0] sm:$0xff] }
  0xf2   : > { %v9608_v59 = vpop.permute.xlu1 %703  ;;  %v9610_v60 = vpop.permute.xlu0 %698 }
  0xf3   : > { %13182 = vst [vmem:[#allocation39_spill] sm:$0xff] %v9608_v59  ;;  %13183 = vst [vmem:[#allocation40_spill] sm:$0xff] %v9610_v60  ;;  %1013 = vperm.xlu1 %9209, %v446_v55   ;;  %1008 = vperm.xlu0 %9208, %v445_v56  }
  0xf6   : > { %v9614_v7 = vpop.permute.xlu1 %713  ;;  %v9616_v8 = vpop.permute.xlu0 %708 }
  0xf7   : > { %13184 = vst [vmem:[#allocation41_spill] sm:$0xff] %v9614_v7  ;;  %13185 = vst [vmem:[#allocation42_spill] sm:$0xff] %v9616_v8  ;;  %1023 = vperm.xlu1 %9209, %v448_v63   ;;  %1018 = vperm.xlu0 %9208, %v447_v0   ;;  %v456_v63 = vld [vmem:[%s9404_s25 + $0x3b8] sm:$0xff]  ;;  %v455_v0 = vld [vmem:[%s9404_s25 + $0x3b0] sm:$0xff] }
  0xfa   : > { %v9620_v23 = vpop.permute.xlu1 %723  ;;  %v9622_v24 = vpop.permute.xlu0 %718 }
  0xfb   : > { %13186 = vst [vmem:[#allocation43_spill] sm:$0xff] %v9620_v23  ;;  %13187 = vst [vmem:[#allocation44_spill] sm:$0xff] %v9622_v24  ;;  %1033 = vperm.xlu1 %9209, %v450_v15   ;;  %1028 = vperm.xlu0 %9208, %v449_v16  }
  0xfe   : > { %v9626_v39 = vpop.permute.xlu1 %733  ;;  %v9628_v40 = vpop.permute.xlu0 %728 }
  0xff   : > { %13188 = vst [vmem:[#allocation45_spill] sm:$0xff] %v9626_v39  ;;  %13189 = vst [vmem:[#allocation46_spill] sm:$0xff] %v9628_v40  ;;  %1043 = vperm.xlu1 %9209, %v452_v31   ;;  %1038 = vperm.xlu0 %9208, %v451_v32   ;;  %v458_v31 = vld [vmem:[%s9404_s25 + $0x3c8] sm:$0xff]  ;;  %v457_v32 = vld [vmem:[%s9404_s25 + $0x3c0] sm:$0xff] }
 0x102   : > { %v9632_v55 = vpop.permute.xlu1 %743  ;;  %v9634_v56 = vpop.permute.xlu0 %738 }
 0x103   : > { %13190 = vst [vmem:[#allocation47_spill] sm:$0xff] %v9632_v55  ;;  %13191 = vst [vmem:[#allocation48_spill] sm:$0xff] %v9634_v56  ;;  %1053 = vperm.xlu1 %9209, %v454_v47   ;;  %1048 = vperm.xlu0 %9208, %v453_v48   ;;  %v460_v47 = vld [vmem:[%s9404_s25 + $0x3d8] sm:$0xff]  ;;  %v459_v48 = vld [vmem:[%s9404_s25 + $0x3d0] sm:$0xff] }
 0x106   : > { %v9638_v15 = vpop.permute.xlu1 %753  ;;  %v9640_v16 = vpop.permute.xlu0 %748 }
 0x107   : > { %13192 = vst [vmem:[#allocation49_spill] sm:$0xff] %v9638_v15  ;;  %13193 = vst [vmem:[#allocation50_spill] sm:$0xff] %v9640_v16  ;;  %1063 = vperm.xlu1 %9209, %v456_v63   ;;  %1058 = vperm.xlu0 %9208, %v455_v0   ;;  %v462_v63 = vld [vmem:[%s9404_s25 + $0x3e8] sm:$0xff]  ;;  %v461_v0 = vld [vmem:[%s9404_s25 + $0x3e0] sm:$0xff] }
 0x10a   : > { %v9644_v23 = vpop.permute.xlu1 %763  ;;  %v9646_v55 = vpop.permute.xlu0 %758 }
 0x10b   : > { %13194 = vst [vmem:[#allocation51_spill] sm:$0xff] %v9644_v23  ;;  %13195 = vst [vmem:[#allocation52_spill] sm:$0xff] %v9646_v55  ;;  %1073 = vperm.xlu1 %9209, %v458_v31   ;;  %1068 = vperm.xlu0 %9208, %v457_v32   ;;  %v464_v31 = vld [vmem:[%s9404_s25 + $0x3f8] sm:$0xff]  ;;  %v463_v32 = vld [vmem:[%s9404_s25 + $0x3f0] sm:$0xff] }
 0x10e   : > { %v9650_v56 = vpop.permute.xlu1 %773  ;;  %v9652_v15 = vpop.permute.xlu0 %768 }
 0x10f   : > { %13196 = vst [vmem:[#allocation53_spill] sm:$0xff] %v9650_v56  ;;  %13197 = vst [vmem:[#allocation54_spill] sm:$0xff] %v9652_v15  ;;  %1083 = vperm.xlu1 %9209, %v460_v47   ;;  %1078 = vperm.xlu0 %9208, %v459_v48   ;;  %v1239_v47 = vld [vmem:[%s9404_s25 + $0x9] sm:$0xff]  ;;  %v1238_v48 = vld [vmem:[%s9404_s25 + $0x1] sm:$0xff] }
 0x112   : > { %v9656_v16 = vpop.permute.xlu1 %783  ;;  %v9658_v23 = vpop.permute.xlu0 %778 }
 0x113   : > { %13198 = vst [vmem:[#allocation55_spill] sm:$0xff] %v9656_v16  ;;  %13199 = vst [vmem:[#allocation56_spill] sm:$0xff] %v9658_v23  ;;  %1093 = vperm.xlu1 %9209, %v462_v63   ;;  %1088 = vperm.xlu0 %9208, %v461_v0   ;;  %v1241_v63 = vld [vmem:[%s9404_s25 + $0x19] sm:$0xff]  ;;  %v1240_v0 = vld [vmem:[%s9404_s25 + $0x11] sm:$0xff] }
 0x116   : > { %v9662_v55 = vpop.permute.xlu1 %793  ;;  %v9664_v56 = vpop.permute.xlu0 %788 }
 0x117   : > { %13200 = vst [vmem:[#allocation57_spill] sm:$0xff] %v9662_v55  ;;  %13201 = vst [vmem:[#allocation58_spill] sm:$0xff] %v9664_v56  ;;  %1103 = vperm.xlu1 %9209, %v464_v31   ;;  %1098 = vperm.xlu0 %9208, %v463_v32   ;;  %v1243_v31 = vld [vmem:[%s9404_s25 + $0x29] sm:$0xff]  ;;  %v1242_v32 = vld [vmem:[%s9404_s25 + $0x21] sm:$0xff] }
 0x11a   : > { %v9668_v15 = vpop.permute.xlu1 %803  ;;  %v9670_v16 = vpop.permute.xlu0 %798 }
 0x11b   : > { %13202 = vst [vmem:[#allocation59_spill] sm:$0xff] %v9668_v15  ;;  %13203 = vst [vmem:[#allocation60_spill] sm:$0xff] %v9670_v16  ;;  %1374 = vperm.xlu1 %9209, %v1239_v47   ;;  %1369 = vperm.xlu0 %9208, %v1238_v48   ;;  %v1245_v47 = vld [vmem:[%s9404_s25 + $0x39] sm:$0xff]  ;;  %v1244_v48 = vld [vmem:[%s9404_s25 + $0x31] sm:$0xff] }
 0x11e   : > { %v9674_v23 = vpop.permute.xlu1 %813  ;;  %v9676_v55 = vpop.permute.xlu0 %808 }
 0x11f   : > { %13204 = vst [vmem:[#allocation61_spill] sm:$0xff] %v9674_v23  ;;  %13205 = vst [vmem:[#allocation62_spill] sm:$0xff] %v9676_v55  ;;  %1384 = vperm.xlu1 %9209, %v1241_v63   ;;  %1379 = vperm.xlu0 %9208, %v1240_v0   ;;  %v1247_v63 = vld [vmem:[%s9404_s25 + $0x49] sm:$0xff]  ;;  %v1246_v0 = vld [vmem:[%s9404_s25 + $0x41] sm:$0xff] }
 0x122   : > { %v9680_v56 = vpop.permute.xlu1 %823  ;;  %v9682_v15 = vpop.permute.xlu0 %818 }
 0x123   : > { %13206 = vst [vmem:[#allocation63_spill] sm:$0xff] %v9680_v56  ;;  %13207 = vst [vmem:[#allocation64_spill] sm:$0xff] %v9682_v15  ;;  %1394 = vperm.xlu1 %9209, %v1243_v31   ;;  %1389 = vperm.xlu0 %9208, %v1242_v32   ;;  %v1249_v31 = vld [vmem:[%s9404_s25 + $0x59] sm:$0xff]  ;;  %v1248_v32 = vld [vmem:[%s9404_s25 + $0x51] sm:$0xff] }
 0x126   : > { %v9686_v16 = vpop.permute.xlu1 %833  ;;  %v9688_v23 = vpop.permute.xlu0 %828 }
 0x127   : > { %13208 = vst [vmem:[#allocation65_spill] sm:$0xff] %v9686_v16  ;;  %13209 = vst [vmem:[#allocation66_spill] sm:$0xff] %v9688_v23  ;;  %1404 = vperm.xlu1 %9209, %v1245_v47   ;;  %1399 = vperm.xlu0 %9208, %v1244_v48   ;;  %v1251_v47 = vld [vmem:[%s9404_s25 + $0x69] sm:$0xff]  ;;  %v1250_v48 = vld [vmem:[%s9404_s25 + $0x61] sm:$0xff] }
 0x12a   : > { %v9692_v55 = vpop.permute.xlu1 %843  ;;  %v9694_v56 = vpop.permute.xlu0 %838 }
 0x12b   : > { %13210 = vst [vmem:[#allocation67_spill] sm:$0xff] %v9692_v55  ;;  %13211 = vst [vmem:[#allocation68_spill] sm:$0xff] %v9694_v56  ;;  %1414 = vperm.xlu1 %9209, %v1247_v63   ;;  %1409 = vperm.xlu0 %9208, %v1246_v0   ;;  %v1253_v63 = vld [vmem:[%s9404_s25 + $0x79] sm:$0xff]  ;;  %v1252_v0 = vld [vmem:[%s9404_s25 + $0x71] sm:$0xff] }
 0x12e   : > { %v9698_v15 = vpop.permute.xlu1 %853  ;;  %v9700_v16 = vpop.permute.xlu0 %848 }
 0x12f   : > { %13212 = vst [vmem:[#allocation69_spill] sm:$0xff] %v9698_v15  ;;  %13213 = vst [vmem:[#allocation70_spill] sm:$0xff] %v9700_v16  ;;  %1424 = vperm.xlu1 %9209, %v1249_v31   ;;  %1419 = vperm.xlu0 %9208, %v1248_v32   ;;  %v1255_v31 = vld [vmem:[%s9404_s25 + $0x89] sm:$0xff]  ;;  %v1254_v32 = vld [vmem:[%s9404_s25 + $0x81] sm:$0xff] }
 0x132   : > { %v9704_v23 = vpop.permute.xlu1 %863  ;;  %v9706_v55 = vpop.permute.xlu0 %858 }
 0x133   : > { %13214 = vst [vmem:[#allocation71_spill] sm:$0xff] %v9704_v23  ;;  %13215 = vst [vmem:[#allocation72_spill] sm:$0xff] %v9706_v55  ;;  %1434 = vperm.xlu1 %9209, %v1251_v47   ;;  %1429 = vperm.xlu0 %9208, %v1250_v48   ;;  %v1257_v47 = vld [vmem:[%s9404_s25 + $0x99] sm:$0xff]  ;;  %v1256_v48 = vld [vmem:[%s9404_s25 + $0x91] sm:$0xff] }
 0x136   : > { %v9710_v56 = vpop.permute.xlu1 %873  ;;  %v9712_v15 = vpop.permute.xlu0 %868 }
 0x137   : > { %13216 = vst [vmem:[#allocation73_spill] sm:$0xff] %v9710_v56  ;;  %13217 = vst [vmem:[#allocation74_spill] sm:$0xff] %v9712_v15  ;;  %1444 = vperm.xlu1 %9209, %v1253_v63   ;;  %1439 = vperm.xlu0 %9208, %v1252_v0   ;;  %v1259_v63 = vld [vmem:[%s9404_s25 + $0xa9] sm:$0xff]  ;;  %v1258_v0 = vld [vmem:[%s9404_s25 + $0xa1] sm:$0xff] }
 0x13a   : > { %v9716_v16 = vpop.permute.xlu1 %883  ;;  %v9718_v23 = vpop.permute.xlu0 %878 }
 0x13b   : > { %13218 = vst [vmem:[#allocation75_spill] sm:$0xff] %v9716_v16  ;;  %13219 = vst [vmem:[#allocation76_spill] sm:$0xff] %v9718_v23  ;;  %1454 = vperm.xlu1 %9209, %v1255_v31   ;;  %1449 = vperm.xlu0 %9208, %v1254_v32   ;;  %v1261_v31 = vld [vmem:[%s9404_s25 + $0xb9] sm:$0xff]  ;;  %v1260_v32 = vld [vmem:[%s9404_s25 + $0xb1] sm:$0xff] }
 0x13e   : > { %v9722_v55 = vpop.permute.xlu1 %893  ;;  %v9724_v56 = vpop.permute.xlu0 %888 }
 0x13f   : > { %13220 = vst [vmem:[#allocation77_spill] sm:$0xff] %v9722_v55  ;;  %13221 = vst [vmem:[#allocation78_spill] sm:$0xff] %v9724_v56  ;;  %1464 = vperm.xlu1 %9209, %v1257_v47   ;;  %1459 = vperm.xlu0 %9208, %v1256_v48   ;;  %v1263_v47 = vld [vmem:[%s9404_s25 + $0xc9] sm:$0xff]  ;;  %v1262_v48 = vld [vmem:[%s9404_s25 + $0xc1] sm:$0xff] }
 0x142   : > { %v9728_v15 = vpop.permute.xlu1 %903  ;;  %v9730_v16 = vpop.permute.xlu0 %898 }
 0x143   : > { %13222 = vst [vmem:[#allocation79_spill] sm:$0xff] %v9728_v15  ;;  %13223 = vst [vmem:[#allocation80_spill] sm:$0xff] %v9730_v16  ;;  %1474 = vperm.xlu1 %9209, %v1259_v63   ;;  %1469 = vperm.xlu0 %9208, %v1258_v0   ;;  %v1265_v63 = vld [vmem:[%s9404_s25 + $0xd9] sm:$0xff]  ;;  %v1264_v0 = vld [vmem:[%s9404_s25 + $0xd1] sm:$0xff] }
 0x146   : > { %v9734_v23 = vpop.permute.xlu1 %913  ;;  %v9736_v55 = vpop.permute.xlu0 %908 }
 0x147   : > { %13224 = vst [vmem:[#allocation81_spill] sm:$0xff] %v9734_v23  ;;  %13225 = vst [vmem:[#allocation82_spill] sm:$0xff] %v9736_v55  ;;  %1484 = vperm.xlu1 %9209, %v1261_v31   ;;  %1479 = vperm.xlu0 %9208, %v1260_v32   ;;  %v1267_v31 = vld [vmem:[%s9404_s25 + $0xe9] sm:$0xff]  ;;  %v1266_v32 = vld [vmem:[%s9404_s25 + $0xe1] sm:$0xff] }
 0x14a   : > { %v9740_v56 = vpop.permute.xlu1 %923  ;;  %v9742_v15 = vpop.permute.xlu0 %918 }
 0x14b   : > { %13226 = vst [vmem:[#allocation83_spill] sm:$0xff] %v9740_v56  ;;  %13227 = vst [vmem:[#allocation84_spill] sm:$0xff] %v9742_v15  ;;  %1494 = vperm.xlu1 %9209, %v1263_v47   ;;  %1489 = vperm.xlu0 %9208, %v1262_v48   ;;  %v1269_v47 = vld [vmem:[%s9404_s25 + $0xf9] sm:$0xff]  ;;  %v1268_v48 = vld [vmem:[%s9404_s25 + $0xf1] sm:$0xff] }
 0x14e   : > { %v9746_v16 = vpop.permute.xlu1 %933  ;;  %v9748_v23 = vpop.permute.xlu0 %928 }
 0x14f   : > { %13228 = vst [vmem:[#allocation85_spill] sm:$0xff] %v9746_v16  ;;  %13229 = vst [vmem:[#allocation86_spill] sm:$0xff] %v9748_v23  ;;  %1504 = vperm.xlu1 %9209, %v1265_v63   ;;  %1499 = vperm.xlu0 %9208, %v1264_v0   ;;  %v1271_v63 = vld [vmem:[%s9404_s25 + $0x109] sm:$0xff]  ;;  %v1270_v0 = vld [vmem:[%s9404_s25 + $0x101] sm:$0xff] }
 0x152   : > { %v9752_v55 = vpop.permute.xlu1 %943  ;;  %v9754_v56 = vpop.permute.xlu0 %938 }
 0x153   : > { %13230 = vst [vmem:[#allocation87_spill] sm:$0xff] %v9752_v55  ;;  %13231 = vst [vmem:[#allocation88_spill] sm:$0xff] %v9754_v56  ;;  %1514 = vperm.xlu1 %9209, %v1267_v31   ;;  %1509 = vperm.xlu0 %9208, %v1266_v32   ;;  %v1273_v31 = vld [vmem:[%s9404_s25 + $0x119] sm:$0xff]  ;;  %v1272_v32 = vld [vmem:[%s9404_s25 + $0x111] sm:$0xff] }
 0x156   : > { %v9758_v15 = vpop.permute.xlu1 %953  ;;  %v9760_v16 = vpop.permute.xlu0 %948 }
 0x157   : > { %13232 = vst [vmem:[#allocation89_spill] sm:$0xff] %v9758_v15  ;;  %13233 = vst [vmem:[#allocation90_spill] sm:$0xff] %v9760_v16  ;;  %1524 = vperm.xlu1 %9209, %v1269_v47   ;;  %1519 = vperm.xlu0 %9208, %v1268_v48   ;;  %v1275_v47 = vld [vmem:[%s9404_s25 + $0x129] sm:$0xff]  ;;  %v1274_v48 = vld [vmem:[%s9404_s25 + $0x121] sm:$0xff] }
 0x15a   : > { %v9764_v23 = vpop.permute.xlu1 %963  ;;  %v9766_v55 = vpop.permute.xlu0 %958 }
 0x15b   : > { %13234 = vst [vmem:[#allocation91_spill] sm:$0xff] %v9764_v23  ;;  %13235 = vst [vmem:[#allocation92_spill] sm:$0xff] %v9766_v55  ;;  %1534 = vperm.xlu1 %9209, %v1271_v63   ;;  %1529 = vperm.xlu0 %9208, %v1270_v0   ;;  %v1277_v63 = vld [vmem:[%s9404_s25 + $0x139] sm:$0xff]  ;;  %v1276_v0 = vld [vmem:[%s9404_s25 + $0x131] sm:$0xff] }
 0x15e   : > { %v9770_v56 = vpop.permute.xlu1 %973  ;;  %v9772_v15 = vpop.permute.xlu0 %968 }
 0x15f   : > { %13236 = vst [vmem:[#allocation93_spill] sm:$0xff] %v9770_v56  ;;  %13237 = vst [vmem:[#allocation94_spill] sm:$0xff] %v9772_v15  ;;  %1544 = vperm.xlu1 %9209, %v1273_v31   ;;  %1539 = vperm.xlu0 %9208, %v1272_v32   ;;  %v1279_v31 = vld [vmem:[%s9404_s25 + $0x149] sm:$0xff]  ;;  %v1278_v32 = vld [vmem:[%s9404_s25 + $0x141] sm:$0xff] }
 0x162   : > { %v9776_v16 = vpop.permute.xlu1 %983  ;;  %v9778_v23 = vpop.permute.xlu0 %978 }
 0x163   : > { %13238 = vst [vmem:[#allocation95_spill] sm:$0xff] %v9776_v16  ;;  %13239 = vst [vmem:[#allocation96_spill] sm:$0xff] %v9778_v23  ;;  %1554 = vperm.xlu1 %9209, %v1275_v47   ;;  %1549 = vperm.xlu0 %9208, %v1274_v48   ;;  %v1281_v47 = vld [vmem:[%s9404_s25 + $0x159] sm:$0xff]  ;;  %v1280_v48 = vld [vmem:[%s9404_s25 + $0x151] sm:$0xff] }
 0x166   : > { %v9782_v55 = vpop.permute.xlu1 %993  ;;  %v9784_v56 = vpop.permute.xlu0 %988 }
 0x167   : > { %13240 = vst [vmem:[#allocation97_spill] sm:$0xff] %v9782_v55  ;;  %13241 = vst [vmem:[#allocation98_spill] sm:$0xff] %v9784_v56  ;;  %1564 = vperm.xlu1 %9209, %v1277_v63   ;;  %1559 = vperm.xlu0 %9208, %v1276_v0   ;;  %v1283_v63 = vld [vmem:[%s9404_s25 + $0x169] sm:$0xff]  ;;  %v1282_v0 = vld [vmem:[%s9404_s25 + $0x161] sm:$0xff] }
 0x16a   : > { %v9788_v15 = vpop.permute.xlu1 %1003  ;;  %v9790_v16 = vpop.permute.xlu0 %998 }
 0x16b   : > { %13242 = vst [vmem:[#allocation99_spill] sm:$0xff] %v9788_v15  ;;  %13243 = vst [vmem:[#allocation100_spill] sm:$0xff] %v9790_v16  ;;  %1574 = vperm.xlu1 %9209, %v1279_v31   ;;  %1569 = vperm.xlu0 %9208, %v1278_v32   ;;  %v1285_v31 = vld [vmem:[%s9404_s25 + $0x179] sm:$0xff]  ;;  %v1284_v32 = vld [vmem:[%s9404_s25 + $0x171] sm:$0xff] }
 0x16e   : > { %v9794_v23 = vpop.permute.xlu1 %1013  ;;  %v9796_v55 = vpop.permute.xlu0 %1008 }
 0x16f   : > { %13244 = vst [vmem:[#allocation101_spill] sm:$0xff] %v9794_v23  ;;  %13245 = vst [vmem:[#allocation102_spill] sm:$0xff] %v9796_v55  ;;  %1584 = vperm.xlu1 %9209, %v1281_v47   ;;  %1579 = vperm.xlu0 %9208, %v1280_v48   ;;  %v1287_v47 = vld [vmem:[%s9404_s25 + $0x189] sm:$0xff]  ;;  %v1286_v48 = vld [vmem:[%s9404_s25 + $0x181] sm:$0xff] }
 0x172   : > { %v9800_v56 = vpop.permute.xlu1 %1023  ;;  %v9802_v15 = vpop.permute.xlu0 %1018 }
 0x173   : > { %13246 = vst [vmem:[#allocation103_spill] sm:$0xff] %v9800_v56  ;;  %13247 = vst [vmem:[#allocation104_spill] sm:$0xff] %v9802_v15  ;;  %1594 = vperm.xlu1 %9209, %v1283_v63   ;;  %1589 = vperm.xlu0 %9208, %v1282_v0   ;;  %v1289_v63 = vld [vmem:[%s9404_s25 + $0x199] sm:$0xff]  ;;  %v1288_v0 = vld [vmem:[%s9404_s25 + $0x191] sm:$0xff] }
 0x176   : > { %v9806_v16 = vpop.permute.xlu1 %1033  ;;  %v9808_v23 = vpop.permute.xlu0 %1028 }
 0x177   : > { %13248 = vst [vmem:[#allocation105_spill] sm:$0xff] %v9806_v16  ;;  %13249 = vst [vmem:[#allocation106_spill] sm:$0xff] %v9808_v23  ;;  %1604 = vperm.xlu1 %9209, %v1285_v31   ;;  %1599 = vperm.xlu0 %9208, %v1284_v32   ;;  %v1291_v31 = vld [vmem:[%s9404_s25 + $0x1a9] sm:$0xff]  ;;  %v1290_v32 = vld [vmem:[%s9404_s25 + $0x1a1] sm:$0xff] }
 0x17a   : > { %v9812_v55 = vpop.permute.xlu1 %1043  ;;  %v9814_v56 = vpop.permute.xlu0 %1038 }
 0x17b   : > { %13250 = vst [vmem:[#allocation107_spill] sm:$0xff] %v9812_v55  ;;  %13251 = vst [vmem:[#allocation108_spill] sm:$0xff] %v9814_v56  ;;  %1614 = vperm.xlu1 %9209, %v1287_v47   ;;  %1609 = vperm.xlu0 %9208, %v1286_v48   ;;  %v1293_v47 = vld [vmem:[%s9404_s25 + $0x1b9] sm:$0xff]  ;;  %v1292_v48 = vld [vmem:[%s9404_s25 + $0x1b1] sm:$0xff] }
 0x17e   : > { %v9818_v15 = vpop.permute.xlu1 %1053  ;;  %v9820_v16 = vpop.permute.xlu0 %1048 }
 0x17f   : > { %13252 = vst [vmem:[#allocation109_spill] sm:$0xff] %v9818_v15  ;;  %13253 = vst [vmem:[#allocation110_spill] sm:$0xff] %v9820_v16  ;;  %1624 = vperm.xlu1 %9209, %v1289_v63   ;;  %1619 = vperm.xlu0 %9208, %v1288_v0   ;;  %v1295_v63 = vld [vmem:[%s9404_s25 + $0x1c9] sm:$0xff]  ;;  %v1294_v0 = vld [vmem:[%s9404_s25 + $0x1c1] sm:$0xff] }
 0x182   : > { %v9824_v23 = vpop.permute.xlu1 %1063  ;;  %v9826_v55 = vpop.permute.xlu0 %1058 }
 0x183   : > { %13254 = vst [vmem:[#allocation111_spill] sm:$0xff] %v9824_v23  ;;  %13255 = vst [vmem:[#allocation112_spill] sm:$0xff] %v9826_v55  ;;  %1634 = vperm.xlu1 %9209, %v1291_v31   ;;  %1629 = vperm.xlu0 %9208, %v1290_v32   ;;  %v1297_v31 = vld [vmem:[%s9404_s25 + $0x1d9] sm:$0xff]  ;;  %v1296_v32 = vld [vmem:[%s9404_s25 + $0x1d1] sm:$0xff] }
 0x186   : > { %v9830_v56 = vpop.permute.xlu1 %1073  ;;  %v9832_v15 = vpop.permute.xlu0 %1068 }
 0x187   : > { %13256 = vst [vmem:[#allocation113_spill] sm:$0xff] %v9830_v56  ;;  %13257 = vst [vmem:[#allocation114_spill] sm:$0xff] %v9832_v15  ;;  %1644 = vperm.xlu1 %9209, %v1293_v47   ;;  %1639 = vperm.xlu0 %9208, %v1292_v48   ;;  %v1299_v47 = vld [vmem:[%s9404_s25 + $0x1e9] sm:$0xff]  ;;  %v1298_v48 = vld [vmem:[%s9404_s25 + $0x1e1] sm:$0xff] }
 0x18a   : > { %v9836_v16 = vpop.permute.xlu1 %1083  ;;  %v9838_v23 = vpop.permute.xlu0 %1078 }
 0x18b   : > { %13258 = vst [vmem:[#allocation115_spill] sm:$0xff] %v9836_v16  ;;  %13259 = vst [vmem:[#allocation116_spill] sm:$0xff] %v9838_v23  ;;  %1654 = vperm.xlu1 %9209, %v1295_v63   ;;  %1649 = vperm.xlu0 %9208, %v1294_v0   ;;  %v1301_v63 = vld [vmem:[%s9404_s25 + $0x1f9] sm:$0xff]  ;;  %v1300_v0 = vld [vmem:[%s9404_s25 + $0x1f1] sm:$0xff] }
 0x18e   : > { %v9842_v55 = vpop.permute.xlu1 %1093  ;;  %v9844_v56 = vpop.permute.xlu0 %1088 }
 0x18f   : > { %13260 = vst [vmem:[#allocation117_spill] sm:$0xff] %v9842_v55  ;;  %13261 = vst [vmem:[#allocation118_spill] sm:$0xff] %v9844_v56  ;;  %1664 = vperm.xlu1 %9209, %v1297_v31   ;;  %1659 = vperm.xlu0 %9208, %v1296_v32   ;;  %v1303_v31 = vld [vmem:[%s9404_s25 + $0x209] sm:$0xff]  ;;  %v1302_v32 = vld [vmem:[%s9404_s25 + $0x201] sm:$0xff] }
 0x192   : > { %v9848_v15 = vpop.permute.xlu1 %1103  ;;  %v9850_v16 = vpop.permute.xlu0 %1098 }
 0x193   : > { %13262 = vst [vmem:[#allocation119_spill] sm:$0xff] %v9848_v15  ;;  %13263 = vst [vmem:[#allocation120_spill] sm:$0xff] %v9850_v16  ;;  %1674 = vperm.xlu1 %9209, %v1299_v47   ;;  %1669 = vperm.xlu0 %9208, %v1298_v48   ;;  %v1305_v47 = vld [vmem:[%s9404_s25 + $0x219] sm:$0xff]  ;;  %v1304_v48 = vld [vmem:[%s9404_s25 + $0x211] sm:$0xff] }
 0x196   : > { %v9854_v23 = vpop.permute.xlu1 %1374  ;;  %v9856_v55 = vpop.permute.xlu0 %1369 }
 0x197   : > { %1684 = vperm.xlu1 %9209, %v1301_v63   ;;  %1679 = vperm.xlu0 %9208, %v1300_v0   ;;  %v1307_v63 = vld [vmem:[%s9404_s25 + $0x229] sm:$0xff]  ;;  %v1306_v0 = vld [vmem:[%s9404_s25 + $0x221] sm:$0xff] }
 0x19a   : > { %v9860_v56 = vpop.permute.xlu1 %1384  ;;  %v9862_v15 = vpop.permute.xlu0 %1379 }
 0x19b   : > { %1694 = vperm.xlu1 %9209, %v1303_v31   ;;  %1689 = vperm.xlu0 %9208, %v1302_v32   ;;  %v1309_v31 = vld [vmem:[%s9404_s25 + $0x239] sm:$0xff]  ;;  %v1308_v32 = vld [vmem:[%s9404_s25 + $0x231] sm:$0xff] }
 0x19e   : > { %v9866_v16 = vpop.permute.xlu1 %1394  ;;  %v9868_v39 = vpop.permute.xlu0 %1389 }
 0x19f   : > { %1704 = vperm.xlu1 %9209, %v1305_v47   ;;  %1699 = vperm.xlu0 %9208, %v1304_v48   ;;  %v1311_v47 = vld [vmem:[%s9404_s25 + $0x249] sm:$0xff]  ;;  %v1310_v48 = vld [vmem:[%s9404_s25 + $0x241] sm:$0xff] }
 0x1a2   : > { %v9872_v24 = vpop.permute.xlu1 %1404  ;;  %v9874_v40 = vpop.permute.xlu0 %1399 }
 0x1a3   : > { %1714 = vperm.xlu1 %9209, %v1307_v63   ;;  %1709 = vperm.xlu0 %9208, %v1306_v0   ;;  %v1313_v63 = vld [vmem:[%s9404_s25 + $0x259] sm:$0xff]  ;;  %v1312_v0 = vld [vmem:[%s9404_s25 + $0x251] sm:$0xff] }
 0x1a6   : > { %v9878_v7 = vpop.permute.xlu1 %1414  ;;  %v9880_v8 = vpop.permute.xlu0 %1409 }
 0x1a7   : > { %1724 = vperm.xlu1 %9209, %v1309_v31   ;;  %1719 = vperm.xlu0 %9208, %v1308_v32   ;;  %v1315_v31 = vld [vmem:[%s9404_s25 + $0x269] sm:$0xff]  ;;  %v1314_v32 = vld [vmem:[%s9404_s25 + $0x261] sm:$0xff] }
 0x1aa   : > { %v9884_v59 = vpop.permute.xlu1 %1424  ;;  %v9886_v43 = vpop.permute.xlu0 %1419 }
 0x1ab   : > { %1734 = vperm.xlu1 %9209, %v1311_v47   ;;  %1729 = vperm.xlu0 %9208, %v1310_v48   ;;  %v1317_v47 = vld [vmem:[%s9404_s25 + $0x279] sm:$0xff]  ;;  %v1316_v48 = vld [vmem:[%s9404_s25 + $0x271] sm:$0xff] }
 0x1ae   : > { %v9890_v60 = vpop.permute.xlu1 %1434  ;;  %v9892_v51 = vpop.permute.xlu0 %1429 }
 0x1af   : > { %1744 = vperm.xlu1 %9209, %v1313_v63   ;;  %1739 = vperm.xlu0 %9208, %v1312_v0   ;;  %v1319_v63 = vld [vmem:[%s9404_s25 + $0x289] sm:$0xff]  ;;  %v1318_v0 = vld [vmem:[%s9404_s25 + $0x281] sm:$0xff] }
 0x1b2   : > { %v9896_v52 = vpop.permute.xlu1 %1444  ;;  %v9898_v44 = vpop.permute.xlu0 %1439 }
 0x1b3   : > { %1754 = vperm.xlu1 %9209, %v1315_v31   ;;  %1749 = vperm.xlu0 %9208, %v1314_v32   ;;  %v1321_v31 = vld [vmem:[%s9404_s25 + $0x299] sm:$0xff]  ;;  %v1320_v32 = vld [vmem:[%s9404_s25 + $0x291] sm:$0xff] }
 0x1b6   : > { %v9902_v35 = vpop.permute.xlu1 %1454  ;;  %v9904_v36 = vpop.permute.xlu0 %1449 }
 0x1b7   : > { %1764 = vperm.xlu1 %9209, %v1317_v47   ;;  %1759 = vperm.xlu0 %9208, %v1316_v48   ;;  %v1323_v47 = vld [vmem:[%s9404_s25 + $0x2a9] sm:$0xff]  ;;  %v1322_v48 = vld [vmem:[%s9404_s25 + $0x2a1] sm:$0xff] }
 0x1ba   : > { %v9908_v11 = vpop.permute.xlu1 %1464  ;;  %v9910_v27 = vpop.permute.xlu0 %1459 }
 0x1bb   : > { %13264 = vst [vmem:[#allocation121_spill] sm:$0xff] %v9908_v11  ;;  %1774 = vperm.xlu1 %9209, %v1319_v63   ;;  %1769 = vperm.xlu0 %9208, %v1318_v0   ;;  %v1325_v63 = vld [vmem:[%s9404_s25 + $0x2b9] sm:$0xff]  ;;  %v1324_v0 = vld [vmem:[%s9404_s25 + $0x2b1] sm:$0xff] }
 0x1be   : > { %v9914_v28 = vpop.permute.xlu1 %1474  ;;  %v9916_v19 = vpop.permute.xlu0 %1469 }
 0x1bf   : > { %13265 = vst [vmem:[#allocation122_spill] sm:$0xff] %v9914_v28  ;;  %1784 = vperm.xlu1 %9209, %v1321_v31   ;;  %1779 = vperm.xlu0 %9208, %v1320_v32   ;;  %v1327_v31 = vld [vmem:[%s9404_s25 + $0x2c9] sm:$0xff]  ;;  %v1326_v32 = vld [vmem:[%s9404_s25 + $0x2c1] sm:$0xff] }
 0x1c2   : > { %v9920_v20 = vpop.permute.xlu1 %1484  ;;  %v9922_v12 = vpop.permute.xlu0 %1479 }
 0x1c3   : > { %13266 = vst [vmem:[#allocation123_spill] sm:$0xff] %v9920_v20  ;;  %13267 = vst [vmem:[#allocation124_spill] sm:$0xff] %v9922_v12  ;;  %1794 = vperm.xlu1 %9209, %v1323_v47   ;;  %1789 = vperm.xlu0 %9208, %v1322_v48   ;;  %v1329_v47 = vld [vmem:[%s9404_s25 + $0x2d9] sm:$0xff]  ;;  %v1328_v48 = vld [vmem:[%s9404_s25 + $0x2d1] sm:$0xff] }
 0x1c6   : > { %v9926_v3 = vpop.permute.xlu1 %1494  ;;  %v9928_v4 = vpop.permute.xlu0 %1489 }
 0x1c7   : > { %13268 = vst [vmem:[#allocation125_spill] sm:$0xff] %v9926_v3  ;;  %13269 = vst [vmem:[#allocation126_spill] sm:$0xff] %v9928_v4  ;;  %1804 = vperm.xlu1 %9209, %v1325_v63   ;;  %1799 = vperm.xlu0 %9208, %v1324_v0   ;;  %v1331_v63 = vld [vmem:[%s9404_s25 + $0x2e9] sm:$0xff]  ;;  %v1330_v0 = vld [vmem:[%s9404_s25 + $0x2e1] sm:$0xff] }
 0x1c8   : > { %v2301_v3 = vld [vmem:[%s9404_s25 + $0x130] sm:$0xff] }
 0x1ca   : > { %v9932_v61 = vpop.permute.xlu1 %1504  ;;  %v9934_v53 = vpop.permute.xlu0 %1499 }
 0x1cb   : > { %13270 = vst [vmem:[#allocation127_spill] sm:$0xff] %v9932_v61  ;;  %13271 = vst [vmem:[#allocation128_spill] sm:$0xff] %v9934_v53  ;;  %1814 = vperm.xlu1 %9209, %v1327_v31   ;;  %1809 = vperm.xlu0 %9208, %v1326_v32   ;;  %v1333_v31 = vld [vmem:[%s9404_s25 + $0x2f9] sm:$0xff]  ;;  %v1332_v32 = vld [vmem:[%s9404_s25 + $0x2f1] sm:$0xff] }
 0x1ce   : > { %v9938_v62 = vpop.permute.xlu1 %1514  ;;  %v9940_v57 = vpop.permute.xlu0 %1509 }
 0x1cf   : > { %13272 = vst [vmem:[#allocation129_spill] sm:$0xff] %v9938_v62  ;;  %13273 = vst [vmem:[#allocation130_spill] sm:$0xff] %v9940_v57  ;;  %1824 = vperm.xlu1 %9209, %v1329_v47   ;;  %1819 = vperm.xlu0 %9208, %v1328_v48   ;;  %v1335_v47 = vld [vmem:[%s9404_s25 + $0x309] sm:$0xff]  ;;  %v1334_v48 = vld [vmem:[%s9404_s25 + $0x301] sm:$0xff] }
 0x1d2   : > { %v9944_v58 = vpop.permute.xlu1 %1524  ;;  %v9946_v61 = vpop.permute.xlu0 %1519 }
 0x1d3   : > { %13274 = vst [vmem:[#allocation131_spill] sm:$0xff] %v9944_v58  ;;  %13275 = vst [vmem:[#allocation132_spill] sm:$0xff] %v9946_v61  ;;  %1834 = vperm.xlu1 %9209, %v1331_v63   ;;  %1829 = vperm.xlu0 %9208, %v1330_v0   ;;  %v1337_v63 = vld [vmem:[%s9404_s25 + $0x319] sm:$0xff]  ;;  %v1336_v0 = vld [vmem:[%s9404_s25 + $0x311] sm:$0xff] }
 0x1d6   : > { %v9950_v54 = vpop.permute.xlu1 %1534  ;;  %v9952_v62 = vpop.permute.xlu0 %1529 }
 0x1d7   : > { %13276 = vst [vmem:[#allocation133_spill] sm:$0xff] %v9950_v54  ;;  %13277 = vst [vmem:[#allocation134_spill] sm:$0xff] %v9952_v62  ;;  %1844 = vperm.xlu1 %9209, %v1333_v31   ;;  %1839 = vperm.xlu0 %9208, %v1332_v32   ;;  %v1339_v31 = vld [vmem:[%s9404_s25 + $0x329] sm:$0xff]  ;;  %v1338_v32 = vld [vmem:[%s9404_s25 + $0x321] sm:$0xff] }
 0x1da   : > { %v9956_v57 = vpop.permute.xlu1 %1544  ;;  %v9958_v58 = vpop.permute.xlu0 %1539 }
 0x1db   : > { %13278 = vst [vmem:[#allocation135_spill] sm:$0xff] %v9956_v57  ;;  %13279 = vst [vmem:[#allocation136_spill] sm:$0xff] %v9958_v58  ;;  %1854 = vperm.xlu1 %9209, %v1335_v47   ;;  %1849 = vperm.xlu0 %9208, %v1334_v48   ;;  %v1341_v47 = vld [vmem:[%s9404_s25 + $0x339] sm:$0xff]  ;;  %v1340_v48 = vld [vmem:[%s9404_s25 + $0x331] sm:$0xff] }
 0x1de   : > { %v9962_v61 = vpop.permute.xlu1 %1554  ;;  %v9964_v54 = vpop.permute.xlu0 %1549 }
 0x1df   : > { %13280 = vst [vmem:[#allocation137_spill] sm:$0xff] %v9962_v61  ;;  %13281 = vst [vmem:[#allocation138_spill] sm:$0xff] %v9964_v54  ;;  %1864 = vperm.xlu1 %9209, %v1337_v63   ;;  %1859 = vperm.xlu0 %9208, %v1336_v0   ;;  %v1343_v63 = vld [vmem:[%s9404_s25 + $0x349] sm:$0xff]  ;;  %v1342_v0 = vld [vmem:[%s9404_s25 + $0x341] sm:$0xff] }
 0x1e2   : > { %v9968_v62 = vpop.permute.xlu1 %1564  ;;  %v9970_v57 = vpop.permute.xlu0 %1559 }
 0x1e3   : > { %13282 = vst [vmem:[#allocation139_spill] sm:$0xff] %v9968_v62  ;;  %13283 = vst [vmem:[#allocation140_spill] sm:$0xff] %v9970_v57  ;;  %1874 = vperm.xlu1 %9209, %v1339_v31   ;;  %1869 = vperm.xlu0 %9208, %v1338_v32   ;;  %v1345_v31 = vld [vmem:[%s9404_s25 + $0x359] sm:$0xff]  ;;  %v1344_v32 = vld [vmem:[%s9404_s25 + $0x351] sm:$0xff] }
 0x1e6   : > { %v9974_v58 = vpop.permute.xlu1 %1574  ;;  %v9976_v61 = vpop.permute.xlu0 %1569 }
 0x1e7   : > { %13284 = vst [vmem:[#allocation141_spill] sm:$0xff] %v9974_v58  ;;  %13285 = vst [vmem:[#allocation142_spill] sm:$0xff] %v9976_v61  ;;  %1884 = vperm.xlu1 %9209, %v1341_v47   ;;  %1879 = vperm.xlu0 %9208, %v1340_v48   ;;  %v1347_v47 = vld [vmem:[%s9404_s25 + $0x369] sm:$0xff]  ;;  %v1346_v48 = vld [vmem:[%s9404_s25 + $0x361] sm:$0xff] }
 0x1ea   : > { %v9980_v54 = vpop.permute.xlu1 %1584  ;;  %v9982_v62 = vpop.permute.xlu0 %1579 }
 0x1eb   : > { %13286 = vst [vmem:[#allocation143_spill] sm:$0xff] %v9980_v54  ;;  %13287 = vst [vmem:[#allocation144_spill] sm:$0xff] %v9982_v62  ;;  %1894 = vperm.xlu1 %9209, %v1343_v63   ;;  %1889 = vperm.xlu0 %9208, %v1342_v0   ;;  %v1349_v63 = vld [vmem:[%s9404_s25 + $0x379] sm:$0xff]  ;;  %v1348_v0 = vld [vmem:[%s9404_s25 + $0x371] sm:$0xff] }
 0x1ee   : > { %v9986_v57 = vpop.permute.xlu1 %1594  ;;  %v9988_v58 = vpop.permute.xlu0 %1589 }
 0x1ef   : > { %13288 = vst [vmem:[#allocation145_spill] sm:$0xff] %v9986_v57  ;;  %13289 = vst [vmem:[#allocation146_spill] sm:$0xff] %v9988_v58  ;;  %1904 = vperm.xlu1 %9209, %v1345_v31   ;;  %1899 = vperm.xlu0 %9208, %v1344_v32   ;;  %v2267_v31 = vld [vmem:[%s9404_s25 + $0x20] sm:$0xff] }
 0x1f0   : > { %v1350_v32 = vld [vmem:[%s9404_s25 + $0x381] sm:$0xff] }
 0x1f2   : > { %v9992_v61 = vpop.permute.xlu1 %1604  ;;  %v9994_v54 = vpop.permute.xlu0 %1599 }
 0x1f3   : > { %13290 = vst [vmem:[#allocation147_spill] sm:$0xff] %v9992_v61  ;;  %13291 = vst [vmem:[#allocation148_spill] sm:$0xff] %v9994_v54  ;;  %1914 = vperm.xlu1 %9209, %v1347_v47   ;;  %1909 = vperm.xlu0 %9208, %v1346_v48   ;;  %v2269_v47 = vld [vmem:[%s9404_s25 + $0x30] sm:$0xff]  ;;  %v2268_v48 = vld [vmem:[%s9404_s25 + $0x28] sm:$0xff] }
 0x1f6   : > { %v9998_v62 = vpop.permute.xlu1 %1614  ;;  %v10000_v57 = vpop.permute.xlu0 %1609 }
 0x1f7   : > { %13292 = vst [vmem:[#allocation149_spill] sm:$0xff] %v9998_v62  ;;  %13293 = vst [vmem:[#allocation150_spill] sm:$0xff] %v10000_v57  ;;  %1924 = vperm.xlu1 %9209, %v1349_v63   ;;  %1919 = vperm.xlu0 %9208, %v1348_v0   ;;  %v2271_v63 = vld [vmem:[%s9404_s25 + $0x40] sm:$0xff]  ;;  %v2270_v0 = vld [vmem:[%s9404_s25 + $0x38] sm:$0xff] }
 0x1fa   : > { %v10004_v58 = vpop.permute.xlu1 %1624  ;;  %v10006_v61 = vpop.permute.xlu0 %1619 }
 0x1fb   : > { %13294 = vst [vmem:[#allocation151_spill] sm:$0xff] %v10004_v58  ;;  %13295 = vst [vmem:[#allocation152_spill] sm:$0xff] %v10006_v61  ;;  %2398 = vperm.xlu1 %9209, %v2267_v31   ;;  %1929 = vperm.xlu0 %9208, %v1350_v32   ;;  %v2273_v31 = vld [vmem:[%s9404_s25 + $0x50] sm:$0xff]  ;;  %v2272_v32 = vld [vmem:[%s9404_s25 + $0x48] sm:$0xff] }
 0x1fe   : > { %v10010_v54 = vpop.permute.xlu1 %1634  ;;  %v10012_v62 = vpop.permute.xlu0 %1629 }
 0x1ff   : > { %13296 = vst [vmem:[#allocation153_spill] sm:$0xff] %v10010_v54  ;;  %13297 = vst [vmem:[#allocation154_spill] sm:$0xff] %v10012_v62  ;;  %2408 = vperm.xlu1 %9209, %v2269_v47   ;;  %2403 = vperm.xlu0 %9208, %v2268_v48   ;;  %v2275_v47 = vld [vmem:[%s9404_s25 + $0x60] sm:$0xff]  ;;  %v2274_v48 = vld [vmem:[%s9404_s25 + $0x58] sm:$0xff] }
 0x202   : > { %v10016_v57 = vpop.permute.xlu1 %1644  ;;  %v10018_v58 = vpop.permute.xlu0 %1639 }
 0x203   : > { %13298 = vst [vmem:[#allocation155_spill] sm:$0xff] %v10016_v57  ;;  %13299 = vst [vmem:[#allocation156_spill] sm:$0xff] %v10018_v58  ;;  %2418 = vperm.xlu1 %9209, %v2271_v63   ;;  %2413 = vperm.xlu0 %9208, %v2270_v0   ;;  %v3297_v63 = vld [vmem:[%s9404_s25 + $0x29] sm:$0xff]  ;;  %v3296_v0 = vld [vmem:[%s9404_s25 + $0x21] sm:$0xff] }
 0x206   : > { %v10022_v61 = vpop.permute.xlu1 %1654  ;;  %v10024_v54 = vpop.permute.xlu0 %1649 }
 0x207   : > { %13300 = vst [vmem:[#allocation157_spill] sm:$0xff] %v10022_v61  ;;  %13301 = vst [vmem:[#allocation158_spill] sm:$0xff] %v10024_v54  ;;  %2428 = vperm.xlu1 %9209, %v2273_v31   ;;  %2423 = vperm.xlu0 %9208, %v2272_v32   ;;  %v3299_v31 = vld [vmem:[%s9404_s25 + $0x39] sm:$0xff]  ;;  %v3298_v32 = vld [vmem:[%s9404_s25 + $0x31] sm:$0xff] }
 0x20a   : > { %v10028_v62 = vpop.permute.xlu1 %1664  ;;  %v10030_v57 = vpop.permute.xlu0 %1659 }
 0x20b   : > { %13302 = vst [vmem:[#allocation159_spill] sm:$0xff] %v10028_v62  ;;  %13303 = vst [vmem:[#allocation160_spill] sm:$0xff] %v10030_v57  ;;  %2438 = vperm.xlu1 %9209, %v2275_v47   ;;  %2433 = vperm.xlu0 %9208, %v2274_v48   ;;  %v3301_v47 = vld [vmem:[%s9404_s25 + $0x49] sm:$0xff]  ;;  %v3300_v48 = vld [vmem:[%s9404_s25 + $0x41] sm:$0xff] }
 0x20e   : > { %v10034_v58 = vpop.permute.xlu1 %1674  ;;  %v10036_v61 = vpop.permute.xlu0 %1669 }
 0x20f   : > { %13304 = vst [vmem:[#allocation161_spill] sm:$0xff] %v10034_v58  ;;  %13305 = vst [vmem:[#allocation162_spill] sm:$0xff] %v10036_v61  ;;  %3432 = vperm.xlu1 %9209, %v3297_v63   ;;  %3427 = vperm.xlu0 %9208, %v3296_v0   ;;  %v3303_v63 = vld [vmem:[%s9404_s25 + $0x59] sm:$0xff]  ;;  %v3302_v0 = vld [vmem:[%s9404_s25 + $0x51] sm:$0xff] }
 0x212   : > { %v10040_v54 = vpop.permute.xlu1 %1684  ;;  %v10042_v62 = vpop.permute.xlu0 %1679 }
 0x213   : > { %13306 = vst [vmem:[#allocation163_spill] sm:$0xff] %v10040_v54  ;;  %13307 = vst [vmem:[#allocation164_spill] sm:$0xff] %v10042_v62  ;;  %3442 = vperm.xlu1 %9209, %v3299_v31   ;;  %3437 = vperm.xlu0 %9208, %v3298_v32   ;;  %v2276_v31 = vld [vmem:[%s9404_s25 + $0x68] sm:$0xff] }
 0x214   : > { %v3304_v32 = vld [vmem:[%s9404_s25 + $0x61] sm:$0xff] }
 0x216   : > { %v10046_v57 = vpop.permute.xlu1 %1694  ;;  %v10048_v58 = vpop.permute.xlu0 %1689 }
 0x217   : > { %13308 = vst [vmem:[#allocation165_spill] sm:$0xff] %v10046_v57  ;;  %13309 = vst [vmem:[#allocation166_spill] sm:$0xff] %v10048_v58  ;;  %3452 = vperm.xlu1 %9209, %v3301_v47   ;;  %3447 = vperm.xlu0 %9208, %v3300_v48   ;;  %v2279_v47 = vld [vmem:[%s9404_s25 + $0x80] sm:$0xff]  ;;  %v2277_v48 = vld [vmem:[%s9404_s25 + $0x70] sm:$0xff] }
 0x21a   : > { %v10052_v61 = vpop.permute.xlu1 %1704  ;;  %v10054_v54 = vpop.permute.xlu0 %1699 }
 0x21b   : > { %13310 = vst [vmem:[#allocation167_spill] sm:$0xff] %v10052_v61  ;;  %13311 = vst [vmem:[#allocation168_spill] sm:$0xff] %v10054_v54  ;;  %3462 = vperm.xlu1 %9209, %v3303_v63   ;;  %3457 = vperm.xlu0 %9208, %v3302_v0   ;;  %v2281_v63 = vld [vmem:[%s9404_s25 + $0x90] sm:$0xff]  ;;  %v2280_v0 = vld [vmem:[%s9404_s25 + $0x88] sm:$0xff] }
 0x21e   : > { %v10058_v62 = vpop.permute.xlu1 %1714  ;;  %v10060_v57 = vpop.permute.xlu0 %1709 }
 0x21f   : > { %13312 = vst [vmem:[#allocation169_spill] sm:$0xff] %v10058_v62  ;;  %13313 = vst [vmem:[#allocation170_spill] sm:$0xff] %v10060_v57  ;;  %2443 = vperm.xlu1 %9209, %v2276_v31   ;;  %3467 = vperm.xlu0 %9208, %v3304_v32   ;;  %v3305_v31 = vld [vmem:[%s9404_s25 + $0x69] sm:$0xff]  ;;  %v2278_v32 = vld [vmem:[%s9404_s25 + $0x78] sm:$0xff] }
 0x222   : > { %v10064_v58 = vpop.permute.xlu1 %1724  ;;  %v10066_v61 = vpop.permute.xlu0 %1719 }
 0x223   : > { %13314 = vst [vmem:[#allocation171_spill] sm:$0xff] %v10064_v58  ;;  %13315 = vst [vmem:[#allocation172_spill] sm:$0xff] %v10066_v61  ;;  %2458 = vperm.xlu1 %9209, %v2279_v47   ;;  %2448 = vperm.xlu0 %9208, %v2277_v48   ;;  %v3308_v47 = vld [vmem:[%s9404_s25 + $0x81] sm:$0xff]  ;;  %v3306_v48 = vld [vmem:[%s9404_s25 + $0x71] sm:$0xff] }
 0x226   : > { %v10070_v54 = vpop.permute.xlu1 %1734  ;;  %v10072_v62 = vpop.permute.xlu0 %1729 }
 0x227   : > { %13316 = vst [vmem:[#allocation173_spill] sm:$0xff] %v10070_v54  ;;  %13317 = vst [vmem:[#allocation174_spill] sm:$0xff] %v10072_v62  ;;  %2468 = vperm.xlu1 %9209, %v2281_v63   ;;  %2463 = vperm.xlu0 %9208, %v2280_v0   ;;  %v3310_v63 = vld [vmem:[%s9404_s25 + $0x91] sm:$0xff]  ;;  %v3309_v0 = vld [vmem:[%s9404_s25 + $0x89] sm:$0xff] }
 0x22a   : > { %v10076_v57 = vpop.permute.xlu1 %1744  ;;  %v10078_v58 = vpop.permute.xlu0 %1739 }
 0x22b   : > { %13318 = vst [vmem:[#allocation175_spill] sm:$0xff] %v10076_v57  ;;  %13319 = vst [vmem:[#allocation176_spill] sm:$0xff] %v10078_v58  ;;  %3472 = vperm.xlu1 %9209, %v3305_v31   ;;  %2453 = vperm.xlu0 %9208, %v2278_v32   ;;  %v2283_v31 = vld [vmem:[%s9404_s25 + $0xa0] sm:$0xff]  ;;  %v2282_v32 = vld [vmem:[%s9404_s25 + $0x98] sm:$0xff] }
 0x22e   : > { %v10082_v61 = vpop.permute.xlu1 %1754  ;;  %v10084_v54 = vpop.permute.xlu0 %1749 }
 0x22f   : > { %13320 = vst [vmem:[#allocation177_spill] sm:$0xff] %v10082_v61  ;;  %13321 = vst [vmem:[#allocation178_spill] sm:$0xff] %v10084_v54  ;;  %3487 = vperm.xlu1 %9209, %v3308_v47   ;;  %3477 = vperm.xlu0 %9208, %v3306_v48   ;;  %v3311_v47 = vld [vmem:[%s9404_s25 + $0x99] sm:$0xff] }
 0x230   : > { %v3307_v48 = vld [vmem:[%s9404_s25 + $0x79] sm:$0xff] }
 0x232   : > { %v10088_v62 = vpop.permute.xlu1 %1764  ;;  %v10090_v57 = vpop.permute.xlu0 %1759 }
 0x233   : > { %13322 = vst [vmem:[#allocation179_spill] sm:$0xff] %v10088_v62  ;;  %13323 = vst [vmem:[#allocation180_spill] sm:$0xff] %v10090_v57  ;;  %3497 = vperm.xlu1 %9209, %v3310_v63   ;;  %3492 = vperm.xlu0 %9208, %v3309_v0   ;;  %v2284_v63 = vld [vmem:[%s9404_s25 + $0xa8] sm:$0xff] }
 0x234   : > { %v3312_v0 = vld [vmem:[%s9404_s25 + $0xa1] sm:$0xff] }
 0x236   : > { %v10094_v58 = vpop.permute.xlu1 %1774  ;;  %v10096_v61 = vpop.permute.xlu0 %1769 }
 0x237   : > { %13324 = vst [vmem:[#allocation181_spill] sm:$0xff] %v10094_v58  ;;  %13325 = vst [vmem:[#allocation182_spill] sm:$0xff] %v10096_v61  ;;  %2478 = vperm.xlu1 %9209, %v2283_v31   ;;  %2473 = vperm.xlu0 %9208, %v2282_v32   ;;  %v2287_v31 = vld [vmem:[%s9404_s25 + $0xc0] sm:$0xff]  ;;  %v2285_v32 = vld [vmem:[%s9404_s25 + $0xb0] sm:$0xff]  ;;  %v13151_v58 = vmov 0.0  }
 0x238   : > { %8700 = vmatprep.subr.mxu1 %v13151_v58  ;;  %331 = vst.msk [vmem:[#allocation6 + $0xe1] sm:$0xff] %vm330_vm0, %v13151_v58  ;;  %332 = vst.msk [vmem:[#allocation6 + $0xe9] sm:$0xff] %vm330_vm0, %v13151_v58  ;;  %8609 = vmatprep.subr.mxu0 %v13151_v58 }
 0x239   : > { %8704 = vmatprep.mubr.msk.f32.mxu1 %vm9299_vm1, %v13151_v58  ;;  %8613 = vmatprep.mubr.msk.f32.mxu0 %vm9299_vm1, %v13151_v58 }
 0x23a   : > { %v10100_v54 = vpop.permute.xlu1 %1784  ;;  %v10102_v62 = vpop.permute.xlu0 %1779 }
 0x23b   : > { %13326 = vst [vmem:[#allocation183_spill] sm:$0xff] %v10100_v54  ;;  %13327 = vst [vmem:[#allocation184_spill] sm:$0xff] %v10102_v62  ;;  %3502 = vperm.xlu1 %9209, %v3311_v47   ;;  %3482 = vperm.xlu0 %9208, %v3307_v48   ;;  %v5529_v47 = vld [vmem:[%s13143_s2 + $0x8] sm:$0xff]  ;;  %v2289_v54 = vld [vmem:[%s9404_s25 + $0xd0] sm:$0xff] }
 0x23c   : > { %8701 = vmatpush3.msra.mxu1 %v5529_v47  ;;  %v5560_v47 = vld [vmem:[%s13143_s2 + $0x18] sm:$0xff] }
 0x23d   : > { %8702 = vmatprep.subr.mxu1 %v13151_v58  ;;  %8610 = vmatpush3.msra.mxu0 %v5560_v47  ;;  %v3313_v47 = vld [vmem:[%s9404_s25 + $0xa9] sm:$0xff]  ;;  %v3314_v62 = vld [vmem:[%s9404_s25 + $0xb1] sm:$0xff] }
 0x23e   : > { %v10106_v57 = vpop.permute.xlu1 %1794  ;;  %v10108_v53 = vpop.permute.xlu0 %1789  ;;  %8611 = vmatprep.subr.mxu0 %v13151_v58 }
 0x23f   : > { %13328 = vst [vmem:[#allocation185_spill] sm:$0xff] %v10106_v57  ;;  %13329 = vst [vmem:[#allocation186_spill] sm:$0xff] %v10108_v53  ;;  %2483 = vperm.xlu1 %9209, %v2284_v63   ;;  %3507 = vperm.xlu0 %9208, %v3312_v0   ;;  %v5528_v0 = vld [vmem:[%s13143_s2] sm:$0xff]  ;;  %v2288_v57 = vld [vmem:[%s9404_s25 + $0xc8] sm:$0xff] }
 0x240   : > { %8703 = vmatpush3.msra.mxu1 %v5528_v0  ;;  %v5559_v0 = vld [vmem:[%s13143_s2 + $0x10] sm:$0xff] }
 0x241   : > { %8882 = vmatprep.subr.mxu1 %v13151_v58  ;;  %8612 = vmatpush3.msra.mxu0 %v5559_v0  ;;  %v3317_v0 = vld [vmem:[%s9404_s25 + $0xc9] sm:$0xff] }
 0x242   : > { %v10121_v48 = vpop.permute.xlu1 %1804  ;;  %v10123_v63 = vpop.permute.xlu0 %1799  ;;  %8791 = vmatprep.subr.mxu0 %v13151_v58 }
 0x243   : > { %13330 = vst [vmem:[#allocation187_spill] sm:$0xff] %v10121_v48  ;;  %13331 = vst [vmem:[#allocation188_spill] sm:$0xff] %v10123_v63  ;;  %2498 = vperm.xlu1 %9209, %v2287_v31   ;;  %2488 = vperm.xlu0 %9208, %v2285_v32   ;;  %v2286_v48 = vld [vmem:[%s9404_s25 + $0xb8] sm:$0xff]  ;;  %v3316_v63 = vld [vmem:[%s9404_s25 + $0xc1] sm:$0xff] }
 0x246   : > { %v10138_v31 = vpop.permute.xlu1 %1814  ;;  %v10140_v32 = vpop.permute.xlu0 %1809 }
 0x247   : > { %13332 = vst [vmem:[#allocation189_spill] sm:$0xff] %v10138_v31  ;;  %13333 = vst [vmem:[#allocation190_spill] sm:$0xff] %v10140_v32  ;;  %2508 = vperm.xlu1 %9209, %v2289_v54   ;;  %2503 = vperm.xlu0 %9208, %v2288_v57   ;;  %v3318_v57 = vld [vmem:[%s9404_s25 + $0xd1] sm:$0xff] }
 0x24a   : > { %v10150_v31 = vpop.permute.xlu1 %1824  ;;  %v10152_v32 = vpop.permute.xlu0 %1819 }
 0x24b   : > { %13334 = vst [vmem:[#allocation191_spill] sm:$0xff] %v10150_v31  ;;  %13335 = vst [vmem:[#allocation192_spill] sm:$0xff] %v10152_v32  ;;  %3512 = vperm.xlu1 %9209, %v3313_v47   ;;  %2493 = vperm.xlu0 %9208, %v2286_v48   ;;  %v2291_v48 = vld [vmem:[%s9404_s25 + $0xe0] sm:$0xff]  ;;  %v2290_v47 = vld [vmem:[%s9404_s25 + $0xd8] sm:$0xff] }
 0x24e   : > { %v10156_v53 = vpop.permute.xlu1 %1834  ;;  %v10158_v54 = vpop.permute.xlu0 %1829 }
 0x24f   : > { %13336 = vst [vmem:[#allocation193_spill] sm:$0xff] %v10156_v53  ;;  %13337 = vst [vmem:[#allocation194_spill] sm:$0xff] %v10158_v54  ;;  %3527 = vperm.xlu1 %9209, %v3316_v63   ;;  %3517 = vperm.xlu0 %9208, %v3314_v62   ;;  %v3319_v62 = vld [vmem:[%s9404_s25 + $0xd9] sm:$0xff] }
 0x250   : > { %v3315_v63 = vld [vmem:[%s9404_s25 + $0xb9] sm:$0xff] }
 0x252   : > { %v10162_v58 = vpop.permute.xlu1 %1844  ;;  %v10164_v31 = vpop.permute.xlu0 %1839 }
 0x253   : > { %13338 = vst [vmem:[#allocation195_spill] sm:$0xff] %v10162_v58  ;;  %13339 = vst [vmem:[#allocation196_spill] sm:$0xff] %v10164_v31  ;;  %3537 = vperm.xlu1 %9209, %v3318_v57   ;;  %3532 = vperm.xlu0 %9208, %v3317_v0   ;;  %v2292_v57 = vld [vmem:[%s9404_s25 + $0xe8] sm:$0xff] }
 0x254   : > { %v3320_v0 = vld [vmem:[%s9404_s25 + $0xe1] sm:$0xff] }
 0x256   : > { %v10168_v32 = vpop.permute.xlu1 %1854  ;;  %v10170_v53 = vpop.permute.xlu0 %1849 }
 0x257   : > { %13340 = vst [vmem:[#allocation197_spill] sm:$0xff] %v10168_v32  ;;  %13341 = vst [vmem:[#allocation198_spill] sm:$0xff] %v10170_v53  ;;  %2518 = vperm.xlu1 %9209, %v2291_v48   ;;  %2513 = vperm.xlu0 %9208, %v2290_v47   ;;  %v2295_v48 = vld [vmem:[%s9404_s25 + $0x100] sm:$0xff]  ;;  %v2293_v47 = vld [vmem:[%s9404_s25 + $0xf0] sm:$0xff] }
 0x25a   : > { %v10174_v54 = vpop.permute.xlu1 %1864  ;;  %v10176_v58 = vpop.permute.xlu0 %1859 }
 0x25b   : > { %13342 = vst [vmem:[#allocation199_spill] sm:$0xff] %v10174_v54  ;;  %13343 = vst [vmem:[#allocation200_spill] sm:$0xff] %v10176_v58  ;;  %3542 = vperm.xlu1 %9209, %v3319_v62   ;;  %3522 = vperm.xlu0 %9208, %v3315_v63   ;;  %v2297_v62 = vld [vmem:[%s9404_s25 + $0x110] sm:$0xff]  ;;  %v2296_v63 = vld [vmem:[%s9404_s25 + $0x108] sm:$0xff] }
 0x25e   : > { %v10180_v31 = vpop.permute.xlu1 %1874  ;;  %v10182_v32 = vpop.permute.xlu0 %1869 }
 0x25f   : > { %13344 = vst [vmem:[#allocation201_spill] sm:$0xff] %v10180_v31  ;;  %13345 = vst [vmem:[#allocation202_spill] sm:$0xff] %v10182_v32  ;;  %2523 = vperm.xlu1 %9209, %v2292_v57   ;;  %3547 = vperm.xlu0 %9208, %v3320_v0   ;;  %v3321_v57 = vld [vmem:[%s9404_s25 + $0xe9] sm:$0xff]  ;;  %v2294_v0 = vld [vmem:[%s9404_s25 + $0xf8] sm:$0xff] }
 0x262   : > { %v10186_v53 = vpop.permute.xlu1 %1884  ;;  %v10188_v54 = vpop.permute.xlu0 %1879 }
 0x263   : > { %13346 = vst [vmem:[#allocation203_spill] sm:$0xff] %v10186_v53  ;;  %13347 = vst [vmem:[#allocation204_spill] sm:$0xff] %v10188_v54  ;;  %2538 = vperm.xlu1 %9209, %v2295_v48   ;;  %2528 = vperm.xlu0 %9208, %v2293_v47   ;;  %v3324_v48 = vld [vmem:[%s9404_s25 + $0x101] sm:$0xff]  ;;  %v3322_v47 = vld [vmem:[%s9404_s25 + $0xf1] sm:$0xff] }
 0x266   : > { %v10192_v58 = vpop.permute.xlu1 %1894  ;;  %v10194_v31 = vpop.permute.xlu0 %1889 }
 0x267   : > { %13348 = vst [vmem:[#allocation205_spill] sm:$0xff] %v10192_v58  ;;  %13349 = vst [vmem:[#allocation206_spill] sm:$0xff] %v10194_v31  ;;  %2548 = vperm.xlu1 %9209, %v2297_v62   ;;  %2543 = vperm.xlu0 %9208, %v2296_v63   ;;  %v3326_v62 = vld [vmem:[%s9404_s25 + $0x111] sm:$0xff]  ;;  %v3325_v63 = vld [vmem:[%s9404_s25 + $0x109] sm:$0xff] }
 0x26a   : > { %v10198_v32 = vpop.permute.xlu1 %1904  ;;  %v10200_v53 = vpop.permute.xlu0 %1899 }
 0x26b   : > { %13350 = vst [vmem:[#allocation207_spill] sm:$0xff] %v10198_v32  ;;  %13351 = vst [vmem:[#allocation208_spill] sm:$0xff] %v10200_v53  ;;  %3552 = vperm.xlu1 %9209, %v3321_v57   ;;  %2533 = vperm.xlu0 %9208, %v2294_v0   ;;  %v2299_v57 = vld [vmem:[%s9404_s25 + $0x120] sm:$0xff]  ;;  %v2298_v0 = vld [vmem:[%s9404_s25 + $0x118] sm:$0xff] }
 0x26e   : > { %v10204_v54 = vpop.permute.xlu1 %1914  ;;  %v10206_v58 = vpop.permute.xlu0 %1909 }
 0x26f   : > { %13352 = vst [vmem:[#allocation209_spill] sm:$0xff] %v10204_v54  ;;  %13353 = vst [vmem:[#allocation210_spill] sm:$0xff] %v10206_v58  ;;  %3567 = vperm.xlu1 %9209, %v3324_v48   ;;  %3557 = vperm.xlu0 %9208, %v3322_v47   ;;  %v3327_v48 = vld [vmem:[%s9404_s25 + $0x119] sm:$0xff] }
 0x270   : > { %v3323_v47 = vld [vmem:[%s9404_s25 + $0xf9] sm:$0xff] }
 0x272   : > { %v10210_v31 = vpop.permute.xlu1 %1924  ;;  %v10212_v32 = vpop.permute.xlu0 %1919 }
 0x273   : > { %13354 = vst [vmem:[#allocation211_spill] sm:$0xff] %v10210_v31  ;;  %13355 = vst [vmem:[#allocation212_spill] sm:$0xff] %v10212_v32  ;;  %3577 = vperm.xlu1 %9209, %v3326_v62   ;;  %3572 = vperm.xlu0 %9208, %v3325_v63   ;;  %v2300_v31 = vld [vmem:[%s9404_s25 + $0x128] sm:$0xff] }
 0x274   : > { %v3328_v32 = vld [vmem:[%s9404_s25 + $0x121] sm:$0xff] }
 0x276   : > { %v2399_v53 = vpop.permute.xlu1 %2398  ;;  %v10216_v54 = vpop.permute.xlu0 %1929 }
 0x277   : > { %13356 = vst [vmem:[#allocation213_spill] sm:$0xff] %v10216_v54  ;;  %2558 = vperm.xlu1 %9209, %v2299_v57   ;;  %2553 = vperm.xlu0 %9208, %v2298_v0   ;;  %v10227_v57 = vld [vmem:[%s13142_s1 + $0x1] ss:$0 sm:$0xff] }
 0x278   : > { %v2012_v4 = vmul.f32 %v10227_v57, %v9854_v23  ;;  %v2014_v46 = vmul.f32 %v10227_v57, %v9860_v56  ;;  %v2013_v23 = vmul.f32 %v10227_v57, %v9862_v15 }
 0x27a   : > { %v2409_v58 = vpop.permute.xlu1 %2408  ;;  %v2404_v61 = vpop.permute.xlu0 %2403 }
 0x27b   : > { %3582 = vperm.xlu1 %9209, %v3327_v48   ;;  %3562 = vperm.xlu0 %9208, %v3323_v47   ;;  %v10234_v48 = vld [vmem:[%s13142_s1] ss:$0 sm:$0xff]  ;;  %v2305_v47 = vld [vmem:[%s9404_s25 + $0x150] sm:$0xff] }
 0x27c   : > { %v1110_v45 = vmul.f32 %v10234_v48, %v9472_v2  ;;  %v10262_v2 = vld [vmem:[%s13142_s1 + $0x3] ss:$0 sm:$0xff] }
 0x27e   : > { %v2419_v62 = vpop.permute.xlu1 %2418  ;;  %v2414_v63 = vpop.permute.xlu0 %2413 }
 0x27f   : > { %2563 = vperm.xlu1 %9209, %v2300_v31   ;;  %3587 = vperm.xlu0 %9208, %v3328_v32   ;;  %v10239_v31 = vld [vmem:[%s13142_s1 + $0x2] ss:$0 sm:$0xff]  ;;  %v2011_v32 = vmul.f32 %v10227_v57, %v9856_v55 }
 0x280   : > { %v3040_v37 = vmul.f32 %v10239_v31, %v2399_v53  ;;  %v3329_v53 = vld [vmem:[%s9404_s25 + $0x129] sm:$0xff]  ;;  %v3042_v56 = vmul.f32 %v10239_v31, %v2409_v58  ;;  %v3043_v15 = vmul.f32 %v10239_v31, %v2414_v63  ;;  %v1115_v58 = vmul.f32 %v10234_v48, %v9482_v9 }
 0x281   : > { %v2139_v55 = vadd.f32 %v2011_v32, %v1110_v45  ;;  %v1113_v45 = vmul.f32 %v10234_v48, %v9476_v5  ;;  %v3332_v5 = vld [vmem:[%s9404_s25 + $0x141] sm:$0xff]  ;;  %v2016_v63 = vmul.f32 %v10227_v57, %v9866_v16  ;;  %v3334_v16 = vld [vmem:[%s9404_s25 + $0x151] sm:$0xff] }
 0x282   : > { %v10229_v0 = vpop.permute.xlu1 %2428  ;;  %v2424_v54 = vpop.permute.xlu0 %2423 }
 0x283   : > { %2578 = vperm.xlu1 %9209, %v2303_v49   ;;  %2568 = vperm.xlu0 %9208, %v2301_v3   ;;  %v1111_v49 = vmul.f32 %v10234_v48, %v9478_v6  ;;  %v3041_v3 = vmul.f32 %v10239_v31, %v2404_v61  ;;  %v1112_v6 = vmul.f32 %v10234_v48, %v9470_v1 }
 0x284   : > { %v2142_v1 = vadd.f32 %v2014_v46, %v1113_v45  ;;  %v3044_v46 = vmul.f32 %v10239_v31, %v2419_v62  ;;  %v3333_v62 = vld [vmem:[%s9404_s25 + $0x149] sm:$0xff]  ;;  %v2144_v45 = vadd.f32 %v2016_v63, %v1115_v58  ;;  %v2306_v58 = vld [vmem:[%s9404_s25 + $0x158] sm:$0xff] }
 0x285   : > { %v2140_v61 = vadd.f32 %v2012_v4, %v1111_v49  ;;  %v2141_v4 = vadd.f32 %v2013_v23, %v1112_v6  ;;  %v2015_v49 = vmul.f32 %v10227_v57, %v9868_v39  ;;  %v3045_v6 = vmul.f32 %v10239_v31, %v2424_v54 }
 0x286   : > { %v10250_v20 = vpop.permute.xlu1 %2438  ;;  %v2434_v11 = vpop.permute.xlu0 %2433  ;;  %v3171_v23 = vadd.f32 %v3043_v15, %v2142_v1  ;;  %v1117_v54 = vmul.f32 %v10234_v48, %v9488_v13  ;;  %v1116_v15 = vmul.f32 %v10234_v48, %v9490_v14 }
 0x287   : > { %2588 = vperm.xlu1 %9209, %v2305_v47   ;;  %2583 = vperm.xlu0 %9208, %v2304_v50   ;;  %v3168_v50 = vadd.f32 %v3040_v37, %v2139_v55  ;;  %v3169_v12 = vadd.f32 %v3041_v3, %v2140_v61  ;;  %v3330_v37 = vld [vmem:[%s9404_s25 + $0x131] sm:$0xff]  ;;  %v1114_v61 = vmul.f32 %v10234_v48, %v9484_v10 }
 0x289   : > { %v2143_v10 = vadd.f32 %v2015_v49, %v1114_v61  ;;  %v3048_v61 = vmul.f32 %v10239_v31, %v10250_v20 }
 0x28a   : > { %v3433_v32 = vpop.permute.xlu1 %3432  ;;  %v3428_v47 = vpop.permute.xlu0 %3427 }
 0x28b   : > { %v4070_v28 = vmul.f32 %v10262_v2, %v3433_v32  ;;  %v4069_v42 = vmul.f32 %v10262_v2, %v3428_v47  ;;  %3592 = vperm.xlu1 %9209, %v3329_v53   ;;  %2573 = vperm.xlu0 %9208, %v2302_v41   ;;  %v3170_v41 = vadd.f32 %v3042_v56, %v2141_v4 }
 0x28c   : > { %v3172_v32 = vadd.f32 %v3044_v46, %v2143_v10  ;;  %v3047_v47 = vmul.f32 %v10239_v31, %v2434_v11  ;;  %v3173_v4 = vadd.f32 %v3045_v6, %v2144_v45  ;;  %v2019_v11 = vmul.f32 %v10227_v57, %v9880_v8 }
 0x28d   : > { %v4198_v3 = vadd.f32 %v4070_v28, %v3169_v12  ;;  %v4197_v55 = vadd.f32 %v4069_v42, %v3168_v50  ;;  %v2018_v12 = vmul.f32 %v10227_v57, %v9872_v24  ;;  %v2017_v28 = vmul.f32 %v10227_v57, %v9874_v40 }
 0x28e   : > { %v3443_v39 = vpop.permute.xlu1 %3442  ;;  %v3438_v53 = vpop.permute.xlu0 %3437  ;;  %v3046_v24 = vmul.f32 %v10239_v31, %v10229_v0 }
 0x28f   : > { %4326 = vst.msk [vmem:[#allocation2 + $0x8] sm:$0xff] %vm330_vm0, %v4198_v3  ;;  %4325 = vst.msk [vmem:[#allocation2] sm:$0xff] %vm330_vm0, %v4197_v55  ;;  %v4072_v9 = vmul.f32 %v10262_v2, %v3443_v39  ;;  %v4071_v42 = vmul.f32 %v10262_v2, %v3438_v53  ;;  %3607 = vperm.xlu1 %9209, %v3332_v5   ;;  %3597 = vperm.xlu0 %9208, %v3330_v37   ;;  %v2307_v37 = vld [vmem:[%s9404_s25 + $0x160] sm:$0xff] }
 0x290   : > { %v2146_v14 = vadd.f32 %v2018_v12, %v1117_v54  ;;  %v2145_v5 = vadd.f32 %v2017_v28, %v1116_v15  ;;  %v1118_v3 = vmul.f32 %v10234_v48, %v9496_v18  ;;  %v3335_v18 = vld [vmem:[%s9404_s25 + $0x159] sm:$0xff] }
 0x291   : > { %v4200_v50 = vadd.f32 %v4072_v9, %v3171_v23  ;;  %v4199_v56 = vadd.f32 %v4071_v42, %v3170_v41  ;;  %v3331_v28 = vld [vmem:[%s9404_s25 + $0x139] sm:$0xff] }
 0x292   : > { %v3453_v40 = vpop.permute.xlu1 %3452  ;;  %v3448_v1 = vpop.permute.xlu0 %3447  ;;  %v3174_v55 = vadd.f32 %v3046_v24, %v2145_v5  ;;  %v3175_v41 = vadd.f32 %v3047_v47, %v2146_v14  ;;  %v2147_v42 = vadd.f32 %v2019_v11, %v1118_v3  ;;  %v2308_v47 = vld [vmem:[%s9404_s25 + $0x168] sm:$0xff]  ;;  %v2309_v3 = vld [vmem:[%s9404_s25 + $0x170] sm:$0xff] }
 0x293   : > { %4328 = vst.msk [vmem:[#allocation2 + $0x18] sm:$0xff] %vm330_vm0, %v4200_v50  ;;  %4327 = vst.msk [vmem:[#allocation2 + $0x10] sm:$0xff] %vm330_vm0, %v4199_v56  ;;  %v4074_v13 = vmul.f32 %v10262_v2, %v3453_v40  ;;  %v4073_v49 = vmul.f32 %v10262_v2, %v3448_v1  ;;  %3617 = vperm.xlu1 %9209, %v3334_v16   ;;  %3612 = vperm.xlu0 %9208, %v3333_v62  }
 0x294   : > { %v3176_v56 = vadd.f32 %v3048_v61, %v2147_v42  ;;  %v2313_v42 = vld [vmem:[%s9404_s25 + $0x190] sm:$0xff] }
 0x295   : > { %v4202_v0 = vadd.f32 %v4074_v13, %v3173_v4  ;;  %v4201_v63 = vadd.f32 %v4073_v49, %v3172_v32  ;;  %v3336_v4 = vld [vmem:[%s9404_s25 + $0x161] sm:$0xff] }
 0x296   : > { %v4453_v46 = vld [vmem:[#allocation2] sm:$0xff]  ;;  %v3463_v39 = vpop.permute.xlu1 %3462  ;;  %v3458_v53 = vpop.permute.xlu0 %3457  ;;  %v4454_v20 = vld [vmem:[#allocation2 + $0x8] sm:$0xff] }
 0x297   : > { %v4581_v23 = vld [vmem:[#allocation2 + $0x1] sm:$0xff]  ;;  %4330 = vst.msk [vmem:[#allocation2 + $0x28] sm:$0xff] %vm330_vm0, %v4202_v0  ;;  %4329 = vst.msk [vmem:[#allocation2 + $0x20] sm:$0xff] %vm330_vm0, %v4201_v63  ;;  %v4076_v8 = vmul.f32 %v10262_v2, %v3463_v39  ;;  %v4075_v9 = vmul.f32 %v10262_v2, %v3458_v53  ;;  %2598 = vperm.xlu1 %9209, %v2307_v37   ;;  %2593 = vperm.xlu0 %9208, %v2306_v58  }
 0x298   : > { %v4709_v6 = vmax.f32 %v4453_v46, %v4581_v23  ;;  %v2311_v0 = vld [vmem:[%s9404_s25 + $0x180] sm:$0xff]  ;;  %v2020_v63 = vmul.f32 %v10227_v57, %v9878_v7  ;;  %v1119_v39 = vmul.f32 %v10234_v48, %v9494_v17  ;;  %v2021_v7 = vmul.f32 %v10227_v57, %v9886_v43 }
 0x299   : > { %v4204_v10 = vadd.f32 %v4076_v8, %v3175_v41  ;;  %v4203_v12 = vadd.f32 %v4075_v9, %v3174_v55  ;;  %v2023_v9 = vmul.f32 %v10227_v57, %v9892_v51  ;;  %v1120_v17 = vmul.f32 %v10234_v48, %v9502_v22 }
 0x29a   : > { %4837 = vst.msk [vmem:[#allocation2] sm:$0xff] %vm330_vm0, %v4709_v6  ;;  %v4455_v16 = vld [vmem:[#allocation2 + $0x10] sm:$0xff]  ;;  %v2444_v45 = vpop.permute.xlu1 %2443  ;;  %v3468_v50 = vpop.permute.xlu0 %3467  ;;  %v4456_v40 = vld [vmem:[#allocation2 + $0x18] sm:$0xff] }
 0x29b   : > { %v4582_v62 = vld [vmem:[#allocation2 + $0x9] sm:$0xff]  ;;  %v4583_v54 = vld [vmem:[#allocation2 + $0x11] sm:$0xff]  ;;  %4332 = vst.msk [vmem:[#allocation2 + $0x38] sm:$0xff] %vm330_vm0, %v4204_v10  ;;  %4331 = vst.msk [vmem:[#allocation2 + $0x30] sm:$0xff] %vm330_vm0, %v4203_v12  ;;  %v4077_v24 = vmul.f32 %v10262_v2, %v3468_v50  ;;  %3622 = vperm.xlu1 %9209, %v3335_v18   ;;  %3602 = vperm.xlu0 %9208, %v3331_v28   ;;  %v3049_v8 = vmul.f32 %v10239_v31, %v2444_v45 }
 0x29c   : > { %v4710_v15 = vmax.f32 %v4454_v20, %v4582_v62  ;;  %v4711_v32 = vmax.f32 %v4455_v16, %v4583_v54  ;;  %v2148_v20 = vadd.f32 %v2020_v63, %v1119_v39  ;;  %v2312_v10 = vld [vmem:[%s9404_s25 + $0x188] sm:$0xff]  ;;  %v1122_v12 = vmul.f32 %v10234_v48, %v9508_v26 }
 0x29d   : > { %v4205_v1 = vadd.f32 %v4077_v24, %v3176_v56  ;;  %v2149_v56 = vadd.f32 %v2021_v7, %v1120_v17  ;;  %v2024_v26 = vmul.f32 %v10227_v57, %v9890_v60  ;;  %v1124_v60 = vmul.f32 %v10234_v48, %v9514_v30 }
 0x29e   : > { %4838 = vst.msk [vmem:[#allocation2 + $0x8] sm:$0xff] %vm330_vm0, %v4710_v15  ;;  %4839 = vst.msk [vmem:[#allocation2 + $0x10] sm:$0xff] %vm330_vm0, %v4711_v32  ;;  %v4457_v13 = vld [vmem:[#allocation2 + $0x20] sm:$0xff]  ;;  %v2459_v5 = vpop.permute.xlu1 %2458  ;;  %v2449_v37 = vpop.permute.xlu0 %2448  ;;  %v4458_v55 = vld [vmem:[#allocation2 + $0x28] sm:$0xff]  ;;  %v3177_v45 = vadd.f32 %v3049_v8, %v2148_v20  ;;  %v2151_v15 = vadd.f32 %v2023_v9, %v1122_v12  ;;  %v2022_v17 = vmul.f32 %v10227_v57, %v9884_v59 }
 0x29f   : > { %v4584_v49 = vld [vmem:[#allocation2 + $0x19] sm:$0xff]  ;;  %v4585_v14 = vld [vmem:[#allocation2 + $0x21] sm:$0xff]  ;;  %4333 = vst.msk [vmem:[#allocation2 + $0x40] sm:$0xff] %vm330_vm0, %v4205_v1  ;;  %2603 = vperm.xlu1 %9209, %v2308_v47   ;;  %3627 = vperm.xlu0 %9208, %v3336_v4   ;;  %v3052_v51 = vmul.f32 %v10239_v31, %v2459_v5  ;;  %v3050_v16 = vmul.f32 %v10239_v31, %v2449_v37  ;;  %v3337_v47 = vld [vmem:[%s9404_s25 + $0x169] sm:$0xff] }
 0x2a0   : > { %v4712_v58 = vmax.f32 %v4456_v40, %v4584_v49  ;;  %v4713_v11 = vmax.f32 %v4457_v13, %v4585_v14  ;;  %v2025_v40 = vmul.f32 %v10227_v57, %v9898_v44  ;;  %v2310_v13 = vld [vmem:[%s9404_s25 + $0x178] sm:$0xff]  ;;  %v1123_v49 = vmul.f32 %v10234_v48, %v9506_v25 }
 0x2a1   : > { %v4966_v32 = vld [vmem:[#allocation2] sm:$0xff]  ;;  %v3180_v14 = vadd.f32 %v3052_v51, %v2151_v15  ;;  %v3178_v5 = vadd.f32 %v3050_v16, %v2149_v56  ;;  %v3342_v12 = vld [vmem:[%s9404_s25 + $0x191] sm:$0xff]  ;;  %v2026_v51 = vmul.f32 %v10227_v57, %v9896_v52  ;;  %v1125_v52 = vmul.f32 %v10234_v48, %v9512_v29 }
 0x2a2   : > { %4840 = vst.msk [vmem:[#allocation2 + $0x18] sm:$0xff] %vm330_vm0, %v4712_v58  ;;  %4841 = vst.msk [vmem:[#allocation2 + $0x20] sm:$0xff] %vm330_vm0, %v4713_v11  ;;  %v4459_v61 = vld [vmem:[#allocation2 + $0x30] sm:$0xff]  ;;  %v2469_v46 = vpop.permute.xlu1 %2468  ;;  %v2464_v23 = vpop.permute.xlu0 %2463  ;;  %v4460_v28 = vld [vmem:[#allocation2 + $0x38] sm:$0xff]  ;;  %v2152_v30 = vadd.f32 %v2024_v26, %v1123_v49  ;;  %v1126_v49 = vmul.f32 %v10234_v48, %v9520_v34 }
 0x2a3   : > { %v4586_v41 = vld [vmem:[#allocation2 + $0x29] sm:$0xff]  ;;  %v4587_v53 = vld [vmem:[#allocation2 + $0x31] sm:$0xff]  ;;  %2618 = vperm.xlu1 %9209, %v2311_v0   ;;  %2608 = vperm.xlu0 %9208, %v2309_v3   ;;  %v3054_v44 = vmul.f32 %v10239_v31, %v2469_v46  ;;  %v3053_v11 = vmul.f32 %v10239_v31, %v2464_v23 }
 0x2a4   : > { %v4714_v6 = vmax.f32 %v4458_v55, %v4586_v41  ;;  %v4715_v18 = vmax.f32 %v4459_v61, %v4587_v53  ;;  %v3340_v55 = vld [vmem:[%s9404_s25 + $0x181] sm:$0xff]  ;;  %v2153_v61 = vadd.f32 %v2025_v40, %v1124_v60  ;;  %v3338_v23 = vld [vmem:[%s9404_s25 + $0x171] sm:$0xff] }
 0x2a5   : > { %v4967_v63 = vld [vmem:[#allocation2 + $0x8] sm:$0xff]  ;;  %v4968_v41 = vld [vmem:[#allocation2 + $0x10] sm:$0xff]  ;;  %v2314_v29 = vld [vmem:[%s9404_s25 + $0x198] sm:$0xff] }
 0x2a6   : > { %4842 = vst.msk [vmem:[#allocation2 + $0x28] sm:$0xff] %vm330_vm0, %v4714_v6  ;;  %4843 = vst.msk [vmem:[#allocation2 + $0x30] sm:$0xff] %vm330_vm0, %v4715_v18  ;;  %v4588_v43 = vld [vmem:[#allocation2 + $0x39] sm:$0xff]  ;;  %v3473_v62 = vpop.permute.xlu1 %3472  ;;  %v10353_v54 = vpop.permute.xlu0 %2453  ;;  %v3182_v18 = vadd.f32 %v3054_v44, %v2153_v61 }
 0x2a7   : > { %v4716_v50 = vmax.f32 %v4460_v28, %v4588_v43  ;;  %v4078_v22 = vmul.f32 %v10262_v2, %v3473_v62  ;;  %2628 = vperm.xlu1 %9209, %v2313_v42   ;;  %2623 = vperm.xlu0 %9208, %v2312_v10   ;;  %v3181_v42 = vadd.f32 %v3053_v11, %v2152_v30  ;;  %v4461_v59 = vld [vmem:[#allocation2 + $0x40] sm:$0xff] }
 0x2a8   : > { %v3051_v26 = vmul.f32 %v10239_v31, %v10353_v54  ;;  %v2154_v54 = vadd.f32 %v2026_v51, %v1125_v52  ;;  %v2317_v52 = vld [vmem:[%s9404_s25 + $0x1b0] sm:$0xff] }
 0x2a9   : > { %v10358_v24 = vld [vmem:[#allocation2 + $0x20] sm:$0xff]  ;;  %4844 = vst.msk [vmem:[#allocation2 + $0x38] sm:$0xff] %vm330_vm0, %v4716_v50  ;;  %v4206_v4 = vadd.f32 %v4078_v22, %v3177_v45  ;;  %v4969_v28 = vld [vmem:[#allocation2 + $0x18] sm:$0xff]  ;;  %v3341_v45 = vld [vmem:[%s9404_s25 + $0x189] sm:$0xff]  ;;  %v1121_v22 = vmul.f32 %v10234_v48, %v9500_v21 }
 0x2aa   : > { %v5095_v1 = vmax.f32 %v4966_v32, %v10358_v24  ;;  %v3488_v37 = vpop.permute.xlu1 %3487  ;;  %v3478_v58 = vpop.permute.xlu0 %3477 }
 0x2ab   : > { %4334 = vst.msk [vmem:[#allocation2 + $0x48] sm:$0xff] %vm330_vm0, %v4206_v4  ;;  %v4081_v0 = vmul.f32 %v10262_v2, %v3488_v37  ;;  %v4079_v25 = vmul.f32 %v10262_v2, %v3478_v58  ;;  %3632 = vperm.xlu1 %9209, %v3337_v47   ;;  %2613 = vperm.xlu0 %9208, %v2310_v13   ;;  %v10417_v13 = vld [vmem:[%s13146_s5] ss:$0 sm:$0xff] }
 0x2ac   : > { %5219 = vst.msk [vmem:[#allocation2] sm:$0xff] %vm330_vm0, %v5095_v1  ;;  %v2150_v21 = vadd.f32 %v2022_v17, %v1121_v22  ;;  %v2315_v1 = vld [vmem:[%s9404_s25 + $0x1a0] sm:$0xff]  ;;  %v2027_v4 = vmul.f32 %v10227_v57, %v9904_v36  ;;  %v2316_v17 = vld [vmem:[%s9404_s25 + $0x1a8] sm:$0xff] }
 0x2ad   : > { %v10376_v3 = vld [vmem:[#allocation2 + $0x28] sm:$0xff]  ;;  %v4209_v39 = vadd.f32 %v4081_v0, %v3180_v14  ;;  %v4207_v46 = vadd.f32 %v4079_v25, %v3178_v5  ;;  %v10381_v6 = vld [vmem:[#allocation2 + $0x30] sm:$0xff] }
 0x2ae   : > { %v5096_v53 = vmax.f32 %v4967_v63, %v10376_v3  ;;  %v3498_v8 = vpop.permute.xlu1 %3497  ;;  %v3493_v7 = vpop.permute.xlu0 %3492  ;;  %v5097_v9 = vmax.f32 %v4968_v41, %v10381_v6  ;;  %v3179_v14 = vadd.f32 %v3051_v26, %v2150_v21  ;;  %v3343_v63 = vld [vmem:[%s9404_s25 + $0x199] sm:$0xff] }
 0x2af   : > { %4337 = vst.msk [vmem:[#allocation2 + $0x60] sm:$0xff] %vm330_vm0, %v4209_v39  ;;  %4335 = vst.msk [vmem:[#allocation2 + $0x50] sm:$0xff] %vm330_vm0, %v4207_v46  ;;  %v4083_v20 = vmul.f32 %v10262_v2, %v3498_v8  ;;  %v4082_v10 = vmul.f32 %v10262_v2, %v3493_v7  ;;  %3647 = vperm.xlu1 %9209, %v3340_v55   ;;  %3637 = vperm.xlu0 %9208, %v3338_v23   ;;  %v3339_v39 = vld [vmem:[%s9404_s25 + $0x179] sm:$0xff] }
 0x2b0   : > { %5220 = vst.msk [vmem:[#allocation2 + $0x8] sm:$0xff] %vm330_vm0, %v5096_v53  ;;  %v10392_v43 = vld [vmem:[#allocation2 + $0x38] sm:$0xff]  ;;  %5221 = vst.msk [vmem:[#allocation2 + $0x10] sm:$0xff] %vm330_vm0, %v5097_v9  ;;  %v2155_v55 = vadd.f32 %v2027_v4, %v1126_v49  ;;  %v2029_v49 = vmul.f32 %v10227_v57, %v9910_v27  ;;  %v1128_v27 = vmul.f32 %v10234_v48, %v9526_v38 }
 0x2b1   : > { %v4211_v16 = vadd.f32 %v4083_v20, %v3182_v18  ;;  %v4210_v62 = vadd.f32 %v4082_v10, %v3181_v42  ;;  %v5098_v50 = vmax.f32 %v4969_v28, %v10392_v43 }
 0x2b2   : > { %v4589_v56 = vld [vmem:[#allocation2 + $0x41] sm:$0xff]  ;;  %v2479_v15 = vpop.permute.xlu1 %2478  ;;  %v2474_v32 = vpop.permute.xlu0 %2473 }
 0x2b3   : > { %v4717_v47 = vmax.f32 %v4461_v59, %v4589_v56  ;;  %4339 = vst.msk [vmem:[#allocation2 + $0x70] sm:$0xff] %vm330_vm0, %v4211_v16  ;;  %4338 = vst.msk [vmem:[#allocation2 + $0x68] sm:$0xff] %vm330_vm0, %v4210_v62  ;;  %v3055_v40 = vmul.f32 %v10239_v31, %v2474_v32  ;;  %3657 = vperm.xlu1 %9209, %v3342_v12   ;;  %3652 = vperm.xlu0 %9208, %v3341_v45   ;;  %v4462_v60 = vld [vmem:[#allocation2 + $0x48] sm:$0xff]  ;;  %v2319_v56 = vld [vmem:[%s9404_s25 + $0x1c0] sm:$0xff] }
 0x2b4   : > { %5222 = vst.msk [vmem:[#allocation2 + $0x18] sm:$0xff] %vm330_vm0, %v5098_v50  ;;  %v3056_v37 = vmul.f32 %v10239_v31, %v2479_v15  ;;  %v3344_v62 = vld [vmem:[%s9404_s25 + $0x1a1] sm:$0xff] }
 0x2b5   : > { %4845 = vst.msk [vmem:[#allocation2 + $0x40] sm:$0xff] %vm330_vm0, %v4717_v47  ;;  %v3183_v11 = vadd.f32 %v3055_v40, %v2154_v54 }
 0x2b6   : > { %v4590_v5 = vld [vmem:[#allocation2 + $0x49] sm:$0xff]  ;;  %v3503_v58 = vpop.permute.xlu1 %3502  ;;  %v3483_v36 = vpop.permute.xlu0 %3482  ;;  %v3184_v9 = vadd.f32 %v3056_v37, %v2155_v55  ;;  %v4465_v26 = vld [vmem:[#allocation2 + $0x60] sm:$0xff]  ;;  %v2031_v37 = vmul.f32 %v10227_v57, %v9916_v19 }
 0x2b7   : > { %v4718_v44 = vmax.f32 %v4462_v60, %v4590_v5  ;;  %v4084_v0 = vmul.f32 %v10262_v2, %v3503_v58  ;;  %v4080_v25 = vmul.f32 %v10262_v2, %v3483_v36  ;;  %2638 = vperm.xlu1 %9209, %v2315_v1   ;;  %v5344_v30 = vld [vmem:[#allocation2] ss:$2 sm:$0xff]  ;;  %2633 = vperm.xlu0 %9208, %v2314_v29   ;;  %v4463_v32 = vld [vmem:[#allocation2 + $0x50] sm:$0xff] }
 0x2b8   : > { %v5353_v34 = vadd.f32 %v10417_v13, %v5344_v30  ;;  %v1127_v29 = vmul.f32 %v10234_v48, %v9518_v33  ;;  %v2321_v33 = vld [vmem:[%s9404_s25 + $0x1d0] sm:$0xff] }
 0x2b9   : > { %4846 = vst.msk [vmem:[#allocation2 + $0x48] sm:$0xff] %vm330_vm0, %v4718_v44  ;;  %v4212_v61 = vadd.f32 %v4084_v0, %v3183_v11  ;;  %v4208_v41 = vadd.f32 %v4080_v25, %v3179_v14  ;;  %v2320_v0 = vld [vmem:[%s9404_s25 + $0x1c8] sm:$0xff]  ;;  %v13357_v25 = vmov 0.0  }
 0x2ba   : > { %v4466_v46 = vld [vmem:[#allocation2 + $0x68] sm:$0xff]  ;;  %v2484_v53 = vpop.permute.xlu1 %2483  ;;  %v3508_v23 = vpop.permute.xlu0 %3507  ;;  %v5355_v8 = vmax.f32 %v5353_v34, 0.0  ;;  %v4467_v47 = vld [vmem:[#allocation2 + $0x70] sm:$0xff]  ;;  %334 = vst.msk [vmem:[#allocation7 + $0x31] sm:$0xff] %vm333_vm3, %v13357_v25 }
 0x2bb   : > { %v4594_v7 = vld [vmem:[#allocation2 + $0x69] sm:$0xff]  ;;  %4340 = vst.msk [vmem:[#allocation2 + $0x78] sm:$0xff] %vm330_vm0, %v4212_v61  ;;  %4336 = vst.msk [vmem:[#allocation2 + $0x58] sm:$0xff] %vm330_vm0, %v4208_v41  ;;  %v4085_v18 = vmul.f32 %v10262_v2, %v3508_v23  ;;  %3662 = vperm.xlu1 %9209, %v3343_v63   ;;  %3642 = vperm.xlu0 %9208, %v3339_v39   ;;  %v4593_v28 = vld [vmem:[#allocation2 + $0x61] sm:$0xff]  ;;  %v3057_v14 = vmul.f32 %v10239_v31, %v2484_v53 }
 0x2bc   : > { %v5346_v42 = vld [vmem:[#allocation2 + $0x10] ss:$2 sm:$0x7f]  ;;  %v4722_v20 = vmax.f32 %v4466_v46, %v4594_v7  ;;  %v10431_v10 = vld [vmem:[#allocation2 + $0x40] sm:$0xff]  ;;  %5357 = vst.msk [vmem:[#allocation6] sm:$0xff] %vm330_vm0, %v5355_v8  ;;  %v4721_v40 = vmax.f32 %v4465_v26, %v4593_v28  ;;  %v2157_v7 = vadd.f32 %v2029_v49, %v1128_v27 }
 0x2bd   : > { %v5354_v12 = vadd.f32 %v10417_v13, %v5346_v42  ;;  %v5099_v51 = vmax.f32 %v10358_v24, %v10431_v10  ;;  %v4213_v16 = vadd.f32 %v4085_v18, %v3184_v9  ;;  %v2028_v24 = vmul.f32 %v10227_v57, %v9902_v35  ;;  %v13358_v19 = vld [vmem:[#allocation14_spill] sm:$0xff]  ;;  %336 = vst.msk [vmem:[#allocation8 + $0x9] sm:$0xf] %vm335_vm6, %v13357_v25 }
 0x2be   : > { %4850 = vst.msk [vmem:[#allocation2 + $0x68] sm:$0xff] %vm330_vm0, %v4722_v20  ;;  %v2499_v45 = vpop.permute.xlu1 %2498  ;;  %v2489_v50 = vpop.permute.xlu0 %2488  ;;  %v1130_v30 = vmul.f32 %v10234_v48, %v13358_v19  ;;  %v3345_v18 = vld [vmem:[%s9404_s25 + $0x1a9] sm:$0xff] }
 0x2bf   : > { %v5356_v22 = vmax.f32 %v5354_v12, 0.0  ;;  %5223 = vst.msk [vmem:[#allocation2 + $0x20] sm:$0xff] %vm330_vm0, %v5099_v51  ;;  %4341 = vst.msk [vmem:[#allocation2 + $0x80] sm:$0xff] %vm330_vm0, %v4213_v16  ;;  %2643 = vperm.xlu1 %9209, %v2316_v17   ;;  %3667 = vperm.xlu0 %9208, %v3344_v62   ;;  %v2156_v44 = vadd.f32 %v2028_v24, %v1127_v29  ;;  %v3060_v55 = vmul.f32 %v10239_v31, %v2499_v45  ;;  %v13359_v42 = vld [vmem:[#allocation122_spill] sm:$0xff]  ;;  %v13360_v17 = vld [vmem:[#allocation124_spill] sm:$0xff] }
 0x2c0   : > { %v4975_v59 = vld [vmem:[#allocation2 + $0x48] sm:$0xff]  ;;  %v3058_v61 = vmul.f32 %v10239_v31, %v2489_v50  ;;  %v2159_v9 = vadd.f32 %v2031_v37, %v1130_v30  ;;  %v2032_v20 = vmul.f32 %v10227_v57, %v13359_v42  ;;  %v2033_v12 = vmul.f32 %v10227_v57, %v13360_v17  ;;  %v2318_v51 = vld [vmem:[%s9404_s25 + $0x1b8] sm:$0xff] }
 0x2c1   : > { %5358 = vst.msk [vmem:[#allocation6 + $0x8] sm:$0x7f] %vm4964_vm2, %v5356_v22  ;;  %v5100_v15 = vmax.f32 %v10376_v3, %v4975_v59  ;;  %v3185_v46 = vadd.f32 %v3057_v14, %v2156_v44  ;;  %v13361_v16 = vld [vmem:[#allocation13_spill] sm:$0xff]  ;;  %v13362_v45 = vld [vmem:[#allocation16_spill] sm:$0xff]  ;;  %v13364_v30 = vld [vmem:[#allocation123_spill] sm:$0xff] }
 0x2c2   : > { %v4595_v21 = vld [vmem:[#allocation2 + $0x71] sm:$0xff]  ;;  %v2509_v54 = vpop.permute.xlu1 %2508  ;;  %v2504_v4 = vpop.permute.xlu0 %2503  ;;  %v4592_v3 = vld [vmem:[#allocation2 + $0x59] sm:$0xff]  ;;  %v1131_v62 = vmul.f32 %v10234_v48, %v13361_v16  ;;  %v1132_v50 = vmul.f32 %v10234_v48, %v13362_v45  ;;  %v3188_v22 = vadd.f32 %v3060_v55, %v2159_v9  ;;  %v3349_v55 = vld [vmem:[%s9404_s25 + $0x1c9] sm:$0xff] }
 0x2c3   : > { %v4464_v1 = vld [vmem:[#allocation2 + $0x58] sm:$0xff]  ;;  %5224 = vst.msk [vmem:[#allocation2 + $0x28] sm:$0xff] %vm330_vm0, %v5100_v15  ;;  %v4723_v35 = vmax.f32 %v4467_v47, %v4595_v21  ;;  %2658 = vperm.xlu1 %9209, %v2319_v56   ;;  %v5499_v5 = vld [vmem:[#allocation6] sm:$0xff]  ;;  %4849 = vst.msk [vmem:[#allocation2 + $0x60] sm:$0xff] %vm330_vm0, %v4721_v40  ;;  %2648 = vperm.xlu0 %9208, %v2317_v52   ;;  %v3062_v15 = vmul.f32 %v10239_v31, %v2509_v54 }
 0x2c4   : > { %v4591_v60 = vld [vmem:[#allocation2 + $0x51] sm:$0xff]  ;;  %v4720_v36 = vmax.f32 %v4464_v1, %v4592_v3  ;;  %8705 = vmatmul.mubr.msk.f32.vlgmr.msra.gmra.mxu1 %vm330_vm0, %v5499_v5  ;;  %v3348_v1 = vld [vmem:[%s9404_s25 + $0x1c1] sm:$0xff]  ;;  %v2160_v29 = vadd.f32 %v2032_v20, %v1131_v62  ;;  %v2161_v49 = vadd.f32 %v2033_v12, %v1132_v50 }
 0x2c5   : > { %v4719_v58 = vmax.f32 %v4463_v32, %v4591_v60  ;;  %v10461_v11 = vld [vmem:[#allocation2 + $0x68] sm:$0xff]  ;;  %4851 = vst.msk [vmem:[#allocation2 + $0x70] sm:$0xff] %vm330_vm0, %v4723_v35  ;;  %8707 = vmatprep.mubr.msk.f32.mxu1 %vm9299_vm1, %v13357_v25  ;;  %v4468_v34 = vld [vmem:[#allocation2 + $0x78] sm:$0xff]  ;;  %v3061_v32 = vmul.f32 %v10239_v31, %v2504_v4 }
 0x2c6   : > { %v5104_v63 = vmax.f32 %v4975_v59, %v10461_v11  ;;  %4848 = vst.msk [vmem:[#allocation2 + $0x58] sm:$0xff] %vm330_vm0, %v4720_v36  ;;  %v4596_v38 = vld [vmem:[#allocation2 + $0x79] sm:$0xff]  ;;  %v3513_v41 = vpop.permute.xlu1 %3512  ;;  %v10474_v39 = vpop.permute.xlu0 %2493  ;;  %v3186_v59 = vadd.f32 %v3058_v61, %v2157_v7  ;;  %v3346_v3 = vld [vmem:[%s9404_s25 + $0x1b1] sm:$0xff]  ;;  %v3190_v36 = vadd.f32 %v3062_v15, %v2161_v49 }
 0x2c7   : > { %4847 = vst.msk [vmem:[#allocation2 + $0x50] sm:$0xff] %vm330_vm0, %v4719_v58  ;;  %v4724_v53 = vmax.f32 %v4468_v34, %v4596_v38  ;;  %v4086_v23 = vmul.f32 %v10262_v2, %v3513_v41  ;;  %2668 = vperm.xlu1 %9209, %v2321_v33   ;;  %2663 = vperm.xlu0 %9208, %v2320_v0   ;;  %v3350_v0 = vld [vmem:[%s9404_s25 + $0x1d1] sm:$0xff]  ;;  %v13365_v41 = vld [vmem:[#allocation12_spill] sm:$0xff] }
 0x2c8   : > { %v5530_v8 = vld [vmem:[#allocation6 + $0x1] sm:$0xff]  ;;  %5228 = vst.msk [vmem:[#allocation2 + $0x48] sm:$0xff] %vm330_vm0, %v5104_v63  ;;  %v3189_v33 = vadd.f32 %v3061_v32, %v2160_v29  ;;  %v2034_v63 = vmul.f32 %v10227_v57, %v13364_v30 }
 0x2c9   : > { %8614 = vmatmul.mubr.msk.f32.vlgmr.msra.gmra.mxu0 %vm330_vm0, %v5530_v8  ;;  %4852 = vst.msk [vmem:[#allocation2 + $0x78] sm:$0xff] %vm330_vm0, %v4724_v53  ;;  %v4214_v28 = vadd.f32 %v4086_v23, %v3185_v46  ;;  %v1129_v46 = vmul.f32 %v10234_v48, %v13365_v41  ;;  %v4469_v53 = vld [vmem:[#allocation2 + $0x80] sm:$0xff]  ;;  %v3059_v8 = vmul.f32 %v10239_v31, %v10474_v39  ;;  %v2322_v62 = vld [vmem:[%s9404_s25 + $0x1d8] sm:$0xff]  ;;  %v13368_v50 = vld [vmem:[#allocation18_spill] sm:$0xff] }
 0x2ca   : > { %8616 = vmatprep.mubr.msk.f32.mxu0 %vm9299_vm1, %v13357_v25  ;;  %v3528_v56 = vpop.permute.xlu1 %3527  ;;  %v3518_v24 = vpop.permute.xlu0 %3517  ;;  %v10492_v26 = vld [vmem:[#allocation2 + $0x60] sm:$0xff] }
 0x2cb   : > { %4342 = vst.msk [vmem:[#allocation2 + $0x88] sm:$0xff] %vm330_vm0, %v4214_v28  ;;  %v4089_v52 = vmul.f32 %v10262_v2, %v3528_v56  ;;  %v4087_v47 = vmul.f32 %v10262_v2, %v3518_v24  ;;  %3672 = vperm.xlu1 %9209, %v3345_v18   ;;  %v5103_v21 = vmax.f32 %v10431_v10, %v10492_v26  ;;  %v13366_v18 = vld [vmem:[#allocation15_spill] sm:$0xff]  ;;  %v2323_v28 = vld [vmem:[%s9404_s25 + $0x1e0] sm:$0xff] }
 0x2cc   : > { %v10499_v40 = vld [vmem:[#allocation2 + $0x70] sm:$0xff]  ;;  %2653 = vperm.xlu0 %9208, %v2318_v51   ;;  %v1133_v42 = vmul.f32 %v10234_v48, %v13366_v18 }
 0x2cd   : > { %v4977_v35 = vld [vmem:[#allocation2 + $0x58] sm:$0xff]  ;;  %v4217_v60 = vadd.f32 %v4089_v52, %v3188_v22  ;;  %v4215_v4 = vadd.f32 %v4087_v47, %v3186_v59  ;;  %5227 = vst.msk [vmem:[#allocation2 + $0x40] sm:$0xff] %vm330_vm0, %v5103_v21  ;;  %v13367_v51 = vld [vmem:[#allocation126_spill] sm:$0xff]  ;;  %v1134_v22 = vmul.f32 %v10234_v48, %v13368_v50 }
 0x2ce   : > { %v4976_v54 = vld [vmem:[#allocation2 + $0x50] sm:$0xff]  ;;  %v5102_v5 = vmax.f32 %v10392_v43, %v4977_v35  ;;  %v3538_v58 = vpop.permute.xlu1 %3537  ;;  %v3533_v10 = vpop.permute.xlu0 %3532  ;;  %v13363_v43 = vld [vmem:[#allocation121_spill] sm:$0xff]  ;;  %v2162_v39 = vadd.f32 %v2034_v63, %v1133_v42  ;;  %v2035_v16 = vmul.f32 %v10227_v57, %v13367_v51 }
 0x2cf   : > { %v5101_v14 = vmax.f32 %v10381_v6, %v4976_v54  ;;  %v5105_v37 = vmax.f32 %v4976_v54, %v10499_v40  ;;  %4345 = vst.msk [vmem:[#allocation2 + $0xa0] sm:$0xff] %vm330_vm0, %v4217_v60  ;;  %4343 = vst.msk [vmem:[#allocation2 + $0x90] sm:$0xff] %vm330_vm0, %v4215_v4  ;;  %v4091_v27 = vmul.f32 %v10262_v2, %v3538_v58  ;;  %3687 = vperm.xlu1 %9209, %v3348_v1   ;;  %v3351_v54 = vld [vmem:[%s9404_s25 + $0x1d9] sm:$0xff]  ;;  %v13370_v42 = vld [vmem:[#allocation17_spill] sm:$0xff] }
 0x2d0   : > { %v4090_v6 = vmul.f32 %v10262_v2, %v3533_v10  ;;  %v2030_v44 = vmul.f32 %v10227_v57, %v13363_v43  ;;  %5226 = vst.msk [vmem:[#allocation2 + $0x38] sm:$0xff] %vm330_vm0, %v5102_v5  ;;  %3677 = vperm.xlu0 %9208, %v3346_v3   ;;  %v10519_v19 = vld [vmem:[#allocation2 + $0x78] sm:$0xff]  ;;  %v2163_v60 = vadd.f32 %v2035_v16, %v1134_v22 }
 0x2d1   : > { %5225 = vst.msk [vmem:[#allocation2 + $0x30] sm:$0xff] %vm330_vm0, %v5101_v14  ;;  %5229 = vst.msk [vmem:[#allocation2 + $0x50] sm:$0xff] %vm330_vm0, %v5105_v37  ;;  %v4219_v34 = vadd.f32 %v4091_v27, %v3190_v36  ;;  %v5106_v61 = vmax.f32 %v4977_v35, %v10519_v19  ;;  %v3347_v14 = vld [vmem:[%s9404_s25 + $0x1b9] sm:$0xff] }
 0x2d2   : > { %v4218_v38 = vadd.f32 %v4090_v6, %v3189_v33  ;;  %v4597_v23 = vld [vmem:[#allocation2 + $0x81] sm:$0xff]  ;;  %v2519_v7 = vpop.permute.xlu1 %2518  ;;  %v2514_v9 = vpop.permute.xlu0 %2513  ;;  %v2158_v12 = vadd.f32 %v2030_v44, %v1129_v46 }
 0x2d3   : > { %v4725_v20 = vmax.f32 %v4469_v53, %v4597_v23  ;;  %4347 = vst.msk [vmem:[#allocation2 + $0xb0] sm:$0xff] %vm330_vm0, %v4219_v34  ;;  %v3063_v17 = vmul.f32 %v10239_v31, %v2514_v9  ;;  %3697 = vperm.xlu1 %9209, %v3350_v0   ;;  %5230 = vst.msk [vmem:[#allocation2 + $0x58] sm:$0xff] %vm330_vm0, %v5106_v61  ;;  %v4470_v59 = vld [vmem:[#allocation2 + $0x88] sm:$0xff]  ;;  %v3064_v15 = vmul.f32 %v10239_v31, %v2519_v7  ;;  %v2327_v46 = vld [vmem:[%s9404_s25 + $0x200] sm:$0xff] }
 0x2d4   : > { %4346 = vst.msk [vmem:[#allocation2 + $0xa8] sm:$0xff] %vm330_vm0, %v4218_v38  ;;  %3692 = vperm.xlu0 %9208, %v3349_v55   ;;  %v5360_v45 = vld [vmem:[#allocation2 + $0x40] ss:$2 sm:$0xff]  ;;  %v3187_v56 = vadd.f32 %v3059_v8, %v2158_v12  ;;  %v2325_v53 = vld [vmem:[%s9404_s25 + $0x1f0] sm:$0xff] }
 0x2d5   : > { %4853 = vst.msk [vmem:[#allocation2 + $0x80] sm:$0xff] %vm330_vm0, %v4725_v20  ;;  %v5363_v47 = vadd.f32 %v10417_v13, %v5360_v45  ;;  %v3191_v1 = vadd.f32 %v3063_v17, %v2162_v39  ;;  %v3192_v36 = vadd.f32 %v3064_v15, %v2163_v60  ;;  %v2324_v44 = vld [vmem:[%s9404_s25 + $0x1e8] sm:$0xff]  ;;  %v1135_v20 = vmul.f32 %v10234_v48, %v13370_v42 }
 0x2d6   : > { %v4598_v24 = vld [vmem:[#allocation2 + $0x89] sm:$0xff]  ;;  %v3543_v32 = vpop.permute.xlu1 %3542  ;;  %v3523_v52 = vpop.permute.xlu0 %3522  ;;  %v3352_v38 = vld [vmem:[%s9404_s25 + $0x1e1] sm:$0xff] }
 0x2d7   : > { %v4726_v21 = vmax.f32 %v4470_v59, %v4598_v24  ;;  %v4092_v29 = vmul.f32 %v10262_v2, %v3543_v32  ;;  %v4088_v49 = vmul.f32 %v10262_v2, %v3523_v52  ;;  %2678 = vperm.xlu1 %9209, %v2323_v28   ;;  %v5365_v35 = vmax.f32 %v5363_v47, 0.0  ;;  %v4473_v8 = vld [vmem:[#allocation2 + $0xa0] sm:$0xff]  ;;  %v4471_v48 = vld [vmem:[#allocation2 + $0x90] sm:$0xff] }
 0x2d8   : > { %2673 = vperm.xlu0 %9208, %v2322_v62   ;;  %v13371_v62 = vld [vmem:[#allocation128_spill] sm:$0xff] }
 0x2d9   : > { %4854 = vst.msk [vmem:[#allocation2 + $0x88] sm:$0xff] %vm330_vm0, %v4726_v21  ;;  %v4220_v4 = vadd.f32 %v4092_v29, %v3191_v1  ;;  %v4216_v3 = vadd.f32 %v4088_v49, %v3187_v56  ;;  %5367 = vst.msk [vmem:[#allocation6 + $0xf] sm:$0xff] %vm330_vm0, %v5365_v35  ;;  %v10589_v56 = vld [vmem:[%s13142_s1 + $0x1] ss:$0 sm:$0xff]  ;;  %v10600_v52 = vld [vmem:[%s13142_s1] ss:$0 sm:$0xff] }
 0x2da   : > { %v2524_v37 = vpop.permute.xlu1 %2523  ;;  %v3548_v58 = vpop.permute.xlu0 %3547  ;;  %v5362_v27 = vld [vmem:[#allocation2 + $0x50] ss:$2 sm:$0x7f]  ;;  %v2328_v49 = vld [vmem:[%s9404_s25 + $0x208] sm:$0xff] }
 0x2db   : > { %v4474_v5 = vld [vmem:[#allocation2 + $0xa8] sm:$0xff]  ;;  %4348 = vst.msk [vmem:[#allocation2 + $0xb8] sm:$0xff] %vm330_vm0, %v4220_v4  ;;  %4344 = vst.msk [vmem:[#allocation2 + $0x98] sm:$0xff] %vm330_vm0, %v4216_v3  ;;  %v4093_v33 = vmul.f32 %v10262_v2, %v3548_v58  ;;  %3702 = vperm.xlu1 %9209, %v3351_v54   ;;  %v5364_v0 = vadd.f32 %v10417_v13, %v5362_v27  ;;  %v4475_v17 = vld [vmem:[#allocation2 + $0xb0] sm:$0xff]  ;;  %v3065_v59 = vmul.f32 %v10239_v31, %v2524_v37 }
 0x2dc   : > { %v4602_v10 = vld [vmem:[#allocation2 + $0xa9] sm:$0xff]  ;;  %v10553_v43 = vld [vmem:[#allocation2 + $0x80] sm:$0xff]  ;;  %3682 = vperm.xlu0 %9208, %v3347_v14  }
 0x2dd   : > { %v4730_v6 = vmax.f32 %v4474_v5, %v4602_v10  ;;  %v4601_v30 = vld [vmem:[#allocation2 + $0xa1] sm:$0xff]  ;;  %v5107_v63 = vmax.f32 %v10492_v26, %v10553_v43  ;;  %v4221_v34 = vadd.f32 %v4093_v33, %v3192_v36  ;;  %v5366_v61 = vmax.f32 %v5364_v0, 0.0  ;;  %v2329_v31 = vld [vmem:[%s9404_s25 + $0x210] sm:$0xff] }
 0x2de   : > { %v2539_v2 = vpop.permute.xlu1 %2538  ;;  %v2529_v55 = vpop.permute.xlu0 %2528  ;;  %v13369_v26 = vld [vmem:[#allocation125_spill] sm:$0xff]  ;;  %v4729_v12 = vmax.f32 %v4473_v8, %v4601_v30  ;;  %v13373_v47 = vld [vmem:[#allocation20_spill] sm:$0xff]  ;;  %v13374_v54 = vld [vmem:[#allocation22_spill] sm:$0xff] }
 0x2df   : > { %4858 = vst.msk [vmem:[#allocation2 + $0xa8] sm:$0xff] %vm330_vm0, %v4730_v6  ;;  %5231 = vst.msk [vmem:[#allocation2 + $0x60] sm:$0xff] %vm330_vm0, %v5107_v63  ;;  %2683 = vperm.xlu1 %9209, %v2324_v44   ;;  %v2036_v23 = vmul.f32 %v10227_v57, %v13369_v26  ;;  %v1136_v21 = vmul.f32 %v10600_v52, %v13373_v47  ;;  %v1138_v35 = vmul.f32 %v10600_v52, %v13374_v54  ;;  %v10617_v14 = vld [vmem:[%s13142_s1 + $0x2] ss:$0 sm:$0xff]  ;;  %v10626_v27 = vld [vmem:[%s13142_s1 + $0x3] ss:$0 sm:$0xff] }
 0x2e0   : > { %4349 = vst.msk [vmem:[#allocation2 + $0xc0] sm:$0xff] %vm330_vm0, %v4221_v34  ;;  %v10563_v41 = vld [vmem:[#allocation2 + $0x88] sm:$0xff]  ;;  %3707 = vperm.xlu0 %9208, %v3352_v38   ;;  %v5531_v9 = vld [vmem:[#allocation6 + $0x9] sm:$0xff]  ;;  %v3068_v5 = vmul.f32 %v10617_v14, %v2539_v2  ;;  %v3066_v37 = vmul.f32 %v10617_v14, %v2529_v55  ;;  %v3358_v54 = vld [vmem:[%s9404_s25 + $0x211] sm:$0xff] }
 0x2e1   : > { %5368 = vst.msk [vmem:[#allocation6 + $0x17] sm:$0x7f] %vm4964_vm2, %v5366_v61  ;;  %v5108_v7 = vmax.f32 %v10461_v11, %v10563_v41  ;;  %v5500_v18 = vld [vmem:[#allocation6 + $0x8] sm:$0xff]  ;;  %8617 = vmatmul.mubr.msk.f32.gmra.mxu0 %vm330_vm0, %v5531_v9  ;;  %v2037_v11 = vmul.f32 %v10227_v57, %v13371_v62  ;;  %v13372_v57 = vld [vmem:[#allocation130_spill] sm:$0xff]  ;;  %v2164_v1 = vadd.f32 %v2036_v23, %v1135_v20  ;;  %v13375_v38 = vld [vmem:[#allocation129_spill] sm:$0xff] }
 0x2e2   : > { %v4603_v28 = vld [vmem:[#allocation2 + $0xb1] sm:$0xff]  ;;  %8708 = vmatmul.mubr.msk.f32.gmra.mxu1 %vm330_vm0, %v5500_v18  ;;  %v10576_v51 = vpop.permute.xlu1 %2548  ;;  %v10578_v16 = vpop.permute.xlu0 %2543  ;;  %v4600_v22 = vld [vmem:[#allocation2 + $0x99] sm:$0xff]  ;;  %8619 = vmatprep.mubr.msk.f32.mxu0 %vm9299_vm1, %v13357_v25  ;;  %v2039_v24 = vmul.f32 %v10589_v56, %v13372_v57  ;;  %v3353_v34 = vld [vmem:[%s9404_s25 + $0x1e9] sm:$0xff]  ;;  %v2040_v2 = vmul.f32 %v10589_v56, %v13375_v38 }
 0x2e3   : > { %v4472_v39 = vld [vmem:[#allocation2 + $0x98] sm:$0xff]  ;;  %5232 = vst.msk [vmem:[#allocation2 + $0x68] sm:$0xff] %vm330_vm0, %v5108_v7  ;;  %v4731_v45 = vmax.f32 %v4475_v17, %v4603_v28  ;;  %2698 = vperm.xlu1 %9209, %v2327_v46   ;;  %4857 = vst.msk [vmem:[#allocation2 + $0xa0] sm:$0xff] %vm330_vm0, %v4729_v12  ;;  %8710 = vmatprep.mubr.msk.f32.mxu1 %vm9299_vm1, %v13357_v25  ;;  %v3193_v36 = vadd.f32 %v3065_v59, %v2164_v1 }
 0x2e4   : > { %v4599_v50 = vld [vmem:[#allocation2 + $0x91] sm:$0xff]  ;;  %v4728_v32 = vmax.f32 %v4472_v39, %v4600_v22  ;;  %2688 = vperm.xlu0 %9208, %v2325_v53   ;;  %v2165_v30 = vadd.f32 %v2037_v11, %v1136_v21  ;;  %v2167_v63 = vadd.f32 %v2039_v24, %v1138_v35  ;;  %v13376_v55 = vld [vmem:[#allocation132_spill] sm:$0xff]  ;;  %v13377_v53 = vld [vmem:[#allocation21_spill] sm:$0xff]  ;;  %v3070_v17 = vmul.f32 %v10617_v14, %v10576_v51 }
 0x2e5   : > { %v4727_v15 = vmax.f32 %v4471_v48, %v4599_v50  ;;  %4859 = vst.msk [vmem:[#allocation2 + $0xb0] sm:$0xff] %vm330_vm0, %v4731_v45  ;;  %v4476_v4 = vld [vmem:[#allocation2 + $0xb8] sm:$0xff]  ;;  %v2041_v61 = vmul.f32 %v10589_v56, %v13376_v55  ;;  %v1139_v26 = vmul.f32 %v10600_v52, %v13377_v53  ;;  %v3069_v12 = vmul.f32 %v10617_v14, %v10578_v16  ;;  %v3356_v45 = vld [vmem:[%s9404_s25 + $0x201] sm:$0xff] }
 0x2e6   : > { %v10604_v29 = vld [vmem:[#allocation2 + $0xa8] sm:$0xff]  ;;  %4856 = vst.msk [vmem:[#allocation2 + $0x98] sm:$0xff] %vm330_vm0, %v4728_v32  ;;  %v3553_v58 = vpop.permute.xlu1 %3552  ;;  %v10621_v10 = vpop.permute.xlu0 %2533  ;;  %v2326_v46 = vld [vmem:[%s9404_s25 + $0x1f8] sm:$0xff]  ;;  %v3196_v7 = vadd.f32 %v3068_v5, %v2167_v63  ;;  %v3194_v9 = vadd.f32 %v3066_v37, %v2165_v30 }
 0x2e7   : > { %v5112_v60 = vmax.f32 %v10563_v41, %v10604_v29  ;;  %4855 = vst.msk [vmem:[#allocation2 + $0x90] sm:$0xff] %vm330_vm0, %v4727_v15  ;;  %v4604_v3 = vld [vmem:[#allocation2 + $0xb9] sm:$0xff]  ;;  %v4094_v6 = vmul.f32 %v10626_v27, %v3553_v58  ;;  %2708 = vperm.xlu1 %9209, %v2329_v31   ;;  %v2168_v48 = vadd.f32 %v2040_v2, %v1139_v26  ;;  %v3354_v57 = vld [vmem:[%s9404_s25 + $0x1f1] sm:$0xff]  ;;  %v3357_v37 = vld [vmem:[%s9404_s25 + $0x209] sm:$0xff] }
 0x2e8   : > { %v4732_v33 = vmax.f32 %v4476_v4, %v4604_v3  ;;  %v5532_v44 = vld [vmem:[#allocation6 + $0x11] sm:$0xff]  ;;  %2703 = vperm.xlu0 %9208, %v2328_v49   ;;  %v2330_v26 = vld [vmem:[%s9404_s25 + $0x218] sm:$0xff] }
 0x2e9   : > { %v5501_v0 = vld [vmem:[#allocation6 + $0x10] sm:$0xff]  ;;  %5236 = vst.msk [vmem:[#allocation2 + $0x88] sm:$0xff] %vm330_vm0, %v5112_v60  ;;  %8620 = vmatmul.mubr.msk.f32.gmra.mxu0 %vm330_vm0, %v5532_v44  ;;  %v4222_v41 = vadd.f32 %v4094_v6, %v3193_v36  ;;  %v3197_v21 = vadd.f32 %v3069_v12, %v2168_v48  ;;  %v13380_v60 = vld [vmem:[#allocation131_spill] sm:$0xff] }
 0x2ea   : > { %4860 = vst.msk [vmem:[#allocation2 + $0xb8] sm:$0xff] %vm330_vm0, %v4732_v33  ;;  %8711 = vmatmul.mubr.msk.f32.gmra.mxu1 %vm330_vm0, %v5501_v0  ;;  %8622 = vmatprep.mubr.msk.f32.mxu0 %vm9299_vm1, %v13357_v25  ;;  %v13378_v23 = vld [vmem:[#allocation24_spill] sm:$0xff]  ;;  %v3568_v18 = vpop.permute.xlu1 %3567  ;;  %v3558_v42 = vpop.permute.xlu0 %3557  ;;  %v2042_v4 = vmul.f32 %v10589_v56, %v13380_v60  ;;  %v13381_v36 = vld [vmem:[#allocation19_spill] sm:$0xff]  ;;  %v3067_v0 = vmul.f32 %v10617_v14, %v10621_v10 }
 0x2eb   : > { %v1140_v8 = vmul.f32 %v10600_v52, %v13378_v23  ;;  %8713 = vmatprep.mubr.msk.f32.mxu1 %vm9299_vm1, %v13357_v25  ;;  %v10647_v20 = vld [vmem:[#allocation2 + $0xa0] sm:$0xff]  ;;  %4350 = vst.msk [vmem:[#allocation2 + $0xc8] sm:$0xff] %vm330_vm0, %v4222_v41  ;;  %v4097_v28 = vmul.f32 %v10626_v27, %v3568_v18  ;;  %v4095_v39 = vmul.f32 %v10626_v27, %v3558_v42 }
 0x2ec   : > { %3712 = vperm.xlu1 %9209, %v3353_v34   ;;  %v10656_v62 = vld [vmem:[#allocation2 + $0xb0] sm:$0xff]  ;;  %v5111_v11 = vmax.f32 %v10553_v43, %v10647_v20  ;;  %2693 = vperm.xlu0 %9208, %v2326_v46   ;;  %v1137_v33 = vmul.f32 %v10600_v52, %v13381_v36  ;;  %v4477_v6 = vld [vmem:[#allocation2 + $0xc0] sm:$0xff] }
 0x2ed   : > { %v2169_v51 = vadd.f32 %v2041_v61, %v1140_v8  ;;  %v4985_v22 = vld [vmem:[#allocation2 + $0x98] sm:$0xff]  ;;  %v4225_v59 = vadd.f32 %v4097_v28, %v3196_v7  ;;  %v4223_v16 = vadd.f32 %v4095_v39, %v3194_v9  ;;  %v2331_v41 = vld [vmem:[%s9404_s25 + $0x220] sm:$0xff]  ;;  %v13383_v46 = vld [vmem:[#allocation134_spill] sm:$0xff] }
 0x2ee   : > { %v4984_v50 = vld [vmem:[#allocation2 + $0x90] sm:$0xff]  ;;  %v5110_v15 = vmax.f32 %v10519_v19, %v4985_v22  ;;  %5235 = vst.msk [vmem:[#allocation2 + $0x80] sm:$0xff] %vm330_vm0, %v5111_v11  ;;  %v3578_v31 = vpop.permute.xlu1 %3577  ;;  %v3573_v43 = vpop.permute.xlu0 %3572  ;;  %v2043_v53 = vmul.f32 %v10589_v56, %v13383_v46 }
 0x2ef   : > { %v5109_v24 = vmax.f32 %v10499_v40, %v4984_v50  ;;  %v5113_v32 = vmax.f32 %v4984_v50, %v10656_v62  ;;  %v3198_v47 = vadd.f32 %v3070_v17, %v2169_v51  ;;  %4353 = vst.msk [vmem:[#allocation2 + $0xe0] sm:$0xff] %vm330_vm0, %v4225_v59  ;;  %4351 = vst.msk [vmem:[#allocation2 + $0xd0] sm:$0xff] %vm330_vm0, %v4223_v16  ;;  %v13379_v19 = vld [vmem:[#allocation127_spill] sm:$0xff]  ;;  %v13384_v8 = vld [vmem:[#allocation26_spill] sm:$0xff] }
 0x2f0   : > { %v4099_v1 = vmul.f32 %v10626_v27, %v3578_v31  ;;  %v4098_v40 = vmul.f32 %v10626_v27, %v3573_v43  ;;  %3727 = vperm.xlu1 %9209, %v3356_v45   ;;  %v2038_v49 = vmul.f32 %v10589_v56, %v13379_v19  ;;  %5234 = vst.msk [vmem:[#allocation2 + $0x78] sm:$0xff] %vm330_vm0, %v5110_v15  ;;  %v13382_v34 = vld [vmem:[#allocation23_spill] sm:$0xff] }
 0x2f1   : > { %5233 = vst.msk [vmem:[#allocation2 + $0x70] sm:$0xff] %vm330_vm0, %v5109_v24  ;;  %5237 = vst.msk [vmem:[#allocation2 + $0x90] sm:$0xff] %vm330_vm0, %v5113_v32  ;;  %3717 = vperm.xlu0 %9208, %v3354_v57   ;;  %v10676_v35 = vld [vmem:[#allocation2 + $0xb8] sm:$0xff]  ;;  %v1141_v38 = vmul.f32 %v10600_v52, %v13382_v34  ;;  %v1142_v7 = vmul.f32 %v10600_v52, %v13384_v8  ;;  %v2333_v50 = vld [vmem:[%s9404_s25 + $0x230] sm:$0xff] }
 0x2f2   : > { %v4227_v3 = vadd.f32 %v4099_v1, %v3198_v47  ;;  %v4226_v5 = vadd.f32 %v4098_v40, %v3197_v21  ;;  %v5114_v58 = vmax.f32 %v4985_v22, %v10676_v35  ;;  %v4605_v44 = vld [vmem:[#allocation2 + $0xc1] sm:$0xff]  ;;  %v2559_v30 = vpop.permute.xlu1 %2558  ;;  %v2554_v63 = vpop.permute.xlu0 %2553  ;;  %v2166_v61 = vadd.f32 %v2038_v49, %v1137_v33 }
 0x2f3   : > { %v4733_v2 = vmax.f32 %v4477_v6, %v4605_v44  ;;  %v3071_v55 = vmul.f32 %v10617_v14, %v2554_v63  ;;  %v2170_v10 = vadd.f32 %v2042_v4, %v1141_v38  ;;  %v4478_v9 = vld [vmem:[#allocation2 + $0xc8] sm:$0xff]  ;;  %v3072_v17 = vmul.f32 %v10617_v14, %v2559_v30  ;;  %v3355_v6 = vld [vmem:[%s9404_s25 + $0x1f9] sm:$0xff] }
 0x2f4   : > { %4355 = vst.msk [vmem:[#allocation2 + $0xf0] sm:$0xff] %vm330_vm0, %v4227_v3  ;;  %4354 = vst.msk [vmem:[#allocation2 + $0xe8] sm:$0xff] %vm330_vm0, %v4226_v5  ;;  %3737 = vperm.xlu1 %9209, %v3358_v54   ;;  %v3195_v18 = vadd.f32 %v3067_v0, %v2166_v61  ;;  %v2171_v59 = vadd.f32 %v2043_v53, %v1142_v7  ;;  %v2332_v24 = vld [vmem:[%s9404_s25 + $0x228] sm:$0xff]  ;;  %v2335_v5 = vld [vmem:[%s9404_s25 + $0x240] sm:$0xff] }
 0x2f5   : > { %5238 = vst.msk [vmem:[#allocation2 + $0x98] sm:$0xff] %vm330_vm0, %v5114_v58  ;;  %3732 = vperm.xlu0 %9208, %v3357_v37   ;;  %4861 = vst.msk [vmem:[#allocation2 + $0xc0] sm:$0xff] %vm330_vm0, %v4733_v2  ;;  %v5370_v23 = vld [vmem:[#allocation2 + $0x80] ss:$2 sm:$0xff]  ;;  %v3199_v45 = vadd.f32 %v3071_v55, %v2170_v10 }
 0x2f6   : > { %v4606_v42 = vld [vmem:[#allocation2 + $0xc9] sm:$0xff]  ;;  %v3583_v12 = vpop.permute.xlu1 %3582  ;;  %v3563_v28 = vpop.permute.xlu0 %3562  ;;  %v5373_v39 = vadd.f32 %v10417_v13, %v5370_v23  ;;  %v3200_v47 = vadd.f32 %v3072_v17, %v2171_v59  ;;  %v4481_v0 = vld [vmem:[#allocation2 + $0xe0] sm:$0xff] }
 0x2f7   : > { %v4734_v11 = vmax.f32 %v4478_v9, %v4606_v42  ;;  %v4100_v48 = vmul.f32 %v10626_v27, %v3583_v12  ;;  %v4096_v51 = vmul.f32 %v10626_v27, %v3563_v28  ;;  %v2336_v49 = vld [vmem:[%s9404_s25 + $0x248] sm:$0xff]  ;;  %v4479_v8 = vld [vmem:[#allocation2 + $0xd0] sm:$0xff] }
 0x2f8   : > { %2718 = vperm.xlu1 %9209, %v2331_v41   ;;  %v5375_v22 = vmax.f32 %v5373_v39, 0.0  ;;  %v13385_v44 = vld [vmem:[#allocation133_spill] sm:$0xff]  ;;  %v13388_v42 = vld [vmem:[#allocation138_spill] sm:$0xff]  ;;  %v3359_v39 = vld [vmem:[%s9404_s25 + $0x219] sm:$0xff] }
 0x2f9   : > { %2713 = vperm.xlu0 %9208, %v2330_v26   ;;  %4862 = vst.msk [vmem:[#allocation2 + $0xc8] sm:$0xff] %vm330_vm0, %v4734_v11  ;;  %v4228_v16 = vadd.f32 %v4100_v48, %v3199_v45  ;;  %v4224_v57 = vadd.f32 %v4096_v51, %v3195_v18  ;;  %v13386_v38 = vld [vmem:[#allocation25_spill] sm:$0xff]  ;;  %v13387_v26 = vld [vmem:[#allocation136_spill] sm:$0xff]  ;;  %v2047_v17 = vmul.f32 %v10589_v56, %v13388_v42 }
 0x2fa   : > { %v2564_v32 = vpop.permute.xlu1 %2563  ;;  %v3588_v31 = vpop.permute.xlu0 %3587  ;;  %5377 = vst.msk [vmem:[#allocation6 + $0x1e] sm:$0xff] %vm330_vm0, %v5375_v22  ;;  %v1143_v2 = vmul.f32 %v10600_v52, %v13386_v38  ;;  %v2045_v23 = vmul.f32 %v10589_v56, %v13387_v26  ;;  %v13389_v11 = vld [vmem:[#allocation28_spill] sm:$0xff]  ;;  %v13390_v22 = vld [vmem:[#allocation30_spill] sm:$0xff] }
 0x2fb   : > { %v4482_v15 = vld [vmem:[#allocation2 + $0xe8] sm:$0xff]  ;;  %4356 = vst.msk [vmem:[#allocation2 + $0xf8] sm:$0xff] %vm330_vm0, %v4228_v16  ;;  %4352 = vst.msk [vmem:[#allocation2 + $0xd8] sm:$0xff] %vm330_vm0, %v4224_v57  ;;  %v4101_v21 = vmul.f32 %v10626_v27, %v3588_v31  ;;  %v4483_v55 = vld [vmem:[#allocation2 + $0xf0] sm:$0xff]  ;;  %v3073_v18 = vmul.f32 %v10617_v14, %v2564_v32  ;;  %v1144_v45 = vmul.f32 %v10600_v52, %v13389_v11 }
 0x2fc   : > { %v4610_v43 = vld [vmem:[#allocation2 + $0xe9] sm:$0xff]  ;;  %2728 = vperm.xlu1 %9209, %v2333_v50   ;;  %v10710_v19 = vld [vmem:[#allocation2 + $0xc0] sm:$0xff]  ;;  %v2334_v50 = vld [vmem:[%s9404_s25 + $0x238] sm:$0xff]  ;;  %v1146_v59 = vmul.f32 %v10600_v52, %v13390_v22 }
 0x2fd   : > { %v5372_v1 = vld [vmem:[#allocation2 + $0x90] ss:$2 sm:$0x7f]  ;;  %v4738_v40 = vmax.f32 %v4482_v15, %v4610_v43  ;;  %2723 = vperm.xlu0 %9208, %v2332_v24   ;;  %v4609_v60 = vld [vmem:[#allocation2 + $0xe1] sm:$0xff]  ;;  %v5115_v4 = vmax.f32 %v10647_v20, %v10710_v19  ;;  %v4229_v3 = vadd.f32 %v4101_v21, %v3200_v47  ;;  %v2044_v20 = vmul.f32 %v10589_v56, %v13385_v44 }
 0x2fe   : > { %v5374_v54 = vadd.f32 %v10417_v13, %v5372_v1  ;;  %v2579_v37 = vpop.permute.xlu1 %2578  ;;  %v2569_v58 = vpop.permute.xlu0 %2568  ;;  %v2337_v13 = vld [vmem:[%s9404_s25 + $0x250] sm:$0xff]  ;;  %v4737_v61 = vmax.f32 %v4481_v0, %v4609_v60  ;;  %v2175_v60 = vadd.f32 %v2047_v17, %v1146_v59  ;;  %v13394_v44 = vld [vmem:[#allocation32_spill] sm:$0xff] }
 0x2ff   : > { %4866 = vst.msk [vmem:[#allocation2 + $0xe8] sm:$0xff] %vm330_vm0, %v4738_v40  ;;  %5239 = vst.msk [vmem:[#allocation2 + $0xa0] sm:$0xff] %vm330_vm0, %v5115_v4  ;;  %v2172_v48 = vadd.f32 %v2044_v20, %v1143_v2  ;;  %v3076_v15 = vmul.f32 %v10617_v14, %v2579_v37  ;;  %v3074_v32 = vmul.f32 %v10617_v14, %v2569_v58  ;;  %v3361_v4 = vld [vmem:[%s9404_s25 + $0x229] sm:$0xff]  ;;  %v13392_v37 = vld [vmem:[#allocation140_spill] sm:$0xff] }
 0x300   : > { %v5376_v36 = vmax.f32 %v5374_v54, 0.0  ;;  %4357 = vst.msk [vmem:[#allocation2 + $0x100] sm:$0xff] %vm330_vm0, %v4229_v3  ;;  %2743 = vperm.xlu1 %9209, %v2336_v49   ;;  %v4991_v33 = vld [vmem:[#allocation2 + $0xc8] sm:$0xff]  ;;  %v2173_v54 = vadd.f32 %v2045_v23, %v1144_v45  ;;  %v2049_v58 = vmul.f32 %v10589_v56, %v13392_v37  ;;  %v1148_v20 = vmul.f32 %v10600_v52, %v13394_v44  ;;  %v2339_v37 = vld [vmem:[%s9404_s25 + $0x260] sm:$0xff] }
 0x301   : > { %2738 = vperm.xlu0 %9208, %v2335_v5   ;;  %v5116_v30 = vmax.f32 %v10604_v29, %v4991_v33  ;;  %v5533_v63 = vld [vmem:[#allocation6 + $0x19] sm:$0xff]  ;;  %v3201_v47 = vadd.f32 %v3073_v18, %v2172_v48  ;;  %v3204_v0 = vadd.f32 %v3076_v15, %v2175_v60  ;;  %v3364_v23 = vld [vmem:[%s9404_s25 + $0x241] sm:$0xff]  ;;  %v3362_v18 = vld [vmem:[%s9404_s25 + $0x231] sm:$0xff] }
 0x302   : > { %5378 = vst.msk [vmem:[#allocation6 + $0x26] sm:$0x7f] %vm4964_vm2, %v5376_v36  ;;  %v5502_v34 = vld [vmem:[#allocation6 + $0x18] sm:$0xff]  ;;  %v4611_v41 = vld [vmem:[#allocation2 + $0xf1] sm:$0xff]  ;;  %8623 = vmatmul.mubr.msk.f32.gmra.mxu0 %vm330_vm0, %v5533_v63  ;;  %v2589_v46 = vpop.permute.xlu1 %2588  ;;  %v2584_v53 = vpop.permute.xlu0 %2583  ;;  %v4608_v9 = vld [vmem:[#allocation2 + $0xd9] sm:$0xff] }
 0x303   : > { %v4480_v10 = vld [vmem:[#allocation2 + $0xd8] sm:$0xff]  ;;  %8714 = vmatmul.mubr.msk.f32.gmra.mxu1 %vm330_vm0, %v5502_v34  ;;  %5240 = vst.msk [vmem:[#allocation2 + $0xa8] sm:$0xff] %vm330_vm0, %v5116_v30  ;;  %v4739_v29 = vmax.f32 %v4483_v55, %v4611_v41  ;;  %8625 = vmatprep.mubr.msk.f32.mxu0 %vm9299_vm1, %v13357_v25  ;;  %4865 = vst.msk [vmem:[#allocation2 + $0xe0] sm:$0xff] %vm330_vm0, %v4737_v61  ;;  %v13391_v3 = vld [vmem:[#allocation137_spill] sm:$0xff]  ;;  %v3202_v30 = vadd.f32 %v3074_v32, %v2173_v54 }
 0x304   : > { %v4607_v7 = vld [vmem:[#allocation2 + $0xd1] sm:$0xff]  ;;  %3722 = vperm.xlu1 %9209, %v3355_v6   ;;  %v4736_v28 = vmax.f32 %v4480_v10, %v4608_v9  ;;  %8716 = vmatprep.mubr.msk.f32.mxu1 %vm9299_vm1, %v13357_v25  ;;  %v2048_v5 = vmul.f32 %v10589_v56, %v13391_v3  ;;  %v13393_v6 = vld [vmem:[#allocation29_spill] sm:$0xff]  ;;  %v3078_v2 = vmul.f32 %v10617_v14, %v2589_v46 }
 0x305   : > { %v4735_v12 = vmax.f32 %v4479_v8, %v4607_v7  ;;  %2748 = vperm.xlu0 %9208, %v2337_v13   ;;  %4867 = vst.msk [vmem:[#allocation2 + $0xf0] sm:$0xff] %vm330_vm0, %v4739_v29  ;;  %v4484_v57 = vld [vmem:[#allocation2 + $0xf8] sm:$0xff]  ;;  %v1147_v13 = vmul.f32 %v10600_v52, %v13393_v6  ;;  %v3077_v55 = vmul.f32 %v10617_v14, %v2584_v53 }
 0x306   : > { %v10744_v51 = vld [vmem:[#allocation2 + $0xe8] sm:$0xff]  ;;  %4864 = vst.msk [vmem:[#allocation2 + $0xd8] sm:$0xff] %vm330_vm0, %v4736_v28  ;;  %v3593_v31 = vpop.permute.xlu1 %3592  ;;  %v10755_v43 = vpop.permute.xlu0 %2573  ;;  %v2177_v8 = vadd.f32 %v2049_v58, %v1148_v20  ;;  %v13396_v15 = vld [vmem:[#allocation135_spill] sm:$0xff] }
 0x307   : > { %v5120_v16 = vmax.f32 %v4991_v33, %v10744_v51  ;;  %4863 = vst.msk [vmem:[#allocation2 + $0xd0] sm:$0xff] %vm330_vm0, %v4735_v12  ;;  %v4612_v24 = vld [vmem:[#allocation2 + $0xf9] sm:$0xff]  ;;  %v4102_v1 = vmul.f32 %v10626_v27, %v3593_v31  ;;  %v3360_v33 = vld [vmem:[%s9404_s25 + $0x221] sm:$0xff]  ;;  %v2176_v29 = vadd.f32 %v2048_v5, %v1147_v13  ;;  %v2046_v32 = vmul.f32 %v10589_v56, %v13396_v15  ;;  %v13399_v13 = vld [vmem:[#allocation142_spill] sm:$0xff] }
 0x308   : > { %v4740_v21 = vmax.f32 %v4484_v57, %v4612_v24  ;;  %3742 = vperm.xlu1 %9209, %v3359_v39   ;;  %v3206_v39 = vadd.f32 %v3078_v2, %v2177_v8  ;;  %v3365_v57 = vld [vmem:[%s9404_s25 + $0x249] sm:$0xff]  ;;  %v4485_v31 = vld [vmem:[#allocation2 + $0x100] sm:$0xff]  ;;  %v3075_v5 = vmul.f32 %v10617_v14, %v10755_v43  ;;  %v2051_v44 = vmul.f32 %v10589_v56, %v13399_v13 }
 0x309   : > { %v5534_v40 = vld [vmem:[#allocation6 + $0x21] sm:$0xff]  ;;  %5244 = vst.msk [vmem:[#allocation2 + $0xc8] sm:$0xff] %vm330_vm0, %v5120_v16  ;;  %2733 = vperm.xlu0 %9208, %v2334_v50   ;;  %v4230_v36 = vadd.f32 %v4102_v1, %v3201_v47  ;;  %v3205_v11 = vadd.f32 %v3077_v55, %v2176_v29 }
 0x30a   : > { %v5503_v49 = vld [vmem:[#allocation6 + $0x20] sm:$0xff]  ;;  %8626 = vmatmul.mubr.msk.f32.gmra.mxu0 %vm330_vm0, %v5534_v40  ;;  %4868 = vst.msk [vmem:[#allocation2 + $0xf8] sm:$0xff] %vm330_vm0, %v4740_v21  ;;  %v3608_v63 = vpop.permute.xlu1 %3607  ;;  %v3598_v34 = vpop.permute.xlu0 %3597  ;;  %v10776_v38 = vld [vmem:[#allocation2 + $0xe0] sm:$0xff] }
 0x30b   : > { %8717 = vmatmul.mubr.msk.f32.gmra.mxu1 %vm330_vm0, %v5503_v49  ;;  %8628 = vmatprep.mubr.msk.f32.mxu0 %vm9299_vm1, %v13357_v25  ;;  %4358 = vst.msk [vmem:[#allocation2 + $0x108] sm:$0xff] %vm330_vm0, %v4230_v36  ;;  %v4105_v61 = vmul.f32 %v10626_v27, %v3608_v63  ;;  %v4103_v41 = vmul.f32 %v10626_v27, %v3598_v34  ;;  %v13395_v50 = vld [vmem:[#allocation139_spill] sm:$0xff]  ;;  %v10827_v63 = vld [vmem:[%s13146_s5] ss:$0 sm:$0xff]  ;;  %v13400_v34 = vld [vmem:[#allocation34_spill] sm:$0xff] }
 0x30c   : > { %8719 = vmatprep.mubr.msk.f32.mxu1 %vm9299_vm1, %v13357_v25  ;;  %3752 = vperm.xlu1 %9209, %v3361_v4   ;;  %v10783_v10 = vld [vmem:[#allocation2 + $0xf0] sm:$0xff]  ;;  %v5119_v26 = vmax.f32 %v10710_v19, %v10776_v38  ;;  %v2050_v22 = vmul.f32 %v10589_v56, %v13395_v50  ;;  %v2338_v36 = vld [vmem:[%s9404_s25 + $0x258] sm:$0xff]  ;;  %v1150_v2 = vmul.f32 %v10600_v52, %v13400_v34  ;;  %v2340_v50 = vld [vmem:[%s9404_s25 + $0x268] sm:$0xff] }
 0x30d   : > { %3747 = vperm.xlu0 %9208, %v3360_v33   ;;  %v4993_v7 = vld [vmem:[#allocation2 + $0xd8] sm:$0xff]  ;;  %v4233_v9 = vadd.f32 %v4105_v61, %v3204_v0  ;;  %v4231_v53 = vadd.f32 %v4103_v41, %v3202_v30 }
 0x30e   : > { %v4992_v46 = vld [vmem:[#allocation2 + $0xd0] sm:$0xff]  ;;  %v5118_v17 = vmax.f32 %v10676_v35, %v4993_v7  ;;  %5243 = vst.msk [vmem:[#allocation2 + $0xc0] sm:$0xff] %vm330_vm0, %v5119_v26  ;;  %v3618_v28 = vpop.permute.xlu1 %3617  ;;  %v3613_v19 = vpop.permute.xlu0 %3612 }
 0x30f   : > { %v5117_v42 = vmax.f32 %v10656_v62, %v4992_v46  ;;  %v5121_v12 = vmax.f32 %v4992_v46, %v10783_v10  ;;  %4361 = vst.msk [vmem:[#allocation2 + $0x120] sm:$0xff] %vm330_vm0, %v4233_v9  ;;  %4359 = vst.msk [vmem:[#allocation2 + $0x110] sm:$0xff] %vm330_vm0, %v4231_v53  ;;  %v4107_v45 = vmul.f32 %v10626_v27, %v3618_v28  ;;  %v3366_v35 = vld [vmem:[%s9404_s25 + $0x251] sm:$0xff]  ;;  %v3367_v46 = vld [vmem:[%s9404_s25 + $0x259] sm:$0xff] }
 0x310   : > { %v4106_v62 = vmul.f32 %v10626_v27, %v3613_v19  ;;  %3767 = vperm.xlu1 %9209, %v3364_v23   ;;  %5242 = vst.msk [vmem:[#allocation2 + $0xb8] sm:$0xff] %vm330_vm0, %v5118_v17  ;;  %v13397_v40 = vld [vmem:[#allocation31_spill] sm:$0xff] }
 0x311   : > { %5241 = vst.msk [vmem:[#allocation2 + $0xb0] sm:$0xff] %vm330_vm0, %v5117_v42  ;;  %5245 = vst.msk [vmem:[#allocation2 + $0xd0] sm:$0xff] %vm330_vm0, %v5121_v12  ;;  %3757 = vperm.xlu0 %9208, %v3362_v18   ;;  %v10801_v48 = vld [vmem:[#allocation2 + $0xf8] sm:$0xff]  ;;  %v4235_v59 = vadd.f32 %v4107_v45, %v3206_v39  ;;  %v1149_v49 = vmul.f32 %v10600_v52, %v13397_v40  ;;  %v2179_v18 = vadd.f32 %v2051_v44, %v1150_v2  ;;  %v13401_v40 = vld [vmem:[#allocation141_spill] sm:$0xff] }
 0x312   : > { %v4234_v16 = vadd.f32 %v4106_v62, %v3205_v11  ;;  %v5122_v24 = vmax.f32 %v4993_v7, %v10801_v48  ;;  %v4613_v47 = vld [vmem:[#allocation2 + $0x101] sm:$0xff]  ;;  %v2599_v21 = vpop.permute.xlu1 %2598  ;;  %v2594_v1 = vpop.permute.xlu0 %2593  ;;  %v13398_v4 = vld [vmem:[#allocation27_spill] sm:$0xff] }
 0x313   : > { %v4741_v54 = vmax.f32 %v4485_v31, %v4613_v47  ;;  %4363 = vst.msk [vmem:[#allocation2 + $0x130] sm:$0xff] %vm330_vm0, %v4235_v59  ;;  %v3079_v60 = vmul.f32 %v10617_v14, %v2594_v1  ;;  %v1145_v3 = vmul.f32 %v10600_v52, %v13398_v4  ;;  %v2178_v58 = vadd.f32 %v2050_v22, %v1149_v49  ;;  %v4486_v20 = vld [vmem:[#allocation2 + $0x108] sm:$0xff]  ;;  %v3363_v53 = vld [vmem:[%s9404_s25 + $0x239] sm:$0xff]  ;;  %v2341_v1 = vld [vmem:[%s9404_s25 + $0x270] sm:$0xff] }
 0x314   : > { %4362 = vst.msk [vmem:[#allocation2 + $0x128] sm:$0xff] %vm330_vm0, %v4234_v16  ;;  %3777 = vperm.xlu1 %9209, %v3366_v35   ;;  %5246 = vst.msk [vmem:[#allocation2 + $0xd8] sm:$0xff] %vm330_vm0, %v5122_v24  ;;  %v3080_v29 = vmul.f32 %v10617_v14, %v2599_v21  ;;  %v2343_v21 = vld [vmem:[%s9404_s25 + $0x280] sm:$0xff]  ;;  %v2345_v2 = vld [vmem:[%s9404_s25 + $0x290] sm:$0xff] }
 0x315   : > { %3772 = vperm.xlu0 %9208, %v3365_v57   ;;  %4869 = vst.msk [vmem:[#allocation2 + $0x100] sm:$0xff] %vm330_vm0, %v4741_v54  ;;  %v5380_v33 = vld [vmem:[#allocation2 + $0xc0] ss:$2 sm:$0xff]  ;;  %v2174_v6 = vadd.f32 %v2046_v32, %v1145_v3  ;;  %v3207_v61 = vadd.f32 %v3079_v60, %v2178_v58 }
 0x316   : > { %v4614_v0 = vld [vmem:[#allocation2 + $0x109] sm:$0xff]  ;;  %v3623_v30 = vpop.permute.xlu1 %3622  ;;  %v5383_v43 = vadd.f32 %v10827_v63, %v5380_v33  ;;  %v3603_v26 = vpop.permute.xlu0 %3602  ;;  %v3208_v45 = vadd.f32 %v3080_v29, %v2179_v18  ;;  %v3368_v57 = vld [vmem:[%s9404_s25 + $0x261] sm:$0xff] }
 0x317   : > { %v4742_v55 = vmax.f32 %v4486_v20, %v4614_v0  ;;  %v4108_v41 = vmul.f32 %v10626_v27, %v3623_v30  ;;  %v3203_v23 = vadd.f32 %v3075_v5, %v2174_v6  ;;  %v4104_v8 = vmul.f32 %v10626_v27, %v3603_v26  ;;  %v4489_v49 = vld [vmem:[#allocation2 + $0x120] sm:$0xff]  ;;  %v4487_v58 = vld [vmem:[#allocation2 + $0x110] sm:$0xff] }
 0x318   : > { %2758 = vperm.xlu1 %9209, %v2339_v37   ;;  %v5385_v7 = vmax.f32 %v5383_v43, 0.0  ;;  %v13402_v33 = vld [vmem:[#allocation33_spill] sm:$0xff]  ;;  %v13404_v29 = vld [vmem:[#allocation36_spill] sm:$0xff]  ;;  %v13406_v18 = vld [vmem:[#allocation38_spill] sm:$0xff] }
 0x319   : > { %2753 = vperm.xlu0 %9208, %v2338_v36   ;;  %4870 = vst.msk [vmem:[#allocation2 + $0x108] sm:$0xff] %vm330_vm0, %v4742_v55  ;;  %v4236_v9 = vadd.f32 %v4108_v41, %v3207_v61  ;;  %v4232_v17 = vadd.f32 %v4104_v8, %v3203_v23  ;;  %v1151_v6 = vmul.f32 %v10600_v52, %v13402_v33  ;;  %v13403_v61 = vld [vmem:[#allocation146_spill] sm:$0xff] }
 0x31a   : > { %v2604_v12 = vpop.permute.xlu1 %2603  ;;  %5387 = vst.msk [vmem:[#allocation6 + $0x2d] sm:$0xff] %vm330_vm0, %v5385_v7  ;;  %v3628_v19 = vpop.permute.xlu0 %3627  ;;  %v4491_v3 = vld [vmem:[#allocation2 + $0x130] sm:$0xff]  ;;  %v2055_v41 = vmul.f32 %v10589_v56, %v13403_v61  ;;  %v2344_v23 = vld [vmem:[%s9404_s25 + $0x288] sm:$0xff]  ;;  %v1152_v8 = vmul.f32 %v10600_v52, %v13404_v29 }
 0x31b   : > { %v4490_v42 = vld [vmem:[#allocation2 + $0x128] sm:$0xff]  ;;  %4364 = vst.msk [vmem:[#allocation2 + $0x138] sm:$0xff] %vm330_vm0, %v4236_v9  ;;  %v5382_v39 = vld [vmem:[#allocation2 + $0xd0] ss:$2 sm:$0x7f]  ;;  %4360 = vst.msk [vmem:[#allocation2 + $0x118] sm:$0xff] %vm330_vm0, %v4232_v17  ;;  %v4109_v35 = vmul.f32 %v10626_v27, %v3628_v19  ;;  %v3081_v0 = vmul.f32 %v10617_v14, %v2604_v12 }
 0x31c   : > { %v4618_v28 = vld [vmem:[#allocation2 + $0x129] sm:$0xff]  ;;  %3782 = vperm.xlu1 %9209, %v3367_v46   ;;  %v10840_v62 = vld [vmem:[#allocation2 + $0x100] sm:$0xff]  ;;  %v5384_v22 = vadd.f32 %v10827_v63, %v5382_v39 }
 0x31d   : > { %v4746_v11 = vmax.f32 %v4490_v42, %v4618_v28  ;;  %3762 = vperm.xlu0 %9208, %v3363_v53   ;;  %v4617_v59 = vld [vmem:[#allocation2 + $0x121] sm:$0xff]  ;;  %v5123_v16 = vmax.f32 %v10776_v38, %v10840_v62  ;;  %v4237_v24 = vadd.f32 %v4109_v35, %v3208_v45  ;;  %v2052_v38 = vmul.f32 %v10589_v56, %v13401_v40 }
 0x31e   : > { %v2619_v15 = vpop.permute.xlu1 %2618  ;;  %v5386_v32 = vmax.f32 %v5384_v22, 0.0  ;;  %v2609_v31 = vpop.permute.xlu0 %2608  ;;  %v4745_v5 = vmax.f32 %v4489_v49, %v4617_v59  ;;  %v13405_v46 = vld [vmem:[#allocation144_spill] sm:$0xff]  ;;  %v1154_v42 = vmul.f32 %v10600_v52, %v13406_v18  ;;  %v13407_v35 = vld [vmem:[#allocation145_spill] sm:$0xff] }
 0x31f   : > { %4874 = vst.msk [vmem:[#allocation2 + $0x128] sm:$0xff] %vm330_vm0, %v4746_v11  ;;  %5247 = vst.msk [vmem:[#allocation2 + $0xe0] sm:$0xff] %vm330_vm0, %v5123_v16  ;;  %v2180_v55 = vadd.f32 %v2052_v38, %v1151_v6  ;;  %v2053_v7 = vmul.f32 %v10589_v56, %v13405_v46  ;;  %v3084_v19 = vmul.f32 %v10617_v14, %v2619_v15  ;;  %v13408_v15 = vld [vmem:[#allocation148_spill] sm:$0xff]  ;;  %v3374_v46 = vld [vmem:[%s9404_s25 + $0x291] sm:$0xff] }
 0x320   : > { %2763 = vperm.xlu1 %9209, %v2340_v50   ;;  %v4999_v47 = vld [vmem:[#allocation2 + $0x108] sm:$0xff]  ;;  %4365 = vst.msk [vmem:[#allocation2 + $0x140] sm:$0xff] %vm330_vm0, %v4237_v24  ;;  %v2056_v50 = vmul.f32 %v10589_v56, %v13407_v35  ;;  %v3082_v59 = vmul.f32 %v10617_v14, %v2609_v31  ;;  %v2183_v24 = vadd.f32 %v2055_v41, %v1154_v42  ;;  %v13410_v49 = vld [vmem:[#allocation40_spill] sm:$0xff] }
 0x321   : > { %3787 = vperm.xlu0 %9208, %v3368_v57   ;;  %5388 = vst.msk [vmem:[#allocation6 + $0x35] sm:$0x7f] %vm4964_vm2, %v5386_v32  ;;  %v5124_v54 = vmax.f32 %v10744_v51, %v4999_v47  ;;  %v5535_v60 = vld [vmem:[#allocation6 + $0x29] sm:$0xff]  ;;  %v3209_v12 = vadd.f32 %v3081_v0, %v2180_v55  ;;  %v3369_v57 = vld [vmem:[%s9404_s25 + $0x269] sm:$0xff]  ;;  %v2057_v32 = vmul.f32 %v10589_v56, %v13408_v15 }
 0x322   : > { %v5504_v4 = vld [vmem:[#allocation6 + $0x28] sm:$0xff]  ;;  %8629 = vmatmul.mubr.msk.f32.gmra.mxu0 %vm330_vm0, %v5535_v60  ;;  %v2629_v36 = vpop.permute.xlu1 %2628  ;;  %v2624_v30 = vpop.permute.xlu0 %2623  ;;  %v2181_v31 = vadd.f32 %v2053_v7, %v1152_v8 }
 0x323   : > { %v4619_v37 = vld [vmem:[#allocation2 + $0x131] sm:$0xff]  ;;  %8720 = vmatmul.mubr.msk.f32.gmra.mxu1 %vm330_vm0, %v5504_v4  ;;  %5248 = vst.msk [vmem:[#allocation2 + $0xe8] sm:$0xff] %vm330_vm0, %v5124_v54  ;;  %v4616_v20 = vld [vmem:[#allocation2 + $0x119] sm:$0xff]  ;;  %8631 = vmatprep.mubr.msk.f32.mxu0 %vm9299_vm1, %v13357_v25  ;;  %v1156_v54 = vmul.f32 %v10600_v52, %v13410_v49  ;;  %v3212_v4 = vadd.f32 %v3084_v19, %v2183_v24 }
 0x324   : > { %v4747_v13 = vmax.f32 %v4491_v3, %v4619_v37  ;;  %v4488_v44 = vld [vmem:[#allocation2 + $0x118] sm:$0xff]  ;;  %2778 = vperm.xlu1 %9209, %v2343_v21   ;;  %4873 = vst.msk [vmem:[#allocation2 + $0x120] sm:$0xff] %vm330_vm0, %v4745_v5  ;;  %8722 = vmatprep.mubr.msk.f32.mxu1 %vm9299_vm1, %v13357_v25  ;;  %v3086_v3 = vmul.f32 %v10617_v14, %v2629_v36 }
 0x325   : > { %v4615_v51 = vld [vmem:[#allocation2 + $0x111] sm:$0xff]  ;;  %v4744_v34 = vmax.f32 %v4488_v44, %v4616_v20  ;;  %2768 = vperm.xlu0 %9208, %v2341_v1   ;;  %v13409_v1 = vld [vmem:[#allocation37_spill] sm:$0xff]  ;;  %v3210_v6 = vadd.f32 %v3082_v59, %v2181_v31  ;;  %v2185_v20 = vadd.f32 %v2057_v32, %v1156_v54 }
 0x326   : > { %v4743_v43 = vmax.f32 %v4487_v58, %v4615_v51  ;;  %v10872_v26 = vld [vmem:[#allocation2 + $0x128] sm:$0xff]  ;;  %4875 = vst.msk [vmem:[#allocation2 + $0x130] sm:$0xff] %vm330_vm0, %v4747_v13  ;;  %v3633_v53 = vpop.permute.xlu1 %3632  ;;  %v4492_v17 = vld [vmem:[#allocation2 + $0x138] sm:$0xff]  ;;  %v10887_v11 = vpop.permute.xlu0 %2613  ;;  %v1155_v40 = vmul.f32 %v10600_v52, %v13409_v1  ;;  %v3085_v13 = vmul.f32 %v10617_v14, %v2624_v30 }
 0x327   : > { %v5128_v9 = vmax.f32 %v4999_v47, %v10872_v26  ;;  %4872 = vst.msk [vmem:[#allocation2 + $0x118] sm:$0xff] %vm330_vm0, %v4744_v34  ;;  %v4620_v28 = vld [vmem:[#allocation2 + $0x139] sm:$0xff]  ;;  %v4110_v39 = vmul.f32 %v10626_v27, %v3633_v53  ;;  %v3372_v51 = vld [vmem:[%s9404_s25 + $0x281] sm:$0xff]  ;;  %v3083_v24 = vmul.f32 %v10617_v14, %v10887_v11 }
 0x328   : > { %4871 = vst.msk [vmem:[#allocation2 + $0x110] sm:$0xff] %vm330_vm0, %v4743_v43  ;;  %2788 = vperm.xlu1 %9209, %v2345_v2   ;;  %v5536_v45 = vld [vmem:[#allocation6 + $0x31] sm:$0xff]  ;;  %v4748_v22 = vmax.f32 %v4492_v17, %v4620_v28  ;;  %v2342_v21 = vld [vmem:[%s9404_s25 + $0x278] sm:$0xff]  ;;  %v2184_v36 = vadd.f32 %v2056_v50, %v1155_v40  ;;  %v3373_v17 = vld [vmem:[%s9404_s25 + $0x289] sm:$0xff] }
 0x329   : > { %5252 = vst.msk [vmem:[#allocation2 + $0x108] sm:$0xff] %vm330_vm0, %v5128_v9  ;;  %2783 = vperm.xlu0 %9208, %v2344_v23   ;;  %8632 = vmatmul.mubr.msk.f32.gmra.mxu0 %vm330_vm0, %v5536_v45  ;;  %v5505_v16 = vld [vmem:[#allocation6 + $0x30] sm:$0xff]  ;;  %v4238_v47 = vadd.f32 %v4110_v39, %v3209_v12  ;;  %v3370_v2 = vld [vmem:[%s9404_s25 + $0x271] sm:$0xff]  ;;  %v3214_v23 = vadd.f32 %v3086_v3, %v2185_v20 }
 0x32a   : > { %8723 = vmatmul.mubr.msk.f32.gmra.mxu1 %vm330_vm0, %v5505_v16  ;;  %8634 = vmatprep.mubr.msk.f32.mxu0 %vm9299_vm1, %v13357_v25  ;;  %4876 = vst.msk [vmem:[#allocation2 + $0x138] sm:$0xff] %vm330_vm0, %v4748_v22  ;;  %v3648_v38 = vpop.permute.xlu1 %3647  ;;  %v3638_v37 = vpop.permute.xlu0 %3637  ;;  %v13411_v7 = vld [vmem:[#allocation143_spill] sm:$0xff]  ;;  %v4493_v28 = vld [vmem:[#allocation2 + $0x140] sm:$0xff] }
 0x32b   : > { %8725 = vmatprep.mubr.msk.f32.mxu1 %vm9299_vm1, %v13357_v25  ;;  %v10908_v60 = vld [vmem:[#allocation2 + $0x120] sm:$0xff]  ;;  %4366 = vst.msk [vmem:[#allocation2 + $0x148] sm:$0xff] %vm330_vm0, %v4238_v47  ;;  %v4113_v5 = vmul.f32 %v10626_v27, %v3648_v38  ;;  %v4111_v44 = vmul.f32 %v10626_v27, %v3638_v37  ;;  %v2054_v9 = vmul.f32 %v10589_v56, %v13411_v7  ;;  %v13412_v53 = vld [vmem:[#allocation147_spill] sm:$0xff]  ;;  %v13415_v38 = vld [vmem:[#allocation150_spill] sm:$0xff] }
 0x32c   : > { %3792 = vperm.xlu1 %9209, %v3369_v57   ;;  %v5127_v33 = vmax.f32 %v10840_v62, %v10908_v60  ;;  %v2058_v18 = vmul.f32 %v10589_v56, %v13412_v53  ;;  %v13413_v50 = vld [vmem:[#allocation35_spill] sm:$0xff]  ;;  %v2347_v47 = vld [vmem:[%s9404_s25 + $0x2a0] sm:$0xff]  ;;  %v2059_v11 = vmul.f32 %v10589_v56, %v13415_v38 }
 0x32d   : > { %v10913_v58 = vld [vmem:[#allocation2 + $0x130] sm:$0xff]  ;;  %2773 = vperm.xlu0 %9208, %v2342_v21   ;;  %v4241_v34 = vadd.f32 %v4113_v5, %v3212_v4  ;;  %v4239_v62 = vadd.f32 %v4111_v44, %v3210_v6  ;;  %v1153_v22 = vmul.f32 %v10600_v52, %v13413_v50  ;;  %v2346_v40 = vld [vmem:[%s9404_s25 + $0x298] sm:$0xff]  ;;  %v3376_v7 = vld [vmem:[%s9404_s25 + $0x2a1] sm:$0xff] }
 0x32e   : > { %v5001_v43 = vld [vmem:[#allocation2 + $0x118] sm:$0xff]  ;;  %5251 = vst.msk [vmem:[#allocation2 + $0x100] sm:$0xff] %vm330_vm0, %v5127_v33  ;;  %v3658_v30 = vpop.permute.xlu1 %3657  ;;  %v3653_v8 = vpop.permute.xlu0 %3652  ;;  %v13416_v4 = vld [vmem:[#allocation42_spill] sm:$0xff] }
 0x32f   : > { %v5000_v0 = vld [vmem:[#allocation2 + $0x110] sm:$0xff]  ;;  %v5126_v61 = vmax.f32 %v10801_v48, %v5001_v43  ;;  %4369 = vst.msk [vmem:[#allocation2 + $0x160] sm:$0xff] %vm330_vm0, %v4241_v34  ;;  %v4115_v29 = vmul.f32 %v10626_v27, %v3658_v30  ;;  %4367 = vst.msk [vmem:[#allocation2 + $0x150] sm:$0xff] %vm330_vm0, %v4239_v62  ;;  %v4114_v48 = vmul.f32 %v10626_v27, %v3653_v8  ;;  %v3375_v20 = vld [vmem:[%s9404_s25 + $0x299] sm:$0xff] }
 0x330   : > { %v5125_v55 = vmax.f32 %v10783_v10, %v5000_v0  ;;  %v5129_v41 = vmax.f32 %v5000_v0, %v10913_v58  ;;  %3807 = vperm.xlu1 %9209, %v3372_v51   ;;  %v3213_v10 = vadd.f32 %v3085_v13, %v2184_v36  ;;  %v13414_v59 = vld [vmem:[#allocation39_spill] sm:$0xff]  ;;  %v2182_v21 = vadd.f32 %v2054_v9, %v1153_v22  ;;  %v2348_v8 = vld [vmem:[%s9404_s25 + $0x2a8] sm:$0xff] }
 0x331   : > { %5250 = vst.msk [vmem:[#allocation2 + $0xf8] sm:$0xff] %vm330_vm0, %v5126_v61  ;;  %3797 = vperm.xlu0 %9208, %v3370_v2   ;;  %v4243_v42 = vadd.f32 %v4115_v29, %v3214_v23  ;;  %v10938_v12 = vld [vmem:[#allocation2 + $0x138] sm:$0xff]  ;;  %v1157_v16 = vmul.f32 %v10600_v52, %v13414_v59  ;;  %v1158_v3 = vmul.f32 %v10600_v52, %v13416_v4 }
 0x332   : > { %5249 = vst.msk [vmem:[#allocation2 + $0xf0] sm:$0xff] %vm330_vm0, %v5125_v55  ;;  %5253 = vst.msk [vmem:[#allocation2 + $0x110] sm:$0xff] %vm330_vm0, %v5129_v41  ;;  %v4621_v19 = vld [vmem:[#allocation2 + $0x141] sm:$0xff]  ;;  %v4242_v39 = vadd.f32 %v4114_v48, %v3213_v10  ;;  %v2639_v45 = vpop.permute.xlu1 %2638  ;;  %v5130_v35 = vmax.f32 %v5001_v43, %v10938_v12  ;;  %v2634_v15 = vpop.permute.xlu0 %2633  ;;  %v3211_v37 = vadd.f32 %v3083_v24, %v2182_v21  ;;  %v3371_v34 = vld [vmem:[%s9404_s25 + $0x279] sm:$0xff] }
 0x333   : > { %v4749_v57 = vmax.f32 %v4493_v28, %v4621_v19  ;;  %4371 = vst.msk [vmem:[#allocation2 + $0x170] sm:$0xff] %vm330_vm0, %v4243_v42  ;;  %v3087_v32 = vmul.f32 %v10617_v14, %v2634_v15  ;;  %v2186_v1 = vadd.f32 %v2058_v18, %v1157_v16  ;;  %v4494_v5 = vld [vmem:[#allocation2 + $0x148] sm:$0xff]  ;;  %v3088_v36 = vmul.f32 %v10617_v14, %v2639_v45  ;;  %v2351_v28 = vld [vmem:[%s9404_s25 + $0x2c0] sm:$0xff]  ;;  %v2349_v19 = vld [vmem:[%s9404_s25 + $0x2b0] sm:$0xff] }
 0x334   : > { %3817 = vperm.xlu1 %9209, %v3374_v46   ;;  %4370 = vst.msk [vmem:[#allocation2 + $0x168] sm:$0xff] %vm330_vm0, %v4242_v39  ;;  %5254 = vst.msk [vmem:[#allocation2 + $0x118] sm:$0xff] %vm330_vm0, %v5130_v35  ;;  %v2187_v2 = vadd.f32 %v2059_v11, %v1158_v3  ;;  %v13417_v39 = vld [vmem:[#allocation149_spill] sm:$0xff] }
 0x335   : > { %3812 = vperm.xlu0 %9208, %v3373_v17   ;;  %4877 = vst.msk [vmem:[#allocation2 + $0x140] sm:$0xff] %vm330_vm0, %v4749_v57  ;;  %v5390_v31 = vld [vmem:[#allocation2 + $0x100] ss:$2 sm:$0xff]  ;;  %v3215_v6 = vadd.f32 %v3087_v32, %v2186_v1 }
 0x336   : > { %v3663_v49 = vpop.permute.xlu1 %3662  ;;  %v5393_v54 = vadd.f32 %v10827_v63, %v5390_v31  ;;  %v4622_v33 = vld [vmem:[#allocation2 + $0x149] sm:$0xff]  ;;  %v3643_v44 = vpop.permute.xlu0 %3642  ;;  %v3216_v30 = vadd.f32 %v3088_v36, %v2187_v2  ;;  %v4497_v17 = vld [vmem:[#allocation2 + $0x160] sm:$0xff] }
 0x337   : > { %v4116_v13 = vmul.f32 %v10626_v27, %v3663_v49  ;;  %v4750_v51 = vmax.f32 %v4494_v5, %v4622_v33  ;;  %v4112_v56 = vmul.f32 %v10626_v27, %v3643_v44  ;;  %v4495_v15 = vld [vmem:[#allocation2 + $0x150] sm:$0xff]  ;;  %v13418_v21 = vld [vmem:[#allocation41_spill] sm:$0xff] }
 0x338   : > { %2798 = vperm.xlu1 %9209, %v2347_v47   ;;  %v5395_v0 = vmax.f32 %v5393_v54, 0.0  ;;  %v10997_v47 = vld [vmem:[%s13142_s1] ss:$0 sm:$0xff]  ;;  %v11004_v11 = vld [vmem:[%s13142_s1 + $0x2] ss:$0 sm:$0xff]  ;;  %v2353_v5 = vld [vmem:[%s9404_s25 + $0x2d0] sm:$0xff] }
 0x339   : > { %2793 = vperm.xlu0 %9208, %v2346_v40   ;;  %v4244_v43 = vadd.f32 %v4116_v13, %v3215_v6  ;;  %4878 = vst.msk [vmem:[#allocation2 + $0x148] sm:$0xff] %vm330_vm0, %v4750_v51  ;;  %v4240_v52 = vadd.f32 %v4112_v56, %v3211_v37  ;;  %v1159_v1 = vmul.f32 %v10997_v47, %v13418_v21  ;;  %v13419_v33 = vld [vmem:[#allocation154_spill] sm:$0xff]  ;;  %v13420_v51 = vld [vmem:[#allocation152_spill] sm:$0xff] }
 0x33a   : > { %v2644_v55 = vpop.permute.xlu1 %2643  ;;  %5397 = vst.msk [vmem:[#allocation6 + $0x3c] sm:$0xff] %vm330_vm0, %v5395_v0  ;;  %v3668_v14 = vpop.permute.xlu0 %3667  ;;  %v4499_v59 = vld [vmem:[#allocation2 + $0x170] sm:$0xff]  ;;  %v2352_v44 = vld [vmem:[%s9404_s25 + $0x2c8] sm:$0xff] }
 0x33b   : > { %v4498_v61 = vld [vmem:[#allocation2 + $0x168] sm:$0xff]  ;;  %4372 = vst.msk [vmem:[#allocation2 + $0x178] sm:$0xff] %vm330_vm0, %v4244_v43  ;;  %4368 = vst.msk [vmem:[#allocation2 + $0x158] sm:$0xff] %vm330_vm0, %v4240_v52  ;;  %v4117_v29 = vmul.f32 %v10626_v27, %v3668_v14  ;;  %v5392_v10 = vld [vmem:[#allocation2 + $0x110] ss:$2 sm:$0x7f]  ;;  %v3089_v49 = vmul.f32 %v11004_v11, %v2644_v55 }
 0x33c   : > { %v4626_v41 = vld [vmem:[#allocation2 + $0x169] sm:$0xff]  ;;  %3822 = vperm.xlu1 %9209, %v3375_v20   ;;  %v10967_v23 = vld [vmem:[#allocation2 + $0x140] sm:$0xff]  ;;  %v5394_v9 = vadd.f32 %v10827_v63, %v5392_v10 }
 0x33d   : > { %v4754_v62 = vmax.f32 %v4498_v61, %v4626_v41  ;;  %3802 = vperm.xlu0 %9208, %v3371_v34   ;;  %v4625_v48 = vld [vmem:[#allocation2 + $0x161] sm:$0xff]  ;;  %v5131_v46 = vmax.f32 %v10908_v60, %v10967_v23  ;;  %v4245_v53 = vadd.f32 %v4117_v29, %v3216_v30  ;;  %v13421_v0 = vld [vmem:[#allocation46_spill] sm:$0xff] }
 0x33e   : > { %v2659_v18 = vpop.permute.xlu1 %2658  ;;  %v10978_v42 = vpop.permute.xlu0 %2648  ;;  %v5396_v27 = vmax.f32 %v5394_v9, 0.0  ;;  %v10986_v60 = vld [vmem:[%s13142_s1 + $0x1] ss:$0 sm:$0xff]  ;;  %v4753_v57 = vmax.f32 %v4497_v17, %v4625_v48  ;;  %v1162_v43 = vmul.f32 %v10997_v47, %v13421_v0  ;;  %v11031_v61 = vld [vmem:[%s13142_s1 + $0x3] ss:$0 sm:$0xff]  ;;  %v3377_v9 = vld [vmem:[%s9404_s25 + $0x2a9] sm:$0xff] }
 0x33f   : > { %4882 = vst.msk [vmem:[#allocation2 + $0x168] sm:$0xff] %vm330_vm0, %v4754_v62  ;;  %5255 = vst.msk [vmem:[#allocation2 + $0x120] sm:$0xff] %vm330_vm0, %v5131_v46  ;;  %v2060_v45 = vmul.f32 %v10986_v60, %v13417_v39  ;;  %v2063_v6 = vmul.f32 %v10986_v60, %v13419_v33  ;;  %v2061_v36 = vmul.f32 %v10986_v60, %v13420_v51  ;;  %v13422_v62 = vld [vmem:[#allocation44_spill] sm:$0xff]  ;;  %v13423_v29 = vld [vmem:[#allocation153_spill] sm:$0xff] }
 0x340   : > { %2803 = vperm.xlu1 %9209, %v2348_v8   ;;  %4373 = vst.msk [vmem:[#allocation2 + $0x180] sm:$0xff] %vm330_vm0, %v4245_v53  ;;  %v5007_v35 = vld [vmem:[#allocation2 + $0x148] sm:$0xff]  ;;  %v3092_v55 = vmul.f32 %v11004_v11, %v2659_v18  ;;  %v1160_v30 = vmul.f32 %v10997_v47, %v13422_v62  ;;  %v2064_v8 = vmul.f32 %v10986_v60, %v13423_v29  ;;  %v13424_v18 = vld [vmem:[#allocation156_spill] sm:$0xff] }
 0x341   : > { %3827 = vperm.xlu0 %9208, %v3376_v7   ;;  %v5537_v50 = vld [vmem:[#allocation6 + $0x39] sm:$0xff]  ;;  %5398 = vst.msk [vmem:[#allocation6 + $0x44] sm:$0x7f] %vm4964_vm2, %v5396_v27  ;;  %v5132_v16 = vmax.f32 %v10872_v26, %v5007_v35  ;;  %v2188_v37 = vadd.f32 %v2060_v45, %v1159_v1  ;;  %v3090_v48 = vmul.f32 %v11004_v11, %v10978_v42 }
 0x342   : > { %v5506_v22 = vld [vmem:[#allocation6 + $0x38] sm:$0xff]  ;;  %v4627_v24 = vld [vmem:[#allocation2 + $0x171] sm:$0xff]  ;;  %8635 = vmatmul.mubr.msk.f32.gmra.mxu0 %vm330_vm0, %v5537_v50  ;;  %v2669_v32 = vpop.permute.xlu1 %2668  ;;  %v4624_v38 = vld [vmem:[#allocation2 + $0x159] sm:$0xff]  ;;  %v2664_v54 = vpop.permute.xlu0 %2663  ;;  %v2191_v53 = vadd.f32 %v2063_v6, %v1162_v43  ;;  %v2065_v27 = vmul.f32 %v10986_v60, %v13424_v18  ;;  %v2189_v45 = vadd.f32 %v2061_v36, %v1160_v30 }
 0x343   : > { %8726 = vmatmul.mubr.msk.f32.gmra.mxu1 %vm330_vm0, %v5506_v22  ;;  %v4755_v40 = vmax.f32 %v4499_v59, %v4627_v24  ;;  %v4496_v31 = vld [vmem:[#allocation2 + $0x158] sm:$0xff]  ;;  %8637 = vmatprep.mubr.msk.f32.mxu0 %vm9299_vm1, %v13357_v25  ;;  %5256 = vst.msk [vmem:[#allocation2 + $0x128] sm:$0xff] %vm330_vm0, %v5132_v16  ;;  %4881 = vst.msk [vmem:[#allocation2 + $0x160] sm:$0xff] %vm330_vm0, %v4753_v57  ;;  %v3217_v2 = vadd.f32 %v3089_v49, %v2188_v37 }
 0x344   : > { %v4623_v26 = vld [vmem:[#allocation2 + $0x151] sm:$0xff]  ;;  %2818 = vperm.xlu1 %9209, %v2351_v28   ;;  %v4752_v3 = vmax.f32 %v4496_v31, %v4624_v38  ;;  %8728 = vmatprep.mubr.msk.f32.mxu1 %vm9299_vm1, %v13357_v25  ;;  %v3220_v59 = vadd.f32 %v3092_v55, %v2191_v53  ;;  %v3094_v16 = vmul.f32 %v11004_v11, %v2669_v32 }
 0x345   : > { %v4751_v4 = vmax.f32 %v4495_v15, %v4623_v26  ;;  %2808 = vperm.xlu0 %9208, %v2349_v19   ;;  %4883 = vst.msk [vmem:[#allocation2 + $0x170] sm:$0xff] %vm330_vm0, %v4755_v40  ;;  %v4500_v34 = vld [vmem:[#allocation2 + $0x178] sm:$0xff]  ;;  %v13425_v19 = vld [vmem:[#allocation45_spill] sm:$0xff]  ;;  %v3218_v1 = vadd.f32 %v3090_v48, %v2189_v45  ;;  %v3093_v40 = vmul.f32 %v11004_v11, %v2664_v54 }
 0x346   : > { %v11016_v13 = vld [vmem:[#allocation2 + $0x168] sm:$0xff]  ;;  %4880 = vst.msk [vmem:[#allocation2 + $0x158] sm:$0xff] %vm330_vm0, %v4752_v3  ;;  %v3673_v20 = vpop.permute.xlu1 %3672  ;;  %v2350_v28 = vld [vmem:[%s9404_s25 + $0x2b8] sm:$0xff]  ;;  %v1163_v39 = vmul.f32 %v10997_v47, %v13425_v19 }
 0x347   : > { %v5136_v56 = vmax.f32 %v5007_v35, %v11016_v13  ;;  %4879 = vst.msk [vmem:[#allocation2 + $0x150] sm:$0xff] %vm330_vm0, %v4751_v4  ;;  %v4628_v52 = vld [vmem:[#allocation2 + $0x179] sm:$0xff]  ;;  %v4118_v41 = vmul.f32 %v11031_v61, %v3673_v20  ;;  %v11034_v14 = vpop.permute.xlu0 %2653  ;;  %v3380_v26 = vld [vmem:[%s9404_s25 + $0x2c1] sm:$0xff] }
 0x348   : > { %2828 = vperm.xlu1 %9209, %v2353_v5   ;;  %v4756_v10 = vmax.f32 %v4500_v34, %v4628_v52  ;;  %v5538_v46 = vld [vmem:[#allocation6 + $0x41] sm:$0xff]  ;;  %v13426_v35 = vld [vmem:[#allocation48_spill] sm:$0xff]  ;;  %v2192_v32 = vadd.f32 %v2064_v8, %v1163_v39  ;;  %v3381_v52 = vld [vmem:[%s9404_s25 + $0x2c9] sm:$0xff]  ;;  %v3091_v53 = vmul.f32 %v11004_v11, %v11034_v14 }
 0x349   : > { %5260 = vst.msk [vmem:[#allocation2 + $0x148] sm:$0xff] %vm330_vm0, %v5136_v56  ;;  %2823 = vperm.xlu0 %9208, %v2352_v44   ;;  %v5507_v7 = vld [vmem:[#allocation6 + $0x40] sm:$0xff]  ;;  %v4246_v17 = vadd.f32 %v4118_v41, %v3217_v2  ;;  %8638 = vmatmul.mubr.msk.f32.gmra.mxu0 %vm330_vm0, %v5538_v46  ;;  %v1164_v50 = vmul.f32 %v10997_v47, %v13426_v35  ;;  %v4501_v41 = vld [vmem:[#allocation2 + $0x180] sm:$0xff]  ;;  %v2354_v39 = vld [vmem:[%s9404_s25 + $0x2d8] sm:$0xff] }
 0x34a   : > { %8729 = vmatmul.mubr.msk.f32.gmra.mxu1 %vm330_vm0, %v5507_v7  ;;  %4884 = vst.msk [vmem:[#allocation2 + $0x178] sm:$0xff] %vm330_vm0, %v4756_v10  ;;  %v3688_v42 = vpop.permute.xlu1 %3687  ;;  %8640 = vmatprep.mubr.msk.f32.mxu0 %vm9299_vm1, %v13357_v25  ;;  %v11058_v22 = vld [vmem:[#allocation2 + $0x160] sm:$0xff]  ;;  %v3378_v5 = vld [vmem:[%s9404_s25 + $0x2b1] sm:$0xff] }
 0x34b   : > { %8731 = vmatprep.mubr.msk.f32.mxu1 %vm9299_vm1, %v13357_v25  ;;  %4374 = vst.msk [vmem:[#allocation2 + $0x188] sm:$0xff] %vm330_vm0, %v4246_v17  ;;  %v4121_v57 = vmul.f32 %v11031_v61, %v3688_v42  ;;  %v3678_v24 = vpop.permute.xlu0 %3677  ;;  %v5135_v21 = vmax.f32 %v10967_v23, %v11058_v22  ;;  %v2193_v38 = vadd.f32 %v2065_v27, %v1164_v50  ;;  %v3382_v56 = vld [vmem:[%s9404_s25 + $0x2d1] sm:$0xff]  ;;  %v2355_v17 = vld [vmem:[%s9404_s25 + $0x2e0] sm:$0xff] }
 0x34c   : > { %3832 = vperm.xlu1 %9209, %v3377_v9   ;;  %v11063_v15 = vld [vmem:[#allocation2 + $0x170] sm:$0xff]  ;;  %v4119_v31 = vmul.f32 %v11031_v61, %v3678_v24 }
 0x34d   : > { %2813 = vperm.xlu0 %9208, %v2350_v28   ;;  %v5009_v4 = vld [vmem:[#allocation2 + $0x158] sm:$0xff]  ;;  %v4249_v3 = vadd.f32 %v4121_v57, %v3220_v59  ;;  %5259 = vst.msk [vmem:[#allocation2 + $0x140] sm:$0xff] %vm330_vm0, %v5135_v21  ;;  %v3222_v44 = vadd.f32 %v3094_v16, %v2193_v38  ;;  %v13431_v42 = vld [vmem:[#allocation158_spill] sm:$0xff] }
 0x34e   : > { %v5008_v49 = vld [vmem:[#allocation2 + $0x150] sm:$0xff]  ;;  %v5134_v33 = vmax.f32 %v10938_v12, %v5009_v4  ;;  %v4247_v23 = vadd.f32 %v4119_v31, %v3218_v1  ;;  %v3698_v54 = vpop.permute.xlu1 %3697  ;;  %v2067_v14 = vmul.f32 %v10986_v60, %v13431_v42 }
 0x34f   : > { %v5133_v37 = vmax.f32 %v10913_v58, %v5008_v49  ;;  %v5137_v6 = vmax.f32 %v5008_v49, %v11063_v15  ;;  %4377 = vst.msk [vmem:[#allocation2 + $0x1a0] sm:$0xff] %vm330_vm0, %v4249_v3  ;;  %v4123_v51 = vmul.f32 %v11031_v61, %v3698_v54  ;;  %v3693_v36 = vpop.permute.xlu0 %3692  ;;  %v3221_v58 = vadd.f32 %v3093_v40, %v2192_v32  ;;  %v13427_v20 = vld [vmem:[#allocation151_spill] sm:$0xff]  ;;  %v13432_v59 = vld [vmem:[#allocation50_spill] sm:$0xff] }
 0x350   : > { %3847 = vperm.xlu1 %9209, %v3380_v26   ;;  %5258 = vst.msk [vmem:[#allocation2 + $0x138] sm:$0xff] %vm330_vm0, %v5134_v33  ;;  %4375 = vst.msk [vmem:[#allocation2 + $0x190] sm:$0xff] %vm330_vm0, %v4247_v23  ;;  %v4122_v12 = vmul.f32 %v11031_v61, %v3693_v36  ;;  %v2062_v0 = vmul.f32 %v10986_v60, %v13427_v20  ;;  %v13428_v43 = vld [vmem:[#allocation155_spill] sm:$0xff]  ;;  %v1166_v16 = vmul.f32 %v10997_v47, %v13432_v59 }
 0x351   : > { %5257 = vst.msk [vmem:[#allocation2 + $0x130] sm:$0xff] %vm330_vm0, %v5133_v37  ;;  %5261 = vst.msk [vmem:[#allocation2 + $0x150] sm:$0xff] %vm330_vm0, %v5137_v6  ;;  %3837 = vperm.xlu0 %9208, %v3378_v5   ;;  %v2066_v34 = vmul.f32 %v10986_v60, %v13428_v43  ;;  %v4251_v2 = vadd.f32 %v4123_v51, %v3222_v44  ;;  %v11088_v55 = vld [vmem:[#allocation2 + $0x178] sm:$0xff] }
 0x352   : > { %v4629_v62 = vld [vmem:[#allocation2 + $0x181] sm:$0xff]  ;;  %v4250_v30 = vadd.f32 %v4122_v12, %v3221_v58  ;;  %v2679_v29 = vpop.permute.xlu1 %2678  ;;  %v5138_v8 = vmax.f32 %v5009_v4, %v11088_v55  ;;  %v13429_v10 = vld [vmem:[#allocation43_spill] sm:$0xff]  ;;  %v2195_v37 = vadd.f32 %v2067_v14, %v1166_v16 }
 0x353   : > { %v1161_v48 = vmul.f32 %v10997_v47, %v13429_v10  ;;  %v13430_v46 = vld [vmem:[#allocation47_spill] sm:$0xff]  ;;  %v4757_v9 = vmax.f32 %v4501_v41, %v4629_v62  ;;  %4379 = vst.msk [vmem:[#allocation2 + $0x1b0] sm:$0xff] %vm330_vm0, %v4251_v2  ;;  %v2674_v18 = vpop.permute.xlu0 %2673  ;;  %v4502_v57 = vld [vmem:[#allocation2 + $0x188] sm:$0xff]  ;;  %v3096_v32 = vmul.f32 %v11004_v11, %v2679_v29 }
 0x354   : > { %v1165_v7 = vmul.f32 %v10997_v47, %v13430_v46  ;;  %3857 = vperm.xlu1 %9209, %v3382_v56   ;;  %4378 = vst.msk [vmem:[#allocation2 + $0x1a8] sm:$0xff] %vm330_vm0, %v4250_v30  ;;  %v3095_v27 = vmul.f32 %v11004_v11, %v2674_v18  ;;  %5262 = vst.msk [vmem:[#allocation2 + $0x158] sm:$0xff] %vm330_vm0, %v5138_v8  ;;  %v5400_v45 = vld [vmem:[#allocation2 + $0x140] ss:$2 sm:$0xff]  ;;  %v2357_v10 = vld [vmem:[%s9404_s25 + $0x2f0] sm:$0xff] }
 0x355   : > { %3852 = vperm.xlu0 %9208, %v3381_v52   ;;  %v2190_v28 = vadd.f32 %v2062_v0, %v1161_v48  ;;  %4885 = vst.msk [vmem:[#allocation2 + $0x180] sm:$0xff] %vm330_vm0, %v4757_v9  ;;  %v5403_v50 = vadd.f32 %v10827_v63, %v5400_v45  ;;  %v3383_v49 = vld [vmem:[%s9404_s25 + $0x2d9] sm:$0xff]  ;;  %v3224_v36 = vadd.f32 %v3096_v32, %v2195_v37  ;;  %v2356_v56 = vld [vmem:[%s9404_s25 + $0x2e8] sm:$0xff] }
 0x356   : > { %v2194_v19 = vadd.f32 %v2066_v34, %v1165_v7  ;;  %v3703_v35 = vpop.permute.xlu1 %3702  ;;  %v3379_v5 = vld [vmem:[%s9404_s25 + $0x2b9] sm:$0xff]  ;;  %v3384_v34 = vld [vmem:[%s9404_s25 + $0x2e1] sm:$0xff] }
 0x357   : > { %v3219_v24 = vadd.f32 %v3091_v53, %v2190_v28  ;;  %v4630_v21 = vld [vmem:[#allocation2 + $0x189] sm:$0xff]  ;;  %v4124_v40 = vmul.f32 %v11031_v61, %v3703_v35  ;;  %v3683_v31 = vpop.permute.xlu0 %3682  ;;  %v5405_v4 = vmax.f32 %v5403_v50, 0.0  ;;  %v4505_v29 = vld [vmem:[#allocation2 + $0x1a0] sm:$0xff] }
 0x358   : > { %v3223_v1 = vadd.f32 %v3095_v27, %v2194_v19  ;;  %2838 = vperm.xlu1 %9209, %v2355_v17   ;;  %v4758_v26 = vmax.f32 %v4502_v57, %v4630_v21  ;;  %v4120_v38 = vmul.f32 %v11031_v61, %v3683_v31  ;;  %v2359_v8 = vld [vmem:[%s9404_s25 + $0x300] sm:$0xff]  ;;  %v4503_v17 = vld [vmem:[#allocation2 + $0x190] sm:$0xff]  ;;  %v2360_v31 = vld [vmem:[%s9404_s25 + $0x308] sm:$0xff] }
 0x359   : > { %2833 = vperm.xlu0 %9208, %v2354_v39   ;;  %5407 = vst.msk [vmem:[#allocation6 + $0x4b] sm:$0xff] %vm330_vm0, %v5405_v4  ;;  %v13433_v48 = vld [vmem:[#allocation157_spill] sm:$0xff]  ;;  %v2361_v57 = vld [vmem:[%s9404_s25 + $0x310] sm:$0xff] }
 0x35a   : > { %v4252_v3 = vadd.f32 %v4124_v40, %v3223_v1  ;;  %4886 = vst.msk [vmem:[#allocation2 + $0x188] sm:$0xff] %vm330_vm0, %v4758_v26  ;;  %v4248_v33 = vadd.f32 %v4120_v38, %v3219_v24  ;;  %v2684_v6 = vpop.permute.xlu1 %2683  ;;  %v4507_v9 = vld [vmem:[#allocation2 + $0x1b0] sm:$0xff]  ;;  %v13434_v19 = vld [vmem:[#allocation49_spill] sm:$0xff]  ;;  %v13436_v26 = vld [vmem:[#allocation160_spill] sm:$0xff] }
 0x35b   : > { %v4506_v23 = vld [vmem:[#allocation2 + $0x1a8] sm:$0xff]  ;;  %v3708_v44 = vpop.permute.xlu0 %3707  ;;  %v5402_v20 = vld [vmem:[#allocation2 + $0x150] ss:$2 sm:$0x7f]  ;;  %v1167_v39 = vmul.f32 %v10997_v47, %v13434_v19  ;;  %v3097_v50 = vmul.f32 %v11004_v11, %v2684_v6  ;;  %v2069_v32 = vmul.f32 %v10986_v60, %v13436_v26 }
 0x35c   : > { %v4634_v54 = vld [vmem:[#allocation2 + $0x1a9] sm:$0xff]  ;;  %4380 = vst.msk [vmem:[#allocation2 + $0x1b8] sm:$0xff] %vm330_vm0, %v4252_v3  ;;  %3862 = vperm.xlu1 %9209, %v3383_v49   ;;  %v11117_v58 = vld [vmem:[#allocation2 + $0x180] sm:$0xff]  ;;  %4376 = vst.msk [vmem:[#allocation2 + $0x198] sm:$0xff] %vm330_vm0, %v4248_v33  ;;  %v4125_v12 = vmul.f32 %v11031_v61, %v3708_v44  ;;  %v5404_v2 = vadd.f32 %v10827_v63, %v5402_v20 }
 0x35d   : > { %v4762_v51 = vmax.f32 %v4506_v23, %v4634_v54  ;;  %3842 = vperm.xlu0 %9208, %v3379_v5   ;;  %v4633_v0 = vld [vmem:[#allocation2 + $0x1a1] sm:$0xff]  ;;  %v5139_v43 = vmax.f32 %v11058_v22, %v11117_v58  ;;  %v2068_v22 = vmul.f32 %v10986_v60, %v13433_v48  ;;  %v13435_v21 = vld [vmem:[#allocation162_spill] sm:$0xff] }
 0x35e   : > { %v4253_v52 = vadd.f32 %v4125_v12, %v3224_v36  ;;  %v2699_v41 = vpop.permute.xlu1 %2698  ;;  %v5406_v30 = vmax.f32 %v5404_v2, 0.0  ;;  %v4761_v18 = vmax.f32 %v4505_v29, %v4633_v0  ;;  %v2071_v1 = vmul.f32 %v10986_v60, %v13435_v21  ;;  %v13437_v4 = vld [vmem:[#allocation54_spill] sm:$0xff]  ;;  %v13438_v44 = vld [vmem:[#allocation52_spill] sm:$0xff]  ;;  %v13439_v36 = vld [vmem:[#allocation161_spill] sm:$0xff] }
 0x35f   : > { %4890 = vst.msk [vmem:[#allocation2 + $0x1a8] sm:$0xff] %vm330_vm0, %v4762_v51  ;;  %5263 = vst.msk [vmem:[#allocation2 + $0x160] sm:$0xff] %vm330_vm0, %v5139_v43  ;;  %v2689_v62 = vpop.permute.xlu0 %2688  ;;  %v2196_v24 = vadd.f32 %v2068_v22, %v1167_v39  ;;  %v1170_v3 = vmul.f32 %v10997_v47, %v13437_v4  ;;  %v3100_v6 = vmul.f32 %v11004_v11, %v2699_v41  ;;  %v2358_v29 = vld [vmem:[%s9404_s25 + $0x2f8] sm:$0xff] }
 0x360   : > { %2843 = vperm.xlu1 %9209, %v2356_v56   ;;  %4381 = vst.msk [vmem:[#allocation2 + $0x1c0] sm:$0xff] %vm330_vm0, %v4253_v52  ;;  %v5539_v63 = vld [vmem:[#allocation6 + $0x49] sm:$0xff]  ;;  %v1168_v51 = vmul.f32 %v10997_v47, %v13438_v44  ;;  %v2072_v12 = vmul.f32 %v10986_v60, %v13439_v36  ;;  %v3098_v20 = vmul.f32 %v11004_v11, %v2689_v62 }
 0x361   : > { %3867 = vperm.xlu0 %9208, %v3384_v34   ;;  %v5015_v46 = vld [vmem:[#allocation2 + $0x188] sm:$0xff]  ;;  %v5508_v7 = vld [vmem:[#allocation6 + $0x48] sm:$0xff]  ;;  %5408 = vst.msk [vmem:[#allocation6 + $0x53] sm:$0x7f] %vm4964_vm2, %v5406_v30  ;;  %8641 = vmatmul.mubr.msk.f32.gmra.mxu0 %vm330_vm0, %v5539_v63  ;;  %v3225_v37 = vadd.f32 %v3097_v50, %v2196_v24  ;;  %v2199_v2 = vadd.f32 %v2071_v1, %v1170_v3 }
 0x362   : > { %v5140_v53 = vmax.f32 %v11016_v13, %v5015_v46  ;;  %8732 = vmatmul.mubr.msk.f32.gmra.mxu1 %vm330_vm0, %v5508_v7  ;;  %v2709_v28 = vpop.permute.xlu1 %2708  ;;  %8643 = vmatprep.mubr.msk.f32.mxu0 %vm9299_vm1, %v13357_v25  ;;  %v3385_v34 = vld [vmem:[%s9404_s25 + $0x2e9] sm:$0xff]  ;;  %v13440_v52 = vld [vmem:[#allocation164_spill] sm:$0xff]  ;;  %v2197_v48 = vadd.f32 %v2069_v32, %v1168_v51  ;;  %v3390_v32 = vld [vmem:[%s9404_s25 + $0x311] sm:$0xff] }
 0x363   : > { %v4635_v27 = vld [vmem:[#allocation2 + $0x1b1] sm:$0xff]  ;;  %v4632_v35 = vld [vmem:[#allocation2 + $0x199] sm:$0xff]  ;;  %v2704_v13 = vpop.permute.xlu0 %2703  ;;  %8734 = vmatprep.mubr.msk.f32.mxu1 %vm9299_vm1, %v13357_v25  ;;  %v2073_v41 = vmul.f32 %v10986_v60, %v13440_v52  ;;  %v3228_v7 = vadd.f32 %v3100_v6, %v2199_v2 }
 0x364   : > { %v4763_v45 = vmax.f32 %v4507_v9, %v4635_v27  ;;  %v4504_v42 = vld [vmem:[#allocation2 + $0x198] sm:$0xff]  ;;  %2858 = vperm.xlu1 %9209, %v2359_v8   ;;  %5264 = vst.msk [vmem:[#allocation2 + $0x168] sm:$0xff] %vm330_vm0, %v5140_v53  ;;  %4889 = vst.msk [vmem:[#allocation2 + $0x1a0] sm:$0xff] %vm330_vm0, %v4761_v18  ;;  %v13441_v8 = vld [vmem:[#allocation53_spill] sm:$0xff]  ;;  %v3102_v9 = vmul.f32 %v11004_v11, %v2709_v28  ;;  %v3226_v19 = vadd.f32 %v3098_v20, %v2197_v48 }
 0x365   : > { %v4631_v14 = vld [vmem:[#allocation2 + $0x191] sm:$0xff]  ;;  %v4760_v16 = vmax.f32 %v4504_v42, %v4632_v35  ;;  %2848 = vperm.xlu0 %9208, %v2357_v10   ;;  %v1171_v10 = vmul.f32 %v10997_v47, %v13441_v8  ;;  %v13442_v22 = vld [vmem:[#allocation56_spill] sm:$0xff]  ;;  %v3101_v39 = vmul.f32 %v11004_v11, %v2704_v13 }
 0x366   : > { %v4759_v59 = vmax.f32 %v4503_v17, %v4631_v14  ;;  %v11149_v40 = vld [vmem:[#allocation2 + $0x1a8] sm:$0xff]  ;;  %4891 = vst.msk [vmem:[#allocation2 + $0x1b0] sm:$0xff] %vm330_vm0, %v4763_v45  ;;  %v4508_v5 = vld [vmem:[#allocation2 + $0x1b8] sm:$0xff]  ;;  %v2363_v51 = vld [vmem:[%s9404_s25 + $0x320] sm:$0xff] }
 0x367   : > { %v5144_v38 = vmax.f32 %v5015_v46, %v11149_v40  ;;  %4888 = vst.msk [vmem:[#allocation2 + $0x198] sm:$0xff] %vm330_vm0, %v4760_v16  ;;  %v3713_v49 = vpop.permute.xlu1 %3712  ;;  %v4636_v33 = vld [vmem:[#allocation2 + $0x1b9] sm:$0xff]  ;;  %v11162_v54 = vpop.permute.xlu0 %2693  ;;  %v1172_v46 = vmul.f32 %v10997_v47, %v13442_v22  ;;  %v3388_v42 = vld [vmem:[%s9404_s25 + $0x301] sm:$0xff]  ;;  %v2200_v28 = vadd.f32 %v2072_v12, %v1171_v10  ;;  %v3386_v16 = vld [vmem:[%s9404_s25 + $0x2f1] sm:$0xff] }
 0x368   : > { %4887 = vst.msk [vmem:[#allocation2 + $0x190] sm:$0xff] %vm330_vm0, %v4759_v59  ;;  %v4126_v23 = vmul.f32 %v11031_v61, %v3713_v49  ;;  %2868 = vperm.xlu1 %9209, %v2361_v57   ;;  %v4764_v56 = vmax.f32 %v4508_v5, %v4636_v33  ;;  %v5540_v0 = vld [vmem:[#allocation6 + $0x51] sm:$0xff]  ;;  %v3389_v49 = vld [vmem:[%s9404_s25 + $0x309] sm:$0xff]  ;;  %v2362_v36 = vld [vmem:[%s9404_s25 + $0x318] sm:$0xff] }
 0x369   : > { %5268 = vst.msk [vmem:[#allocation2 + $0x188] sm:$0xff] %vm330_vm0, %v5144_v38  ;;  %2863 = vperm.xlu0 %9208, %v2360_v31   ;;  %v5509_v43 = vld [vmem:[#allocation6 + $0x50] sm:$0xff]  ;;  %8644 = vmatmul.mubr.msk.f32.gmra.mxu0 %vm330_vm0, %v5540_v0  ;;  %v2201_v14 = vadd.f32 %v2073_v41, %v1172_v46  ;;  %v3099_v46 = vmul.f32 %v11004_v11, %v11162_v54 }
 0x36a   : > { %v4254_v30 = vadd.f32 %v4126_v23, %v3225_v37  ;;  %8735 = vmatmul.mubr.msk.f32.gmra.mxu1 %vm330_vm0, %v5509_v43  ;;  %4892 = vst.msk [vmem:[#allocation2 + $0x1b8] sm:$0xff] %vm330_vm0, %v4764_v56  ;;  %8646 = vmatprep.mubr.msk.f32.mxu0 %vm9299_vm1, %v13357_v25  ;;  %v4509_v3 = vld [vmem:[#allocation2 + $0x1c0] sm:$0xff] }
 0x36b   : > { %v3728_v62 = vpop.permute.xlu1 %3727  ;;  %8737 = vmatprep.mubr.msk.f32.mxu1 %vm9299_vm1, %v13357_v25  ;;  %v11185_v63 = vld [vmem:[#allocation2 + $0x1a0] sm:$0xff]  ;;  %v3230_v1 = vadd.f32 %v3102_v9, %v2201_v14 }
 0x36c   : > { %4382 = vst.msk [vmem:[#allocation2 + $0x1c8] sm:$0xff] %vm330_vm0, %v4254_v30  ;;  %v4129_v53 = vmul.f32 %v11031_v61, %v3728_v62  ;;  %v3718_v18 = vpop.permute.xlu0 %3717  ;;  %3872 = vperm.xlu1 %9209, %v3385_v34   ;;  %v5143_v17 = vmax.f32 %v11117_v58, %v11185_v63  ;;  %v11227_v20 = vld [vmem:[%s13146_s5] ss:$0 sm:$0xff]  ;;  %v13444_v62 = vld [vmem:[#allocation51_spill] sm:$0xff] }
 0x36d   : > { %v11190_v27 = vld [vmem:[#allocation2 + $0x1b0] sm:$0xff]  ;;  %v4127_v45 = vmul.f32 %v11031_v61, %v3718_v18  ;;  %2853 = vperm.xlu0 %9208, %v2358_v29   ;;  %v3391_v41 = vld [vmem:[%s9404_s25 + $0x319] sm:$0xff]  ;;  %v1169_v22 = vmul.f32 %v10997_v47, %v13444_v62 }
 0x36e   : > { %v5017_v50 = vld [vmem:[#allocation2 + $0x198] sm:$0xff]  ;;  %v4257_v59 = vadd.f32 %v4129_v53, %v3228_v7  ;;  %5267 = vst.msk [vmem:[#allocation2 + $0x180] sm:$0xff] %vm330_vm0, %v5143_v17  ;;  %v2364_v17 = vld [vmem:[%s9404_s25 + $0x328] sm:$0xff] }
 0x36f   : > { %v5016_v35 = vld [vmem:[#allocation2 + $0x190] sm:$0xff]  ;;  %v5142_v24 = vmax.f32 %v11088_v55, %v5017_v50  ;;  %v4255_v58 = vadd.f32 %v4127_v45, %v3226_v19  ;;  %v3738_v13 = vpop.permute.xlu1 %3737  ;;  %v3387_v10 = vld [vmem:[%s9404_s25 + $0x2f9] sm:$0xff] }
 0x370   : > { %v5141_v57 = vmax.f32 %v11063_v15, %v5016_v35  ;;  %v5145_v21 = vmax.f32 %v5016_v35, %v11190_v27  ;;  %4385 = vst.msk [vmem:[#allocation2 + $0x1e0] sm:$0xff] %vm330_vm0, %v4257_v59  ;;  %v4131_v31 = vmul.f32 %v11031_v61, %v3738_v13  ;;  %v3733_v26 = vpop.permute.xlu0 %3732  ;;  %3887 = vperm.xlu1 %9209, %v3388_v42   ;;  %v13443_v29 = vld [vmem:[#allocation159_spill] sm:$0xff]  ;;  %v3392_v35 = vld [vmem:[%s9404_s25 + $0x321] sm:$0xff] }
 0x371   : > { %5266 = vst.msk [vmem:[#allocation2 + $0x178] sm:$0xff] %vm330_vm0, %v5142_v24  ;;  %v3229_v15 = vadd.f32 %v3101_v39, %v2200_v28  ;;  %4383 = vst.msk [vmem:[#allocation2 + $0x1d0] sm:$0xff] %vm330_vm0, %v4255_v58  ;;  %v4130_v55 = vmul.f32 %v11031_v61, %v3733_v26  ;;  %3877 = vperm.xlu0 %9208, %v3386_v16   ;;  %v11211_v4 = vld [vmem:[#allocation2 + $0x1b8] sm:$0xff]  ;;  %v2070_v8 = vmul.f32 %v10986_v60, %v13443_v29  ;;  %v2367_v26 = vld [vmem:[%s9404_s25 + $0x340] sm:$0xff] }
 0x372   : > { %5265 = vst.msk [vmem:[#allocation2 + $0x170] sm:$0xff] %vm330_vm0, %v5141_v57  ;;  %5269 = vst.msk [vmem:[#allocation2 + $0x190] sm:$0xff] %vm330_vm0, %v5145_v21  ;;  %v4259_v38 = vadd.f32 %v4131_v31, %v3230_v1  ;;  %v5146_v6 = vmax.f32 %v5017_v50, %v11211_v4  ;;  %v13445_v42 = vld [vmem:[#allocation163_spill] sm:$0xff]  ;;  %v13453_v62 = vld [vmem:[#allocation60_spill] sm:$0xff] }
 0x373   : > { %v4637_v5 = vld [vmem:[#allocation2 + $0x1c1] sm:$0xff]  ;;  %v4258_v37 = vadd.f32 %v4130_v55, %v3229_v15  ;;  %v11213_v33 = vpop.permute.xlu1 %2718  ;;  %v2198_v45 = vadd.f32 %v2070_v8, %v1169_v22  ;;  %v2074_v28 = vmul.f32 %v10986_v60, %v13445_v42  ;;  %v13446_v59 = vld [vmem:[#allocation55_spill] sm:$0xff]  ;;  %v1176_v22 = vmul.f32 %v10997_v47, %v13453_v62 }
 0x374   : > { %v4765_v23 = vmax.f32 %v4509_v3, %v4637_v5  ;;  %4387 = vst.msk [vmem:[#allocation2 + $0x1f0] sm:$0xff] %vm330_vm0, %v4259_v38  ;;  %v2714_v44 = vpop.permute.xlu0 %2713  ;;  %3897 = vperm.xlu1 %9209, %v3390_v32   ;;  %5270 = vst.msk [vmem:[#allocation2 + $0x198] sm:$0xff] %vm330_vm0, %v5146_v6  ;;  %v4510_v43 = vld [vmem:[#allocation2 + $0x1c8] sm:$0xff]  ;;  %v1173_v16 = vmul.f32 %v10997_v47, %v13446_v59  ;;  %v2365_v15 = vld [vmem:[%s9404_s25 + $0x330] sm:$0xff]  ;;  %v3104_v8 = vmul.f32 %v11004_v11, %v11213_v33 }
 0x375   : > { %4386 = vst.msk [vmem:[#allocation2 + $0x1e8] sm:$0xff] %vm330_vm0, %v4258_v37  ;;  %3892 = vperm.xlu0 %9208, %v3389_v49   ;;  %v5410_v12 = vld [vmem:[#allocation2 + $0x180] ss:$2 sm:$0xff]  ;;  %v3227_v24 = vadd.f32 %v3099_v46, %v2198_v45  ;;  %v3103_v21 = vmul.f32 %v11004_v11, %v2714_v44 }
 0x376   : > { %4893 = vst.msk [vmem:[#allocation2 + $0x1c0] sm:$0xff] %vm330_vm0, %v4765_v23  ;;  %v5413_v0 = vadd.f32 %v11227_v20, %v5410_v12  ;;  %v2202_v55 = vadd.f32 %v2074_v28, %v1173_v16  ;;  %v13448_v32 = vld [vmem:[#allocation165_spill] sm:$0xff]  ;;  %v13449_v49 = vld [vmem:[#allocation166_spill] sm:$0xff]  ;;  %v13450_v44 = vld [vmem:[#allocation168_spill] sm:$0xff] }
 0x377   : > { %v11222_v56 = vpop.permute.xlu1 %2728  ;;  %v2076_v38 = vmul.f32 %v10986_v60, %v13448_v32  ;;  %v2075_v3 = vmul.f32 %v10986_v60, %v13449_v49  ;;  %v13454_v46 = vld [vmem:[#allocation62_spill] sm:$0xff]  ;;  %v13455_v45 = vld [vmem:[#allocation64_spill] sm:$0xff] }
 0x378   : > { %v4638_v34 = vld [vmem:[#allocation2 + $0x1c9] sm:$0xff]  ;;  %v2724_v2 = vpop.permute.xlu0 %2723  ;;  %2878 = vperm.xlu1 %9209, %v2363_v51   ;;  %v5415_v30 = vmax.f32 %v5413_v0, 0.0  ;;  %v2077_v51 = vmul.f32 %v10986_v60, %v13450_v44  ;;  %v1180_v33 = vmul.f32 %v10997_v47, %v13455_v45 }
 0x379   : > { %v4766_v52 = vmax.f32 %v4510_v43, %v4638_v34  ;;  %2873 = vperm.xlu0 %9208, %v2362_v36   ;;  %v13451_v36 = vld [vmem:[#allocation170_spill] sm:$0xff]  ;;  %v3231_v34 = vadd.f32 %v3103_v21, %v2202_v55 }
 0x37a   : > { %5417 = vst.msk [vmem:[#allocation6 + $0x5a] sm:$0xff] %vm330_vm0, %v5415_v30  ;;  %v2079_v12 = vmul.f32 %v10986_v60, %v13451_v36  ;;  %v2205_v59 = vadd.f32 %v2077_v51, %v1176_v22 }
 0x37b   : > { %4894 = vst.msk [vmem:[#allocation2 + $0x1c8] sm:$0xff] %vm330_vm0, %v4766_v52  ;;  %v11235_v48 = vpop.permute.xlu1 %2743  ;;  %v5412_v39 = vld [vmem:[#allocation2 + $0x190] ss:$2 sm:$0x7f]  ;;  %v3105_v52 = vmul.f32 %v11004_v11, %v2724_v2 }
 0x37c   : > { %v4514_v7 = vld [vmem:[#allocation2 + $0x1e8] sm:$0xff]  ;;  %v11242_v53 = vpop.permute.xlu0 %2738  ;;  %3902 = vperm.xlu1 %9209, %v3391_v41   ;;  %v5414_v50 = vadd.f32 %v11227_v20, %v5412_v39  ;;  %v3109_v62 = vmul.f32 %v11004_v11, %v11235_v48 }
 0x37d   : > { %v4642_v9 = vld [vmem:[#allocation2 + $0x1e9] sm:$0xff]  ;;  %3882 = vperm.xlu0 %9208, %v3387_v10   ;;  %v11245_v19 = vld [vmem:[#allocation2 + $0x1c0] sm:$0xff] }
 0x37e   : > { %v4770_v18 = vmax.f32 %v4514_v7, %v4642_v9  ;;  %v11249_v14 = vld [vmem:[#allocation2 + $0x1e1] sm:$0xff]  ;;  %v5147_v54 = vmax.f32 %v11185_v63, %v11245_v19  ;;  %v5416_v1 = vmax.f32 %v5414_v50, 0.0  ;;  %v2369_v10 = vld [vmem:[%s9404_s25 + $0x350] sm:$0xff]  ;;  %v1178_v7 = vmul.f32 %v10997_v47, %v13454_v46 }
 0x37f   : > { %v3723_v57 = vpop.permute.xlu1 %3722  ;;  %v13447_v63 = vld [vmem:[#allocation57_spill] sm:$0xff] }
 0x380   : > { %4898 = vst.msk [vmem:[#allocation2 + $0x1e8] sm:$0xff] %vm330_vm0, %v4770_v18  ;;  %v4128_v58 = vmul.f32 %v11031_v61, %v3723_v57  ;;  %v11260_v13 = vpop.permute.xlu0 %2748  ;;  %2883 = vperm.xlu1 %9209, %v2364_v17   ;;  %5271 = vst.msk [vmem:[#allocation2 + $0x1a0] sm:$0xff] %vm330_vm0, %v5147_v54  ;;  %v1175_v31 = vmul.f32 %v10997_v47, %v13447_v63  ;;  %v2368_v39 = vld [vmem:[%s9404_s25 + $0x348] sm:$0xff]  ;;  %v2207_v16 = vadd.f32 %v2079_v12, %v1178_v7 }
 0x381   : > { %3907 = vperm.xlu0 %9208, %v3392_v35   ;;  %v5541_v6 = vld [vmem:[#allocation6 + $0x59] sm:$0xff]  ;;  %5418 = vst.msk [vmem:[#allocation6 + $0x62] sm:$0x7f] %vm4964_vm2, %v5416_v1  ;;  %v3108_v35 = vmul.f32 %v11004_v11, %v11242_v53  ;;  %v13456_v1 = vld [vmem:[#allocation172_spill] sm:$0xff] }
 0x382   : > { %v5023_v5 = vld [vmem:[#allocation2 + $0x1c8] sm:$0xff]  ;;  %v4256_v37 = vadd.f32 %v4128_v58, %v3227_v24  ;;  %8647 = vmatmul.mubr.msk.f32.gmra.mxu0 %vm330_vm0, %v5541_v6  ;;  %v2204_v9 = vadd.f32 %v2076_v38, %v1175_v31  ;;  %v2081_v63 = vmul.f32 %v10986_v60, %v13456_v1  ;;  %v4513_v31 = vld [vmem:[#allocation2 + $0x1e0] sm:$0xff]  ;;  %v2366_v6 = vld [vmem:[%s9404_s25 + $0x338] sm:$0xff] }
 0x383   : > { %v5510_v23 = vld [vmem:[#allocation6 + $0x58] sm:$0xff]  ;;  %v5148_v0 = vmax.f32 %v11149_v40, %v5023_v5  ;;  %v3743_v43 = vpop.permute.xlu1 %3742  ;;  %8649 = vmatprep.mubr.msk.f32.mxu0 %vm9299_vm1, %v13357_v25  ;;  %v4769_v49 = vmax.f32 %v4513_v31, %v11249_v14  ;;  %v3236_v44 = vadd.f32 %v3108_v35, %v2207_v16  ;;  %v3398_v16 = vld [vmem:[%s9404_s25 + $0x351] sm:$0xff] }
 0x384   : > { %8738 = vmatmul.mubr.msk.f32.gmra.mxu1 %vm330_vm0, %v5510_v23  ;;  %4384 = vst.msk [vmem:[#allocation2 + $0x1d8] sm:$0xff] %vm330_vm0, %v4256_v37  ;;  %v4132_v41 = vmul.f32 %v11031_v61, %v3743_v43  ;;  %v11282_v30 = vpop.permute.xlu0 %2733  ;;  %2898 = vperm.xlu1 %9209, %v2367_v26   ;;  %v13452_v40 = vld [vmem:[#allocation58_spill] sm:$0xff]  ;;  %v6011_v2 = vpop.f32.mrf.mxu1  ;;  %v3233_v57 = vadd.f32 %v3105_v52, %v2204_v9  ;;  %v13457_v23 = vld [vmem:[#allocation169_spill] sm:$0xff]  ;;  %v13460_v1 = vld [vmem:[#allocation167_spill] sm:$0xff] }
 0x385   : > { %v1174_v29 = vmul.f32 %v10997_v47, %v13452_v40  ;;  %5272 = vst.msk [vmem:[#allocation2 + $0x1a8] sm:$0xff] %vm330_vm0, %v5148_v0  ;;  %2888 = vperm.xlu0 %9208, %v2365_v15   ;;  %8740 = vmatprep.mubr.msk.f32.mxu1 %vm9299_vm1, %v13357_v25  ;;  %v3393_v58 = vld [vmem:[%s9404_s25 + $0x329] sm:$0xff]  ;;  %v3106_v26 = vmul.f32 %v11004_v11, %v11222_v56  ;;  %v3394_v9 = vld [vmem:[%s9404_s25 + $0x331] sm:$0xff] }
 0x386   : > { %v4260_v17 = vadd.f32 %v4132_v41, %v3231_v34  ;;  %v8706_v54 = vpop.f32.mrf.mxu1  ;;  %v2080_v56 = vmul.f32 %v10986_v60, %v13457_v23  ;;  %v3110_v41 = vmul.f32 %v11004_v11, %v11260_v13  ;;  %v3396_v13 = vld [vmem:[%s9404_s25 + $0x341] sm:$0xff]  ;;  %v2209_v46 = vadd.f32 %v2081_v63, %v1180_v33 }
 0x387   : > { %v11298_v18 = vld [vmem:[#allocation2 + $0x1e8] sm:$0xff]  ;;  %v2203_v42 = vadd.f32 %v2075_v3, %v1174_v29  ;;  %v3753_v50 = vpop.permute.xlu1 %3752  ;;  %v4511_v3 = vld [vmem:[#allocation2 + $0x1d0] sm:$0xff]  ;;  %v2078_v63 = vmul.f32 %v10986_v60, %v13460_v1 }
 0x388   : > { %v5152_v28 = vmax.f32 %v5023_v5, %v11298_v18  ;;  %4388 = vst.msk [vmem:[#allocation2 + $0x1f8] sm:$0xff] %vm330_vm0, %v4260_v17  ;;  %v4134_v24 = vmul.f32 %v11031_v61, %v3753_v50  ;;  %v3748_v21 = vpop.permute.xlu0 %3747  ;;  %2908 = vperm.xlu1 %9209, %v2369_v10   ;;  %v5542_v32 = vld [vmem:[#allocation6 + $0x61] sm:$0xff]  ;;  %v3234_v10 = vadd.f32 %v3106_v26, %v2205_v59 }
 0x389   : > { %v3232_v53 = vadd.f32 %v3104_v8, %v2203_v42  ;;  %v4133_v15 = vmul.f32 %v11031_v61, %v3748_v21  ;;  %v5714_v55 = vpop.f32.mrf.mxu0  ;;  %2903 = vperm.xlu0 %9208, %v2368_v39   ;;  %v5511_v38 = vld [vmem:[#allocation6 + $0x60] sm:$0xff]  ;;  %8650 = vmatmul.mubr.msk.f32.gmra.mxu0 %vm330_vm0, %v5542_v32  ;;  %v13458_v8 = vld [vmem:[#allocation61_spill] sm:$0xff] }
 0x38a   : > { %5276 = vst.msk [vmem:[#allocation2 + $0x1c8] sm:$0xff] %vm330_vm0, %v5152_v28  ;;  %v4262_v5 = vadd.f32 %v4134_v24, %v3233_v57  ;;  %v11316_v37 = vadd.f32 %v6011_v2, %v5714_v55  ;;  %8741 = vmatmul.mubr.msk.f32.gmra.mxu1 %vm330_vm0, %v5511_v38  ;;  %8652 = vmatprep.mubr.msk.f32.mxu0 %vm9299_vm1, %v13357_v25  ;;  %v4515_v39 = vld [vmem:[#allocation2 + $0x1f0] sm:$0xff] }
 0x38b   : > { %v4512_v51 = vld [vmem:[#allocation2 + $0x1d8] sm:$0xff]  ;;  %v4261_v0 = vadd.f32 %v4133_v15, %v3232_v53  ;;  %v8615_v43 = vpop.f32.mrf.mxu0  ;;  %v3768_v34 = vpop.permute.xlu1 %3767  ;;  %8743 = vmatprep.mubr.msk.f32.mxu1 %vm9299_vm1, %v13357_v25  ;;  %v1179_v2 = vmul.f32 %v10997_v47, %v13458_v8  ;;  %v3238_v28 = vadd.f32 %v3110_v41, %v2209_v46 }
 0x38c   : > { %v4639_v36 = vld [vmem:[#allocation2 + $0x1d1] sm:$0xff]  ;;  %v4640_v12 = vld [vmem:[#allocation2 + $0x1d9] sm:$0xff]  ;;  %4390 = vst.msk [vmem:[#allocation2 + $0x208] sm:$0xff] %vm330_vm0, %v4262_v5  ;;  %v4137_v40 = vmul.f32 %v11031_v61, %v3768_v34  ;;  %v3758_v29 = vpop.permute.xlu0 %3757  ;;  %3912 = vperm.xlu1 %9209, %v3393_v58   ;;  %v3397_v58 = vld [vmem:[%s9404_s25 + $0x349] sm:$0xff] }
 0x38d   : > { %v4767_v14 = vmax.f32 %v4511_v3, %v4639_v36  ;;  %v4768_v52 = vmax.f32 %v4512_v51, %v4640_v12  ;;  %4897 = vst.msk [vmem:[#allocation2 + $0x1e0] sm:$0xff] %vm330_vm0, %v4769_v49  ;;  %4389 = vst.msk [vmem:[#allocation2 + $0x200] sm:$0xff] %vm330_vm0, %v4261_v0  ;;  %v4135_v22 = vmul.f32 %v11031_v61, %v3758_v29  ;;  %2893 = vperm.xlu0 %9208, %v2366_v6   ;;  %v13459_v57 = vld [vmem:[#allocation171_spill] sm:$0xff]  ;;  %v2371_v43 = vld [vmem:[%s9404_s25 + $0x360] sm:$0xff] }
 0x38e   : > { %v4265_v7 = vadd.f32 %v4137_v40, %v3236_v44  ;;  %v2208_v17 = vadd.f32 %v2080_v56, %v1179_v2  ;;  %v2082_v24 = vmul.f32 %v10986_v60, %v13459_v57  ;;  %v13461_v55 = vld [vmem:[#allocation59_spill] sm:$0xff]  ;;  %v3107_v51 = vmul.f32 %v11004_v11, %v11282_v30  ;;  %v13463_v30 = vld [vmem:[#allocation174_spill] sm:$0xff] }
 0x38f   : > { %4895 = vst.msk [vmem:[#allocation2 + $0x1d0] sm:$0xff] %vm330_vm0, %v4767_v14  ;;  %4896 = vst.msk [vmem:[#allocation2 + $0x1d8] sm:$0xff] %vm330_vm0, %v4768_v52  ;;  %v4643_v45 = vld [vmem:[#allocation2 + $0x1f1] sm:$0xff]  ;;  %v4263_v42 = vadd.f32 %v4135_v22, %v3234_v10  ;;  %v3778_v48 = vpop.permute.xlu1 %3777  ;;  %v1177_v32 = vmul.f32 %v10997_v47, %v13461_v55  ;;  %v2083_v29 = vmul.f32 %v10986_v60, %v13463_v30  ;;  %v2372_v57 = vld [vmem:[%s9404_s25 + $0x368] sm:$0xff] }
 0x390   : > { %v4771_v35 = vmax.f32 %v4515_v39, %v4643_v45  ;;  %4393 = vst.msk [vmem:[#allocation2 + $0x220] sm:$0xff] %vm330_vm0, %v4265_v7  ;;  %v4139_v54 = vmul.f32 %v11031_v61, %v3778_v48  ;;  %v3773_v33 = vpop.permute.xlu0 %3772  ;;  %3927 = vperm.xlu1 %9209, %v3396_v13   ;;  %v3237_v50 = vadd.f32 %v3109_v62, %v2208_v17  ;;  %v4516_v31 = vld [vmem:[#allocation2 + $0x1f8] sm:$0xff]  ;;  %v13464_v2 = vld [vmem:[#allocation66_spill] sm:$0xff] }
 0x391   : > { %4391 = vst.msk [vmem:[#allocation2 + $0x210] sm:$0xff] %vm330_vm0, %v4263_v42  ;;  %v4138_v59 = vmul.f32 %v11031_v61, %v3773_v33  ;;  %3917 = vperm.xlu0 %9208, %v3394_v9   ;;  %v13462_v38 = vld [vmem:[#allocation63_spill] sm:$0xff]  ;;  %v2206_v40 = vadd.f32 %v2078_v63, %v1177_v32  ;;  %v1182_v10 = vmul.f32 %v10997_v47, %v13464_v2 }
 0x392   : > { %4899 = vst.msk [vmem:[#allocation2 + $0x1f0] sm:$0xff] %vm330_vm0, %v4771_v35  ;;  %v4267_v21 = vadd.f32 %v4139_v54, %v3238_v28  ;;  %v1181_v49 = vmul.f32 %v10997_v47, %v13462_v38  ;;  %v2370_v41 = vld [vmem:[%s9404_s25 + $0x358] sm:$0xff] }
 0x393   : > { %v4266_v26 = vadd.f32 %v4138_v59, %v3237_v50  ;;  %v2759_v15 = vpop.permute.xlu1 %2758  ;;  %v3235_v13 = vadd.f32 %v3107_v51, %v2206_v40  ;;  %v3399_v17 = vld [vmem:[%s9404_s25 + $0x359] sm:$0xff]  ;;  %v2211_v48 = vadd.f32 %v2083_v29, %v1182_v10 }
 0x394   : > { %v11353_v53 = vld [vmem:[#allocation2 + $0x1e0] sm:$0xff]  ;;  %4395 = vst.msk [vmem:[#allocation2 + $0x230] sm:$0xff] %vm330_vm0, %v4267_v21  ;;  %v2754_v56 = vpop.permute.xlu0 %2753  ;;  %3937 = vperm.xlu1 %9209, %v3398_v16   ;;  %v2210_v34 = vadd.f32 %v2082_v24, %v1181_v49  ;;  %v3112_v7 = vmul.f32 %v11004_v11, %v2759_v15 }
 0x395   : > { %v5151_v3 = vmax.f32 %v11245_v19, %v11353_v53  ;;  %v4517_v5 = vld [vmem:[#allocation2 + $0x200] sm:$0xff]  ;;  %4394 = vst.msk [vmem:[#allocation2 + $0x228] sm:$0xff] %vm330_vm0, %v4266_v26  ;;  %v3111_v0 = vmul.f32 %v11004_v11, %v2754_v56  ;;  %3932 = vperm.xlu0 %9208, %v3397_v58   ;;  %v2373_v56 = vld [vmem:[%s9404_s25 + $0x370] sm:$0xff] }
 0x396   : > { %v4644_v6 = vld [vmem:[#allocation2 + $0x1f9] sm:$0xff]  ;;  %v4645_v23 = vld [vmem:[#allocation2 + $0x201] sm:$0xff]  ;;  %v5024_v19 = vld [vmem:[#allocation2 + $0x1d0] sm:$0xff]  ;;  %v3240_v59 = vadd.f32 %v3112_v7, %v2211_v48 }
 0x397   : > { %v11362_v44 = vld [vmem:[#allocation2 + $0x1d8] sm:$0xff]  ;;  %v4772_v36 = vmax.f32 %v4516_v31, %v4644_v6  ;;  %v4773_v12 = vmax.f32 %v4517_v5, %v4645_v23  ;;  %5275 = vst.msk [vmem:[#allocation2 + $0x1c0] sm:$0xff] %vm330_vm0, %v5151_v3  ;;  %v5149_v52 = vmax.f32 %v11190_v27, %v5024_v19  ;;  %v3783_v8 = vpop.permute.xlu1 %3782  ;;  %v3239_v27 = vadd.f32 %v3111_v0, %v2210_v34  ;;  %v3400_v24 = vld [vmem:[%s9404_s25 + $0x361] sm:$0xff]  ;;  %v11426_v34 = vld [vmem:[%s13142_s1] ss:$0 sm:$0xff] }
 0x398   : > { %v5150_v14 = vmax.f32 %v11211_v4, %v11362_v44  ;;  %v4518_v4 = vld [vmem:[#allocation2 + $0x208] sm:$0xff]  ;;  %v4140_v22 = vmul.f32 %v11031_v61, %v3783_v8  ;;  %v3763_v60 = vpop.permute.xlu0 %3762  ;;  %2918 = vperm.xlu1 %9209, %v2371_v43   ;;  %v3395_v42 = vld [vmem:[%s9404_s25 + $0x339] sm:$0xff]  ;;  %v11416_v49 = vld [vmem:[%s13142_s1 + $0x1] ss:$0 sm:$0xff] }
 0x399   : > { %4900 = vst.msk [vmem:[#allocation2 + $0x1f8] sm:$0xff] %vm330_vm0, %v4772_v36  ;;  %4901 = vst.msk [vmem:[#allocation2 + $0x200] sm:$0xff] %vm330_vm0, %v4773_v12  ;;  %v4646_v62 = vld [vmem:[#allocation2 + $0x209] sm:$0xff]  ;;  %v4136_v47 = vmul.f32 %v11031_v61, %v3763_v60  ;;  %2913 = vperm.xlu0 %9208, %v2370_v41   ;;  %v4521_v6 = vld [vmem:[#allocation2 + $0x220] sm:$0xff] }
 0x39a   : > { %5274 = vst.msk [vmem:[#allocation2 + $0x1b8] sm:$0xff] %vm330_vm0, %v5150_v14  ;;  %5273 = vst.msk [vmem:[#allocation2 + $0x1b0] sm:$0xff] %vm330_vm0, %v5149_v52  ;;  %v4774_v46 = vmax.f32 %v4518_v4, %v4646_v62  ;;  %v11384_v9 = vld [vmem:[#allocation2 + $0x1f0] sm:$0xff]  ;;  %v4268_v39 = vadd.f32 %v4140_v22, %v3239_v27  ;;  %v13465_v3 = vld [vmem:[#allocation173_spill] sm:$0xff] }
 0x39b   : > { %v5153_v45 = vmax.f32 %v5024_v19, %v11384_v9  ;;  %v4264_v28 = vadd.f32 %v4136_v47, %v3235_v13  ;;  %v2764_v35 = vpop.permute.xlu1 %2763  ;;  %v2084_v5 = vmul.f32 %v11416_v49, %v13465_v3  ;;  %v4519_v0 = vld [vmem:[#allocation2 + $0x210] sm:$0xff]  ;;  %v13466_v14 = vld [vmem:[#allocation65_spill] sm:$0xff] }
 0x39c   : > { %4902 = vst.msk [vmem:[#allocation2 + $0x208] sm:$0xff] %vm330_vm0, %v4774_v46  ;;  %v4522_v54 = vld [vmem:[#allocation2 + $0x228] sm:$0xff]  ;;  %4396 = vst.msk [vmem:[#allocation2 + $0x238] sm:$0xff] %vm330_vm0, %v4268_v39  ;;  %v3788_v11 = vpop.permute.xlu0 %3787  ;;  %3942 = vperm.xlu1 %9209, %v3399_v17   ;;  %v1183_v52 = vmul.f32 %v11426_v34, %v13466_v14  ;;  %v2377_v13 = vld [vmem:[%s9404_s25 + $0x390] sm:$0xff] }
 0x39d   : > { %v4650_v33 = vld [vmem:[#allocation2 + $0x229] sm:$0xff]  ;;  %5277 = vst.msk [vmem:[#allocation2 + $0x1d0] sm:$0xff] %vm330_vm0, %v5153_v45  ;;  %4392 = vst.msk [vmem:[#allocation2 + $0x218] sm:$0xff] %vm330_vm0, %v4264_v28  ;;  %v4141_v16 = vmul.f32 %v11031_v61, %v3788_v11  ;;  %3922 = vperm.xlu0 %9208, %v3395_v42   ;;  %v4649_v1 = vld [vmem:[#allocation2 + $0x221] sm:$0xff] }
 0x39e   : > { %v4778_v50 = vmax.f32 %v4522_v54, %v4650_v33  ;;  %v5420_v21 = vld [vmem:[#allocation2 + $0x1c0] ss:$2 sm:$0xff]  ;;  %v4777_v36 = vmax.f32 %v4521_v6, %v4649_v1  ;;  %v2212_v46 = vadd.f32 %v2084_v5, %v1183_v52 }
 0x39f   : > { %v5423_v31 = vadd.f32 %v11227_v20, %v5420_v21  ;;  %v4269_v15 = vadd.f32 %v4141_v16, %v3240_v59  ;;  %v2779_v55 = vpop.permute.xlu1 %2778  ;;  %v2376_v47 = vld [vmem:[%s9404_s25 + $0x388] sm:$0xff]  ;;  %v13469_v28 = vld [vmem:[#allocation176_spill] sm:$0xff]  ;;  %v11465_v21 = vld [vmem:[%s13142_s1 + $0x3] ss:$0 sm:$0xff] }
 0x3a0   : > { %v11397_v58 = vld [vmem:[#allocation2 + $0x200] sm:$0xff]  ;;  %v11399_v63 = vld [vmem:[#allocation2 + $0x1f8] sm:$0xff]  ;;  %4906 = vst.msk [vmem:[#allocation2 + $0x228] sm:$0xff] %vm330_vm0, %v4778_v50  ;;  %v11407_v32 = vpop.permute.xlu0 %2768  ;;  %2923 = vperm.xlu1 %9209, %v2372_v57   ;;  %v13467_v17 = vld [vmem:[#allocation178_spill] sm:$0xff] }
 0x3a1   : > { %v5155_v26 = vmax.f32 %v11353_v53, %v11397_v58  ;;  %v5154_v61 = vmax.f32 %v11362_v44, %v11399_v63  ;;  %v5425_v38 = vmax.f32 %v5423_v31, 0.0  ;;  %4397 = vst.msk [vmem:[#allocation2 + $0x240] sm:$0xff] %vm330_vm0, %v4269_v15  ;;  %3947 = vperm.xlu0 %9208, %v3400_v24   ;;  %v2375_v53 = vld [vmem:[%s9404_s25 + $0x380] sm:$0xff]  ;;  %v4523_v44 = vld [vmem:[#allocation2 + $0x230] sm:$0xff]  ;;  %v5719_v19 = vpop.f32.mrf.mxu0  ;;  %v2087_v39 = vmul.f32 %v11416_v49, %v13467_v17 }
 0x3a2   : > { %v6016_v43 = vpop.f32.mrf.mxu1  ;;  %v13468_v42 = vld [vmem:[#allocation70_spill] sm:$0xff]  ;;  %v13471_v5 = vld [vmem:[#allocation180_spill] sm:$0xff] }
 0x3a3   : > { %5279 = vst.msk [vmem:[#allocation2 + $0x1e0] sm:$0xff] %vm330_vm0, %v5155_v26  ;;  %5278 = vst.msk [vmem:[#allocation2 + $0x1d8] sm:$0xff] %vm330_vm0, %v5154_v61  ;;  %v5031_v23 = vld [vmem:[#allocation2 + $0x208] sm:$0xff]  ;;  %v4651_v12 = vld [vmem:[#allocation2 + $0x231] sm:$0xff]  ;;  %v11436_v2 = vadd.f32 %v6016_v43, %v5719_v19  ;;  %v11438_v10 = vpop.permute.xlu1 %2788  ;;  %v8618_v22 = vpop.f32.mrf.mxu0  ;;  %v1186_v48 = vmul.f32 %v11426_v34, %v13468_v42 }
 0x3a4   : > { %5427 = vst.msk [vmem:[#allocation6 + $0x69] sm:$0xff] %vm330_vm0, %v5425_v38  ;;  %v5156_v51 = vmax.f32 %v11298_v18, %v5031_v23  ;;  %v4779_v41 = vmax.f32 %v4523_v44, %v4651_v12  ;;  %v4520_v40 = vld [vmem:[#allocation2 + $0x218] sm:$0xff]  ;;  %v11433_v18 = vld [vmem:[%s13142_s1 + $0x2] ss:$0 sm:$0xff]  ;;  %v11440_v4 = vpop.permute.xlu0 %2783  ;;  %2938 = vperm.xlu1 %9209, %v2375_v53   ;;  %v8709_v60 = vpop.f32.mrf.mxu1  ;;  %v3401_v15 = vld [vmem:[%s9404_s25 + $0x369] sm:$0xff] }
 0x3a5   : > { %v4647_v30 = vld [vmem:[#allocation2 + $0x211] sm:$0xff]  ;;  %v4648_v29 = vld [vmem:[#allocation2 + $0x219] sm:$0xff]  ;;  %v3113_v8 = vmul.f32 %v11433_v18, %v2764_v35  ;;  %2928 = vperm.xlu0 %9208, %v2373_v56   ;;  %v2085_v35 = vmul.f32 %v11416_v49, %v13469_v28  ;;  %v3116_v24 = vmul.f32 %v11433_v18, %v2779_v55  ;;  %v2089_v55 = vmul.f32 %v11416_v49, %v13471_v5 }
 0x3a6   : > { %5280 = vst.msk [vmem:[#allocation2 + $0x1e8] sm:$0xff] %vm330_vm0, %v5156_v51  ;;  %v4775_v62 = vmax.f32 %v4519_v0, %v4647_v30  ;;  %v4776_v27 = vmax.f32 %v4520_v40, %v4648_v29  ;;  %4905 = vst.msk [vmem:[#allocation2 + $0x220] sm:$0xff] %vm330_vm0, %v4777_v36  ;;  %v4524_v54 = vld [vmem:[#allocation2 + $0x238] sm:$0xff]  ;;  %v3114_v6 = vmul.f32 %v11433_v18, %v11407_v32  ;;  %v13472_v32 = vld [vmem:[#allocation69_spill] sm:$0xff] }
 0x3a7   : > { %v11445_v7 = vld [vmem:[#allocation2 + $0x228] sm:$0xff]  ;;  %4907 = vst.msk [vmem:[#allocation2 + $0x230] sm:$0xff] %vm330_vm0, %v4779_v41  ;;  %v3241_v33 = vadd.f32 %v3113_v8, %v2212_v46  ;;  %v3793_v50 = vpop.permute.xlu1 %3792  ;;  %v13470_v53 = vld [vmem:[#allocation68_spill] sm:$0xff]  ;;  %v2215_v44 = vadd.f32 %v2087_v39, %v1186_v48  ;;  %v1187_v19 = vmul.f32 %v11426_v34, %v13472_v32  ;;  %v3118_v60 = vmul.f32 %v11433_v18, %v11438_v10  ;;  %v3402_v28 = vld [vmem:[%s9404_s25 + $0x371] sm:$0xff] }
 0x3a8   : > { %v5160_v45 = vmax.f32 %v5031_v23, %v11445_v7  ;;  %4903 = vst.msk [vmem:[#allocation2 + $0x210] sm:$0xff] %vm330_vm0, %v4775_v62  ;;  %4904 = vst.msk [vmem:[#allocation2 + $0x218] sm:$0xff] %vm330_vm0, %v4776_v27  ;;  %v4652_v11 = vld [vmem:[#allocation2 + $0x239] sm:$0xff]  ;;  %v11458_v59 = vpop.permute.xlu0 %2773  ;;  %2948 = vperm.xlu1 %9209, %v2377_v13   ;;  %v4142_v1 = vmul.f32 %v11465_v21, %v3793_v50  ;;  %v1184_v3 = vmul.f32 %v11426_v34, %v13470_v53  ;;  %v13474_v41 = vld [vmem:[#allocation177_spill] sm:$0xff] }
 0x3a9   : > { %v4780_v57 = vmax.f32 %v4524_v54, %v4652_v11  ;;  %v5724_v31 = vpop.f32.mrf.mxu0  ;;  %2943 = vperm.xlu0 %9208, %v2376_v47   ;;  %v2374_v56 = vld [vmem:[%s9404_s25 + $0x378] sm:$0xff]  ;;  %v2088_v40 = vmul.f32 %v11416_v49, %v13474_v41  ;;  %v3244_v22 = vadd.f32 %v3116_v24, %v2215_v44  ;;  %v3404_v47 = vld [vmem:[%s9404_s25 + $0x381] sm:$0xff] }
 0x3aa   : > { %v5422_v16 = vld [vmem:[#allocation2 + $0x1d0] ss:$2 sm:$0x7f]  ;;  %5284 = vst.msk [vmem:[#allocation2 + $0x208] sm:$0xff] %vm330_vm0, %v5160_v45  ;;  %v6021_v23 = vpop.f32.mrf.mxu1  ;;  %v4270_v51 = vadd.f32 %v4142_v1, %v3241_v33  ;;  %v2213_v52 = vadd.f32 %v2085_v35, %v1184_v3 }
 0x3ab   : > { %v5543_v26 = vld [vmem:[#allocation6 + $0x69] sm:$0xff]  ;;  %v5424_v38 = vadd.f32 %v11227_v20, %v5422_v16  ;;  %4908 = vst.msk [vmem:[#allocation2 + $0x238] sm:$0xff] %vm330_vm0, %v4780_v57  ;;  %v11480_v36 = vadd.f32 %v6021_v23, %v5724_v31  ;;  %v8621_v12 = vpop.f32.mrf.mxu0  ;;  %v3808_v8 = vpop.permute.xlu1 %3807  ;;  %v2216_v11 = vadd.f32 %v2088_v40, %v1187_v19  ;;  %v11518_v57 = vld [vmem:[%s9404_s25 + $0x391] sm:$0xff]  ;;  %v3405_v31 = vld [vmem:[%s9404_s25 + $0x389] sm:$0xff] }
 0x3ac   : > { %v5512_v61 = vld [vmem:[#allocation6 + $0x68] sm:$0xff]  ;;  %8653 = vmatmul.mubr.msk.f32.gmra.mxu0 %vm330_vm0, %v5543_v26  ;;  %v8712_v29 = vpop.f32.mrf.mxu1  ;;  %3952 = vperm.xlu1 %9209, %v3401_v15   ;;  %4398 = vst.msk [vmem:[#allocation2 + $0x248] sm:$0xff] %vm330_vm0, %v4270_v51  ;;  %v4145_v13 = vmul.f32 %v11465_v21, %v3808_v8  ;;  %v3798_v46 = vpop.permute.xlu0 %3797  ;;  %v3242_v42 = vadd.f32 %v3114_v6, %v2213_v52  ;;  %v2379_v19 = vld [vmem:[%s9404_s25 + $0x3a0] sm:$0xff] }
 0x3ad   : > { %8744 = vmatmul.mubr.msk.f32.gmra.mxu1 %vm330_vm0, %v5512_v61  ;;  %v5426_v0 = vmax.f32 %v5424_v38, 0.0  ;;  %8655 = vmatprep.mubr.msk.f32.mxu0 %vm9299_vm1, %v13357_v25  ;;  %v13473_v43 = vld [vmem:[#allocation72_spill] sm:$0xff]  ;;  %v4143_v48 = vmul.f32 %v11465_v21, %v3798_v46  ;;  %v13475_v61 = vld [vmem:[#allocation179_spill] sm:$0xff]  ;;  %v3115_v52 = vmul.f32 %v11433_v18, %v11458_v59  ;;  %v13480_v46 = vld [vmem:[#allocation74_spill] sm:$0xff] }
 0x3ae   : > { %8746 = vmatprep.mubr.msk.f32.mxu1 %vm9299_vm1, %v13357_v25  ;;  %v1188_v14 = vmul.f32 %v11426_v34, %v13473_v43  ;;  %v11492_v30 = vld [vmem:[#allocation2 + $0x220] sm:$0xff]  ;;  %v11494_v62 = vld [vmem:[#allocation2 + $0x230] sm:$0xff]  ;;  %2933 = vperm.xlu0 %9208, %v2374_v56   ;;  %v4273_v33 = vadd.f32 %v4145_v13, %v3244_v22  ;;  %v2090_v15 = vmul.f32 %v11416_v49, %v13475_v61  ;;  %v2378_v40 = vld [vmem:[%s9404_s25 + $0x398] sm:$0xff] }
 0x3af   : > { %v5159_v27 = vmax.f32 %v11397_v58, %v11492_v30  ;;  %5428 = vst.msk [vmem:[#allocation6 + $0x71] sm:$0x7f] %vm4964_vm2, %v5426_v0  ;;  %v5032_v39 = vld [vmem:[#allocation2 + $0x210] sm:$0xff]  ;;  %v5033_v45 = vld [vmem:[#allocation2 + $0x218] sm:$0xff]  ;;  %v3117_v58 = vmul.f32 %v11433_v18, %v11440_v4  ;;  %v4271_v50 = vadd.f32 %v4143_v48, %v3242_v42  ;;  %v3818_v16 = vpop.permute.xlu1 %3817 }
 0x3b0   : > { %v2217_v17 = vadd.f32 %v2089_v55, %v1188_v14  ;;  %v5157_v10 = vmax.f32 %v11384_v9, %v5032_v39  ;;  %v5158_v35 = vmax.f32 %v11399_v63, %v5033_v45  ;;  %v5161_v54 = vmax.f32 %v5032_v39, %v11494_v62  ;;  %3967 = vperm.xlu1 %9209, %v3404_v47   ;;  %v3813_v4 = vpop.permute.xlu0 %3812  ;;  %v13476_v3 = vld [vmem:[#allocation175_spill] sm:$0xff]  ;;  %v4525_v55 = vld [vmem:[#allocation2 + $0x240] sm:$0xff] }
 0x3b1   : > { %5283 = vst.msk [vmem:[#allocation2 + $0x200] sm:$0xff] %vm330_vm0, %v5159_v27  ;;  %4401 = vst.msk [vmem:[#allocation2 + $0x260] sm:$0xff] %vm330_vm0, %v4273_v33  ;;  %v4147_v63 = vmul.f32 %v11465_v21, %v3818_v16  ;;  %v3245_v24 = vadd.f32 %v3117_v58, %v2216_v11  ;;  %v4146_v1 = vmul.f32 %v11465_v21, %v3813_v4  ;;  %v13477_v51 = vld [vmem:[#allocation71_spill] sm:$0xff]  ;;  %v6185_v4 = vld [vmem:[%s13143_s2 + $0x28] sm:$0xff] }
 0x3b2   : > { %5281 = vst.msk [vmem:[#allocation2 + $0x1f0] sm:$0xff] %vm330_vm0, %v5157_v10  ;;  %5282 = vst.msk [vmem:[#allocation2 + $0x1f8] sm:$0xff] %vm330_vm0, %v5158_v35  ;;  %v3246_v9 = vadd.f32 %v3118_v60, %v2217_v17  ;;  %3957 = vperm.xlu0 %9208, %v3402_v28   ;;  %v11523_v26 = vld [vmem:[#allocation2 + $0x238] sm:$0xff]  ;;  %v2086_v5 = vmul.f32 %v11416_v49, %v13476_v3  ;;  %v1189_v12 = vmul.f32 %v11426_v34, %v13477_v51  ;;  %v13479_v60 = vld [vmem:[#allocation182_spill] sm:$0xff] }
 0x3b3   : > { %5285 = vst.msk [vmem:[#allocation2 + $0x210] sm:$0xff] %vm330_vm0, %v5161_v54  ;;  %4399 = vst.msk [vmem:[#allocation2 + $0x250] sm:$0xff] %vm330_vm0, %v4271_v50  ;;  %v5162_v53 = vmax.f32 %v5033_v45, %v11523_v26  ;;  %v4653_v6 = vld [vmem:[#allocation2 + $0x241] sm:$0xff]  ;;  %v4274_v23 = vadd.f32 %v4146_v1, %v3245_v24  ;;  %v2799_v56 = vpop.permute.xlu1 %2798  ;;  %v13478_v43 = vld [vmem:[#allocation67_spill] sm:$0xff]  ;;  %v2091_v13 = vmul.f32 %v11416_v49, %v13479_v60  ;;  %8792 = vmatpush3.msra.mxu0 %v6185_v4 }
 0x3b4   : > { %v4275_v38 = vadd.f32 %v4147_v63, %v3246_v9  ;;  %3977 = vperm.xlu1 %9209, %v11518_v57   ;;  %v4781_v0 = vmax.f32 %v4525_v55, %v4653_v6  ;;  %v2794_v32 = vpop.permute.xlu0 %2793  ;;  %v1185_v14 = vmul.f32 %v11426_v34, %v13478_v43  ;;  %v2218_v8 = vadd.f32 %v2090_v15, %v1189_v12  ;;  %v4526_v17 = vld [vmem:[#allocation2 + $0x248] sm:$0xff]  ;;  %v3403_v33 = vld [vmem:[%s9404_s25 + $0x379] sm:$0xff]  ;;  %v11584_v12 = vld [vmem:[%s9404_s25 + $0x3b1] sm:$0xff] }
 0x3b5   : > { %5286 = vst.msk [vmem:[#allocation2 + $0x218] sm:$0xff] %vm330_vm0, %v5162_v53  ;;  %4402 = vst.msk [vmem:[#allocation2 + $0x268] sm:$0xff] %vm330_vm0, %v4274_v23  ;;  %v3119_v41 = vmul.f32 %v11433_v18, %v2794_v32  ;;  %v1190_v47 = vmul.f32 %v11426_v34, %v13480_v46  ;;  %v3120_v35 = vmul.f32 %v11433_v18, %v2799_v56  ;;  %v11563_v15 = vld [vmem:[%s9404_s25 + $0x3a1] sm:$0xff]  ;;  %v6542_v55 = vld [vmem:[%s13143_s2 + $0x38] sm:$0xff]  ;;  %8793 = vmatprep.subr.mxu0 %v13357_v25 }
 0x3b6   : > { %v5513_v44 = vld [vmem:[#allocation6 + $0x70] sm:$0xff]  ;;  %4403 = vst.msk [vmem:[#allocation2 + $0x270] sm:$0xff] %vm330_vm0, %v4275_v38  ;;  %3972 = vperm.xlu0 %9208, %v3405_v31   ;;  %4909 = vst.msk [vmem:[#allocation2 + $0x240] sm:$0xff] %vm330_vm0, %v4781_v0  ;;  %v2214_v22 = vadd.f32 %v2086_v5, %v1185_v14  ;;  %8883 = vmatpush3.msra.mxu1 %v6542_v55  ;;  %v11589_v32 = vld [vmem:[%s9404_s25 + $0x3a9] sm:$0xff] }
 0x3b7   : > { %8747 = vmatmul.mubr.msk.f32.gmra.mxu1 %vm330_vm0, %v5513_v44  ;;  %v3823_v59 = vpop.permute.xlu1 %3822  ;;  %v3247_v45 = vadd.f32 %v3119_v41, %v2218_v8  ;;  %v2219_v50 = vadd.f32 %v2091_v13, %v1190_v47  ;;  %8884 = vmatprep.subr.mxu1 %v13357_v25 }
 0x3b8   : > { %8749 = vmatprep.mubr.msk.f32.mxu1 %vm9299_vm1, %v13357_v25  ;;  %v5430_v29 = vld [vmem:[#allocation2 + $0x200] ss:$2 sm:$0xff]  ;;  %2958 = vperm.xlu1 %9209, %v2379_v19   ;;  %v4148_v42 = vmul.f32 %v11465_v21, %v3823_v59  ;;  %v3803_v58 = vpop.permute.xlu0 %3802  ;;  %v3243_v28 = vadd.f32 %v3115_v52, %v2214_v22 }
 0x3b9   : > { %v5433_v27 = vadd.f32 %v11227_v20, %v5430_v29  ;;  %v4144_v54 = vmul.f32 %v11465_v21, %v3803_v58  ;;  %v3248_v3 = vadd.f32 %v3120_v35, %v2219_v50  ;;  %v13481_v19 = vld [vmem:[#allocation181_spill] sm:$0xff]  ;;  %v3407_v35 = vld [vmem:[%s9404_s25 + $0x399] sm:$0xff] }
 0x3ba   : > { %v4654_v39 = vld [vmem:[#allocation2 + $0x249] sm:$0xff]  ;;  %2953 = vperm.xlu0 %9208, %v2378_v40   ;;  %v4276_v11 = vadd.f32 %v4148_v42, %v3247_v45  ;;  %v2092_v43 = vmul.f32 %v11416_v49, %v13481_v19  ;;  %v4529_v14 = vld [vmem:[#allocation2 + $0x260] sm:$0xff] }
 0x3bb   : > { %v5435_v48 = vmax.f32 %v5433_v27, 0.0  ;;  %v4782_v10 = vmax.f32 %v4526_v17, %v4654_v39  ;;  %v4272_v16 = vadd.f32 %v4144_v54, %v3243_v28  ;;  %v2804_v9 = vpop.permute.xlu1 %2803  ;;  %v4527_v22 = vld [vmem:[#allocation2 + $0x250] sm:$0xff]  ;;  %v13482_v59 = vld [vmem:[#allocation73_spill] sm:$0xff] }
 0x3bc   : > { %1934 = vperm.xlu1 %9209, %v3405_v31   ;;  %v5432_v63 = vld [vmem:[#allocation2 + $0x210] ss:$2 sm:$0x7f]  ;;  %v4530_v24 = vld [vmem:[#allocation2 + $0x268] sm:$0xff]  ;;  %4404 = vst.msk [vmem:[#allocation2 + $0x278] sm:$0xff] %vm330_vm0, %v4276_v11  ;;  %v3828_v61 = vpop.permute.xlu0 %3827  ;;  %v1191_v46 = vmul.f32 %v11426_v34, %v13482_v59 }
 0x3bd   : > { %5437 = vst.msk [vmem:[#allocation6 + $0x78] sm:$0xff] %vm330_vm0, %v5435_v48  ;;  %4910 = vst.msk [vmem:[#allocation2 + $0x248] sm:$0xff] %vm330_vm0, %v4782_v10  ;;  %v4658_v1 = vld [vmem:[#allocation2 + $0x269] sm:$0xff]  ;;  %v5434_v38 = vadd.f32 %v11227_v20, %v5432_v63  ;;  %v11566_v5 = vld [vmem:[#allocation2 + $0x240] sm:$0xff]  ;;  %v4149_v31 = vmul.f32 %v11465_v21, %v3828_v61 }
 0x3be   : > { %3962 = vperm.xlu0 %9208, %v3403_v33   ;;  %v4786_v53 = vmax.f32 %v4530_v24, %v4658_v1  ;;  %4400 = vst.msk [vmem:[#allocation2 + $0x258] sm:$0xff] %vm330_vm0, %v4272_v16  ;;  %v4657_v6 = vld [vmem:[#allocation2 + $0x261] sm:$0xff]  ;;  %v5163_v20 = vmax.f32 %v11492_v30, %v11566_v5  ;;  %v2220_v54 = vadd.f32 %v2092_v43, %v1191_v46  ;;  %v13483_v33 = vld [vmem:[#allocation186_spill] sm:$0xff] }
 0x3bf   : > { %v5436_v23 = vmax.f32 %v5434_v38, 0.0  ;;  %v4277_v56 = vadd.f32 %v4149_v31, %v3248_v3  ;;  %v2819_v44 = vpop.permute.xlu1 %2818  ;;  %v4785_v8 = vmax.f32 %v4529_v14, %v4657_v6  ;;  %v2095_v11 = vmul.f32 %v11416_v49, %v13483_v33  ;;  %v13484_v16 = vld [vmem:[#allocation78_spill] sm:$0xff]  ;;  %v13485_v63 = vld [vmem:[#allocation184_spill] sm:$0xff] }
 0x3c0   : > { %4914 = vst.msk [vmem:[#allocation2 + $0x268] sm:$0xff] %vm330_vm0, %v4786_v53  ;;  %1949 = vperm.xlu1 %9209, %v11563_v15   ;;  %5287 = vst.msk [vmem:[#allocation2 + $0x220] sm:$0xff] %vm330_vm0, %v5163_v20  ;;  %v11580_v51 = vpop.permute.xlu0 %2808  ;;  %v2093_v4 = vmul.f32 %v11416_v49, %v13485_v63  ;;  %v3124_v31 = vmul.f32 %v11433_v18, %v2819_v44  ;;  %v13490_v46 = vld [vmem:[#allocation80_spill] sm:$0xff] }
 0x3c1   : > { %5438 = vst.msk [vmem:[#allocation6 + $0x80] sm:$0x7f] %vm4964_vm2, %v5436_v23  ;;  %v2380_v23 = vld [vmem:[%s9404_s25 + $0x3a8] sm:$0xff]  ;;  %v3122_v44 = vmul.f32 %v11433_v18, %v11580_v51 }
 0x3c2   : > { %1939 = vperm.xlu0 %9208, %v11518_v57   ;;  %4405 = vst.msk [vmem:[#allocation2 + $0x280] sm:$0xff] %vm330_vm0, %v4277_v56  ;;  %v5729_v41 = vpop.f32.mrf.mxu0  ;;  %v4531_v57 = vld [vmem:[#allocation2 + $0x270] sm:$0xff]  ;;  %v13486_v56 = vld [vmem:[#allocation76_spill] sm:$0xff] }
 0x3c3   : > { %v6026_v40 = vpop.f32.mrf.mxu1  ;;  %v4659_v27 = vld [vmem:[#allocation2 + $0x271] sm:$0xff]  ;;  %v2829_v13 = vpop.permute.xlu1 %2828 }
 0x3c4   : > { %v5544_v30 = vld [vmem:[#allocation6 + $0x71] sm:$0xff]  ;;  %v11596_v60 = vadd.f32 %v6026_v40, %v5729_v41  ;;  %1959 = vperm.xlu1 %9209, %v11584_v12   ;;  %v4787_v47 = vmax.f32 %v4531_v57, %v4659_v27  ;;  %v2824_v42 = vpop.permute.xlu0 %2823  ;;  %v8624_v58 = vpop.f32.mrf.mxu0  ;;  %v4532_v38 = vld [vmem:[#allocation2 + $0x278] sm:$0xff] }
 0x3c5   : > { %v5514_v0 = vld [vmem:[#allocation6 + $0x78] sm:$0xff]  ;;  %8656 = vmatmul.mubr.msk.f32.gmra.mxu0 %vm330_vm0, %v5544_v30  ;;  %v4528_v17 = vld [vmem:[#allocation2 + $0x258] sm:$0xff]  ;;  %v8715_v10 = vpop.f32.mrf.mxu1  ;;  %v1192_v30 = vmul.f32 %v11426_v34, %v13486_v56  ;;  %v3125_v33 = vmul.f32 %v11433_v18, %v2824_v42 }
 0x3c6   : > { %v5039_v52 = vld [vmem:[#allocation2 + $0x248] sm:$0xff]  ;;  %8750 = vmatmul.mubr.msk.f32.gmra.mxu1 %vm330_vm0, %v5514_v0  ;;  %8658 = vmatprep.mubr.msk.f32.mxu0 %vm9299_vm1, %v13357_v25  ;;  %v4655_v39 = vld [vmem:[#allocation2 + $0x251] sm:$0xff]  ;;  %v4656_v45 = vld [vmem:[#allocation2 + $0x259] sm:$0xff]  ;;  %4915 = vst.msk [vmem:[#allocation2 + $0x270] sm:$0xff] %vm330_vm0, %v4787_v47  ;;  %v1196_v47 = vmul.f32 %v11426_v34, %v13490_v46 }
 0x3c7   : > { %v5164_v29 = vmax.f32 %v11445_v7, %v5039_v52  ;;  %v3121_v7 = vmul.f32 %v11433_v18, %v2804_v9  ;;  %1954 = vperm.xlu0 %9208, %v11589_v32   ;;  %8752 = vmatprep.mubr.msk.f32.mxu1 %vm9299_vm1, %v13357_v25  ;;  %v4783_v48 = vmax.f32 %v4527_v22, %v4655_v39  ;;  %v11612_v50 = vld [vmem:[#allocation2 + $0x268] sm:$0xff]  ;;  %v3833_v1 = vpop.permute.xlu1 %3832  ;;  %v13492_v56 = vld [vmem:[#allocation187_spill] sm:$0xff] }
 0x3c8   : > { %v4784_v28 = vmax.f32 %v4528_v17, %v4656_v45  ;;  %4913 = vst.msk [vmem:[#allocation2 + $0x260] sm:$0xff] %vm330_vm0, %v4785_v8  ;;  %v1194_v9 = vmul.f32 %v11426_v34, %v13484_v16  ;;  %v5168_v24 = vmax.f32 %v5039_v52, %v11612_v50  ;;  %3987 = vperm.xlu1 %9209, %v11563_v15   ;;  %v5545_v61 = vld [vmem:[#allocation6 + $0x79] sm:$0xff]  ;;  %v11625_v6 = vpop.permute.xlu0 %2813  ;;  %v13488_v52 = vld [vmem:[#allocation188_spill] sm:$0xff] }
 0x3c9   : > { %5288 = vst.msk [vmem:[#allocation2 + $0x228] sm:$0xff] %vm330_vm0, %v5164_v29  ;;  %4911 = vst.msk [vmem:[#allocation2 + $0x250] sm:$0xff] %vm330_vm0, %v4783_v48  ;;  %v3249_v53 = vadd.f32 %v3121_v7, %v2220_v54  ;;  %v4660_v3 = vld [vmem:[#allocation2 + $0x279] sm:$0xff]  ;;  %v4150_v55 = vmul.f32 %v11465_v21, %v3833_v1  ;;  %8659 = vmatmul.mubr.msk.f32.gmra.mxu0 %vm330_vm0, %v5545_v61  ;;  %v13487_v0 = vld [vmem:[#allocation185_spill] sm:$0xff]  ;;  %v2097_v41 = vmul.f32 %v11416_v49, %v13488_v52 }
 0x3ca   : > { %4912 = vst.msk [vmem:[#allocation2 + $0x258] sm:$0xff] %vm330_vm0, %v4784_v28  ;;  %v5734_v20 = vpop.f32.mrf.mxu0  ;;  %v2096_v15 = vmul.f32 %v11416_v49, %v13487_v0  ;;  %5292 = vst.msk [vmem:[#allocation2 + $0x248] sm:$0xff] %vm330_vm0, %v5168_v24  ;;  %v4788_v19 = vmax.f32 %v4532_v38, %v4660_v3  ;;  %8661 = vmatprep.mubr.msk.f32.mxu0 %vm9299_vm1, %v13357_v25  ;;  %v2223_v14 = vadd.f32 %v2095_v11, %v1194_v9  ;;  %v13489_v8 = vld [vmem:[#allocation77_spill] sm:$0xff]  ;;  %v2381_v16 = vld [vmem:[%s9404_s25 + $0x3b0] sm:$0xff] }
 0x3cb   : > { %3982 = vperm.xlu0 %9208, %v3407_v35   ;;  %v6031_v43 = vpop.f32.mrf.mxu1  ;;  %v4278_v40 = vadd.f32 %v4150_v55, %v3249_v53  ;;  %v1195_v27 = vmul.f32 %v11426_v34, %v13489_v8  ;;  %v2221_v22 = vadd.f32 %v2093_v4, %v1192_v30  ;;  %v3848_v59 = vpop.permute.xlu1 %3847  ;;  %v3126_v45 = vmul.f32 %v11433_v18, %v2829_v13  ;;  %v2383_v48 = vld [vmem:[%s9404_s25 + $0x3c0] sm:$0xff]  ;;  %v2384_v55 = vld [vmem:[%s9404_s25 + $0x3c8] sm:$0xff] }
 0x3cc   : > { %v11640_v57 = vadd.f32 %v6031_v43, %v5734_v20  ;;  %v8627_v29 = vpop.f32.mrf.mxu0  ;;  %4916 = vst.msk [vmem:[#allocation2 + $0x278] sm:$0xff] %vm330_vm0, %v4788_v19  ;;  %2963 = vperm.xlu1 %9209, %v2380_v23   ;;  %v3252_v39 = vadd.f32 %v3124_v31, %v2223_v14  ;;  %v4153_v7 = vmul.f32 %v11465_v21, %v3848_v59  ;;  %v3838_v58 = vpop.permute.xlu0 %3837  ;;  %v2385_v31 = vld [vmem:[%s9404_s25 + $0x3d0] sm:$0xff]  ;;  %v4533_v19 = vld [vmem:[#allocation2 + $0x280] sm:$0xff] }
 0x3cd   : > { %v8718_v51 = vpop.f32.mrf.mxu1  ;;  %4406 = vst.msk [vmem:[#allocation2 + $0x288] sm:$0xff] %vm330_vm0, %v4278_v40  ;;  %v11653_v28 = vld [vmem:[#allocation2 + $0x270] sm:$0xff]  ;;  %v3250_v54 = vadd.f32 %v3122_v44, %v2221_v22  ;;  %v4151_v11 = vmul.f32 %v11465_v21, %v3838_v58  ;;  %v2224_v9 = vadd.f32 %v2096_v15, %v1195_v27  ;;  %v2225_v13 = vadd.f32 %v2097_v41, %v1196_v47  ;;  %v1358_v59 = vld [vmem:[%s9404_s25 + $0x3c1] sm:$0xff]  ;;  %v11692_v47 = vld [vmem:[%s9404_s25 + $0x3b9] sm:$0xff] }
 0x3ce   : > { %v4281_v24 = vadd.f32 %v4153_v7, %v3252_v39  ;;  %v13491_v20 = vld [vmem:[#allocation183_spill] sm:$0xff]  ;;  %v2098_v30 = vmul.f32 %v11416_v49, %v13492_v56  ;;  %v3123_v22 = vmul.f32 %v11433_v18, %v11625_v6  ;;  %v13495_v58 = vld [vmem:[#allocation190_spill] sm:$0xff] }
 0x3cf   : > { %v11647_v17 = vld [vmem:[#allocation2 + $0x260] sm:$0xff]  ;;  %1944 = vperm.xlu0 %9208, %v3407_v35   ;;  %v3858_v42 = vpop.permute.xlu1 %3857  ;;  %v3254_v38 = vadd.f32 %v3126_v45, %v2225_v13  ;;  %v2094_v23 = vmul.f32 %v11416_v49, %v13491_v20  ;;  %v13493_v41 = vld [vmem:[#allocation75_spill] sm:$0xff]  ;;  %v2099_v6 = vmul.f32 %v11416_v49, %v13495_v58 }
 0x3d0   : > { %v5167_v10 = vmax.f32 %v11566_v5, %v11647_v17  ;;  %v5040_v63 = vld [vmem:[#allocation2 + $0x250] sm:$0xff]  ;;  %v4279_v5 = vadd.f32 %v4151_v11, %v3250_v54  ;;  %2978 = vperm.xlu1 %9209, %v2383_v48   ;;  %4409 = vst.msk [vmem:[#allocation2 + $0x2a0] sm:$0xff] %vm330_vm0, %v4281_v24  ;;  %v4155_v53 = vmul.f32 %v11465_v21, %v3858_v42  ;;  %v3853_v3 = vpop.permute.xlu0 %3852 }
 0x3d1   : > { %v5041_v4 = vld [vmem:[#allocation2 + $0x258] sm:$0xff]  ;;  %v5165_v35 = vmax.f32 %v11494_v62, %v5040_v63  ;;  %v5169_v61 = vmax.f32 %v5040_v63, %v11653_v28  ;;  %v3253_v62 = vadd.f32 %v3125_v33, %v2224_v9  ;;  %v1193_v40 = vmul.f32 %v11426_v34, %v13493_v41  ;;  %v13496_v33 = vld [vmem:[#allocation82_spill] sm:$0xff] }
 0x3d2   : > { %v5166_v1 = vmax.f32 %v11523_v26, %v5041_v4  ;;  %5291 = vst.msk [vmem:[#allocation2 + $0x240] sm:$0xff] %vm330_vm0, %v5167_v10  ;;  %4407 = vst.msk [vmem:[#allocation2 + $0x290] sm:$0xff] %vm330_vm0, %v4279_v5  ;;  %v4154_v26 = vmul.f32 %v11465_v21, %v3853_v3  ;;  %v4283_v0 = vadd.f32 %v4155_v53, %v3254_v38  ;;  %v13494_v29 = vld [vmem:[#allocation79_spill] sm:$0xff]  ;;  %v11700_v10 = vld [vmem:[%s13146_s5] ss:$0 sm:$0xff] }
 0x3d3   : > { %2968 = vperm.xlu0 %9208, %v2381_v16   ;;  %5289 = vst.msk [vmem:[#allocation2 + $0x230] sm:$0xff] %vm330_vm0, %v5165_v35  ;;  %5293 = vst.msk [vmem:[#allocation2 + $0x250] sm:$0xff] %vm330_vm0, %v5169_v61  ;;  %v11677_v15 = vld [vmem:[#allocation2 + $0x278] sm:$0xff]  ;;  %v2839_v14 = vpop.permute.xlu1 %2838  ;;  %v1197_v8 = vmul.f32 %v11426_v34, %v13494_v29  ;;  %v2222_v39 = vadd.f32 %v2094_v23, %v1193_v40  ;;  %v1198_v11 = vmul.f32 %v11426_v34, %v13496_v33  ;;  %v13498_v33 = vld [vmem:[#allocation81_spill] sm:$0xff] }
 0x3d4   : > { %5290 = vst.msk [vmem:[#allocation2 + $0x238] sm:$0xff] %vm330_vm0, %v5166_v1  ;;  %v4661_v44 = vld [vmem:[#allocation2 + $0x281] sm:$0xff]  ;;  %v4282_v43 = vadd.f32 %v4154_v26, %v3253_v62  ;;  %2988 = vperm.xlu1 %9209, %v2385_v31   ;;  %v5170_v52 = vmax.f32 %v5041_v4, %v11677_v15  ;;  %4411 = vst.msk [vmem:[#allocation2 + $0x2b0] sm:$0xff] %vm330_vm0, %v4283_v0  ;;  %v2834_v51 = vpop.permute.xlu0 %2833  ;;  %v3128_v1 = vmul.f32 %v11433_v18, %v2839_v14  ;;  %v2382_v5 = vld [vmem:[%s9404_s25 + $0x3b8] sm:$0xff] }
 0x3d5   : > { %v4789_v27 = vmax.f32 %v4533_v19, %v4661_v44  ;;  %v3127_v46 = vmul.f32 %v11433_v18, %v2834_v51  ;;  %v2226_v45 = vadd.f32 %v2098_v30, %v1197_v8  ;;  %v4534_v16 = vld [vmem:[#allocation2 + $0x288] sm:$0xff]  ;;  %v3251_v9 = vadd.f32 %v3123_v22, %v2222_v39  ;;  %v11728_v29 = vld [vmem:[%s9404_s25 + $0x3d1] sm:$0xff] }
 0x3d6   : > { %4410 = vst.msk [vmem:[#allocation2 + $0x2a8] sm:$0xff] %vm330_vm0, %v4282_v43  ;;  %5294 = vst.msk [vmem:[#allocation2 + $0x258] sm:$0xff] %vm330_vm0, %v5170_v52  ;;  %v2227_v53 = vadd.f32 %v2099_v6, %v1198_v11  ;;  %v13497_v8 = vld [vmem:[#allocation189_spill] sm:$0xff]  ;;  %v1199_v11 = vmul.f32 %v11426_v34, %v13498_v33 }
 0x3d7   : > { %2983 = vperm.xlu0 %9208, %v2384_v55   ;;  %4917 = vst.msk [vmem:[#allocation2 + $0x280] sm:$0xff] %vm330_vm0, %v4789_v27  ;;  %v3863_v48 = vpop.permute.xlu1 %3862  ;;  %v3255_v63 = vadd.f32 %v3127_v46, %v2226_v45  ;;  %v4537_v40 = vld [vmem:[#allocation2 + $0x2a0] sm:$0xff]  ;;  %v2100_v27 = vmul.f32 %v11416_v49, %v13497_v8 }
 0x3d8   : > { %1969 = vperm.xlu1 %9209, %v1358_v59   ;;  %v4156_v4 = vmul.f32 %v11465_v21, %v3863_v48  ;;  %v3843_v24 = vpop.permute.xlu0 %3842  ;;  %v3256_v23 = vadd.f32 %v3128_v1, %v2227_v53  ;;  %v2386_v53 = vld [vmem:[%s9404_s25 + $0x3d8] sm:$0xff] }
 0x3d9   : > { %v5440_v7 = vld [vmem:[#allocation2 + $0x240] ss:$2 sm:$0xff]  ;;  %v4152_v61 = vmul.f32 %v11465_v21, %v3843_v24  ;;  %v4535_v6 = vld [vmem:[#allocation2 + $0x290] sm:$0xff] }
 0x3da   : > { %v5443_v54 = vadd.f32 %v11700_v10, %v5440_v7  ;;  %v4662_v13 = vld [vmem:[#allocation2 + $0x289] sm:$0xff]  ;;  %v4284_v38 = vadd.f32 %v4156_v4, %v3255_v63 }
 0x3db   : > { %1964 = vperm.xlu0 %9208, %v11692_v47   ;;  %v4790_v35 = vmax.f32 %v4534_v16, %v4662_v13  ;;  %v4280_v3 = vadd.f32 %v4152_v61, %v3251_v9  ;;  %v2844_v31 = vpop.permute.xlu1 %2843  ;;  %v4539_v45 = vld [vmem:[#allocation2 + $0x2b0] sm:$0xff] }
 0x3dc   : > { %v5445_v42 = vmax.f32 %v5443_v54, 0.0  ;;  %3992 = vperm.xlu1 %9209, %v11589_v32   ;;  %4412 = vst.msk [vmem:[#allocation2 + $0x2b8] sm:$0xff] %vm330_vm0, %v4284_v38  ;;  %v3868_v55 = vpop.permute.xlu0 %3867  ;;  %v3129_v63 = vmul.f32 %v11433_v18, %v2844_v31  ;;  %v2387_v38 = vld [vmem:[%s9404_s25 + $0x3e0] sm:$0xff] }
 0x3dd   : > { %4918 = vst.msk [vmem:[#allocation2 + $0x288] sm:$0xff] %vm330_vm0, %v4790_v35  ;;  %v4538_v62 = vld [vmem:[#allocation2 + $0x2a8] sm:$0xff]  ;;  %4408 = vst.msk [vmem:[#allocation2 + $0x298] sm:$0xff] %vm330_vm0, %v4280_v3  ;;  %v4157_v30 = vmul.f32 %v11465_v21, %v3868_v55  ;;  %v5442_v0 = vld [vmem:[#allocation2 + $0x250] ss:$2 sm:$0x7f]  ;;  %v2228_v3 = vadd.f32 %v2100_v27, %v1199_v11 }
 0x3de   : > { %5447 = vst.msk [vmem:[#allocation6 + $0x87] sm:$0xff] %vm330_vm0, %v5445_v42  ;;  %v4666_v26 = vld [vmem:[#allocation2 + $0x2a9] sm:$0xff]  ;;  %v11714_v56 = vld [vmem:[#allocation2 + $0x280] sm:$0xff]  ;;  %v5444_v44 = vadd.f32 %v11700_v10, %v5442_v0 }
 0x3df   : > { %2973 = vperm.xlu0 %9208, %v2382_v5   ;;  %v4794_v20 = vmax.f32 %v4538_v62, %v4666_v26  ;;  %v4665_v32 = vld [vmem:[#allocation2 + $0x2a1] sm:$0xff]  ;;  %v5171_v19 = vmax.f32 %v11647_v17, %v11714_v56  ;;  %v4285_v43 = vadd.f32 %v4157_v30, %v3256_v23  ;;  %v2859_v14 = vpop.permute.xlu1 %2858  ;;  %v11731_v17 = vld [vmem:[%s9404_s25 + $0x3c9] sm:$0xff] }
 0x3e0   : > { %4007 = vperm.xlu1 %9209, %v1358_v59   ;;  %v11723_v52 = vpop.permute.xlu0 %2848  ;;  %v5446_v41 = vmax.f32 %v5444_v44, 0.0  ;;  %v4793_v7 = vmax.f32 %v4537_v40, %v4665_v32  ;;  %v13499_v35 = vld [vmem:[#allocation194_spill] sm:$0xff]  ;;  %v13500_v62 = vld [vmem:[#allocation84_spill] sm:$0xff]  ;;  %v3257_v44 = vadd.f32 %v3129_v63, %v2228_v3 }
 0x3e1   : > { %4922 = vst.msk [vmem:[#allocation2 + $0x2a8] sm:$0xff] %vm330_vm0, %v4794_v20  ;;  %5295 = vst.msk [vmem:[#allocation2 + $0x260] sm:$0xff] %vm330_vm0, %v5171_v19  ;;  %v2103_v1 = vmul.f32 %v11416_v49, %v13499_v35  ;;  %v1200_v26 = vmul.f32 %v11426_v34, %v13500_v62  ;;  %v13501_v55 = vld [vmem:[#allocation86_spill] sm:$0xff]  ;;  %v13502_v23 = vld [vmem:[#allocation192_spill] sm:$0xff] }
 0x3e2   : > { %4413 = vst.msk [vmem:[#allocation2 + $0x2c0] sm:$0xff] %vm330_vm0, %v4285_v43  ;;  %v5739_v51 = vpop.f32.mrf.mxu0  ;;  %v1202_v20 = vmul.f32 %v11426_v34, %v13501_v55  ;;  %v2101_v30 = vmul.f32 %v11416_v49, %v13502_v23  ;;  %v3416_v55 = vld [vmem:[%s9404_s25 + $0x3e1] sm:$0xff] }
 0x3e3   : > { %3997 = vperm.xlu0 %9208, %v11584_v12   ;;  %v6036_v46 = vpop.f32.mrf.mxu1  ;;  %5448 = vst.msk [vmem:[#allocation6 + $0x8f] sm:$0x7f] %vm4964_vm2, %v5446_v41  ;;  %v4667_v58 = vld [vmem:[#allocation2 + $0x2b1] sm:$0xff]  ;;  %v11741_v54 = vpop.permute.xlu1 %2868  ;;  %v3132_v41 = vmul.f32 %v11433_v18, %v2859_v14 }
 0x3e4   : > { %v5047_v22 = vld [vmem:[#allocation2 + $0x288] sm:$0xff]  ;;  %v11738_v48 = vadd.f32 %v6036_v46, %v5739_v51  ;;  %v4795_v16 = vmax.f32 %v4539_v45, %v4667_v58  ;;  %v4536_v9 = vld [vmem:[#allocation2 + $0x298] sm:$0xff]  ;;  %v11746_v4 = vpop.permute.xlu0 %2863  ;;  %4017 = vperm.xlu1 %9209, %v11728_v29   ;;  %v8630_v24 = vpop.f32.mrf.mxu0  ;;  %v2229_v63 = vadd.f32 %v2101_v30, %v1200_v26 }
 0x3e5   : > { %v5546_v59 = vld [vmem:[#allocation6 + $0x81] sm:$0xff]  ;;  %v5172_v12 = vmax.f32 %v11612_v50, %v5047_v22  ;;  %v4664_v50 = vld [vmem:[#allocation2 + $0x299] sm:$0xff]  ;;  %v8721_v42 = vpop.f32.mrf.mxu1  ;;  %v13503_v51 = vld [vmem:[#allocation193_spill] sm:$0xff]  ;;  %v3133_v26 = vmul.f32 %v11433_v18, %v11746_v4 }
 0x3e6   : > { %v5515_v39 = vld [vmem:[#allocation6 + $0x80] sm:$0xff]  ;;  %8662 = vmatmul.mubr.msk.f32.gmra.mxu0 %vm330_vm0, %v5546_v59  ;;  %v4792_v5 = vmax.f32 %v4536_v9, %v4664_v50  ;;  %4921 = vst.msk [vmem:[#allocation2 + $0x2a0] sm:$0xff] %vm330_vm0, %v4793_v7  ;;  %4923 = vst.msk [vmem:[#allocation2 + $0x2b0] sm:$0xff] %vm330_vm0, %v4795_v16  ;;  %v4540_v19 = vld [vmem:[#allocation2 + $0x2b8] sm:$0xff]  ;;  %v2231_v59 = vadd.f32 %v2103_v1, %v1202_v20 }
 0x3e7   : > { %8753 = vmatmul.mubr.msk.f32.gmra.mxu1 %vm330_vm0, %v5515_v39  ;;  %v4663_v13 = vld [vmem:[#allocation2 + $0x291] sm:$0xff]  ;;  %4012 = vperm.xlu0 %9208, %v11731_v17   ;;  %5296 = vst.msk [vmem:[#allocation2 + $0x268] sm:$0xff] %vm330_vm0, %v5172_v12  ;;  %v3873_v32 = vpop.permute.xlu1 %3872  ;;  %v3130_v39 = vmul.f32 %v11433_v18, %v11723_v52  ;;  %v11782_v7 = vld [vmem:[%s9404_s25 + $0x3d9] sm:$0xff]  ;;  %v13505_v9 = vld [vmem:[#allocation85_spill] sm:$0xff] }
 0x3e8   : > { %v4791_v61 = vmax.f32 %v4535_v6, %v4663_v13  ;;  %8664 = vmatprep.mubr.msk.f32.mxu0 %vm9299_vm1, %v13357_v25  ;;  %8755 = vmatprep.mubr.msk.f32.mxu1 %vm9299_vm1, %v13357_v25  ;;  %v11760_v31 = vld [vmem:[#allocation2 + $0x2a8] sm:$0xff]  ;;  %4920 = vst.msk [vmem:[#allocation2 + $0x298] sm:$0xff] %vm330_vm0, %v4792_v5  ;;  %v4158_v40 = vmul.f32 %v11465_v21, %v3873_v32  ;;  %v11774_v8 = vpop.permute.xlu0 %2853  ;;  %v13504_v58 = vld [vmem:[#allocation196_spill] sm:$0xff] }
 0x3e9   : > { %v5176_v0 = vmax.f32 %v5047_v22, %v11760_v31  ;;  %v4668_v43 = vld [vmem:[#allocation2 + $0x2b9] sm:$0xff]  ;;  %2998 = vperm.xlu1 %9209, %v2387_v38   ;;  %v5744_v27 = vpop.f32.mrf.mxu0  ;;  %v2104_v22 = vmul.f32 %v11416_v49, %v13503_v51  ;;  %v2105_v6 = vmul.f32 %v11416_v49, %v13504_v58  ;;  %v1203_v13 = vmul.f32 %v11426_v34, %v13505_v9 }
 0x3ea   : > { %4919 = vst.msk [vmem:[#allocation2 + $0x290] sm:$0xff] %vm330_vm0, %v4791_v61  ;;  %v4796_v46 = vmax.f32 %v4540_v19, %v4668_v43  ;;  %v6041_v45 = vpop.f32.mrf.mxu1  ;;  %v5547_v12 = vld [vmem:[#allocation6 + $0x89] sm:$0xff]  ;;  %v4286_v33 = vadd.f32 %v4158_v40, %v3257_v44  ;;  %v3260_v61 = vadd.f32 %v3132_v41, %v2231_v59  ;;  %v3134_v5 = vmul.f32 %v11433_v18, %v11741_v54 }
 0x3eb   : > { %2993 = vperm.xlu0 %9208, %v2386_v53   ;;  %5300 = vst.msk [vmem:[#allocation2 + $0x288] sm:$0xff] %vm330_vm0, %v5176_v0  ;;  %v5516_v14 = vld [vmem:[#allocation6 + $0x88] sm:$0xff]  ;;  %v11786_v11 = vadd.f32 %v6041_v45, %v5744_v27  ;;  %8665 = vmatmul.mubr.msk.f32.gmra.mxu0 %vm330_vm0, %v5547_v12  ;;  %v8633_v16 = vpop.f32.mrf.mxu0  ;;  %v3888_v35 = vpop.permute.xlu1 %3887  ;;  %v3258_v62 = vadd.f32 %v3130_v39, %v2229_v63  ;;  %v4541_v12 = vld [vmem:[#allocation2 + $0x2c0] sm:$0xff]  ;;  %v11847_v63 = vld [vmem:[%s9404_s25 + $0x3e9] sm:$0xff] }
 0x3ec   : > { %8756 = vmatmul.mubr.msk.f32.gmra.mxu1 %vm330_vm0, %v5516_v14  ;;  %v13506_v52 = vld [vmem:[#allocation88_spill] sm:$0xff]  ;;  %4924 = vst.msk [vmem:[#allocation2 + $0x2b8] sm:$0xff] %vm330_vm0, %v4796_v46  ;;  %v8724_v24 = vpop.f32.mrf.mxu1  ;;  %8667 = vmatprep.mubr.msk.f32.mxu0 %vm9299_vm1, %v13357_v25  ;;  %4414 = vst.msk [vmem:[#allocation2 + $0x2c8] sm:$0xff] %vm330_vm0, %v4286_v33  ;;  %v4161_v42 = vmul.f32 %v11465_v21, %v3888_v35  ;;  %v3878_v38 = vpop.permute.xlu0 %3877  ;;  %v2232_v20 = vadd.f32 %v2104_v22, %v1203_v13  ;;  %v13507_v27 = vld [vmem:[#allocation191_spill] sm:$0xff] }
 0x3ed   : > { %v1204_v50 = vmul.f32 %v11426_v34, %v13506_v52  ;;  %8758 = vmatprep.mubr.msk.f32.mxu1 %vm9299_vm1, %v13357_v25  ;;  %v11799_v1 = vld [vmem:[#allocation2 + $0x2a0] sm:$0xff]  ;;  %4022 = vperm.xlu1 %9209, %v11782_v7   ;;  %v11807_v53 = vld [vmem:[#allocation2 + $0x2b0] sm:$0xff]  ;;  %v4159_v54 = vmul.f32 %v11465_v21, %v3878_v38  ;;  %v2102_v51 = vmul.f32 %v11416_v49, %v13507_v27 }
 0x3ee   : > { %v5175_v3 = vmax.f32 %v11714_v56, %v11799_v1  ;;  %v4289_v32 = vadd.f32 %v4161_v42, %v3260_v61  ;;  %v13508_v22 = vld [vmem:[#allocation195_spill] sm:$0xff]  ;;  %v11853_v35 = vld [vmem:[%s13142_s1] ss:$0 sm:$0xff]  ;;  %v13512_v61 = vld [vmem:[#allocation198_spill] sm:$0xff] }
 0x3ef   : > { %4002 = vperm.xlu0 %9208, %v11692_v47   ;;  %v2233_v23 = vadd.f32 %v2105_v6, %v1204_v50  ;;  %v5049_v0 = vld [vmem:[#allocation2 + $0x298] sm:$0xff]  ;;  %v4287_v56 = vadd.f32 %v4159_v54, %v3258_v62  ;;  %v3898_v43 = vpop.permute.xlu1 %3897  ;;  %v2106_v59 = vmul.f32 %v11416_v49, %v13508_v22  ;;  %v3131_v49 = vmul.f32 %v11433_v18, %v11774_v8  ;;  %v2389_v27 = vld [vmem:[%s9404_s25 + $0x3f0] sm:$0xff] }
 0x3f0   : > { %v5174_v47 = vmax.f32 %v11677_v15, %v5049_v0  ;;  %5299 = vst.msk [vmem:[#allocation2 + $0x280] sm:$0xff] %vm330_vm0, %v5175_v3  ;;  %4417 = vst.msk [vmem:[#allocation2 + $0x2e0] sm:$0xff] %vm330_vm0, %v4289_v32  ;;  %v4163_v4 = vmul.f32 %v11465_v21, %v3898_v43  ;;  %v3893_v40 = vpop.permute.xlu0 %3892  ;;  %v13509_v39 = vld [vmem:[#allocation83_spill] sm:$0xff] }
 0x3f1   : > { %v5048_v30 = vld [vmem:[#allocation2 + $0x290] sm:$0xff]  ;;  %v3262_v41 = vadd.f32 %v3134_v5, %v2233_v23  ;;  %1974 = vperm.xlu1 %9209, %v11731_v17   ;;  %4415 = vst.msk [vmem:[#allocation2 + $0x2d0] sm:$0xff] %vm330_vm0, %v4287_v56  ;;  %v4162_v15 = vmul.f32 %v11465_v21, %v3893_v40  ;;  %v1201_v45 = vmul.f32 %v11426_v34, %v13509_v39 }
 0x3f2   : > { %v5173_v19 = vmax.f32 %v11653_v28, %v5048_v30  ;;  %v5177_v44 = vmax.f32 %v5048_v30, %v11807_v53  ;;  %5298 = vst.msk [vmem:[#allocation2 + $0x278] sm:$0xff] %vm330_vm0, %v5174_v47  ;;  %v3261_v28 = vadd.f32 %v3133_v26, %v2232_v20  ;;  %v13510_v16 = vld [vmem:[#allocation87_spill] sm:$0xff] }
 0x3f3   : > { %4027 = vperm.xlu0 %9208, %v3416_v55   ;;  %v4291_v46 = vadd.f32 %v4163_v4, %v3262_v41  ;;  %v11831_v17 = vld [vmem:[#allocation2 + $0x2b8] sm:$0xff]  ;;  %v4669_v14 = vld [vmem:[#allocation2 + $0x2c1] sm:$0xff]  ;;  %v2879_v6 = vpop.permute.xlu1 %2878  ;;  %v1205_v9 = vmul.f32 %v11426_v34, %v13510_v16  ;;  %v2230_v34 = vadd.f32 %v2102_v51, %v1201_v45 }
 0x3f4   : > { %5297 = vst.msk [vmem:[#allocation2 + $0x270] sm:$0xff] %vm330_vm0, %v5173_v19  ;;  %5301 = vst.msk [vmem:[#allocation2 + $0x290] sm:$0xff] %vm330_vm0, %v5177_v44  ;;  %v4290_v58 = vadd.f32 %v4162_v15, %v3261_v28  ;;  %v5178_v33 = vmax.f32 %v5049_v0, %v11831_v17  ;;  %v4797_v13 = vmax.f32 %v4541_v12, %v4669_v14  ;;  %v2874_v52 = vpop.permute.xlu0 %2873  ;;  %v4542_v3 = vld [vmem:[#allocation2 + $0x2c8] sm:$0xff]  ;;  %v11870_v0 = vld [vmem:[%s13142_s1 + $0x2] ss:$0 sm:$0xff] }
 0x3f5   : > { %4419 = vst.msk [vmem:[#allocation2 + $0x2f0] sm:$0xff] %vm330_vm0, %v4291_v46  ;;  %1984 = vperm.xlu1 %9209, %v11782_v7   ;;  %v3135_v50 = vmul.f32 %v11433_v18, %v2874_v52  ;;  %v2234_v24 = vadd.f32 %v2106_v59, %v1205_v9  ;;  %v13511_v7 = vld [vmem:[#allocation90_spill] sm:$0xff]  ;;  %v11860_v18 = vld [vmem:[%s13142_s1 + $0x1] ss:$0 sm:$0xff]  ;;  %v3259_v62 = vadd.f32 %v3131_v49, %v2230_v34  ;;  %v11875_v47 = vld [vmem:[%s9404_s25 + $0x3f9] sm:$0xff] }
 0x3f6   : > { %4418 = vst.msk [vmem:[#allocation2 + $0x2e8] sm:$0xff] %vm330_vm0, %v4290_v58  ;;  %5302 = vst.msk [vmem:[#allocation2 + $0x298] sm:$0xff] %vm330_vm0, %v5178_v33  ;;  %v2107_v5 = vmul.f32 %v11860_v18, %v13512_v61  ;;  %v3136_v32 = vmul.f32 %v11870_v0, %v2879_v6  ;;  %v11878_v44 = vld [vmem:[%s9404_s25 + $0x3f1] sm:$0xff]  ;;  %v11895_v46 = vld [vmem:[%s13142_s1 + $0x3] ss:$0 sm:$0xff] }
 0x3f7   : > { %1979 = vperm.xlu0 %9208, %v11728_v29   ;;  %4925 = vst.msk [vmem:[#allocation2 + $0x2c0] sm:$0xff] %vm330_vm0, %v4797_v13  ;;  %v5450_v8 = vld [vmem:[#allocation2 + $0x280] ss:$2 sm:$0xff]  ;;  %v1206_v29 = vmul.f32 %v11853_v35, %v13511_v7  ;;  %v3903_v42 = vpop.permute.xlu1 %3902  ;;  %v3263_v54 = vadd.f32 %v3135_v50, %v2234_v24  ;;  %v2390_v50 = vld [vmem:[%s9404_s25 + $0x3f8] sm:$0xff] }
 0x3f8   : > { %v5453_v38 = vadd.f32 %v11700_v10, %v5450_v8  ;;  %v4670_v26 = vld [vmem:[#allocation2 + $0x2c9] sm:$0xff]  ;;  %v4164_v20 = vmul.f32 %v11465_v21, %v3903_v42  ;;  %v3883_v23 = vpop.permute.xlu0 %3882  ;;  %v4545_v49 = vld [vmem:[#allocation2 + $0x2e0] sm:$0xff] }
 0x3f9   : > { %1994 = vperm.xlu1 %9209, %v11847_v63   ;;  %v4798_v30 = vmax.f32 %v4542_v3, %v4670_v26  ;;  %v4160_v19 = vmul.f32 %v11465_v21, %v3883_v23  ;;  %v2235_v41 = vadd.f32 %v2107_v5, %v1206_v29  ;;  %v2388_v45 = vld [vmem:[%s9404_s25 + $0x3e8] sm:$0xff]  ;;  %v2391_v52 = vld [vmem:[%s9404_s25 + $0x400] sm:$0xff]  ;;  %v4543_v8 = vld [vmem:[#allocation2 + $0x2d0] sm:$0xff] }
 0x3fa   : > { %v5455_v56 = vmax.f32 %v5453_v38, 0.0  ;;  %v4292_v43 = vadd.f32 %v4164_v20, %v3263_v54  ;;  %v13513_v34 = vld [vmem:[#allocation197_spill] sm:$0xff]  ;;  %v6541_v20 = vld [vmem:[%s13143_s2 + $0x30] sm:$0xff] }
 0x3fb   : > { %1989 = vperm.xlu0 %9208, %v3416_v55   ;;  %v6184_v55 = vld [vmem:[%s13143_s2 + $0x20] sm:$0xff]  ;;  %4926 = vst.msk [vmem:[#allocation2 + $0x2c8] sm:$0xff] %vm330_vm0, %v4798_v30  ;;  %v4288_v4 = vadd.f32 %v4160_v19, %v3259_v62  ;;  %v2884_v40 = vpop.permute.xlu1 %2883  ;;  %v3264_v22 = vadd.f32 %v3136_v32, %v2235_v41  ;;  %8885 = vmatpush3.msra.mxu1 %v6541_v20 }
 0x3fc   : > { %5457 = vst.msk [vmem:[#allocation6 + $0x96] sm:$0xff] %vm330_vm0, %v5455_v56  ;;  %8794 = vmatpush3.msra.mxu0 %v6184_v55  ;;  %4420 = vst.msk [vmem:[#allocation2 + $0x2f8] sm:$0xff] %vm330_vm0, %v4292_v43  ;;  %v3908_v15 = vpop.permute.xlu0 %3907  ;;  %v4547_v42 = vld [vmem:[#allocation2 + $0x2f0] sm:$0xff]  ;;  %v13514_v23 = vld [vmem:[#allocation89_spill] sm:$0xff]  ;;  %v3137_v43 = vmul.f32 %v11870_v0, %v2884_v40  ;;  %9002 = vmatprep.subr.mxu1 %v13357_v25 }
 0x3fd   : > { %v4546_v21 = vld [vmem:[#allocation2 + $0x2e8] sm:$0xff]  ;;  %2004 = vperm.xlu1 %9209, %v11875_v47   ;;  %4416 = vst.msk [vmem:[#allocation2 + $0x2d8] sm:$0xff] %vm330_vm0, %v4288_v4  ;;  %v4165_v39 = vmul.f32 %v11895_v46, %v3908_v15  ;;  %v5452_v12 = vld [vmem:[#allocation2 + $0x290] ss:$2 sm:$0x7f]  ;;  %8973 = vmatprep.subr.mxu0 %v13357_v25  ;;  %v1207_v30 = vmul.f32 %v11853_v35, %v13514_v23 }
 0x3fe   : > { %v4674_v28 = vld [vmem:[#allocation2 + $0x2e9] sm:$0xff]  ;;  %v11889_v59 = vld [vmem:[#allocation2 + $0x2c0] sm:$0xff]  ;;  %v5454_v6 = vadd.f32 %v11700_v10, %v5452_v12  ;;  %v2394_v23 = vld [vmem:[%s9404_s25 + $0x418] sm:$0xff] }
 0x3ff   : > { %1999 = vperm.xlu0 %9208, %v11878_v44   ;;  %v4802_v51 = vmax.f32 %v4546_v21, %v4674_v28  ;;  %v4673_v14 = vld [vmem:[#allocation2 + $0x2e1] sm:$0xff]  ;;  %v5179_v58 = vmax.f32 %v11799_v1, %v11889_v59  ;;  %v4293_v33 = vadd.f32 %v4165_v39, %v3264_v22  ;;  %v2899_v16 = vpop.permute.xlu1 %2898  ;;  %v2108_v1 = vmul.f32 %v11860_v18, %v13513_v34  ;;  %v13515_v4 = vld [vmem:[#allocation202_spill] sm:$0xff] }
 0x400   : > { %v11905_v9 = vpop.permute.xlu0 %2888  ;;  %v5456_v13 = vmax.f32 %v5454_v6, 0.0  ;;  %v4801_v3 = vmax.f32 %v4545_v49, %v4673_v14  ;;  %v2111_v21 = vmul.f32 %v11860_v18, %v13515_v4  ;;  %v2393_v40 = vld [vmem:[%s9404_s25 + $0x410] sm:$0xff]  ;;  %v13518_v6 = vld [vmem:[#allocation200_spill] sm:$0xff] }
 0x401   : > { %4930 = vst.msk [vmem:[#allocation2 + $0x2e8] sm:$0xff] %vm330_vm0, %v4802_v51  ;;  %5303 = vst.msk [vmem:[#allocation2 + $0x2a0] sm:$0xff] %vm330_vm0, %v5179_v58  ;;  %3008 = vperm.xlu1 %9209, %v2389_v27   ;;  %v2392_v51 = vld [vmem:[%s9404_s25 + $0x408] sm:$0xff]  ;;  %v2236_v22 = vadd.f32 %v2108_v1, %v1207_v30  ;;  %v3140_v1 = vmul.f32 %v11870_v0, %v2899_v16  ;;  %v3138_v30 = vmul.f32 %v11870_v0, %v11905_v9 }
 0x402   : > { %4421 = vst.msk [vmem:[#allocation2 + $0x300] sm:$0xff] %vm330_vm0, %v4293_v33  ;;  %v5055_v24 = vld [vmem:[#allocation2 + $0x2c8] sm:$0xff]  ;;  %v5749_v7 = vpop.f32.mrf.mxu0  ;;  %v2109_v33 = vmul.f32 %v11860_v18, %v13518_v6 }
 0x403   : > { %3003 = vperm.xlu0 %9208, %v2388_v45   ;;  %v5548_v29 = vld [vmem:[#allocation6 + $0x91] sm:$0xff]  ;;  %v6046_v61 = vpop.f32.mrf.mxu1  ;;  %5458 = vst.msk [vmem:[#allocation6 + $0x9e] sm:$0x7f] %vm4964_vm2, %v5456_v13  ;;  %v5180_v38 = vmax.f32 %v11760_v31, %v5055_v24  ;;  %v4675_v62 = vld [vmem:[#allocation2 + $0x2f1] sm:$0xff]  ;;  %v11918_v54 = vpop.permute.xlu1 %2908 }
 0x404   : > { %v5517_v5 = vld [vmem:[#allocation6 + $0x90] sm:$0xff]  ;;  %8668 = vmatmul.mubr.msk.f32.gmra.mxu0 %vm330_vm0, %v5548_v29  ;;  %v11915_v26 = vadd.f32 %v6046_v61, %v5749_v7  ;;  %v4803_v32 = vmax.f32 %v4547_v42, %v4675_v62  ;;  %v4544_v19 = vld [vmem:[#allocation2 + $0x2d8] sm:$0xff]  ;;  %v11926_v55 = vpop.permute.xlu0 %2903  ;;  %v8636_v41 = vpop.f32.mrf.mxu0  ;;  %v13517_v14 = vld [vmem:[#allocation94_spill] sm:$0xff] }
 0x405   : > { %8759 = vmatmul.mubr.msk.f32.gmra.mxu1 %vm330_vm0, %v5517_v5  ;;  %v4671_v31 = vld [vmem:[#allocation2 + $0x2d1] sm:$0xff]  ;;  %v4672_v56 = vld [vmem:[#allocation2 + $0x2d9] sm:$0xff]  ;;  %3018 = vperm.xlu1 %9209, %v2391_v52   ;;  %5304 = vst.msk [vmem:[#allocation2 + $0x2a8] sm:$0xff] %vm330_vm0, %v5180_v38  ;;  %v8727_v27 = vpop.f32.mrf.mxu1  ;;  %v1210_v58 = vmul.f32 %v11853_v35, %v13517_v14 }
 0x406   : > { %v4799_v28 = vmax.f32 %v4543_v8, %v4671_v31  ;;  %v4800_v15 = vmax.f32 %v4544_v19, %v4672_v56  ;;  %4929 = vst.msk [vmem:[#allocation2 + $0x2e0] sm:$0xff] %vm330_vm0, %v4801_v3  ;;  %8670 = vmatprep.mubr.msk.f32.mxu0 %vm9299_vm1, %v13357_v25  ;;  %8761 = vmatprep.mubr.msk.f32.mxu1 %vm9299_vm1, %v13357_v25  ;;  %4931 = vst.msk [vmem:[#allocation2 + $0x2f0] sm:$0xff] %vm330_vm0, %v4803_v32  ;;  %v13516_v45 = vld [vmem:[#allocation92_spill] sm:$0xff]  ;;  %v13521_v31 = vld [vmem:[#allocation93_spill] sm:$0xff] }
 0x407   : > { %3013 = vperm.xlu0 %9208, %v2390_v50   ;;  %v1208_v12 = vmul.f32 %v11853_v35, %v13516_v45  ;;  %v3913_v49 = vpop.permute.xlu1 %3912  ;;  %v4548_v52 = vld [vmem:[#allocation2 + $0x2f8] sm:$0xff]  ;;  %v3265_v50 = vadd.f32 %v3137_v43, %v2236_v22  ;;  %v2239_v61 = vadd.f32 %v2111_v21, %v1210_v58  ;;  %v1211_v56 = vmul.f32 %v11853_v35, %v13521_v31 }
 0x408   : > { %v11938_v39 = vld [vmem:[#allocation2 + $0x2e8] sm:$0xff]  ;;  %4927 = vst.msk [vmem:[#allocation2 + $0x2d0] sm:$0xff] %vm330_vm0, %v4799_v28  ;;  %4928 = vst.msk [vmem:[#allocation2 + $0x2d8] sm:$0xff] %vm330_vm0, %v4800_v15  ;;  %v4166_v8 = vmul.f32 %v11895_v46, %v3913_v49  ;;  %v11953_v7 = vpop.permute.xlu0 %2893  ;;  %v13520_v5 = vld [vmem:[#allocation204_spill] sm:$0xff]  ;;  %v3142_v27 = vmul.f32 %v11870_v0, %v11918_v54 }
 0x409   : > { %v5184_v13 = vmax.f32 %v5055_v24, %v11938_v39  ;;  %v4676_v34 = vld [vmem:[#allocation2 + $0x2f9] sm:$0xff]  ;;  %3028 = vperm.xlu1 %9209, %v2393_v40   ;;  %v13519_v24 = vld [vmem:[#allocation201_spill] sm:$0xff]  ;;  %v2113_v42 = vmul.f32 %v11860_v18, %v13520_v5  ;;  %v5754_v3 = vpop.f32.mrf.mxu0  ;;  %v2237_v9 = vadd.f32 %v2109_v33, %v1208_v12  ;;  %v3268_v15 = vadd.f32 %v3140_v1, %v2239_v61 }
 0x40a   : > { %v2112_v29 = vmul.f32 %v11860_v18, %v13519_v24  ;;  %v4804_v38 = vmax.f32 %v4548_v52, %v4676_v34  ;;  %v6051_v62 = vpop.f32.mrf.mxu1  ;;  %v5549_v20 = vld [vmem:[#allocation6 + $0x99] sm:$0xff]  ;;  %v4294_v32 = vadd.f32 %v4166_v8, %v3265_v50  ;;  %v13522_v43 = vld [vmem:[#allocation96_spill] sm:$0xff]  ;;  %v3141_v12 = vmul.f32 %v11870_v0, %v11926_v55  ;;  %v13523_v5 = vld [vmem:[#allocation199_spill] sm:$0xff] }
 0x40b   : > { %3023 = vperm.xlu0 %9208, %v2392_v51   ;;  %5308 = vst.msk [vmem:[#allocation2 + $0x2c8] sm:$0xff] %vm330_vm0, %v5184_v13  ;;  %v5518_v16 = vld [vmem:[#allocation6 + $0x98] sm:$0xff]  ;;  %v11963_v19 = vadd.f32 %v6051_v62, %v5754_v3  ;;  %8671 = vmatmul.mubr.msk.f32.gmra.mxu0 %vm330_vm0, %v5549_v20  ;;  %v1212_v41 = vmul.f32 %v11853_v35, %v13522_v43  ;;  %v8639_v4 = vpop.f32.mrf.mxu0  ;;  %v3928_v40 = vpop.permute.xlu1 %3927  ;;  %v4549_v3 = vld [vmem:[#allocation2 + $0x300] sm:$0xff] }
 0x40c   : > { %8762 = vmatmul.mubr.msk.f32.gmra.mxu1 %vm330_vm0, %v5518_v16  ;;  %4932 = vst.msk [vmem:[#allocation2 + $0x2f8] sm:$0xff] %vm330_vm0, %v4804_v38  ;;  %v8730_v21 = vpop.f32.mrf.mxu1  ;;  %8673 = vmatprep.mubr.msk.f32.mxu0 %vm9299_vm1, %v13357_v25  ;;  %4422 = vst.msk [vmem:[#allocation2 + $0x308] sm:$0xff] %vm330_vm0, %v4294_v32  ;;  %v3918_v51 = vpop.permute.xlu0 %3917  ;;  %v4169_v14 = vmul.f32 %v11895_v46, %v3928_v40  ;;  %v2240_v54 = vadd.f32 %v2112_v29, %v1211_v56  ;;  %v3421_v29 = vld [vmem:[%s9404_s25 + $0x409] sm:$0xff]  ;;  %v3420_v61 = vld [vmem:[%s9404_s25 + $0x401] sm:$0xff] }
 0x40d   : > { %8764 = vmatprep.mubr.msk.f32.mxu1 %vm9299_vm1, %v13357_v25  ;;  %v11976_v28 = vld [vmem:[#allocation2 + $0x2e0] sm:$0xff]  ;;  %4032 = vperm.xlu1 %9209, %v11847_v63   ;;  %v11982_v22 = vld [vmem:[#allocation2 + $0x2f0] sm:$0xff]  ;;  %v4167_v58 = vmul.f32 %v11895_v46, %v3918_v51  ;;  %v2241_v6 = vadd.f32 %v2113_v42, %v1212_v41  ;;  %v3266_v49 = vadd.f32 %v3138_v30, %v2237_v9 }
 0x40e   : > { %v5183_v45 = vmax.f32 %v11889_v59, %v11976_v28  ;;  %v4297_v59 = vadd.f32 %v4169_v14, %v3268_v15  ;;  %v13524_v42 = vld [vmem:[#allocation203_spill] sm:$0xff]  ;;  %v3139_v56 = vmul.f32 %v11870_v0, %v11953_v7 }
 0x40f   : > { %3033 = vperm.xlu0 %9208, %v2394_v23   ;;  %v5056_v33 = vld [vmem:[#allocation2 + $0x2d0] sm:$0xff]  ;;  %v5057_v13 = vld [vmem:[#allocation2 + $0x2d8] sm:$0xff]  ;;  %v4295_v55 = vadd.f32 %v4167_v58, %v3266_v49  ;;  %v3938_v34 = vpop.permute.xlu1 %3937  ;;  %v2114_v38 = vmul.f32 %v11860_v18, %v13524_v42 }
 0x410   : > { %v5181_v63 = vmax.f32 %v11807_v53, %v5056_v33  ;;  %v5182_v52 = vmax.f32 %v11831_v17, %v5057_v13  ;;  %v5185_v50 = vmax.f32 %v5056_v33, %v11982_v22  ;;  %5307 = vst.msk [vmem:[#allocation2 + $0x2c0] sm:$0xff] %vm330_vm0, %v5183_v45  ;;  %v3933_v1 = vpop.permute.xlu0 %3932  ;;  %v3270_v53 = vadd.f32 %v3142_v27, %v2241_v6  ;;  %v13525_v30 = vld [vmem:[#allocation91_spill] sm:$0xff]  ;;  %v13527_v45 = vld [vmem:[#allocation206_spill] sm:$0xff] }
 0x411   : > { %4042 = vperm.xlu1 %9209, %v11875_v47   ;;  %v3269_v17 = vadd.f32 %v3141_v12, %v2240_v54  ;;  %4425 = vst.msk [vmem:[#allocation2 + $0x320] sm:$0xff] %vm330_vm0, %v4297_v59  ;;  %v4171_v8 = vmul.f32 %v11895_v46, %v3938_v34  ;;  %v4170_v24 = vmul.f32 %v11895_v46, %v3933_v1  ;;  %4423 = vst.msk [vmem:[#allocation2 + $0x310] sm:$0xff] %vm330_vm0, %v4295_v55  ;;  %v13526_v4 = vld [vmem:[#allocation95_spill] sm:$0xff]  ;;  %v13528_v58 = vld [vmem:[#allocation98_spill] sm:$0xff] }
 0x412   : > { %5305 = vst.msk [vmem:[#allocation2 + $0x2b0] sm:$0xff] %vm330_vm0, %v5181_v63  ;;  %5306 = vst.msk [vmem:[#allocation2 + $0x2b8] sm:$0xff] %vm330_vm0, %v5182_v52  ;;  %v2110_v47 = vmul.f32 %v11860_v18, %v13523_v5  ;;  %v1209_v32 = vmul.f32 %v11853_v35, %v13525_v30  ;;  %v1213_v21 = vmul.f32 %v11853_v35, %v13526_v4  ;;  %v3423_v15 = vld [vmem:[%s9404_s25 + $0x419] sm:$0xff]  ;;  %v3422_v27 = vld [vmem:[%s9404_s25 + $0x411] sm:$0xff]  ;;  %s9235_s25 = scalar_lea.vmem %s8180_s14, 16 }
 0x413   : > { %4037 = vperm.xlu0 %9208, %v11878_v44   ;;  %5309 = vst.msk [vmem:[#allocation2 + $0x2d0] sm:$0xff] %vm330_vm0, %v5185_v50  ;;  %v12007_v44 = vld [vmem:[#allocation2 + $0x2f8] sm:$0xff]  ;;  %v4677_v62 = vld [vmem:[#allocation2 + $0x301] sm:$0xff]  ;;  %v4299_v20 = vadd.f32 %v4171_v8, %v3270_v53  ;;  %v4298_v16 = vadd.f32 %v4170_v24, %v3269_v17  ;;  %v2919_v43 = vpop.permute.xlu1 %2918  ;;  %v2115_v12 = vmul.f32 %v11860_v18, %v13527_v45  ;;  %p9236_p11 = scmp.ne.s32.totalorder %s8180_s14, %s9235_s25  ;;  %p9243_p1 = scmp.lt.s32.totalorder %s9241_s13, %s9235_s25 }
 0x414   : > { %v5186_v23 = vmax.f32 %v5057_v13, %v12007_v44  ;;  %v4805_v31 = vmax.f32 %v4549_v3, %v4677_v62  ;;  %v2914_v41 = vpop.permute.xlu0 %2913  ;;  %v2238_v40 = vadd.f32 %v2110_v47, %v1209_v32  ;;  %v2242_v51 = vadd.f32 %v2114_v38, %v1213_v21  ;;  %v4550_v63 = vld [vmem:[#allocation2 + $0x308] sm:$0xff] }
 0x415   : > { %4052 = vperm.xlu1 %9209, %v3421_v29   ;;  %4427 = vst.msk [vmem:[#allocation2 + $0x330] sm:$0xff] %vm330_vm0, %v4299_v20  ;;  %4426 = vst.msk [vmem:[#allocation2 + $0x328] sm:$0xff] %vm330_vm0, %v4298_v16  ;;  %v3143_v9 = vmul.f32 %v11870_v0, %v2914_v41  ;;  %v1214_v54 = vmul.f32 %v11853_v35, %v13528_v58  ;;  %v3144_v33 = vmul.f32 %v11870_v0, %v2919_v43  ;;  %p9237_p12 = pnand %p9236_p11, %p9389_p5  ;;  %p9244_p2 = por %p9243_p1, %p9242_p0 }
 0x416   : > { %5310 = vst.msk [vmem:[#allocation2 + $0x2d8] sm:$0xff] %vm330_vm0, %v5186_v23  ;;  %4933 = vst.msk [vmem:[#allocation2 + $0x300] sm:$0xff] %vm330_vm0, %v4805_v31  ;;  %v3267_v6 = vadd.f32 %v3139_v56, %v2238_v40 }
 0x417   : > { %4047 = vperm.xlu0 %9208, %v3420_v61   ;;  %v5460_v7 = vld [vmem:[#allocation2 + $0x2c0] ss:$2 sm:$0xff]  ;;  %v3943_v13 = vpop.permute.xlu1 %3942  ;;  %v3271_v50 = vadd.f32 %v3143_v9, %v2242_v51  ;;  %v2243_v53 = vadd.f32 %v2115_v12, %v1214_v54  ;;  %p9238_p13 = pneg %p9237_p12 }
 0x418   : > { %v5463_v14 = vadd.f32 %v11700_v10, %v5460_v7  ;;  %v3923_v49 = vpop.permute.xlu0 %3922  ;;  %v4678_v52 = vld [vmem:[#allocation2 + $0x309] sm:$0xff]  ;;  %v4172_v59 = vmul.f32 %v11895_v46, %v3943_v13  ;;  %v4553_v9 = vld [vmem:[#allocation2 + $0x320] sm:$0xff] }
 0x419   : > { %4062 = vperm.xlu1 %9209, %v3423_v15   ;;  %v4168_v55 = vmul.f32 %v11895_v46, %v3923_v49  ;;  %v4806_v1 = vmax.f32 %v4550_v63, %v4678_v52  ;;  %v3272_v47 = vadd.f32 %v3144_v33, %v2243_v53  ;;  %v13530_v54 = vld [vmem:[#allocation97_spill] sm:$0xff]  ;;  %v4551_v13 = vld [vmem:[#allocation2 + $0x310] sm:$0xff]  ;;  %p9245_p3 = pnand %p9244_p2, %p9238_p13 }
 0x41a   : > { %v5465_v34 = vmax.f32 %v5463_v14, 0.0  ;;  %v4300_v17 = vadd.f32 %v4172_v59, %v3271_v50  ;;  %v13531_v59 = vld [vmem:[#allocation208_spill] sm:$0xff] }
 0x41b   : > { %4057 = vperm.xlu0 %9208, %v3422_v27   ;;  %v4296_v8 = vadd.f32 %v4168_v55, %v3267_v6  ;;  %4934 = vst.msk [vmem:[#allocation2 + $0x308] sm:$0xff] %vm330_vm0, %v4806_v1  ;;  %v2924_v29 = vpop.permute.xlu1 %2923  ;;  %v1215_v6 = vmul.f32 %v11853_v35, %v13530_v54  ;;  %v2117_v55 = vmul.f32 %v11860_v18, %v13531_v59 }
 0x41c   : > { %5467 = vst.msk [vmem:[#allocation6 + $0xa5] sm:$0xff] %vm330_vm0, %v5465_v34  ;;  %v4554_v24 = vld [vmem:[#allocation2 + $0x328] sm:$0xff]  ;;  %v3948_v61 = vpop.permute.xlu0 %3947  ;;  %4428 = vst.msk [vmem:[#allocation2 + $0x338] sm:$0xff] %vm330_vm0, %v4300_v17  ;;  %v4555_v40 = vld [vmem:[#allocation2 + $0x330] sm:$0xff] }
 0x41d   : > { %v4682_v5 = vld [vmem:[#allocation2 + $0x329] sm:$0xff]  ;;  %v12036_v42 = vld [vmem:[#allocation2 + $0x300] sm:$0xff]  ;;  %4424 = vst.msk [vmem:[#allocation2 + $0x318] sm:$0xff] %vm330_vm0, %v4296_v8  ;;  %v4173_v38 = vmul.f32 %v11895_v46, %v3948_v61 }
 0x41e   : > { %v5462_v3 = vld [vmem:[#allocation2 + $0x2d0] ss:$2 sm:$0x7f]  ;;  %v4810_v62 = vmax.f32 %v4554_v24, %v4682_v5  ;;  %v5187_v20 = vmax.f32 %v11976_v28, %v12036_v42  ;;  %v4681_v23 = vld [vmem:[#allocation2 + $0x321] sm:$0xff] }
 0x41f   : > { %v5464_v16 = vadd.f32 %v11700_v10, %v5462_v3  ;;  %v4301_v30 = vadd.f32 %v4173_v38, %v3272_v47  ;;  %v2939_v32 = vpop.permute.xlu1 %2938  ;;  %v13529_v28 = vld [vmem:[#allocation205_spill] sm:$0xff]  ;;  %v4809_v51 = vmax.f32 %v4553_v9, %v4681_v23  ;;  %v13532_v34 = vld [vmem:[#allocation210_spill] sm:$0xff]  ;;  %v13533_v8 = vld [vmem:[#allocation100_spill] sm:$0xff] }
 0x420   : > { %4938 = vst.msk [vmem:[#allocation2 + $0x328] sm:$0xff] %vm330_vm0, %v4810_v62  ;;  %5311 = vst.msk [vmem:[#allocation2 + $0x2e0] sm:$0xff] %vm330_vm0, %v5187_v20  ;;  %v2929_v31 = vpop.permute.xlu0 %2928  ;;  %v2116_v10 = vmul.f32 %v11860_v18, %v13529_v28  ;;  %v2119_v1 = vmul.f32 %v11860_v18, %v13532_v34  ;;  %v1216_v24 = vmul.f32 %v11853_v35, %v13533_v8 }
 0x421   : > { %v5466_v56 = vmax.f32 %v5464_v16, 0.0  ;;  %4429 = vst.msk [vmem:[#allocation2 + $0x340] sm:$0xff] %vm330_vm0, %v4301_v30  ;;  %v5759_v43 = vpop.f32.mrf.mxu0  ;;  %v3148_v20 = vmul.f32 %v11870_v0, %v2939_v32  ;;  %v3146_v16 = vmul.f32 %v11870_v0, %v2929_v31  ;;  %v13535_v31 = vld [vmem:[#allocation209_spill] sm:$0xff] }
 0x422   : > { %v6056_v4 = vpop.f32.mrf.mxu1  ;;  %v5063_v15 = vld [vmem:[#allocation2 + $0x308] sm:$0xff]  ;;  %v2244_v61 = vadd.f32 %v2116_v10, %v1215_v6  ;;  %v2245_v9 = vadd.f32 %v2117_v55, %v1216_v24 }
 0x423   : > { %v5550_v41 = vld [vmem:[#allocation6 + $0xa1] sm:$0xff]  ;;  %5468 = vst.msk [vmem:[#allocation6 + $0xad] sm:$0x7f] %vm4964_vm2, %v5466_v56  ;;  %v12050_v27 = vadd.f32 %v6056_v4, %v5759_v43  ;;  %v5188_v7 = vmax.f32 %v11938_v39, %v5063_v15  ;;  %v2949_v14 = vpop.permute.xlu1 %2948  ;;  %v3145_v39 = vmul.f32 %v11870_v0, %v2924_v29  ;;  %v8642_v52 = vpop.f32.mrf.mxu0  ;;  %v13537_v6 = vld [vmem:[#allocation101_spill] sm:$0xff] }
 0x424   : > { %v5519_v21 = vld [vmem:[#allocation6 + $0xa0] sm:$0xff]  ;;  %8674 = vmatmul.mubr.msk.f32.gmra.mxu0 %vm330_vm0, %v5550_v41  ;;  %v4552_v12 = vld [vmem:[#allocation2 + $0x318] sm:$0xff]  ;;  %v2944_v58 = vpop.permute.xlu0 %2943  ;;  %v8733_v50 = vpop.f32.mrf.mxu1  ;;  %v3150_v55 = vmul.f32 %v11870_v0, %v2949_v14 }
 0x425   : > { %8765 = vmatmul.mubr.msk.f32.gmra.mxu1 %vm330_vm0, %v5519_v21  ;;  %v4683_v45 = vld [vmem:[#allocation2 + $0x331] sm:$0xff]  ;;  %8676 = vmatprep.mubr.msk.f32.mxu0 %vm9299_vm1, %v13357_v25  ;;  %v4680_v63 = vld [vmem:[#allocation2 + $0x319] sm:$0xff]  ;;  %5312 = vst.msk [vmem:[#allocation2 + $0x2e8] sm:$0xff] %vm330_vm0, %v5188_v7  ;;  %v3273_v56 = vadd.f32 %v3145_v39, %v2244_v61  ;;  %v3274_v39 = vadd.f32 %v3146_v16, %v2245_v9 }
 0x426   : > { %8767 = vmatprep.mubr.msk.f32.mxu1 %vm9299_vm1, %v13357_v25  ;;  %v4811_v33 = vmax.f32 %v4555_v40, %v4683_v45  ;;  %v4679_v49 = vld [vmem:[#allocation2 + $0x311] sm:$0xff]  ;;  %v4808_v17 = vmax.f32 %v4552_v12, %v4680_v63  ;;  %4937 = vst.msk [vmem:[#allocation2 + $0x320] sm:$0xff] %vm330_vm0, %v4809_v51  ;;  %v2120_v40 = vmul.f32 %v11860_v18, %v13535_v31  ;;  %v13536_v7 = vld [vmem:[#allocation212_spill] sm:$0xff] }
 0x427   : > { %v4807_v53 = vmax.f32 %v4551_v13, %v4679_v49  ;;  %v12069_v5 = vld [vmem:[#allocation2 + $0x328] sm:$0xff]  ;;  %v4556_v3 = vld [vmem:[#allocation2 + $0x338] sm:$0xff]  ;;  %v3953_v23 = vpop.permute.xlu1 %3952  ;;  %v2121_v51 = vmul.f32 %v11860_v18, %v13536_v7  ;;  %v3149_v34 = vmul.f32 %v11870_v0, %v2944_v58 }
 0x428   : > { %4939 = vst.msk [vmem:[#allocation2 + $0x330] sm:$0xff] %vm330_vm0, %v4811_v33  ;;  %v13534_v29 = vld [vmem:[#allocation102_spill] sm:$0xff]  ;;  %v5192_v38 = vmax.f32 %v5063_v15, %v12069_v5  ;;  %4936 = vst.msk [vmem:[#allocation2 + $0x318] sm:$0xff] %vm330_vm0, %v4808_v17  ;;  %v4684_v62 = vld [vmem:[#allocation2 + $0x339] sm:$0xff]  ;;  %v4174_v41 = vmul.f32 %v11895_v46, %v3953_v23  ;;  %v1219_v33 = vmul.f32 %v11853_v35, %v13537_v6 }
 0x429   : > { %v1218_v47 = vmul.f32 %v11853_v35, %v13534_v29  ;;  %4935 = vst.msk [vmem:[#allocation2 + $0x310] sm:$0xff] %vm330_vm0, %v4807_v53  ;;  %v12079_v30 = vpop.permute.xlu0 %2933  ;;  %v4812_v43 = vmax.f32 %v4556_v3, %v4684_v62  ;;  %v5764_v4 = vpop.f32.mrf.mxu0  ;;  %v13538_v13 = vld [vmem:[#allocation104_spill] sm:$0xff] }
 0x42a   : > { %v5551_v21 = vld [vmem:[#allocation6 + $0xa9] sm:$0xff]  ;;  %v6061_v28 = vpop.f32.mrf.mxu1  ;;  %5316 = vst.msk [vmem:[#allocation2 + $0x308] sm:$0xff] %vm330_vm0, %v5192_v38  ;;  %v4302_v45 = vadd.f32 %v4174_v41, %v3273_v56  ;;  %v1220_v49 = vmul.f32 %v11853_v35, %v13538_v13  ;;  %v2248_v24 = vadd.f32 %v2120_v40, %v1219_v33 }
 0x42b   : > { %v5520_v10 = vld [vmem:[#allocation6 + $0xa8] sm:$0xff]  ;;  %v2247_v15 = vadd.f32 %v2119_v1, %v1218_v47  ;;  %8677 = vmatmul.mubr.msk.f32.gmra.mxu0 %vm330_vm0, %v5551_v21  ;;  %v12084_v32 = vadd.f32 %v6061_v28, %v5764_v4  ;;  %4940 = vst.msk [vmem:[#allocation2 + $0x338] sm:$0xff] %vm330_vm0, %v4812_v43  ;;  %v8645_v12 = vpop.f32.mrf.mxu0  ;;  %v3968_v52 = vpop.permute.xlu1 %3967 }
 0x42c   : > { %8768 = vmatmul.mubr.msk.f32.gmra.mxu1 %vm330_vm0, %v5520_v10  ;;  %v8736_v54 = vpop.f32.mrf.mxu1  ;;  %8679 = vmatprep.mubr.msk.f32.mxu0 %vm9299_vm1, %v13357_v25  ;;  %4430 = vst.msk [vmem:[#allocation2 + $0x348] sm:$0xff] %vm330_vm0, %v4302_v45  ;;  %v4177_v1 = vmul.f32 %v11895_v46, %v3968_v52  ;;  %v2249_v61 = vadd.f32 %v2121_v51, %v1220_v49  ;;  %v4557_v10 = vld [vmem:[#allocation2 + $0x340] sm:$0xff]  ;;  %v13540_v40 = vld [vmem:[#allocation99_spill] sm:$0xff] }
 0x42d   : > { %8770 = vmatprep.mubr.msk.f32.mxu1 %vm9299_vm1, %v13357_v25  ;;  %v3276_v63 = vadd.f32 %v3148_v20, %v2247_v15  ;;  %v3958_v50 = vpop.permute.xlu0 %3957  ;;  %v12100_v59 = vld [vmem:[#allocation2 + $0x320] sm:$0xff]  ;;  %v3277_v56 = vadd.f32 %v3149_v34, %v2248_v24  ;;  %v1217_v7 = vmul.f32 %v11853_v35, %v13540_v40  ;;  %v3147_v45 = vmul.f32 %v11870_v0, %v12079_v30 }
 0x42e   : > { %v4175_v53 = vmul.f32 %v11895_v46, %v3958_v50  ;;  %v5191_v8 = vmax.f32 %v12036_v42, %v12100_v59  ;;  %v3278_v23 = vadd.f32 %v3150_v55, %v2249_v61 }
 0x42f   : > { %v12107_v17 = vld [vmem:[#allocation2 + $0x330] sm:$0xff]  ;;  %v5065_v47 = vld [vmem:[#allocation2 + $0x318] sm:$0xff]  ;;  %v4305_v38 = vadd.f32 %v4177_v1, %v3276_v63  ;;  %v3978_v20 = vpop.permute.xlu1 %3977  ;;  %v12140_v63 = vld [vmem:[%s13146_s5] ss:$0 sm:$0xff] }
 0x430   : > { %v5064_v29 = vld [vmem:[#allocation2 + $0x310] sm:$0xff]  ;;  %v4303_v3 = vadd.f32 %v4175_v53, %v3274_v39  ;;  %v5190_v58 = vmax.f32 %v12007_v44, %v5065_v47  ;;  %5315 = vst.msk [vmem:[#allocation2 + $0x300] sm:$0xff] %vm330_vm0, %v5191_v8  ;;  %v4179_v42 = vmul.f32 %v11895_v46, %v3978_v20 }
 0x431   : > { %v5189_v14 = vmax.f32 %v11982_v22, %v5064_v29  ;;  %v5193_v62 = vmax.f32 %v5064_v29, %v12107_v17  ;;  %v3973_v16 = vpop.permute.xlu0 %3972  ;;  %4433 = vst.msk [vmem:[#allocation2 + $0x360] sm:$0xff] %vm330_vm0, %v4305_v38  ;;  %v13539_v44 = vld [vmem:[#allocation207_spill] sm:$0xff] }
 0x432   : > { %4431 = vst.msk [vmem:[#allocation2 + $0x350] sm:$0xff] %vm330_vm0, %v4303_v3  ;;  %v4178_v43 = vmul.f32 %v11895_v46, %v3973_v16  ;;  %5314 = vst.msk [vmem:[#allocation2 + $0x2f8] sm:$0xff] %vm330_vm0, %v5190_v58  ;;  %v12122_v22 = vld [vmem:[#allocation2 + $0x338] sm:$0xff]  ;;  %v2118_v41 = vmul.f32 %v11860_v18, %v13539_v44  ;;  %v4307_v4 = vadd.f32 %v4179_v42, %v3278_v23  ;;  %v13542_v3 = vld [vmem:[#allocation213_spill] sm:$0xff] }
 0x433   : > { %5313 = vst.msk [vmem:[#allocation2 + $0x2f0] sm:$0xff] %vm330_vm0, %v5189_v14  ;;  %5317 = vst.msk [vmem:[#allocation2 + $0x310] sm:$0xff] %vm330_vm0, %v5193_v62  ;;  %v5194_v28 = vmax.f32 %v5065_v47, %v12122_v22  ;;  %v4685_v9 = vld [vmem:[#allocation2 + $0x341] sm:$0xff]  ;;  %v2959_v15 = vpop.permute.xlu1 %2958  ;;  %v13541_v47 = vld [vmem:[#allocation211_spill] sm:$0xff]  ;;  %v2123_v14 = vmul.f32 %v11860_v18, %v13542_v3 }
 0x434   : > { %v4306_v21 = vadd.f32 %v4178_v43, %v3277_v56  ;;  %v4813_v51 = vmax.f32 %v4557_v10, %v4685_v9  ;;  %4435 = vst.msk [vmem:[#allocation2 + $0x370] sm:$0xff] %vm330_vm0, %v4307_v4  ;;  %v2246_v12 = vadd.f32 %v2118_v41, %v1217_v7  ;;  %v4558_v6 = vld [vmem:[#allocation2 + $0x348] sm:$0xff]  ;;  %v2122_v38 = vmul.f32 %v11860_v18, %v13541_v47  ;;  %v13543_v16 = vld [vmem:[#allocation103_spill] sm:$0xff] }
 0x435   : > { %v2954_v31 = vpop.permute.xlu0 %2953  ;;  %5318 = vst.msk [vmem:[#allocation2 + $0x318] sm:$0xff] %vm330_vm0, %v5194_v28  ;;  %v1221_v23 = vmul.f32 %v11853_v35, %v13543_v16  ;;  %v13544_v42 = vld [vmem:[#allocation106_spill] sm:$0xff]  ;;  %v3152_v44 = vmul.f32 %v11870_v0, %v2959_v15 }
 0x436   : > { %4434 = vst.msk [vmem:[#allocation2 + $0x368] sm:$0xff] %vm330_vm0, %v4306_v21  ;;  %4941 = vst.msk [vmem:[#allocation2 + $0x340] sm:$0xff] %vm330_vm0, %v4813_v51  ;;  %v3275_v39 = vadd.f32 %v3147_v45, %v2246_v12  ;;  %v1222_v43 = vmul.f32 %v11853_v35, %v13544_v42  ;;  %v3151_v41 = vmul.f32 %v11870_v0, %v2954_v31 }
 0x437   : > { %v5470_v54 = vld [vmem:[#allocation2 + $0x300] ss:$2 sm:$0xff]  ;;  %v12135_v13 = vpop.permute.xlu1 %1934  ;;  %v2250_v10 = vadd.f32 %v2122_v38, %v1221_v23 }
 0x438   : > { %v5473_v30 = vadd.f32 %v12140_v63, %v5470_v54  ;;  %v2251_v9 = vadd.f32 %v2123_v14, %v1222_v43  ;;  %v4561_v40 = vld [vmem:[#allocation2 + $0x360] sm:$0xff] }
 0x439   : > { %v4686_v33 = vld [vmem:[#allocation2 + $0x349] sm:$0xff]  ;;  %v3963_v49 = vpop.permute.xlu0 %3962 }
 0x43a   : > { %v4814_v52 = vmax.f32 %v4558_v6, %v4686_v33  ;;  %v4176_v50 = vmul.f32 %v11895_v46, %v3963_v49  ;;  %v5475_v55 = vmax.f32 %v5473_v30, 0.0  ;;  %v4559_v12 = vld [vmem:[#allocation2 + $0x350] sm:$0xff]  ;;  %v3280_v33 = vadd.f32 %v3152_v44, %v2251_v9 }
 0x43b   : > { %v12145_v8 = vpop.permute.xlu1 %1949  ;;  %v3279_v49 = vadd.f32 %v3151_v41, %v2250_v10 }
 0x43c   : > { %4942 = vst.msk [vmem:[#allocation2 + $0x348] sm:$0xff] %vm330_vm0, %v4814_v52  ;;  %v4304_v34 = vadd.f32 %v4176_v50, %v3275_v39  ;;  %5477 = vst.msk [vmem:[#allocation6 + $0xb4] sm:$0xff] %vm330_vm0, %v5475_v55  ;;  %v5472_v29 = vld [vmem:[#allocation2 + $0x310] ss:$2 sm:$0x7f] }
 0x43d   : > { %v4562_v1 = vld [vmem:[#allocation2 + $0x368] sm:$0xff]  ;;  %v12147_v24 = vpop.permute.xlu0 %1939  ;;  %v12155_v62 = vld [vmem:[#allocation2 + $0x340] sm:$0xff]  ;;  %v5474_v20 = vadd.f32 %v12140_v63, %v5472_v29 }
 0x43e   : > { %v4690_v53 = vld [vmem:[#allocation2 + $0x369] sm:$0xff]  ;;  %4432 = vst.msk [vmem:[#allocation2 + $0x358] sm:$0xff] %vm330_vm0, %v4304_v34  ;;  %v4689_v58 = vld [vmem:[#allocation2 + $0x361] sm:$0xff]  ;;  %v5195_v56 = vmax.f32 %v12100_v59, %v12155_v62 }
 0x43f   : > { %v4818_v61 = vmax.f32 %v4562_v1, %v4690_v53  ;;  %v12167_v4 = vpop.permute.xlu1 %1959  ;;  %v5476_v28 = vmax.f32 %v5474_v20, 0.0  ;;  %v4817_v15 = vmax.f32 %v4561_v40, %v4689_v58 }
 0x440   : > { %5319 = vst.msk [vmem:[#allocation2 + $0x320] sm:$0xff] %vm330_vm0, %v5195_v56 }
 0x441   : > { %4946 = vst.msk [vmem:[#allocation2 + $0x368] sm:$0xff] %vm330_vm0, %v4818_v61 }
 0x442   : > { %v12169_v21 = vpop.permute.xlu0 %1954  ;;  %v5769_v51 = vpop.f32.mrf.mxu0  ;;  %5478 = vst.msk [vmem:[#allocation6 + $0xbc] sm:$0x7f] %vm4964_vm2, %v5476_v28 }
 0x443   : > { %v5071_v7 = vld [vmem:[#allocation2 + $0x348] sm:$0xff]  ;;  %v5521_v6 = vld [vmem:[#allocation6 + $0xb0] sm:$0xff]  ;;  %v3988_v50 = vpop.permute.xlu1 %3987 }
 0x444   : > { %v6066_v59 = vpop.f32.mrf.mxu1  ;;  %v5196_v45 = vmax.f32 %v12069_v5, %v5071_v7  ;;  %v5552_v31 = vld [vmem:[#allocation6 + $0xb1] sm:$0xff]  ;;  %8771 = vmatmul.mubr.msk.f32.gmra.mxu1 %vm330_vm0, %v5521_v6  ;;  %v4181_v1 = vmul.f32 %v11895_v46, %v3988_v50  ;;  %v8648_v61 = vpop.f32.mrf.mxu0 }
 0x445   : > { %v12174_v54 = vadd.f32 %v6066_v59, %v5769_v51  ;;  %v4560_v30 = vld [vmem:[#allocation2 + $0x358] sm:$0xff]  ;;  %8680 = vmatmul.mubr.msk.f32.gmra.mxu0 %vm330_vm0, %v5552_v31  ;;  %8773 = vmatprep.mubr.msk.f32.mxu1 %vm9299_vm1, %v13357_v25 }
 0x446   : > { %v4687_v39 = vld [vmem:[#allocation2 + $0x351] sm:$0xff]  ;;  %v4688_v52 = vld [vmem:[#allocation2 + $0x359] sm:$0xff]  ;;  %v3983_v55 = vpop.permute.xlu0 %3982  ;;  %5320 = vst.msk [vmem:[#allocation2 + $0x328] sm:$0xff] %vm330_vm0, %v5196_v45  ;;  %v8739_v29 = vpop.f32.mrf.mxu1  ;;  %8682 = vmatprep.mubr.msk.f32.mxu0 %vm9299_vm1, %v13357_v25  ;;  %v4309_v3 = vadd.f32 %v4181_v1, %v3280_v33 }
 0x447   : > { %v4815_v5 = vmax.f32 %v4559_v12, %v4687_v39  ;;  %v4816_v34 = vmax.f32 %v4560_v30, %v4688_v52  ;;  %4945 = vst.msk [vmem:[#allocation2 + $0x360] sm:$0xff] %vm330_vm0, %v4817_v15  ;;  %v4180_v53 = vmul.f32 %v11895_v46, %v3983_v55  ;;  %v2964_v58 = vpop.permute.xlu1 %2963  ;;  %v4563_v15 = vld [vmem:[#allocation2 + $0x370] sm:$0xff]  ;;  %v2124_v39 = vmul.f32 %v11860_v18, %v12135_v13  ;;  %v13545_v52 = vld [vmem:[#allocation105_spill] sm:$0xff]  ;;  %v13546_v61 = vld [vmem:[#allocation108_spill] sm:$0xff] }
 0x448   : > { %v12184_v47 = vld [vmem:[#allocation2 + $0x368] sm:$0xff]  ;;  %4437 = vst.msk [vmem:[#allocation2 + $0x380] sm:$0xff] %vm330_vm0, %v4309_v3  ;;  %v1223_v50 = vmul.f32 %v11853_v35, %v13545_v52  ;;  %v3153_v55 = vmul.f32 %v11870_v0, %v2964_v58  ;;  %v1224_v29 = vmul.f32 %v11853_v35, %v13546_v61 }
 0x449   : > { %v5200_v38 = vmax.f32 %v5071_v7, %v12184_v47  ;;  %4943 = vst.msk [vmem:[#allocation2 + $0x350] sm:$0xff] %vm330_vm0, %v4815_v5  ;;  %4944 = vst.msk [vmem:[#allocation2 + $0x358] sm:$0xff] %vm330_vm0, %v4816_v34  ;;  %v4308_v14 = vadd.f32 %v4180_v53, %v3279_v49  ;;  %v5774_v16 = vpop.f32.mrf.mxu0  ;;  %v5553_v23 = vld [vmem:[#allocation6 + $0xb9] sm:$0xff]  ;;  %v2127_v5 = vmul.f32 %v11860_v18, %v12145_v8 }
 0x44a   : > { %v12191_v20 = vpop.permute.xlu0 %1944  ;;  %v6071_v56 = vpop.f32.mrf.mxu1  ;;  %v5522_v42 = vld [vmem:[#allocation6 + $0xb8] sm:$0xff]  ;;  %8683 = vmatmul.mubr.msk.f32.gmra.mxu0 %vm330_vm0, %v5553_v23  ;;  %v2125_v34 = vmul.f32 %v11860_v18, %v12147_v24  ;;  %v2252_v13 = vadd.f32 %v2124_v39, %v1223_v50 }
 0x44b   : > { %5324 = vst.msk [vmem:[#allocation2 + $0x348] sm:$0xff] %vm330_vm0, %v5200_v38  ;;  %4436 = vst.msk [vmem:[#allocation2 + $0x378] sm:$0xff] %vm330_vm0, %v4308_v14  ;;  %v12197_v43 = vadd.f32 %v6071_v56, %v5774_v16  ;;  %8774 = vmatmul.mubr.msk.f32.gmra.mxu1 %vm330_vm0, %v5522_v42  ;;  %v8651_v44 = vpop.f32.mrf.mxu0  ;;  %8685 = vmatprep.mubr.msk.f32.mxu0 %vm9299_vm1, %v13357_v25  ;;  %v2979_v10 = vpop.permute.xlu1 %2978  ;;  %v13547_v38 = vld [vmem:[#allocation110_spill] sm:$0xff]  ;;  %v13548_v42 = vld [vmem:[#allocation109_spill] sm:$0xff] }
 0x44c   : > { %v8742_v41 = vpop.f32.mrf.mxu1  ;;  %8776 = vmatprep.mubr.msk.f32.mxu1 %vm9299_vm1, %v13357_v25  ;;  %v1226_v3 = vmul.f32 %v11853_v35, %v13547_v38  ;;  %v3156_v14 = vmul.f32 %v11870_v0, %v2979_v10  ;;  %v3281_v8 = vadd.f32 %v3153_v55, %v2252_v13  ;;  %v1227_v44 = vmul.f32 %v11853_v35, %v13548_v42 }
 0x44d   : > { %v2128_v10 = vmul.f32 %v11860_v18, %v12169_v21 }
 0x44e   : > { %v12204_v28 = vld [vmem:[#allocation2 + $0x360] sm:$0xff]  ;;  %v2969_v9 = vpop.permute.xlu0 %2968  ;;  %v2255_v41 = vadd.f32 %v2127_v5, %v1226_v3 }
 0x44f   : > { %v5199_v40 = vmax.f32 %v12155_v62, %v12204_v28  ;;  %v2989_v6 = vpop.permute.xlu1 %2988  ;;  %v3154_v58 = vmul.f32 %v11870_v0, %v2969_v9 }
 0x450   : > { %v5073_v7 = vld [vmem:[#allocation2 + $0x358] sm:$0xff]  ;;  %v5072_v51 = vld [vmem:[#allocation2 + $0x350] sm:$0xff] }
 0x451   : > { %v5198_v59 = vmax.f32 %v12122_v22, %v5073_v7  ;;  %5323 = vst.msk [vmem:[#allocation2 + $0x340] sm:$0xff] %vm330_vm0, %v5199_v40  ;;  %v5197_v45 = vmax.f32 %v12107_v17, %v5072_v51  ;;  %v2253_v40 = vadd.f32 %v2125_v34, %v1224_v29 }
 0x452   : > { %v4564_v12 = vld [vmem:[#allocation2 + $0x378] sm:$0xff]  ;;  %v2984_v33 = vpop.permute.xlu0 %2983 }
 0x453   : > { %v4691_v31 = vld [vmem:[#allocation2 + $0x371] sm:$0xff]  ;;  %5322 = vst.msk [vmem:[#allocation2 + $0x338] sm:$0xff] %vm330_vm0, %v5198_v59  ;;  %v4692_v49 = vld [vmem:[#allocation2 + $0x379] sm:$0xff]  ;;  %5321 = vst.msk [vmem:[#allocation2 + $0x330] sm:$0xff] %vm330_vm0, %v5197_v45  ;;  %v12217_v17 = vpop.permute.xlu1 %1969  ;;  %v2129_v45 = vmul.f32 %v11860_v18, %v12167_v4  ;;  %v3282_v39 = vadd.f32 %v3154_v58, %v2253_v40  ;;  %v3158_v4 = vmul.f32 %v11870_v0, %v2989_v6 }
 0x454   : > { %v4819_v30 = vmax.f32 %v4563_v15, %v4691_v31  ;;  %v4820_v62 = vmax.f32 %v4564_v12, %v4692_v49  ;;  %v13549_v31 = vld [vmem:[#allocation112_spill] sm:$0xff]  ;;  %v3157_v18 = vmul.f32 %v11870_v0, %v2984_v33 }
 0x455   : > { %v1228_v49 = vmul.f32 %v11853_v35, %v13549_v31 }
 0x456   : > { %4947 = vst.msk [vmem:[#allocation2 + $0x370] sm:$0xff] %vm330_vm0, %v4819_v30  ;;  %4948 = vst.msk [vmem:[#allocation2 + $0x378] sm:$0xff] %vm330_vm0, %v4820_v62  ;;  %v1965_v22 = vpop.permute.xlu0 %1964  ;;  %v3284_v62 = vadd.f32 %v3156_v14, %v2255_v41  ;;  %v13551_v41 = vld [vmem:[#allocation111_spill] sm:$0xff] }
 0x457   : > { %v3993_v16 = vpop.permute.xlu1 %3992  ;;  %v2257_v35 = vadd.f32 %v2129_v45, %v1228_v49 }
 0x458   : > { %v5480_v1 = vld [vmem:[#allocation2 + $0x340] ss:$2 sm:$0xff]  ;;  %v4182_v56 = vmul.f32 %v11895_v46, %v3993_v16  ;;  %v13550_v16 = vld [vmem:[#allocation107_spill] sm:$0xff] }
 0x459   : > { %v5483_v53 = vadd.f32 %v12140_v63, %v5480_v1  ;;  %v3286_v13 = vadd.f32 %v3158_v4, %v2257_v35 }
 0x45a   : > { %v2974_v23 = vpop.permute.xlu0 %2973  ;;  %v4310_v15 = vadd.f32 %v4182_v56, %v3281_v8  ;;  %v4565_v8 = vld [vmem:[#allocation2 + $0x380] sm:$0xff] }
 0x45b   : > { %v5485_v24 = vmax.f32 %v5483_v53, 0.0  ;;  %v4008_v52 = vpop.permute.xlu1 %4007  ;;  %v12263_v53 = vld [vmem:[%s13142_s1 + $0x1] ss:$0 sm:$0xff] }
 0x45c   : > { %4438 = vst.msk [vmem:[#allocation2 + $0x388] sm:$0xff] %vm330_vm0, %v4310_v15  ;;  %v4185_v21 = vmul.f32 %v11895_v46, %v4008_v52  ;;  %v2126_v61 = vmul.f32 %v12263_v53, %v12191_v20  ;;  %v2130_v3 = vmul.f32 %v12263_v53, %v1965_v22  ;;  %v12283_v22 = vld [vmem:[%s13142_s1 + $0x2] ss:$0 sm:$0xff]  ;;  %v2131_v31 = vmul.f32 %v12263_v53, %v12217_v17  ;;  %v12305_v17 = vld [vmem:[%s13142_s1 + $0x3] ss:$0 sm:$0xff] }
 0x45d   : > { %v12236_v59 = vld [vmem:[#allocation2 + $0x370] sm:$0xff]  ;;  %v12242_v9 = vld [vmem:[#allocation2 + $0x378] sm:$0xff]  ;;  %5487 = vst.msk [vmem:[#allocation6 + $0xc3] sm:$0xff] %vm330_vm0, %v5485_v24  ;;  %v3155_v24 = vmul.f32 %v12283_v22, %v2974_v23 }
 0x45e   : > { %v5201_v12 = vmax.f32 %v5072_v51, %v12236_v59  ;;  %v5202_v30 = vmax.f32 %v5073_v7, %v12242_v9  ;;  %v3998_v50 = vpop.permute.xlu0 %3997  ;;  %v2256_v7 = vadd.f32 %v2128_v10, %v1227_v44  ;;  %v4313_v51 = vadd.f32 %v4185_v21, %v3284_v62 }
 0x45f   : > { %v4183_v55 = vmul.f32 %v11895_v46, %v3998_v50  ;;  %v4018_v34 = vpop.permute.xlu1 %4017 }
 0x460   : > { %5325 = vst.msk [vmem:[#allocation2 + $0x350] sm:$0xff] %vm330_vm0, %v5201_v12  ;;  %5326 = vst.msk [vmem:[#allocation2 + $0x358] sm:$0xff] %vm330_vm0, %v5202_v30  ;;  %v3285_v6 = vadd.f32 %v3157_v18, %v2256_v7  ;;  %v4187_v0 = vmul.f32 %v11895_v46, %v4018_v34  ;;  %v13552_v30 = vld [vmem:[#allocation114_spill] sm:$0xff] }
 0x461   : > { %v4311_v5 = vadd.f32 %v4183_v55, %v3282_v39  ;;  %4441 = vst.msk [vmem:[#allocation2 + $0x3a0] sm:$0xff] %vm330_vm0, %v4313_v51 }
 0x462   : > { %v4013_v1 = vpop.permute.xlu0 %4012  ;;  %v4315_v14 = vadd.f32 %v4187_v0, %v3286_v13 }
 0x463   : > { %4439 = vst.msk [vmem:[#allocation2 + $0x390] sm:$0xff] %vm330_vm0, %v4311_v5  ;;  %v4186_v33 = vmul.f32 %v11895_v46, %v4013_v1  ;;  %v12276_v46 = vld [vmem:[%s13142_s1] ss:$0 sm:$0xff]  ;;  %v4693_v56 = vld [vmem:[#allocation2 + $0x381] sm:$0xff] }
 0x464   : > { %v5554_v29 = vld [vmem:[#allocation6 + $0xc1] sm:$0xff]  ;;  %v1225_v20 = vmul.f32 %v12276_v46, %v13550_v16  ;;  %v2999_v42 = vpop.permute.xlu1 %2998  ;;  %v1229_v40 = vmul.f32 %v12276_v46, %v13551_v41  ;;  %v4821_v45 = vmax.f32 %v4565_v8, %v4693_v56  ;;  %4443 = vst.msk [vmem:[#allocation2 + $0x3b0] sm:$0xff] %vm330_vm0, %v4315_v14  ;;  %v1230_v62 = vmul.f32 %v12276_v46, %v13552_v30  ;;  %v4566_v39 = vld [vmem:[#allocation2 + $0x388] sm:$0xff] }
 0x465   : > { %v12267_v38 = vld [vmem:[#allocation6 + $0xc0] sm:$0xff]  ;;  %v4314_v58 = vadd.f32 %v4186_v33, %v3285_v6  ;;  %8686 = vmatmul.mubr.msk.f32.gmra.mxu0 %vm330_vm0, %v5554_v29  ;;  %v3160_v4 = vmul.f32 %v12283_v22, %v2999_v42 }
 0x466   : > { %8777 = vmatmul.mubr.msk.f32.gmra.mxu1 %vm330_vm0, %v12267_v38  ;;  %v2994_v44 = vpop.permute.xlu0 %2993  ;;  %8688 = vmatprep.mubr.msk.f32.mxu0 %vm9299_vm1, %v13357_v25  ;;  %v2254_v23 = vadd.f32 %v2126_v61, %v1225_v20  ;;  %v2258_v49 = vadd.f32 %v2130_v3, %v1229_v40  ;;  %4949 = vst.msk [vmem:[#allocation2 + $0x380] sm:$0xff] %vm330_vm0, %v4821_v45 }
 0x467   : > { %8779 = vmatprep.mubr.msk.f32.mxu1 %vm9299_vm1, %v13357_v25  ;;  %4442 = vst.msk [vmem:[#allocation2 + $0x3a8] sm:$0xff] %vm330_vm0, %v4314_v58  ;;  %v3159_v10 = vmul.f32 %v12283_v22, %v2994_v44  ;;  %v5482_v15 = vld [vmem:[#allocation2 + $0x350] ss:$2 sm:$0x7f]  ;;  %v2259_v6 = vadd.f32 %v2131_v31, %v1230_v62 }
 0x468   : > { %v5484_v12 = vadd.f32 %v12140_v63, %v5482_v15  ;;  %v3283_v52 = vadd.f32 %v3155_v24, %v2254_v23  ;;  %v4023_v18 = vpop.permute.xlu1 %4022 }
 0x469   : > { %v3287_v7 = vadd.f32 %v3159_v10, %v2258_v49  ;;  %v4188_v51 = vmul.f32 %v12305_v17, %v4023_v18  ;;  %v3288_v20 = vadd.f32 %v3160_v4, %v2259_v6 }
 0x46a   : > { %v4694_v50 = vld [vmem:[#allocation2 + $0x389] sm:$0xff]  ;;  %v4003_v21 = vpop.permute.xlu0 %4002  ;;  %v5486_v55 = vmax.f32 %v5484_v12, 0.0 }
 0x46b   : > { %v4822_v35 = vmax.f32 %v4566_v39, %v4694_v50  ;;  %v4184_v5 = vmul.f32 %v12305_v17, %v4003_v21  ;;  %v4316_v0 = vadd.f32 %v4188_v51, %v3287_v7  ;;  %v4571_v31 = vld [vmem:[#allocation2 + $0x3b0] sm:$0xff] }
 0x46c   : > { %v5779_v34 = vpop.f32.mrf.mxu0  ;;  %5488 = vst.msk [vmem:[#allocation6 + $0xcb] sm:$0x7f] %vm4964_vm2, %v5486_v55  ;;  %v12313_v14 = vpop.permute.xlu1 %1974  ;;  %v4567_v4 = vld [vmem:[#allocation2 + $0x390] sm:$0xff] }
 0x46d   : > { %v6076_v1 = vpop.f32.mrf.mxu1  ;;  %4950 = vst.msk [vmem:[#allocation2 + $0x388] sm:$0xff] %vm330_vm0, %v4822_v35  ;;  %v4312_v33 = vadd.f32 %v4184_v5, %v3283_v52  ;;  %4444 = vst.msk [vmem:[#allocation2 + $0x3b8] sm:$0xff] %vm330_vm0, %v4316_v0  ;;  %v5078_v24 = vld [vmem:[#allocation2 + $0x380] sm:$0xff] }
 0x46e   : > { %v12309_v13 = vadd.f32 %v6076_v1, %v5779_v34  ;;  %v8654_v61 = vpop.f32.mrf.mxu0  ;;  %v4570_v3 = vld [vmem:[#allocation2 + $0x3a8] sm:$0xff]  ;;  %v4028_v58 = vpop.permute.xlu0 %4027  ;;  %v5203_v41 = vmax.f32 %v12204_v28, %v5078_v24  ;;  %v4569_v28 = vld [vmem:[#allocation2 + $0x3a0] sm:$0xff] }
 0x46f   : > { %v8745_v29 = vpop.f32.mrf.mxu1  ;;  %v4698_v16 = vld [vmem:[#allocation2 + $0x3a9] sm:$0xff]  ;;  %4440 = vst.msk [vmem:[#allocation2 + $0x398] sm:$0xff] %vm330_vm0, %v4312_v33  ;;  %v4189_v8 = vmul.f32 %v12305_v17, %v4028_v58  ;;  %v4697_v42 = vld [vmem:[#allocation2 + $0x3a1] sm:$0xff] }
 0x470   : > { %v4826_v56 = vmax.f32 %v4570_v3, %v4698_v16  ;;  %v12320_v40 = vpop.permute.xlu1 %1984  ;;  %5327 = vst.msk [vmem:[#allocation2 + $0x360] sm:$0xff] %vm330_vm0, %v5203_v41  ;;  %v4825_v49 = vmax.f32 %v4569_v28, %v4697_v42 }
 0x471   : > { %v4317_v44 = vadd.f32 %v4189_v8, %v3288_v20 }
 0x472   : > { %4954 = vst.msk [vmem:[#allocation2 + $0x3a8] sm:$0xff] %vm330_vm0, %v4826_v56  ;;  %v12322_v45 = vpop.permute.xlu0 %1979 }
 0x473   : > { %4445 = vst.msk [vmem:[#allocation2 + $0x3c0] sm:$0xff] %vm330_vm0, %v4317_v44  ;;  %v5555_v10 = vld [vmem:[#allocation6 + $0xc9] sm:$0xff] }
 0x474   : > { %v12325_v15 = vld [vmem:[#allocation6 + $0xc8] sm:$0xff]  ;;  %v5079_v23 = vld [vmem:[#allocation2 + $0x388] sm:$0xff]  ;;  %8689 = vmatmul.mubr.msk.f32.gmra.mxu0 %vm330_vm0, %v5555_v10  ;;  %v12336_v39 = vpop.permute.xlu1 %1994 }
 0x475   : > { %8780 = vmatmul.mubr.msk.f32.gmra.mxu1 %vm330_vm0, %v12325_v15  ;;  %v5204_v12 = vmax.f32 %v12184_v47, %v5079_v23  ;;  %8691 = vmatprep.mubr.msk.f32.mxu0 %vm9299_vm1, %v13357_v25  ;;  %v4699_v30 = vld [vmem:[#allocation2 + $0x3b1] sm:$0xff] }
 0x476   : > { %8782 = vmatprep.mubr.msk.f32.mxu1 %vm9299_vm1, %v13357_v25  ;;  %v4568_v62 = vld [vmem:[#allocation2 + $0x398] sm:$0xff]  ;;  %v12338_v52 = vpop.permute.xlu0 %1989  ;;  %v4827_v50 = vmax.f32 %v4571_v31, %v4699_v30  ;;  %v13553_v30 = vld [vmem:[#allocation113_spill] sm:$0xff] }
 0x477   : > { %5328 = vst.msk [vmem:[#allocation2 + $0x368] sm:$0xff] %vm330_vm0, %v5204_v12  ;;  %v4695_v18 = vld [vmem:[#allocation2 + $0x391] sm:$0xff]  ;;  %v4696_v47 = vld [vmem:[#allocation2 + $0x399] sm:$0xff]  ;;  %v6081_v21 = vpop.f32.mrf.mxu1 }
 0x478   : > { %v4823_v55 = vmax.f32 %v4567_v4, %v4695_v18  ;;  %v4824_v35 = vmax.f32 %v4568_v62, %v4696_v47  ;;  %4953 = vst.msk [vmem:[#allocation2 + $0x3a0] sm:$0xff] %vm330_vm0, %v4825_v49  ;;  %4955 = vst.msk [vmem:[#allocation2 + $0x3b0] sm:$0xff] %vm330_vm0, %v4827_v50  ;;  %v4572_v34 = vld [vmem:[#allocation2 + $0x3b8] sm:$0xff]  ;;  %v12348_v6 = vpop.permute.xlu1 %2004  ;;  %v1231_v62 = vmul.f32 %v12276_v46, %v13553_v30 }
 0x479   : > { %v12342_v7 = vld [vmem:[#allocation2 + $0x3a8] sm:$0xff]  ;;  %v8748_v51 = vpop.f32.mrf.mxu1  ;;  %v2134_v50 = vmul.f32 %v12263_v53, %v12320_v40 }
 0x47a   : > { %v5208_v5 = vmax.f32 %v5079_v23, %v12342_v7  ;;  %4951 = vst.msk [vmem:[#allocation2 + $0x390] sm:$0xff] %vm330_vm0, %v4823_v55  ;;  %4952 = vst.msk [vmem:[#allocation2 + $0x398] sm:$0xff] %vm330_vm0, %v4824_v35  ;;  %v4700_v1 = vld [vmem:[#allocation2 + $0x3b9] sm:$0xff]  ;;  %v12350_v0 = vpop.permute.xlu0 %1999 }
 0x47b   : > { %v4828_v33 = vmax.f32 %v4572_v34, %v4700_v1 }
 0x47c   : > { %5332 = vst.msk [vmem:[#allocation2 + $0x388] sm:$0xff] %vm330_vm0, %v5208_v5  ;;  %v3009_v61 = vpop.permute.xlu1 %3008  ;;  %v13555_v5 = vld [vmem:[#allocation116_spill] sm:$0xff] }
 0x47d   : > { %4956 = vst.msk [vmem:[#allocation2 + $0x3b8] sm:$0xff] %vm330_vm0, %v4828_v33  ;;  %v1232_v34 = vmul.f32 %v12276_v46, %v13555_v5  ;;  %v3162_v1 = vmul.f32 %v12283_v22, %v3009_v61 }
 0x47e   : > { %v3004_v29 = vpop.permute.xlu0 %3003 }
 0x47f   : > { %v12354_v3 = vld [vmem:[#allocation2 + $0x3a0] sm:$0xff]  ;;  %v12356_v58 = vld [vmem:[#allocation2 + $0x3b0] sm:$0xff]  ;;  %v3161_v4 = vmul.f32 %v12283_v22, %v3004_v29 }
 0x480   : > { %v5207_v16 = vmax.f32 %v5078_v24, %v12354_v3  ;;  %v3019_v41 = vpop.permute.xlu1 %3018 }
 0x481   : > { %v5080_v20 = vld [vmem:[#allocation2 + $0x390] sm:$0xff]  ;;  %v5081_v8 = vld [vmem:[#allocation2 + $0x398] sm:$0xff] }
 0x482   : > { %v5205_v56 = vmax.f32 %v12236_v59, %v5080_v20  ;;  %v5206_v42 = vmax.f32 %v12242_v9, %v5081_v8  ;;  %v5209_v44 = vmax.f32 %v5080_v20, %v12356_v58  ;;  %v3014_v10 = vpop.permute.xlu0 %3013  ;;  %5331 = vst.msk [vmem:[#allocation2 + $0x380] sm:$0xff] %vm330_vm0, %v5207_v16  ;;  %v2132_v59 = vmul.f32 %v12263_v53, %v12313_v14 }
 0x483   : > { %v2133_v14 = vmul.f32 %v12263_v53, %v12322_v45  ;;  %v3163_v40 = vmul.f32 %v12283_v22, %v3014_v10  ;;  %v2135_v10 = vmul.f32 %v12263_v53, %v12338_v52 }
 0x484   : > { %5329 = vst.msk [vmem:[#allocation2 + $0x370] sm:$0xff] %vm330_vm0, %v5205_v56  ;;  %5330 = vst.msk [vmem:[#allocation2 + $0x378] sm:$0xff] %vm330_vm0, %v5206_v42  ;;  %v12366_v28 = vld [vmem:[#allocation2 + $0x3b8] sm:$0xff]  ;;  %v3029_v31 = vpop.permute.xlu1 %3028  ;;  %v2260_v35 = vadd.f32 %v2132_v59, %v1231_v62 }
 0x485   : > { %5333 = vst.msk [vmem:[#allocation2 + $0x390] sm:$0xff] %vm330_vm0, %v5209_v44  ;;  %v5784_v23 = vpop.f32.mrf.mxu0  ;;  %v5210_v12 = vmax.f32 %v5081_v8, %v12366_v28  ;;  %v2261_v42 = vadd.f32 %v2133_v14, %v1232_v34  ;;  %v2136_v44 = vmul.f32 %v12263_v53, %v12336_v39  ;;  %v2137_v34 = vmul.f32 %v12263_v53, %v12350_v0 }
 0x486   : > { %v6086_v24 = vpop.f32.mrf.mxu1  ;;  %v12370_v9 = vadd.f32 %v6081_v21, %v5784_v23  ;;  %v3024_v49 = vpop.permute.xlu0 %3023  ;;  %v13554_v21 = vld [vmem:[#allocation115_spill] sm:$0xff]  ;;  %v3289_v8 = vadd.f32 %v3161_v4, %v2260_v35 }
 0x487   : > { %v8657_v18 = vpop.f32.mrf.mxu0  ;;  %5334 = vst.msk [vmem:[#allocation2 + $0x398] sm:$0xff] %vm330_vm0, %v5210_v12  ;;  %v1233_v55 = vmul.f32 %v12276_v46, %v13554_v21  ;;  %v13556_v12 = vld [vmem:[#allocation117_spill] sm:$0xff] }
 0x488   : > { %v8751_v47 = vpop.f32.mrf.mxu1  ;;  %v4033_v33 = vpop.permute.xlu1 %4032  ;;  %v1235_v61 = vmul.f32 %v12276_v46, %v13556_v12  ;;  %v3290_v18 = vadd.f32 %v3162_v1, %v2261_v42 }
 0x489   : > { %v5490_v51 = vld [vmem:[#allocation2 + $0x380] ss:$2 sm:$0xff]  ;;  %v2262_v20 = vadd.f32 %v2134_v50, %v1233_v55  ;;  %v4190_v45 = vmul.f32 %v12305_v17, %v4033_v33  ;;  %v5789_v56 = vpop.f32.mrf.mxu0  ;;  %v3164_v47 = vmul.f32 %v12283_v22, %v3019_v41  ;;  %v3165_v55 = vmul.f32 %v12283_v22, %v3024_v49  ;;  %v13558_v49 = vld [vmem:[#allocation119_spill] sm:$0xff] }
 0x48a   : > { %v3034_v29 = vpop.permute.xlu0 %3033  ;;  %v5493_v16 = vadd.f32 %v12140_v63, %v5490_v51  ;;  %v12391_v23 = vadd.f32 %v6086_v24, %v5789_v56  ;;  %v13557_v50 = vld [vmem:[#allocation118_spill] sm:$0xff]  ;;  %v2264_v5 = vadd.f32 %v2136_v44, %v1235_v61  ;;  %v2138_v41 = vmul.f32 %v12263_v53, %v12348_v6 }
 0x48b   : > { %v4318_v30 = vadd.f32 %v4190_v45, %v3289_v8  ;;  %v8660_v62 = vpop.f32.mrf.mxu0  ;;  %v1234_v4 = vmul.f32 %v12276_v46, %v13557_v50  ;;  %v3291_v14 = vadd.f32 %v3163_v40, %v2262_v20  ;;  %v1237_v20 = vmul.f32 %v12276_v46, %v13558_v49  ;;  %v13559_v8 = vld [vmem:[#allocation120_spill] sm:$0xff] }
 0x48c   : > { %v5495_v59 = vmax.f32 %v5493_v16, 0.0  ;;  %v4043_v21 = vpop.permute.xlu1 %4042  ;;  %v1236_v45 = vmul.f32 %v12276_v46, %v13559_v8  ;;  %v3166_v56 = vmul.f32 %v12283_v22, %v3029_v31 }
 0x48d   : > { %4446 = vst.msk [vmem:[#allocation2 + $0x3c8] sm:$0xff] %vm330_vm0, %v4318_v30  ;;  %v4192_v52 = vmul.f32 %v12305_v17, %v4043_v21  ;;  %v2263_v1 = vadd.f32 %v2135_v10, %v1234_v4  ;;  %v2266_v12 = vadd.f32 %v2138_v41, %v1237_v20 }
 0x48e   : > { %v4038_v39 = vpop.permute.xlu0 %4037  ;;  %5497 = vst.msk [vmem:[#allocation6 + $0xd2] sm:$0xff] %vm330_vm0, %v5495_v59  ;;  %v5492_v24 = vld [vmem:[#allocation2 + $0x390] ss:$2 sm:$0x7f]  ;;  %v3293_v59 = vadd.f32 %v3165_v55, %v2264_v5  ;;  %v2265_v46 = vadd.f32 %v2137_v34, %v1236_v45 }
 0x48f   : > { %v4191_v35 = vmul.f32 %v12305_v17, %v4038_v39  ;;  %v5494_v51 = vadd.f32 %v12140_v63, %v5492_v24  ;;  %v4320_v40 = vadd.f32 %v4192_v52, %v3291_v14  ;;  %v3167_v63 = vmul.f32 %v12283_v22, %v3034_v29  ;;  %v4573_v29 = vld [vmem:[#allocation2 + $0x3c0] sm:$0xff] }
 0x490   : > { %v4053_v42 = vpop.permute.xlu1 %4052  ;;  %v3292_v6 = vadd.f32 %v3164_v47, %v2263_v1  ;;  %v3294_v30 = vadd.f32 %v3166_v56, %v2265_v46 }
 0x491   : > { %v4319_v33 = vadd.f32 %v4191_v35, %v3290_v18  ;;  %v5496_v16 = vmax.f32 %v5494_v51, 0.0  ;;  %4448 = vst.msk [vmem:[#allocation2 + $0x3d8] sm:$0xff] %vm330_vm0, %v4320_v40  ;;  %v4194_v53 = vmul.f32 %v12305_v17, %v4053_v42  ;;  %v3295_v50 = vadd.f32 %v3167_v63, %v2266_v12  ;;  %v5558_v40 = vld [vmem:[#allocation6 + $0xe1] sm:$0x1]  ;;  %v6155_v42 = vld [vmem:[#allocation6 + $0xf] sm:$0xff] }
 0x492   : > { %v4048_v44 = vpop.permute.xlu0 %4047 }
 0x493   : > { %4447 = vst.msk [vmem:[#allocation2 + $0x3d0] sm:$0xff] %vm330_vm0, %v4319_v33  ;;  %v4193_v0 = vmul.f32 %v12305_v17, %v4048_v44  ;;  %v4322_v61 = vadd.f32 %v4194_v53, %v3293_v59  ;;  %v6512_v44 = vld [vmem:[#allocation6 + $0x10] sm:$0xff] }
 0x494   : > { %5498 = vst.msk [vmem:[#allocation6 + $0xda] sm:$0x7f] %vm4964_vm2, %v5496_v16  ;;  %v4701_v62 = vld [vmem:[#allocation2 + $0x3c1] sm:$0xff]  ;;  %v4063_v4 = vpop.permute.xlu1 %4062 }
 0x495   : > { %v4321_v31 = vadd.f32 %v4193_v0, %v3292_v6  ;;  %v5556_v10 = vld [vmem:[#allocation6 + $0xd1] sm:$0xff]  ;;  %v4829_v47 = vmax.f32 %v4573_v29, %v4701_v62  ;;  %4450 = vst.msk [vmem:[#allocation2 + $0x3e8] sm:$0xff] %vm330_vm0, %v4322_v61  ;;  %v4196_v14 = vmul.f32 %v12305_v17, %v4063_v4 }
 0x496   : > { %v12421_v22 = vld [vmem:[#allocation6 + $0xd0] sm:$0xff]  ;;  %8692 = vmatmul.mubr.msk.f32.gmra.mxu0 %vm330_vm0, %v5556_v10  ;;  %v4058_v18 = vpop.permute.xlu0 %4057  ;;  %v4574_v39 = vld [vmem:[#allocation2 + $0x3c8] sm:$0xff] }
 0x497   : > { %8783 = vmatmul.mubr.msk.f32.gmra.mxu1 %vm330_vm0, %v12421_v22  ;;  %4449 = vst.msk [vmem:[#allocation2 + $0x3e0] sm:$0xff] %vm330_vm0, %v4321_v31  ;;  %v4195_v21 = vmul.f32 %v12305_v17, %v4058_v18  ;;  %8694 = vmatprep.mubr.msk.f32.mxu0 %vm9299_vm1, %v13357_v25  ;;  %4957 = vst.msk [vmem:[#allocation2 + $0x3c0] sm:$0xff] %vm330_vm0, %v4829_v47  ;;  %v4324_v24 = vadd.f32 %v4196_v14, %v3295_v50  ;;  %v6156_v47 = vld [vmem:[#allocation6 + $0x17] sm:$0xff] }
 0x498   : > { %8785 = vmatprep.mubr.msk.f32.mxu1 %vm9299_vm1, %v13357_v25  ;;  %v4576_v1 = vld [vmem:[#allocation2 + $0x3d8] sm:$0xff]  ;;  %v6513_v14 = vld [vmem:[#allocation6 + $0x18] sm:$0xff] }
 0x499   : > { %v4323_v55 = vadd.f32 %v4195_v21, %v3294_v30  ;;  %4452 = vst.msk [vmem:[#allocation2 + $0x3f8] sm:$0xff] %vm330_vm0, %v4324_v24 }
 0x49a   : > { %v4575_v52 = vld [vmem:[#allocation2 + $0x3d0] sm:$0xff] }
 0x49b   : > { %v4702_v35 = vld [vmem:[#allocation2 + $0x3c9] sm:$0xff]  ;;  %v4703_v51 = vld [vmem:[#allocation2 + $0x3d1] sm:$0xff]  ;;  %4451 = vst.msk [vmem:[#allocation2 + $0x3f0] sm:$0xff] %vm330_vm0, %v4323_v55 }
 0x49c   : > { %v4830_v5 = vmax.f32 %v4574_v39, %v4702_v35  ;;  %v4831_v41 = vmax.f32 %v4575_v52, %v4703_v51  ;;  %v5557_v17 = vld [vmem:[#allocation6 + $0xd9] sm:$0xff] }
 0x49d   : > { %v12437_v34 = vld [vmem:[#allocation6 + $0xd8] sm:$0xff]  ;;  %8695 = vmatmul.mubr.msk.f32.gmra.mxu0 %vm330_vm0, %v5557_v17  ;;  %v5527_v45 = vld [vmem:[#allocation6 + $0xe0] sm:$0x1] }
 0x49e   : > { %8786 = vmatmul.mubr.msk.f32.gmra.mxu1 %vm330_vm0, %v12437_v34  ;;  %4958 = vst.msk [vmem:[#allocation2 + $0x3c8] sm:$0xff] %vm330_vm0, %v4830_v5  ;;  %4959 = vst.msk [vmem:[#allocation2 + $0x3d0] sm:$0xff] %vm330_vm0, %v4831_v41  ;;  %8697 = vmatprep.mubr.msk.f32.mxu0 %vm9299_vm1, %v13357_v25  ;;  %v4577_v33 = vld [vmem:[#allocation2 + $0x3e0] sm:$0xff]  ;;  %v4578_v12 = vld [vmem:[#allocation2 + $0x3e8] sm:$0xff] }
 0x49f   : > { %8788 = vmatprep.mubr.msk.f32.mxu1 %vm9299_vm1, %v13357_v25  ;;  %v4704_v16 = vld [vmem:[#allocation2 + $0x3d9] sm:$0xff]  ;;  %v4705_v49 = vld [vmem:[#allocation2 + $0x3e1] sm:$0xff]  ;;  %v6157_v52 = vld [vmem:[#allocation6 + $0x1f] sm:$0xff] }
 0x4a0   : > { %v4832_v20 = vmax.f32 %v4576_v1, %v4704_v16  ;;  %v4833_v8 = vmax.f32 %v4577_v33, %v4705_v49  ;;  %v5086_v56 = vld [vmem:[#allocation2 + $0x3c0] sm:$0xff]  ;;  %v4580_v6 = vld [vmem:[#allocation2 + $0x3f8] sm:$0x7f]  ;;  %v6514_v35 = vld [vmem:[#allocation6 + $0x20] sm:$0xff] }
 0x4a1   : > { %8698 = vmatmul.mubr.msk.f32.gmra.mxu0 %vm330_vm0, %v5558_v40  ;;  %v5211_v63 = vmax.f32 %v12354_v3, %v5086_v56  ;;  %v4708_v59 = vld [vmem:[#allocation2 + $0x3f9] sm:$0x7f] }
 0x4a2   : > { %8789 = vmatmul.mubr.msk.f32.gmra.mxu1 %vm330_vm0, %v5527_v45  ;;  %4960 = vst.msk [vmem:[#allocation2 + $0x3d8] sm:$0xff] %vm330_vm0, %v4832_v20  ;;  %4961 = vst.msk [vmem:[#allocation2 + $0x3e0] sm:$0xff] %vm330_vm0, %v4833_v8  ;;  %8795 = vmatprep.mubr.msk.f32.mxu0 %vm9299_vm1, %v13357_v25  ;;  %v4579_v53 = vld [vmem:[#allocation2 + $0x3f0] sm:$0xff]  ;;  %v4836_v0 = vmax.f32 %v4580_v6, %v4708_v59  ;;  %v6517_v6 = vld [vmem:[#allocation6 + $0x38] sm:$0xff] }
 0x4a3   : > { %8886 = vmatprep.mubr.msk.f32.mxu1 %vm9299_vm1, %v13357_v25  ;;  %5335 = vst.msk [vmem:[#allocation2 + $0x3a0] sm:$0xff] %vm330_vm0, %v5211_v63  ;;  %v4706_v3 = vld [vmem:[#allocation2 + $0x3e9] sm:$0xff]  ;;  %v4707_v46 = vld [vmem:[#allocation2 + $0x3f1] sm:$0xff]  ;;  %v6159_v63 = vld [vmem:[#allocation6 + $0x2f] sm:$0xff] }
 0x4a4   : > { %v4834_v10 = vmax.f32 %v4578_v12, %v4706_v3  ;;  %v4835_v29 = vmax.f32 %v4579_v53, %v4707_v46  ;;  %4965 = vst.msk [vmem:[#allocation2 + $0x3f8] sm:$0x7f] %vm4964_vm2, %v4836_v0  ;;  %v6158_v45 = vld [vmem:[#allocation6 + $0x27] sm:$0xff]  ;;  %v6161_v59 = vld [vmem:[#allocation6 + $0x3f] sm:$0xff]  ;;  %v6163_v3 = vld [vmem:[#allocation6 + $0x4f] sm:$0xff] }
 0x4a5   : > { %v5087_v61 = vld [vmem:[#allocation2 + $0x3c8] sm:$0xff]  ;;  %v5088_v31 = vld [vmem:[#allocation2 + $0x3d0] sm:$0xff]  ;;  %8796 = vmatmul.mubr.msk.f32.vlgmr.msra.gmra.mxu0 %vm330_vm0, %v6155_v42  ;;  %v6516_v42 = vld [vmem:[#allocation6 + $0x30] sm:$0xff] }
 0x4a6   : > { %8887 = vmatmul.mubr.msk.f32.vlgmr.msra.gmra.mxu1 %vm330_vm0, %v6512_v44  ;;  %v5212_v30 = vmax.f32 %v12342_v7, %v5087_v61  ;;  %v5213_v62 = vmax.f32 %v12356_v58, %v5088_v31  ;;  %v5794_v50 = vpop.f32.mrf.mxu0  ;;  %8798 = vmatprep.mubr.msk.f32.mxu0 %vm9299_vm1, %v13357_v25  ;;  %4962 = vst.msk [vmem:[#allocation2 + $0x3e8] sm:$0xff] %vm330_vm0, %v4834_v10  ;;  %4963 = vst.msk [vmem:[#allocation2 + $0x3f0] sm:$0xff] %vm330_vm0, %v4835_v29  ;;  %v6160_v44 = vld [vmem:[#allocation6 + $0x37] sm:$0xff]  ;;  %v6518_v53 = vld [vmem:[#allocation6 + $0x40] sm:$0xff] }
 0x4a7   : > { %v6091_v4 = vpop.f32.mrf.mxu1  ;;  %8889 = vmatprep.mubr.msk.f32.mxu1 %vm9299_vm1, %v13357_v25  ;;  %v6162_v0 = vld [vmem:[#allocation6 + $0x47] sm:$0xff]  ;;  %v6520_v46 = vld [vmem:[#allocation6 + $0x50] sm:$0xff] }
 0x4a8   : > { %v12469_v18 = vadd.f32 %v6091_v4, %v5794_v50  ;;  %5336 = vst.msk [vmem:[#allocation2 + $0x3a8] sm:$0xff] %vm330_vm0, %v5212_v30  ;;  %5337 = vst.msk [vmem:[#allocation2 + $0x3b0] sm:$0xff] %vm330_vm0, %v5213_v62  ;;  %v8663_v7 = vpop.f32.mrf.mxu0  ;;  %v6519_v12 = vld [vmem:[#allocation6 + $0x48] sm:$0xff]  ;;  %v6164_v62 = vld [vmem:[#allocation6 + $0x57] sm:$0xff] }
 0x4a9   : > { %v8754_v58 = vpop.f32.mrf.mxu1  ;;  %v5090_v21 = vld [vmem:[#allocation2 + $0x3d8] sm:$0xff]  ;;  %v5091_v39 = vld [vmem:[#allocation2 + $0x3e0] sm:$0xff]  ;;  %8799 = vmatmul.mubr.msk.f32.gmra.mxu0 %vm330_vm0, %v6156_v47  ;;  %v6521_v50 = vld [vmem:[#allocation6 + $0x58] sm:$0xff] }
 0x4aa   : > { %8890 = vmatmul.mubr.msk.f32.gmra.mxu1 %vm330_vm0, %v6513_v14  ;;  %v5214_v24 = vmax.f32 %v12366_v28, %v5090_v21  ;;  %v5215_v55 = vmax.f32 %v5086_v56, %v5091_v39  ;;  %8801 = vmatprep.mubr.msk.f32.mxu0 %vm9299_vm1, %v13357_v25  ;;  %v5089_v51 = vld [vmem:[#allocation2 + $0x3d8] sm:$0x7f]  ;;  %v6165_v4 = vld [vmem:[#allocation6 + $0x5f] sm:$0xff] }
 0x4ab   : > { %8892 = vmatprep.mubr.msk.f32.mxu1 %vm9299_vm1, %v13357_v25  ;;  %v5094_v5 = vld [vmem:[#allocation2 + $0x3f8] sm:$0x7f]  ;;  %v5799_v41 = vpop.f32.mrf.mxu0  ;;  %v6522_v7 = vld [vmem:[#allocation6 + $0x60] sm:$0xff] }
 0x4ac   : > { %5338 = vst.msk [vmem:[#allocation2 + $0x3b8] sm:$0xff] %vm330_vm0, %v5214_v24  ;;  %5339 = vst.msk [vmem:[#allocation2 + $0x3c0] sm:$0xff] %vm330_vm0, %v5215_v55  ;;  %v6096_v17 = vpop.f32.mrf.mxu1  ;;  %v5218_v40 = vmax.f32 %v5089_v51, %v5094_v5  ;;  %v6515_v56 = vld [vmem:[#allocation6 + $0x28] sm:$0xff]  ;;  %v6168_v51 = vld [vmem:[#allocation6 + $0x77] sm:$0xff] }
 0x4ad   : > { %8802 = vmatmul.mubr.msk.f32.gmra.mxu0 %vm330_vm0, %v6157_v52  ;;  %v5092_v28 = vld [vmem:[#allocation2 + $0x3e8] sm:$0xff]  ;;  %v5093_v1 = vld [vmem:[#allocation2 + $0x3f0] sm:$0xff]  ;;  %v12484_v33 = vadd.f32 %v6096_v17, %v5799_v41  ;;  %v8666_v20 = vpop.f32.mrf.mxu0  ;;  %v6523_v55 = vld [vmem:[#allocation6 + $0x68] sm:$0xff] }
 0x4ae   : > { %8893 = vmatmul.mubr.msk.f32.gmra.mxu1 %vm330_vm0, %v6514_v35  ;;  %8804 = vmatprep.mubr.msk.f32.mxu0 %vm9299_vm1, %v13357_v25  ;;  %v5216_v16 = vmax.f32 %v5087_v61, %v5092_v28  ;;  %v5217_v49 = vmax.f32 %v5088_v31, %v5093_v1  ;;  %v8757_v8 = vpop.f32.mrf.mxu1  ;;  %5342 = vst.msk [vmem:[#allocation2 + $0x3d8] sm:$0x7f] %vm4964_vm2, %v5218_v40  ;;  %v6166_v24 = vld [vmem:[#allocation6 + $0x67] sm:$0xff]  ;;  %v6167_v52 = vld [vmem:[#allocation6 + $0x6f] sm:$0xff]  ;;  %v6525_v5 = vld [vmem:[#allocation6 + $0x78] sm:$0xff] }
 0x4af   : > { %8895 = vmatprep.mubr.msk.f32.mxu1 %vm9299_vm1, %v13357_v25  ;;  %v6524_v35 = vld [vmem:[#allocation6 + $0x70] sm:$0xff]  ;;  %v6169_v41 = vld [vmem:[#allocation6 + $0x7f] sm:$0xff]  ;;  %v6170_v28 = vld [vmem:[#allocation6 + $0x87] sm:$0xff] }
 0x4b0   : > { %5340 = vst.msk [vmem:[#allocation2 + $0x3c8] sm:$0xff] %vm330_vm0, %v5216_v16  ;;  %5341 = vst.msk [vmem:[#allocation2 + $0x3d0] sm:$0xff] %vm330_vm0, %v5217_v49  ;;  %v6526_v17 = vld [vmem:[#allocation6 + $0x80] sm:$0xff]  ;;  %v6527_v1 = vld [vmem:[#allocation6 + $0x88] sm:$0xff] }
 0x4b1   : > { %8805 = vmatmul.mubr.msk.f32.gmra.mxu0 %vm330_vm0, %v6158_v45  ;;  %v6171_v40 = vld [vmem:[#allocation6 + $0x8f] sm:$0xff] }
 0x4b2   : > { %8896 = vmatmul.mubr.msk.f32.gmra.mxu1 %vm330_vm0, %v6515_v56  ;;  %8807 = vmatprep.mubr.msk.f32.mxu0 %vm9299_vm1, %v13357_v25  ;;  %v6528_v16 = vld [vmem:[#allocation6 + $0x90] sm:$0xff] }
 0x4b3   : > { %8898 = vmatprep.mubr.msk.f32.mxu1 %vm9299_vm1, %v13357_v25 }
 0x4b5   : > { %8808 = vmatmul.mubr.msk.f32.gmra.mxu0 %vm330_vm0, %v6159_v63  ;;  %v6172_v63 = vld [vmem:[#allocation6 + $0x97] sm:$0xff] }
 0x4b6   : > { %8899 = vmatmul.mubr.msk.f32.gmra.mxu1 %vm330_vm0, %v6516_v42  ;;  %8810 = vmatprep.mubr.msk.f32.mxu0 %vm9299_vm1, %v13357_v25  ;;  %v6529_v42 = vld [vmem:[#allocation6 + $0x98] sm:$0xff] }
 0x4b7   : > { %8901 = vmatprep.mubr.msk.f32.mxu1 %vm9299_vm1, %v13357_v25 }
 0x4b9   : > { %8811 = vmatmul.mubr.msk.f32.gmra.mxu0 %vm330_vm0, %v6160_v44  ;;  %v6173_v44 = vld [vmem:[#allocation6 + $0x9f] sm:$0xff] }
 0x4ba   : > { %8902 = vmatmul.mubr.msk.f32.gmra.mxu1 %vm330_vm0, %v6517_v6  ;;  %8813 = vmatprep.mubr.msk.f32.mxu0 %vm9299_vm1, %v13357_v25  ;;  %v6530_v6 = vld [vmem:[#allocation6 + $0xa0] sm:$0xff] }
 0x4bb   : > { %8904 = vmatprep.mubr.msk.f32.mxu1 %vm9299_vm1, %v13357_v25 }
 0x4bd   : > { %8814 = vmatmul.mubr.msk.f32.gmra.mxu0 %vm330_vm0, %v6161_v59 }
 0x4be   : > { %8905 = vmatmul.mubr.msk.f32.gmra.mxu1 %vm330_vm0, %v6518_v53  ;;  %8816 = vmatprep.mubr.msk.f32.mxu0 %vm9299_vm1, %v13357_v25 }
 0x4bf   : > { %8907 = vmatprep.mubr.msk.f32.mxu1 %vm9299_vm1, %v13357_v25 }
 0x4c1   : > { %8817 = vmatmul.mubr.msk.f32.gmra.mxu0 %vm330_vm0, %v6162_v0 }
 0x4c2   : > { %8908 = vmatmul.mubr.msk.f32.gmra.mxu1 %vm330_vm0, %v6519_v12  ;;  %8819 = vmatprep.mubr.msk.f32.mxu0 %vm9299_vm1, %v13357_v25 }
 0x4c3   : > { %8910 = vmatprep.mubr.msk.f32.mxu1 %vm9299_vm1, %v13357_v25 }
 0x4c4   : > { %v5804_v61 = vpop.f32.mrf.mxu0 }
 0x4c5   : > { %8820 = vmatmul.mubr.msk.f32.gmra.mxu0 %vm330_vm0, %v6163_v3  ;;  %v6101_v31 = vpop.f32.mrf.mxu1 }
 0x4c6   : > { %8911 = vmatmul.mubr.msk.f32.gmra.mxu1 %vm330_vm0, %v6520_v46  ;;  %8822 = vmatprep.mubr.msk.f32.mxu0 %vm9299_vm1, %v13357_v25  ;;  %v12529_v10 = vadd.f32 %v6101_v31, %v5804_v61  ;;  %v8669_v29 = vpop.f32.mrf.mxu0  ;;  %v6174_v46 = vld [vmem:[#allocation6 + $0xa7] sm:$0xff]  ;;  %v6175_v31 = vld [vmem:[#allocation6 + $0xaf] sm:$0xff] }
 0x4c7   : > { %8913 = vmatprep.mubr.msk.f32.mxu1 %vm9299_vm1, %v13357_v25  ;;  %v8760_v30 = vpop.f32.mrf.mxu1  ;;  %v6531_v61 = vld [vmem:[#allocation6 + $0xa8] sm:$0xff]  ;;  %v6532_v29 = vld [vmem:[#allocation6 + $0xb0] sm:$0xff] }
 0x4c8   : > { %v6176_v30 = vld [vmem:[#allocation6 + $0xb7] sm:$0xff] }
 0x4c9   : > { %8823 = vmatmul.mubr.msk.f32.gmra.mxu0 %vm330_vm0, %v6164_v62  ;;  %v9234_v62 = vld [vmem:[#allocation6 + $0xb8] sm:$0xff] }
 0x4ca   : > { %8914 = vmatmul.mubr.msk.f32.gmra.mxu1 %vm330_vm0, %v6521_v50  ;;  %8825 = vmatprep.mubr.msk.f32.mxu0 %vm9299_vm1, %v13357_v25  ;;  %v6177_v50 = vld [vmem:[#allocation6 + $0xbf] sm:$0xff] }
 0x4cb   : > { %8916 = vmatprep.mubr.msk.f32.mxu1 %vm9299_vm1, %v13357_v25  ;;  %v5809_v58 = vpop.f32.mrf.mxu0 }
 0x4cc   : > { %v6106_v47 = vpop.f32.mrf.mxu1 }
 0x4cd   : > { %8826 = vmatmul.mubr.msk.f32.gmra.mxu0 %vm330_vm0, %v6165_v4  ;;  %v12539_v14 = vadd.f32 %v6106_v47, %v5809_v58  ;;  %v8672_v21 = vpop.f32.mrf.mxu0  ;;  %v6178_v4 = vld [vmem:[#allocation6 + $0xc7] sm:$0xff]  ;;  %v6180_v47 = vld [vmem:[#allocation6 + $0xd7] sm:$0xff] }
 0x4ce   : > { %8917 = vmatmul.mubr.msk.f32.gmra.mxu1 %vm330_vm0, %v6522_v7  ;;  %8828 = vmatprep.mubr.msk.f32.mxu0 %vm9299_vm1, %v13357_v25  ;;  %v8763_v39 = vpop.f32.mrf.mxu1  ;;  %v6179_v7 = vld [vmem:[#allocation6 + $0xcf] sm:$0xff] }
 0x4cf   : > { %8919 = vmatprep.mubr.msk.f32.mxu1 %vm9299_vm1, %v13357_v25 }
 0x4d1   : > { %8829 = vmatmul.mubr.msk.f32.gmra.mxu0 %vm330_vm0, %v6166_v24  ;;  %v6538_v24 = vld [vmem:[#allocation6 + $0xe0] sm:$0xff] }
 0x4d2   : > { %8920 = vmatmul.mubr.msk.f32.gmra.mxu1 %vm330_vm0, %v6523_v55  ;;  %8831 = vmatprep.mubr.msk.f32.mxu0 %vm9299_vm1, %v13357_v25 }
 0x4d3   : > { %8922 = vmatprep.mubr.msk.f32.mxu1 %vm9299_vm1, %v13357_v25 }
 0x4d5   : > { %8832 = vmatmul.mubr.msk.f32.gmra.mxu0 %vm330_vm0, %v6167_v52 }
 0x4d6   : > { %8923 = vmatmul.mubr.msk.f32.gmra.mxu1 %vm330_vm0, %v6524_v35  ;;  %8834 = vmatprep.mubr.msk.f32.mxu0 %vm9299_vm1, %v13357_v25  ;;  %v6182_v35 = vld [vmem:[#allocation6 + $0xe7] sm:$0xff] }
 0x4d7   : > { %8925 = vmatprep.mubr.msk.f32.mxu1 %vm9299_vm1, %v13357_v25 }
 0x4d9   : > { %8835 = vmatmul.mubr.msk.f32.gmra.mxu0 %vm330_vm0, %v6168_v51 }
 0x4da   : > { %8926 = vmatmul.mubr.msk.f32.gmra.mxu1 %vm330_vm0, %v6525_v5  ;;  %8837 = vmatprep.mubr.msk.f32.mxu0 %vm9299_vm1, %v13357_v25  ;;  %v7182_v5 = vld [vmem:[%s13144_s3 + $0x38] sm:$0xff] }
 0x4db   : > { %8928 = vmatprep.mubr.msk.f32.mxu1 %vm9299_vm1, %v13357_v25  ;;  %8974 = vmatpush3.msra.mxu0 %v7182_v5 }
 0x4dc   : > { %8975 = vmatprep.subr.mxu0 %v13357_v25 }
 0x4dd   : > { %8838 = vmatmul.mubr.msk.f32.gmra.mxu0 %vm330_vm0, %v6169_v41  ;;  %v7171_v41 = vld [vmem:[%s13144_s3 + $0x18] sm:$0xff] }
 0x4de   : > { %8929 = vmatmul.mubr.msk.f32.gmra.mxu1 %vm330_vm0, %v6526_v17  ;;  %8840 = vmatprep.mubr.msk.f32.mxu0 %vm9299_vm1, %v13357_v25 }
 0x4df   : > { %8931 = vmatprep.mubr.msk.f32.mxu1 %vm9299_vm1, %v13357_v25  ;;  %9003 = vmatpush3.msra.mxu1 %v7171_v41 }
 0x4e0   : > { %9004 = vmatprep.subr.mxu1 %v13357_v25 }
 0x4e1   : > { %8841 = vmatmul.mubr.msk.f32.gmra.mxu0 %vm330_vm0, %v6170_v28 }
 0x4e2   : > { %8932 = vmatmul.mubr.msk.f32.gmra.mxu1 %vm330_vm0, %v6527_v1  ;;  %8843 = vmatprep.mubr.msk.f32.mxu0 %vm9299_vm1, %v13357_v25  ;;  %v6183_v1 = vld [vmem:[#allocation6 + $0xef] sm:$0x1] }
 0x4e3   : > { %8934 = vmatprep.mubr.msk.f32.mxu1 %vm9299_vm1, %v13357_v25 }
 0x4e4   : > { %v5814_v49 = vpop.f32.mrf.mxu0 }
 0x4e5   : > { %8844 = vmatmul.mubr.msk.f32.gmra.mxu0 %vm330_vm0, %v6171_v40  ;;  %v6111_v20 = vpop.f32.mrf.mxu1  ;;  %v6540_v40 = vld [vmem:[#allocation6 + $0xf0] sm:$0x1] }
 0x4e6   : > { %8935 = vmatmul.mubr.msk.f32.gmra.mxu1 %vm330_vm0, %v6528_v16  ;;  %8846 = vmatprep.mubr.msk.f32.mxu0 %vm9299_vm1, %v13357_v25  ;;  %v12581_v8 = vadd.f32 %v6111_v20, %v5814_v49  ;;  %v8675_v45 = vpop.f32.mrf.mxu0 }
 0x4e7   : > { %8937 = vmatprep.mubr.msk.f32.mxu1 %vm9299_vm1, %v13357_v25  ;;  %v8766_v56 = vpop.f32.mrf.mxu1 }
 0x4e9   : > { %8847 = vmatmul.mubr.msk.f32.gmra.mxu0 %vm330_vm0, %v6172_v63  ;;  %v7181_v63 = vld [vmem:[%s13144_s3 + $0x30] sm:$0xff] }
 0x4ea   : > { %8938 = vmatmul.mubr.msk.f32.gmra.mxu1 %vm330_vm0, %v6529_v42  ;;  %8849 = vmatprep.mubr.msk.f32.mxu0 %vm9299_vm1, %v13357_v25  ;;  %v7170_v42 = vld [vmem:[%s13144_s3 + $0x10] sm:$0xff] }
 0x4eb   : > { %8940 = vmatprep.mubr.msk.f32.mxu1 %vm9299_vm1, %v13357_v25  ;;  %v5819_v59 = vpop.f32.mrf.mxu0  ;;  %8976 = vmatpush3.msra.mxu0 %v7181_v63 }
 0x4ec   : > { %v6116_v53 = vpop.f32.mrf.mxu1  ;;  %8977 = vmatprep.subr.mxu0 %v13357_v25  ;;  %9005 = vmatpush3.msra.mxu1 %v7170_v42 }
 0x4ed   : > { %8850 = vmatmul.mubr.msk.f32.gmra.mxu0 %vm330_vm0, %v6173_v44  ;;  %v12593_v0 = vadd.f32 %v6116_v53, %v5819_v59  ;;  %v8678_v12 = vpop.f32.mrf.mxu0  ;;  %9006 = vmatprep.subr.mxu1 %v13357_v25  ;;  %v7180_v44 = vld [vmem:[%s13144_s3 + $0x28] sm:$0xff]  ;;  %v7179_v59 = vld [vmem:[%s13144_s3 + $0x20] sm:$0xff] }
 0x4ee   : > { %8941 = vmatmul.mubr.msk.f32.gmra.mxu1 %vm330_vm0, %v6530_v6  ;;  %8852 = vmatprep.mubr.msk.f32.mxu0 %vm9299_vm1, %v13357_v25  ;;  %v8769_v3 = vpop.f32.mrf.mxu1  ;;  %v7169_v6 = vld [vmem:[%s13144_s3 + $0x8] sm:$0xff]  ;;  %v7168_v53 = vld [vmem:[%s13144_s3] sm:$0xff] }
 0x4ef   : > { %8943 = vmatprep.mubr.msk.f32.mxu1 %vm9299_vm1, %v13357_v25  ;;  %8978 = vmatpush3.msra.mxu0 %v7180_v44 }
 0x4f0   : > { %9007 = vmatpush3.msra.mxu1 %v7169_v6  ;;  %8979 = vmatprep.subr.mxu0 %v13357_v25 }
 0x4f1   : > { %8853 = vmatmul.mubr.msk.f32.gmra.mxu0 %vm330_vm0, %v6174_v46  ;;  %9008 = vmatprep.subr.mxu1 %v13357_v25 }
 0x4f2   : > { %8944 = vmatmul.mubr.msk.f32.gmra.mxu1 %vm330_vm0, %v6531_v61  ;;  %8855 = vmatprep.mubr.msk.f32.mxu0 %vm9299_vm1, %v13357_v25 }
 0x4f3   : > { %8946 = vmatprep.mubr.msk.f32.mxu1 %vm9299_vm1, %v13357_v25  ;;  %8980 = vmatpush3.msra.mxu0 %v7179_v59 }
 0x4f4   : > { %9009 = vmatpush3.msra.mxu1 %v7168_v53  ;;  %9031 = vmatprep.subr.mxu0 %v13357_v25 }
 0x4f5   : > { %8856 = vmatmul.mubr.msk.f32.gmra.mxu0 %vm330_vm0, %v6175_v31  ;;  %9060 = vmatprep.subr.mxu1 %v13357_v25 }
 0x4f6   : > { %8947 = vmatmul.mubr.msk.f32.gmra.mxu1 %vm330_vm0, %v6532_v29  ;;  %8858 = vmatprep.mubr.msk.f32.mxu0 %vm9299_vm1, %v13357_v25 }
 0x4f7   : > { %8949 = vmatprep.mubr.msk.f32.mxu1 %vm9299_vm1, %v13357_v25 }
 0x4f9   : > { %8859 = vmatmul.mubr.msk.f32.gmra.mxu0 %vm330_vm0, %v6176_v30 }
 0x4fa   : > { %8950 = vmatmul.mubr.msk.f32.gmra.mxu1 %vm330_vm0, %v9234_v62  ;;  %8861 = vmatprep.mubr.msk.f32.mxu0 %vm9299_vm1, %v13357_v25 }
 0x4fb   : > { %8952 = vmatprep.mubr.msk.f32.mxu1 %vm9299_vm1, %v13357_v25 }
 0x4fd   : > { %8862 = vmatmul.mubr.msk.f32.gmra.mxu0 %vm330_vm0, %v6177_v50 }
 0x4fe   : > { %8953 = vmatmul.mubr.msk.f32.gmra.mxu1 %vm330_vm0, %v12267_v38  ;;  %8864 = vmatprep.mubr.msk.f32.mxu0 %vm9299_vm1, %v13357_v25 }
 0x4ff   : > { %8955 = vmatprep.mubr.msk.f32.mxu1 %vm9299_vm1, %v13357_v25 }
 0x501   : > { %8865 = vmatmul.mubr.msk.f32.gmra.mxu0 %vm330_vm0, %v6178_v4 }
 0x502   : > { %8956 = vmatmul.mubr.msk.f32.gmra.mxu1 %vm330_vm0, %v12325_v15  ;;  %8867 = vmatprep.mubr.msk.f32.mxu0 %vm9299_vm1, %v13357_v25 }
 0x503   : > { %8958 = vmatprep.mubr.msk.f32.mxu1 %vm9299_vm1, %v13357_v25 }
 0x504   : > { %v6121_v15 = vpop.f32.mrf.mxu1 }
 0x505   : > { %8868 = vmatmul.mubr.msk.f32.gmra.mxu0 %vm330_vm0, %v6179_v7  ;;  %v5824_v38 = vpop.f32.mrf.mxu0 }
 0x506   : > { %8959 = vmatmul.mubr.msk.f32.gmra.mxu1 %vm330_vm0, %v12421_v22  ;;  %8870 = vmatprep.mubr.msk.f32.mxu0 %vm9299_vm1, %v13357_v25  ;;  %v12638_v58 = vadd.f32 %v6121_v15, %v5824_v38  ;;  %v8772_v39 = vpop.f32.mrf.mxu1  ;;  %v6181_v22 = vld [vmem:[#allocation6 + $0xdf] sm:$0xff] }
 0x507   : > { %8961 = vmatprep.mubr.msk.f32.mxu1 %vm9299_vm1, %v13357_v25  ;;  %v8681_v21 = vpop.f32.mrf.mxu0 }
 0x509   : > { %8871 = vmatmul.mubr.msk.f32.gmra.mxu0 %vm330_vm0, %v6180_v47 }
 0x50a   : > { %8962 = vmatmul.mubr.msk.f32.gmra.mxu1 %vm330_vm0, %v12437_v34  ;;  %8873 = vmatprep.mubr.msk.f32.mxu0 %vm9299_vm1, %v13357_v25  ;;  %v5829_v55 = vpop.f32.mrf.mxu0  ;;  %v6539_v34 = vld [vmem:[#allocation6 + $0xe8] sm:$0xff] }
 0x50b   : > { %8964 = vmatprep.mubr.msk.f32.mxu1 %vm9299_vm1, %v13357_v25  ;;  %v6126_v52 = vpop.f32.mrf.mxu1 }
 0x50c   : > { %v12649_v51 = vadd.f32 %v6126_v52, %v5829_v55  ;;  %v8684_v17 = vpop.f32.mrf.mxu0 }
 0x50d   : > { %8874 = vmatmul.mubr.msk.f32.gmra.mxu0 %vm330_vm0, %v6181_v22  ;;  %v8775_v28 = vpop.f32.mrf.mxu1 }
 0x50e   : > { %8965 = vmatmul.mubr.msk.f32.gmra.mxu1 %vm330_vm0, %v6538_v24  ;;  %8876 = vmatprep.mubr.msk.f32.mxu0 %vm9299_vm1, %v13357_v25 }
 0x50f   : > { %8967 = vmatprep.mubr.msk.f32.mxu1 %vm9299_vm1, %v13357_v25 }
 0x511   : > { %8877 = vmatmul.mubr.msk.f32.gmra.mxu0 %vm330_vm0, %v6182_v35 }
 0x512   : > { %8968 = vmatmul.mubr.msk.f32.gmra.mxu1 %vm330_vm0, %v6539_v34  ;;  %8879 = vmatprep.mubr.msk.f32.mxu0 %vm9299_vm1, %v13357_v25 }
 0x513   : > { %8970 = vmatprep.mubr.msk.f32.mxu1 %vm9299_vm1, %v13357_v25 }
 0x515   : > { %8880 = vmatmul.mubr.msk.f32.gmra.mxu0 %vm330_vm0, %v6183_v1 }
 0x516   : > { %8971 = vmatmul.mubr.msk.f32.gmra.mxu1 %vm330_vm0, %v6540_v40  ;;  %8981 = vmatprep.mubr.msk.f32.mxu0 %vm9299_vm1, %v13357_v25 }
 0x517   : > { %9010 = vmatprep.mubr.msk.f32.mxu1 %vm9299_vm1, %v13357_v25 }
 0x525   : > { %v5834_v16 = vpop.f32.mrf.mxu0 }
 0x526   : > { %v6131_v49 = vpop.f32.mrf.mxu1 }
 0x527   : > { %v12675_v20 = vadd.f32 %v6131_v49, %v5834_v16  ;;  %v8687_v45 = vpop.f32.mrf.mxu0 }
 0x528   : > { %v8778_v56 = vpop.f32.mrf.mxu1 }
 0x534   : > { %v5839_v12 = vpop.f32.mrf.mxu0 }
 0x535   : > { %v6136_v3 = vpop.f32.mrf.mxu1 }
 0x536   : > { %v12701_v46 = vadd.f32 %v6136_v3, %v5839_v12  ;;  %v8690_v61 = vpop.f32.mrf.mxu0 }
 0x537   : > { %v8781_v31 = vpop.f32.mrf.mxu1 }
 0x556   : > { %v5844_v29 = vpop.f32.mrf.mxu0 }
 0x557   : > { %v6141_v30 = vpop.f32.mrf.mxu1 }
 0x558   : > { %v12703_v62 = vadd.f32 %v6141_v30, %v5844_v29  ;;  %v8693_v50 = vpop.f32.mrf.mxu0 }
 0x559   : > { %v8784_v4 = vpop.f32.mrf.mxu1 }
 0x55d   : > { %v5849_v7 = vpop.f32.mrf.mxu0 }
 0x55e   : > { %v6146_v38 = vpop.f32.mrf.mxu1 }
 0x55f   : > { %v12705_v15 = vadd.f32 %v6146_v38, %v5849_v7  ;;  %v8696_v47 = vpop.f32.mrf.mxu0 }
 0x560   : > { %v8787_v21 = vpop.f32.mrf.mxu1 }
 0x561   : > { %v5854_v39 = vpop.f32.mrf.mxu0 }
 0x562   : > { %v6151_v22 = vpop.f32.mrf.mxu1 }
 0x563   : > { %v12707_v24 = vadd.f32 %v6151_v22, %v5854_v39  ;;  %v8699_v55 = vpop.f32.mrf.mxu0 }
 0x564   : > { %v8790_v52 = vpop.f32.mrf.mxu1 }
 0x565   : > { %v6339_v35 = vpop.f32.mrf.mxu0 }
 0x566   : > { %v6696_v34 = vpop.f32.mrf.mxu1  ;;  %v6483_v5 = vadd.f32 %v6339_v35, %v11316_v37 }
 0x567   : > { %v8797_v41 = vpop.f32.mrf.mxu0 }
 0x568   : > { %v8888_v17 = vpop.f32.mrf.mxu1  ;;  %v6840_v28 = vadd.f32 %v6696_v34, %v6483_v5 }
 0x569   : > { %v6344_v1 = vpop.f32.mrf.mxu0 }
 0x56a   : > { %v6701_v40 = vpop.f32.mrf.mxu1  ;;  %6869 = vst.msk [vmem:[#allocation3] sm:$0xff] %vm333_vm3, %v6840_v28  ;;  %v6484_v16 = vadd.f32 %v6344_v1, %v11436_v2 }
 0x56b   : > { %v8800_v49 = vpop.f32.mrf.mxu0 }
 0x56c   : > { %v8891_v45 = vpop.f32.mrf.mxu1  ;;  %v6841_v56 = vadd.f32 %v6701_v40, %v6484_v16 }
 0x56d   : > { %v6349_v63 = vpop.f32.mrf.mxu0 }
 0x56e   : > { %v6706_v42 = vpop.f32.mrf.mxu1  ;;  %6870 = vst.msk [vmem:[#allocation3 + $0x8] sm:$0xff] %vm333_vm3, %v6841_v56  ;;  %v6485_v44 = vadd.f32 %v6349_v63, %v11480_v36 }
 0x56f   : > { %v8803_v6 = vpop.f32.mrf.mxu0 }
 0x570   : > { %v8894_v37 = vpop.f32.mrf.mxu1  ;;  %v6842_v59 = vadd.f32 %v6706_v42, %v6485_v44 }
 0x571   : > { %v6354_v53 = vpop.f32.mrf.mxu0  ;;  %v6899_v29 = vld [vmem:[#allocation3] sm:$0xff] }
 0x572   : > { %v6711_v12 = vpop.f32.mrf.mxu1  ;;  %6871 = vst.msk [vmem:[#allocation3 + $0x10] sm:$0xff] %vm333_vm3, %v6842_v59  ;;  %v6486_v3 = vadd.f32 %v6354_v53, %v11596_v60 }
 0x573   : > { %v8806_v61 = vpop.f32.mrf.mxu0 }
 0x574   : > { %v8897_v2 = vpop.f32.mrf.mxu1  ;;  %v6843_v31 = vadd.f32 %v6711_v12, %v6486_v3 }
 0x575   : > { %v6927_v30 = vld [vmem:[#allocation3 + $0x1] sm:$0xff]  ;;  %v6359_v50 = vpop.f32.mrf.mxu0 }
 0x576   : > { %v6716_v4 = vpop.f32.mrf.mxu1  ;;  %v6955_v7 = vmax.f32 %v6899_v29, %v6927_v30  ;;  %6872 = vst.msk [vmem:[#allocation3 + $0x18] sm:$0xff] %vm333_vm3, %v6843_v31  ;;  %v6487_v36 = vadd.f32 %v6359_v50, %v11640_v57  ;;  %v6900_v39 = vld [vmem:[#allocation3 + $0x8] sm:$0xff] }
 0x577   : > { %v8809_v38 = vpop.f32.mrf.mxu0 }
 0x578   : > { %v8900_v47 = vpop.f32.mrf.mxu1  ;;  %6983 = vst.msk [vmem:[#allocation3] sm:$0xff] %vm333_vm3, %v6955_v7  ;;  %v6844_v21 = vadd.f32 %v6716_v4, %v6487_v36 }
 0x579   : > { %v6928_v22 = vld [vmem:[#allocation3 + $0x9] sm:$0xff]  ;;  %v6364_v60 = vpop.f32.mrf.mxu0 }
 0x57a   : > { %v6721_v55 = vpop.f32.mrf.mxu1  ;;  %v6956_v52 = vmax.f32 %v6900_v39, %v6928_v22  ;;  %6873 = vst.msk [vmem:[#allocation3 + $0x20] sm:$0xff] %vm333_vm3, %v6844_v21  ;;  %v6488_v35 = vadd.f32 %v6364_v60, %v11738_v48  ;;  %v6901_v57 = vld [vmem:[#allocation3 + $0x10] sm:$0xff] }
 0x57b   : > { %v8812_v34 = vpop.f32.mrf.mxu0 }
 0x57c   : > { %v8903_v5 = vpop.f32.mrf.mxu1  ;;  %6984 = vst.msk [vmem:[#allocation3 + $0x8] sm:$0xff] %vm333_vm3, %v6956_v52  ;;  %v6845_v41 = vadd.f32 %v6721_v55, %v6488_v35 }
 0x57d   : > { %v6929_v17 = vld [vmem:[#allocation3 + $0x11] sm:$0xff]  ;;  %v6369_v28 = vpop.f32.mrf.mxu0 }
 0x57e   : > { %v6726_v1 = vpop.f32.mrf.mxu1  ;;  %v6957_v40 = vmax.f32 %v6901_v57, %v6929_v17  ;;  %6874 = vst.msk [vmem:[#allocation3 + $0x28] sm:$0xff] %vm333_vm3, %v6845_v41  ;;  %v6489_v16 = vadd.f32 %v6369_v28, %v11786_v11  ;;  %v6902_v48 = vld [vmem:[#allocation3 + $0x18] sm:$0xff] }
 0x57f   : > { %v8815_v49 = vpop.f32.mrf.mxu0  ;;  %v7011_v30 = vld [vmem:[#allocation3] sm:$0xff] }
 0x580   : > { %v8906_v45 = vpop.f32.mrf.mxu1  ;;  %6985 = vst.msk [vmem:[#allocation3 + $0x10] sm:$0xff] %vm333_vm3, %v6957_v40  ;;  %v6846_v56 = vadd.f32 %v6726_v1, %v6489_v16 }
 0x581   : > { %v6930_v63 = vld [vmem:[#allocation3 + $0x19] sm:$0xff]  ;;  %v6374_v42 = vpop.f32.mrf.mxu0 }
 0x582   : > { %v6731_v44 = vpop.f32.mrf.mxu1  ;;  %v6958_v6 = vmax.f32 %v6902_v48, %v6930_v63  ;;  %6875 = vst.msk [vmem:[#allocation3 + $0x30] sm:$0xff] %vm333_vm3, %v6846_v56  ;;  %v6490_v37 = vadd.f32 %v6374_v42, %v11915_v26  ;;  %v6903_v11 = vld [vmem:[#allocation3 + $0x20] sm:$0xff] }
 0x583   : > { %v8818_v59 = vpop.f32.mrf.mxu0 }
 0x584   : > { %v8909_v53 = vpop.f32.mrf.mxu1  ;;  %6986 = vst.msk [vmem:[#allocation3 + $0x18] sm:$0xff] %vm333_vm3, %v6958_v6  ;;  %v6847_v12 = vadd.f32 %v6731_v44, %v6490_v37 }
 0x585   : > { %v6931_v3 = vld [vmem:[#allocation3 + $0x21] sm:$0xff]  ;;  %v6379_v61 = vpop.f32.mrf.mxu0 }
 0x586   : > { %v6736_v2 = vpop.f32.mrf.mxu1  ;;  %v6959_v31 = vmax.f32 %v6903_v11, %v6931_v3  ;;  %6876 = vst.msk [vmem:[#allocation3 + $0x38] sm:$0xff] %vm333_vm3, %v6847_v12  ;;  %v6491_v29 = vadd.f32 %v6379_v61, %v11963_v19  ;;  %v6904_v38 = vld [vmem:[#allocation3 + $0x28] sm:$0xff]  ;;  %v12745_v3 = vld [vmem:[%s13147_s6] ss:$0 sm:$0xff] }
 0x587   : > { %v7038_v50 = vld [vmem:[#allocation3 + $0xf] sm:$0xff]  ;;  %v8821_v4 = vpop.f32.mrf.mxu0 }
 0x588   : > { %v8912_v7 = vpop.f32.mrf.mxu1  ;;  %v7065_v36 = vmax.f32 %v7011_v30, %v7038_v50  ;;  %6987 = vst.msk [vmem:[#allocation3 + $0x20] sm:$0xff] %vm333_vm3, %v6959_v31  ;;  %v6848_v26 = vadd.f32 %v6736_v2, %v6491_v29  ;;  %v7012_v19 = vld [vmem:[#allocation3 + $0x8] sm:$0xff] }
 0x589   : > { %v6932_v47 = vld [vmem:[#allocation3 + $0x29] sm:$0xff]  ;;  %v6384_v21 = vpop.f32.mrf.mxu0 }
 0x58a   : > { %v6741_v39 = vpop.f32.mrf.mxu1  ;;  %7092 = vst.msk [vmem:[#allocation3] sm:$0xff] %vm333_vm3, %v7065_v36  ;;  %v6960_v22 = vmax.f32 %v6904_v38, %v6932_v47  ;;  %6877 = vst.msk [vmem:[#allocation3 + $0x40] sm:$0xff] %vm333_vm3, %v6848_v26  ;;  %v6492_v60 = vadd.f32 %v6384_v21, %v12050_v27  ;;  %v6905_v41 = vld [vmem:[#allocation3 + $0x30] sm:$0xff] }
 0x58b   : > { %v7039_v55 = vld [vmem:[#allocation3 + $0x17] sm:$0xff]  ;;  %v8824_v52 = vpop.f32.mrf.mxu0 }
 0x58c   : > { %v8915_v35 = vpop.f32.mrf.mxu1  ;;  %v7066_v34 = vmax.f32 %v7012_v19, %v7039_v55  ;;  %6988 = vst.msk [vmem:[#allocation3 + $0x28] sm:$0xff] %vm333_vm3, %v6960_v22  ;;  %v6849_v5 = vadd.f32 %v6741_v39, %v6492_v60  ;;  %v7013_v27 = vld [vmem:[#allocation3 + $0x10] sm:$0xff] }
 0x58d   : > { %v6933_v57 = vld [vmem:[#allocation3 + $0x31] sm:$0xff]  ;;  %v6389_v17 = vpop.f32.mrf.mxu0 }
 0x58e   : > { %v6746_v28 = vpop.f32.mrf.mxu1  ;;  %7093 = vst.msk [vmem:[#allocation3 + $0x8] sm:$0xff] %vm333_vm3, %v7066_v34  ;;  %v6961_v1 = vmax.f32 %v6905_v41, %v6933_v57  ;;  %6878 = vst.msk [vmem:[#allocation3 + $0x48] sm:$0xff] %vm333_vm3, %v6849_v5  ;;  %v6493_v40 = vadd.f32 %v6389_v17, %v12084_v32  ;;  %v6906_v63 = vld [vmem:[#allocation3 + $0x38] sm:$0xff] }
 0x58f   : > { %v7040_v16 = vld [vmem:[#allocation3 + $0x1f] sm:$0xff]  ;;  %v8827_v49 = vpop.f32.mrf.mxu0 }
 0x590   : > { %v8918_v45 = vpop.f32.mrf.mxu1  ;;  %v7067_v56 = vmax.f32 %v7013_v27, %v7040_v16  ;;  %6989 = vst.msk [vmem:[#allocation3 + $0x30] sm:$0xff] %vm333_vm3, %v6961_v1  ;;  %v6850_v48 = vadd.f32 %v6746_v28, %v6493_v40  ;;  %v7014_v32 = vld [vmem:[#allocation3 + $0x18] sm:$0xff]  ;;  %v7015_v26 = vld [vmem:[#allocation3 + $0x20] sm:$0xff] }
 0x591   : > { %v6934_v42 = vld [vmem:[#allocation3 + $0x39] sm:$0xff]  ;;  %v6394_v44 = vpop.f32.mrf.mxu0 }
 0x592   : > { %v6751_v6 = vpop.f32.mrf.mxu1  ;;  %7094 = vst.msk [vmem:[#allocation3 + $0x10] sm:$0xff] %vm333_vm3, %v7067_v56  ;;  %v6962_v37 = vmax.f32 %v6906_v63, %v6934_v42  ;;  %6879 = vst.msk [vmem:[#allocation3 + $0x50] sm:$0xff] %vm333_vm3, %v6850_v48  ;;  %v6494_v59 = vadd.f32 %v6394_v44, %v12174_v54  ;;  %v6907_v31 = vld [vmem:[#allocation3 + $0x40] sm:$0xff] }
 0x593   : > { %v7041_v53 = vld [vmem:[#allocation3 + $0x27] sm:$0xff]  ;;  %v8830_v12 = vpop.f32.mrf.mxu0 }
 0x594   : > { %v8921_v11 = vpop.f32.mrf.mxu1  ;;  %v7068_v61 = vmax.f32 %v7014_v32, %v7041_v53  ;;  %6990 = vst.msk [vmem:[#allocation3 + $0x38] sm:$0xff] %vm333_vm3, %v6962_v37  ;;  %v6851_v2 = vadd.f32 %v6751_v6, %v6494_v59  ;;  %v7016_v5 = vld [vmem:[#allocation3 + $0x28] sm:$0xff] }
 0x595   : > { %v6935_v29 = vld [vmem:[#allocation3 + $0x41] sm:$0xff]  ;;  %v6399_v30 = vpop.f32.mrf.mxu0 }
 0x596   : > { %v6756_v50 = vpop.f32.mrf.mxu1  ;;  %v7120_v4 = vld [vmem:[#allocation3] ss:$2 sm:$0x7f]  ;;  %7095 = vst.msk [vmem:[#allocation3 + $0x18] sm:$0xff] %vm333_vm3, %v7068_v61  ;;  %v6963_v54 = vmax.f32 %v6907_v31, %v6935_v29  ;;  %6880 = vst.msk [vmem:[#allocation3 + $0x58] sm:$0xff] %vm333_vm3, %v6851_v2  ;;  %v6495_v7 = vadd.f32 %v6399_v30, %v12197_v43 }
 0x597   : > { %v7127_v36 = vadd.f32 %v12745_v3, %v7120_v4  ;;  %v7042_v38 = vld [vmem:[#allocation3 + $0x2f] sm:$0xff]  ;;  %v8833_v47 = vpop.f32.mrf.mxu0 }
 0x598   : > { %v8924_v21 = vpop.f32.mrf.mxu1  ;;  %v7069_v39 = vmax.f32 %v7015_v26, %v7042_v38  ;;  %6991 = vst.msk [vmem:[#allocation3 + $0x40] sm:$0xff] %vm333_vm3, %v6963_v54  ;;  %v6852_v22 = vadd.f32 %v6756_v50, %v6495_v7  ;;  %v6908_v19 = vld [vmem:[#allocation3 + $0x48] sm:$0xff]  ;;  %v7017_v56 = vld [vmem:[#allocation3 + $0x30] sm:$0xff] }
 0x599   : > { %v7128_v60 = vmax.f32 %v7127_v36, 0.0  ;;  %v6936_v55 = vld [vmem:[#allocation3 + $0x49] sm:$0xff]  ;;  %v6404_v52 = vpop.f32.mrf.mxu0 }
 0x59a   : > { %v6761_v35 = vpop.f32.mrf.mxu1  ;;  %7096 = vst.msk [vmem:[#allocation3 + $0x20] sm:$0xff] %vm333_vm3, %v7069_v39  ;;  %v6964_v34 = vmax.f32 %v6908_v19, %v6936_v55  ;;  %6881 = vst.msk [vmem:[#allocation3 + $0x60] sm:$0xff] %vm333_vm3, %v6852_v22  ;;  %v6496_v43 = vadd.f32 %v6404_v52, %v12309_v13  ;;  %v6909_v40 = vld [vmem:[#allocation3 + $0x50] sm:$0xff] }
 0x59b   : > { %7130 = vst.msk [vmem:[#allocation7] sm:$0x7f] %vm7129_vm4, %v7128_v60  ;;  %v7043_v41 = vld [vmem:[#allocation3 + $0x37] sm:$0xff]  ;;  %v8836_v57 = vpop.f32.mrf.mxu0 }
 0x59c   : > { %v8927_v17 = vpop.f32.mrf.mxu1  ;;  %v7070_v28 = vmax.f32 %v7016_v5, %v7043_v41  ;;  %6992 = vst.msk [vmem:[#allocation3 + $0x48] sm:$0xff] %vm333_vm3, %v6964_v34  ;;  %v6853_v1 = vadd.f32 %v6761_v35, %v6496_v43 }
 0x59d   : > { %v6937_v27 = vld [vmem:[#allocation3 + $0x51] sm:$0xff]  ;;  %v6409_v16 = vpop.f32.mrf.mxu0 }
 0x59e   : > { %v6766_v49 = vpop.f32.mrf.mxu1  ;;  %7097 = vst.msk [vmem:[#allocation3 + $0x28] sm:$0xff] %vm333_vm3, %v7070_v28  ;;  %v6965_v45 = vmax.f32 %v6909_v40, %v6937_v27  ;;  %6882 = vst.msk [vmem:[#allocation3 + $0x68] sm:$0xff] %vm333_vm3, %v6853_v1  ;;  %v6497_v13 = vadd.f32 %v6409_v16, %v12370_v9  ;;  %v6910_v37 = vld [vmem:[#allocation3 + $0x58] sm:$0xff] }
 0x59f   : > { %v7044_v48 = vld [vmem:[#allocation3 + $0x3f] sm:$0xff]  ;;  %v8839_v63 = vpop.f32.mrf.mxu0 }
 0x5a0   : > { %v8930_v42 = vpop.f32.mrf.mxu1  ;;  %v7071_v44 = vmax.f32 %v7017_v56, %v7044_v48  ;;  %6993 = vst.msk [vmem:[#allocation3 + $0x50] sm:$0xff] %vm333_vm3, %v6965_v45  ;;  %v6854_v6 = vadd.f32 %v6766_v49, %v6497_v13  ;;  %v7018_v9 = vld [vmem:[#allocation3 + $0x38] sm:$0xff]  ;;  %v7019_v47 = vld [vmem:[#allocation3 + $0x40] sm:$0xff] }
 0x5a1   : > { %v6938_v59 = vld [vmem:[#allocation3 + $0x59] sm:$0xff]  ;;  %v6414_v32 = vpop.f32.mrf.mxu0 }
 0x5a2   : > { %v6771_v53 = vpop.f32.mrf.mxu1  ;;  %7098 = vst.msk [vmem:[#allocation3 + $0x30] sm:$0xff] %vm333_vm3, %v7071_v44  ;;  %v6966_v12 = vmax.f32 %v6910_v37, %v6938_v59  ;;  %6883 = vst.msk [vmem:[#allocation3 + $0x70] sm:$0xff] %vm333_vm3, %v6854_v6  ;;  %v6498_v11 = vadd.f32 %v6414_v32, %v12391_v23  ;;  %v6911_v50 = vld [vmem:[#allocation3 + $0x60] sm:$0xff]  ;;  %v7435_v37 = vld [vmem:[%s13144_s3 + $0x58] sm:$0xff] }
 0x5a3   : > { %v7045_v61 = vld [vmem:[#allocation3 + $0x47] sm:$0xff]  ;;  %v8842_v2 = vpop.f32.mrf.mxu0 }
 0x5a4   : > { %v8933_v31 = vpop.f32.mrf.mxu1  ;;  %v7072_v29 = vmax.f32 %v7018_v9, %v7045_v61  ;;  %6994 = vst.msk [vmem:[#allocation3 + $0x58] sm:$0xff] %vm333_vm3, %v6966_v12  ;;  %v6855_v30 = vadd.f32 %v6771_v53, %v6498_v11  ;;  %v7020_v41 = vld [vmem:[#allocation3 + $0x48] sm:$0xff]  ;;  %v7574_v2 = vld [vmem:[%s13144_s3 + $0x78] sm:$0xff] }
 0x5a5   : > { %v6939_v4 = vld [vmem:[#allocation3 + $0x61] sm:$0xff]  ;;  %v6419_v54 = vpop.f32.mrf.mxu0 }
 0x5a6   : > { %v6776_v7 = vpop.f32.mrf.mxu1  ;;  %v7132_v36 = vld [vmem:[#allocation3 + $0x1e] ss:$2 sm:$0x7f]  ;;  %7099 = vst.msk [vmem:[#allocation3 + $0x38] sm:$0xff] %vm333_vm3, %v7072_v29  ;;  %v6967_v26 = vmax.f32 %v6911_v50, %v6939_v4  ;;  %6884 = vst.msk [vmem:[#allocation3 + $0x78] sm:$0xff] %vm333_vm3, %v6855_v30  ;;  %v6499_v23 = vadd.f32 %v6419_v54, %v12469_v18 }
 0x5a7   : > { %v7133_v38 = vadd.f32 %v12745_v3, %v7132_v36  ;;  %v7046_v21 = vld [vmem:[#allocation3 + $0x4f] sm:$0xff]  ;;  %v8845_v39 = vpop.f32.mrf.mxu0 }
 0x5a8   : > { %v8936_v22 = vpop.f32.mrf.mxu1  ;;  %v7073_v60 = vmax.f32 %v7019_v47, %v7046_v21  ;;  %6995 = vst.msk [vmem:[#allocation3 + $0x60] sm:$0xff] %vm333_vm3, %v6967_v26  ;;  %v6856_v19 = vadd.f32 %v6776_v7, %v6499_v23  ;;  %v6912_v52 = vld [vmem:[#allocation3 + $0x68] sm:$0xff]  ;;  %v7021_v56 = vld [vmem:[#allocation3 + $0x50] sm:$0xff] }
 0x5a9   : > { %v7134_v55 = vmax.f32 %v7133_v38, 0.0  ;;  %v6940_v35 = vld [vmem:[#allocation3 + $0x69] sm:$0xff]  ;;  %v6424_v34 = vpop.f32.mrf.mxu0 }
 0x5aa   : > { %v6781_v43 = vpop.f32.mrf.mxu1  ;;  %7100 = vst.msk [vmem:[#allocation3 + $0x40] sm:$0xff] %vm333_vm3, %v7073_v60  ;;  %v6968_v5 = vmax.f32 %v6912_v52, %v6940_v35  ;;  %6885 = vst.msk [vmem:[#allocation3 + $0x80] sm:$0xff] %vm333_vm3, %v6856_v19  ;;  %v6500_v18 = vadd.f32 %v6424_v34, %v12484_v33  ;;  %v6913_v27 = vld [vmem:[#allocation3 + $0x70] sm:$0xff]  ;;  %v7433_v36 = vld [vmem:[%s13144_s3 + $0x48] sm:$0xff] }
 0x5ab   : > { %7135 = vst.msk [vmem:[#allocation7 + $0x7] sm:$0x7f] %vm7129_vm4, %v7134_v55  ;;  %v7047_v57 = vld [vmem:[#allocation3 + $0x57] sm:$0xff]  ;;  %v8848_v17 = vpop.f32.mrf.mxu0  ;;  %v7572_v19 = vld [vmem:[%s13144_s3 + $0x68] sm:$0xff] }
 0x5ac   : > { %v8939_v28 = vpop.f32.mrf.mxu1  ;;  %v7074_v1 = vmax.f32 %v7020_v41, %v7047_v57  ;;  %6996 = vst.msk [vmem:[#allocation3 + $0x68] sm:$0xff] %vm333_vm3, %v6968_v5  ;;  %v6857_v40 = vadd.f32 %v6781_v43, %v6500_v18  ;;  %v7022_v31 = vld [vmem:[#allocation3 + $0x58] sm:$0xff]  ;;  %v7573_v7 = vld [vmem:[%s13144_s3 + $0x70] sm:$0xff]  ;;  %v7571_v41 = vld [vmem:[%s13144_s3 + $0x60] sm:$0xff] }
 0x5ad   : > { %v6941_v16 = vld [vmem:[#allocation3 + $0x71] sm:$0xff]  ;;  %v6429_v49 = vpop.f32.mrf.mxu0 }
 0x5ae   : > { %v6786_v45 = vpop.f32.mrf.mxu1  ;;  %7101 = vst.msk [vmem:[#allocation3 + $0x48] sm:$0xff] %vm333_vm3, %v7074_v1  ;;  %v6969_v13 = vmax.f32 %v6913_v27, %v6941_v16  ;;  %6886 = vst.msk [vmem:[#allocation3 + $0x88] sm:$0xff] %vm333_vm3, %v6857_v40  ;;  %v6501_v33 = vadd.f32 %v6429_v49, %v12529_v10  ;;  %v6914_v59 = vld [vmem:[#allocation3 + $0x78] sm:$0xff] }
 0x5af   : > { %v7048_v48 = vld [vmem:[#allocation3 + $0x5f] sm:$0xff]  ;;  %v8851_v63 = vpop.f32.mrf.mxu0 }
 0x5b0   : > { %v8942_v42 = vpop.f32.mrf.mxu1  ;;  %v7075_v44 = vmax.f32 %v7021_v56, %v7048_v48  ;;  %6997 = vst.msk [vmem:[#allocation3 + $0x70] sm:$0xff] %vm333_vm3, %v6969_v13  ;;  %v6858_v6 = vadd.f32 %v6786_v45, %v6501_v33  ;;  %v7023_v55 = vld [vmem:[#allocation3 + $0x60] sm:$0xff] }
 0x5b1   : > { %v6942_v32 = vld [vmem:[#allocation3 + $0x79] sm:$0xff]  ;;  %v6434_v53 = vpop.f32.mrf.mxu0 }
 0x5b2   : > { %v6791_v12 = vpop.f32.mrf.mxu1  ;;  %v7172_v11 = vld [vmem:[#allocation7 + $0x1] sm:$0xff]  ;;  %7102 = vst.msk [vmem:[#allocation3 + $0x50] sm:$0xff] %vm333_vm3, %v7075_v44  ;;  %v6970_v10 = vmax.f32 %v6914_v59, %v6942_v32  ;;  %6887 = vst.msk [vmem:[#allocation3 + $0x90] sm:$0xff] %vm333_vm3, %v6858_v6  ;;  %v6502_v9 = vadd.f32 %v6434_v53, %v12539_v14  ;;  %v6915_v26 = vld [vmem:[#allocation3 + $0x80] sm:$0xff] }
 0x5b3   : > { %8982 = vmatmul.mubr.msk.f32.vlgmr.msra.gmra.mxu0 %vm333_vm3, %v7172_v11  ;;  %v7161_v61 = vld [vmem:[#allocation7] sm:$0xff]  ;;  %v8854_v30 = vpop.f32.mrf.mxu0  ;;  %v7434_v14 = vld [vmem:[%s13144_s3 + $0x50] sm:$0xff] }
 0x5b4   : > { %v7049_v29 = vld [vmem:[#allocation3 + $0x67] sm:$0xff]  ;;  %9011 = vmatmul.mubr.msk.f32.vlgmr.msra.gmra.mxu1 %vm333_vm3, %v7161_v61  ;;  %v8945_v50 = vpop.f32.mrf.mxu1  ;;  %8984 = vmatprep.mubr.msk.f32.mxu0 %vm9299_vm1, %v13357_v25  ;;  %6998 = vst.msk [vmem:[#allocation3 + $0x78] sm:$0xff] %vm333_vm3, %v6970_v10  ;;  %v6859_v54 = vadd.f32 %v6791_v12, %v6502_v9 }
 0x5b5   : > { %v7076_v4 = vmax.f32 %v7022_v31, %v7049_v29  ;;  %9013 = vmatprep.mubr.msk.f32.mxu1 %vm9299_vm1, %v13357_v25  ;;  %9032 = vmatpush3.msra.mxu0 %v7435_v37  ;;  %v6943_v23 = vld [vmem:[#allocation3 + $0x81] sm:$0xff]  ;;  %v6439_v38 = vpop.f32.mrf.mxu0 }
 0x5b6   : > { %v6796_v47 = vpop.f32.mrf.mxu1  ;;  %v7137_v21 = vld [vmem:[#allocation3 + $0x3c] ss:$2 sm:$0x7f]  ;;  %9061 = vmatpush3.msra.mxu1 %v7574_v2  ;;  %9033 = vmatprep.subr.mxu0 %v13357_v25  ;;  %v6971_v39 = vmax.f32 %v6915_v26, %v6943_v23  ;;  %6888 = vst.msk [vmem:[#allocation3 + $0x98] sm:$0xff] %vm333_vm3, %v6859_v54  ;;  %v6503_v22 = vadd.f32 %v6439_v38, %v12581_v8 }
 0x5b7   : > { %7103 = vst.msk [vmem:[#allocation3 + $0x58] sm:$0xff] %vm333_vm3, %v7076_v4  ;;  %v7138_v60 = vadd.f32 %v12745_v3, %v7137_v21  ;;  %9034 = vmatpush3.msra.mxu0 %v7434_v14  ;;  %9062 = vmatprep.subr.mxu1 %v13357_v25  ;;  %v7050_v52 = vld [vmem:[#allocation3 + $0x6f] sm:$0xff]  ;;  %v8857_v35 = vpop.f32.mrf.mxu0  ;;  %v7432_v8 = vld [vmem:[%s13144_s3 + $0x40] sm:$0xff] }
 0x5b8   : > { %v8948_v34 = vpop.f32.mrf.mxu1  ;;  %9063 = vmatpush3.msra.mxu1 %v7573_v7  ;;  %9035 = vmatprep.subr.mxu0 %v13357_v25  ;;  %v7077_v43 = vmax.f32 %v7023_v55, %v7050_v52  ;;  %6999 = vst.msk [vmem:[#allocation3 + $0x80] sm:$0xff] %vm333_vm3, %v6971_v39  ;;  %v6860_v5 = vadd.f32 %v6796_v47, %v6503_v22  ;;  %v6916_v57 = vld [vmem:[#allocation3 + $0x88] sm:$0xff]  ;;  %v7025_v37 = vld [vmem:[#allocation3 + $0x70] sm:$0xff] }
 0x5b9   : > { %v7139_v18 = vmax.f32 %v7138_v60, 0.0  ;;  %9036 = vmatpush3.msra.mxu0 %v7433_v36  ;;  %9064 = vmatprep.subr.mxu1 %v13357_v25  ;;  %v6944_v17 = vld [vmem:[#allocation3 + $0x89] sm:$0xff]  ;;  %v6444_v28 = vpop.f32.mrf.mxu0 }
 0x5ba   : > { %v6801_v1 = vpop.f32.mrf.mxu1  ;;  %9065 = vmatpush3.msra.mxu1 %v7572_v19  ;;  %9037 = vmatprep.subr.mxu0 %v13357_v25  ;;  %7104 = vst.msk [vmem:[#allocation3 + $0x60] sm:$0xff] %vm333_vm3, %v7077_v43  ;;  %v6972_v40 = vmax.f32 %v6916_v57, %v6944_v17  ;;  %6889 = vst.msk [vmem:[#allocation3 + $0xa0] sm:$0xff] %vm333_vm3, %v6860_v5  ;;  %v6504_v27 = vadd.f32 %v6444_v28, %v12593_v0  ;;  %v7024_v16 = vld [vmem:[#allocation3 + $0x68] sm:$0xff]  ;;  %v6917_v48 = vld [vmem:[#allocation3 + $0x90] sm:$0xff] }
 0x5bb   : > { %7140 = vst.msk [vmem:[#allocation7 + $0xe] sm:$0x7f] %vm7129_vm4, %v7139_v18  ;;  %9038 = vmatpush3.msra.mxu0 %v7432_v8  ;;  %9066 = vmatprep.subr.mxu1 %v13357_v25  ;;  %v7051_v49 = vld [vmem:[#allocation3 + $0x77] sm:$0xff]  ;;  %v8860_v45 = vpop.f32.mrf.mxu0 }
 0x5bc   : > { %v8951_v13 = vpop.f32.mrf.mxu1  ;;  %9067 = vmatpush3.msra.mxu1 %v7571_v41  ;;  %v7078_v33 = vmax.f32 %v7024_v16, %v7051_v49  ;;  %7000 = vst.msk [vmem:[#allocation3 + $0x88] sm:$0xff] %vm333_vm3, %v6972_v40  ;;  %v6861_v56 = vadd.f32 %v6801_v1, %v6504_v27  ;;  %v7026_v14 = vld [vmem:[#allocation3 + $0x78] sm:$0xff] }
 0x5bd   : > { %v6945_v63 = vld [vmem:[#allocation3 + $0x91] sm:$0xff]  ;;  %v6449_v42 = vpop.f32.mrf.mxu0 }
 0x5be   : > { %v6806_v44 = vpop.f32.mrf.mxu1  ;;  %7105 = vst.msk [vmem:[#allocation3 + $0x68] sm:$0xff] %vm333_vm3, %v7078_v33  ;;  %v6973_v0 = vmax.f32 %v6917_v48, %v6945_v63  ;;  %6890 = vst.msk [vmem:[#allocation3 + $0xa8] sm:$0xff] %vm333_vm3, %v6861_v56  ;;  %v6505_v6 = vadd.f32 %v6449_v42, %v12638_v58  ;;  %v6918_v10 = vld [vmem:[#allocation3 + $0x98] sm:$0xff] }
 0x5bf   : > { %v7052_v59 = vld [vmem:[#allocation3 + $0x7f] sm:$0xff]  ;;  %v8863_v32 = vpop.f32.mrf.mxu0 }
 0x5c0   : > { %v8954_v53 = vpop.f32.mrf.mxu1  ;;  %v7079_v12 = vmax.f32 %v7025_v37, %v7052_v59  ;;  %7001 = vst.msk [vmem:[#allocation3 + $0x90] sm:$0xff] %vm333_vm3, %v6973_v0  ;;  %v6862_v11 = vadd.f32 %v6806_v44, %v6505_v6  ;;  %v7027_v19 = vld [vmem:[#allocation3 + $0x80] sm:$0xff] }
 0x5c1   : > { %v6946_v9 = vld [vmem:[#allocation3 + $0x99] sm:$0xff]  ;;  %v6454_v61 = vpop.f32.mrf.mxu0 }
 0x5c2   : > { %v6811_v2 = vpop.f32.mrf.mxu1  ;;  %v7173_v31 = vld [vmem:[#allocation7 + $0x9] sm:$0xff]  ;;  %7106 = vst.msk [vmem:[#allocation3 + $0x70] sm:$0xff] %vm333_vm3, %v7079_v12  ;;  %v6974_v29 = vmax.f32 %v6918_v10, %v6946_v9  ;;  %6891 = vst.msk [vmem:[#allocation3 + $0xb0] sm:$0xff] %vm333_vm3, %v6862_v11  ;;  %v6506_v58 = vadd.f32 %v6454_v61, %v12649_v51  ;;  %v7142_v50 = vld [vmem:[#allocation3 + $0x5a] ss:$2 sm:$0x7f] }
 0x5c3   : > { %8985 = vmatmul.mubr.msk.f32.gmra.mxu0 %vm333_vm3, %v7173_v31  ;;  %v12838_v30 = vld [vmem:[#allocation7 + $0x8] sm:$0xff]  ;;  %v7053_v4 = vld [vmem:[#allocation3 + $0x87] sm:$0xff]  ;;  %v8866_v54 = vpop.f32.mrf.mxu0  ;;  %v7143_v36 = vadd.f32 %v12745_v3, %v7142_v50 }
 0x5c4   : > { %9014 = vmatmul.mubr.msk.f32.gmra.mxu1 %vm333_vm3, %v12838_v30  ;;  %v8957_v7 = vpop.f32.mrf.mxu1  ;;  %8987 = vmatprep.mubr.msk.f32.mxu0 %vm9299_vm1, %v13357_v25  ;;  %v7080_v26 = vmax.f32 %v7026_v14, %v7053_v4  ;;  %7002 = vst.msk [vmem:[#allocation3 + $0x98] sm:$0xff] %vm333_vm3, %v6974_v29  ;;  %v6863_v51 = vadd.f32 %v6811_v2, %v6506_v58  ;;  %v6919_v23 = vld [vmem:[#allocation3 + $0xa0] sm:$0xff]  ;;  %v7028_v17 = vld [vmem:[#allocation3 + $0x88] sm:$0xff] }
 0x5c5   : > { %9016 = vmatprep.mubr.msk.f32.mxu1 %vm9299_vm1, %v13357_v25  ;;  %v6947_v38 = vld [vmem:[#allocation3 + $0xa1] sm:$0xff]  ;;  %v6459_v47 = vpop.f32.mrf.mxu0  ;;  %v7144_v39 = vmax.f32 %v7143_v36, 0.0 }
 0x5c6   : > { %v6816_v21 = vpop.f32.mrf.mxu1  ;;  %7107 = vst.msk [vmem:[#allocation3 + $0x78] sm:$0xff] %vm333_vm3, %v7080_v26  ;;  %v6975_v22 = vmax.f32 %v6919_v23, %v6947_v38  ;;  %6892 = vst.msk [vmem:[#allocation3 + $0xb8] sm:$0xff] %vm333_vm3, %v6863_v51  ;;  %v6507_v60 = vadd.f32 %v6459_v47, %v12675_v20  ;;  %v6920_v43 = vld [vmem:[#allocation3 + $0xa8] sm:$0xff] }
 0x5c7   : > { %v7054_v55 = vld [vmem:[#allocation3 + $0x8f] sm:$0xff]  ;;  %v8869_v52 = vpop.f32.mrf.mxu0  ;;  %7145 = vst.msk [vmem:[#allocation7 + $0x15] sm:$0x7f] %vm7129_vm4, %v7144_v39 }
 0x5c8   : > { %v8960_v35 = vpop.f32.mrf.mxu1  ;;  %v7081_v34 = vmax.f32 %v7027_v19, %v7054_v55  ;;  %7003 = vst.msk [vmem:[#allocation3 + $0xa0] sm:$0xff] %vm333_vm3, %v6975_v22  ;;  %v6864_v8 = vadd.f32 %v6816_v21, %v6507_v60  ;;  %v7029_v42 = vld [vmem:[#allocation3 + $0x90] sm:$0xff] }
 0x5c9   : > { %v6948_v5 = vld [vmem:[#allocation3 + $0xa9] sm:$0xff]  ;;  %v6464_v18 = vpop.f32.mrf.mxu0 }
 0x5ca   : > { %v6821_v41 = vpop.f32.mrf.mxu1  ;;  %7108 = vst.msk [vmem:[#allocation3 + $0x80] sm:$0xff] %vm333_vm3, %v7081_v34  ;;  %v6976_v57 = vmax.f32 %v6920_v43, %v6948_v5  ;;  %6893 = vst.msk [vmem:[#allocation3 + $0xc0] sm:$0xff] %vm333_vm3, %v6864_v8  ;;  %v6508_v20 = vadd.f32 %v6464_v18, %v12701_v46  ;;  %v6921_v49 = vld [vmem:[#allocation3 + $0xb0] sm:$0xff] }
 0x5cb   : > { %v7055_v28 = vld [vmem:[#allocation3 + $0x97] sm:$0xff]  ;;  %v8872_v1 = vpop.f32.mrf.mxu0 }
 0x5cc   : > { %v8963_v40 = vpop.f32.mrf.mxu1  ;;  %v7082_v27 = vmax.f32 %v7028_v17, %v7055_v28  ;;  %7004 = vst.msk [vmem:[#allocation3 + $0xa8] sm:$0xff] %vm333_vm3, %v6976_v57  ;;  %v6865_v16 = vadd.f32 %v6821_v41, %v6508_v20  ;;  %v7030_v2 = vld [vmem:[#allocation3 + $0x98] sm:$0xff] }
 0x5cd   : > { %v6949_v45 = vld [vmem:[#allocation3 + $0xb1] sm:$0xff]  ;;  %v6469_v13 = vpop.f32.mrf.mxu0 }
 0x5ce   : > { %v6826_v33 = vpop.f32.mrf.mxu1  ;;  %7109 = vst.msk [vmem:[#allocation3 + $0x88] sm:$0xff] %vm333_vm3, %v7082_v27  ;;  %v6977_v56 = vmax.f32 %v6921_v49, %v6949_v45  ;;  %6894 = vst.msk [vmem:[#allocation3 + $0xc8] sm:$0xff] %vm333_vm3, %v6865_v16  ;;  %v6509_v48 = vadd.f32 %v6469_v13, %v12703_v62  ;;  %v7174_v46 = vld [vmem:[#allocation7 + $0x11] sm:$0xff] }
 0x5cf   : > { %v12860_v63 = vld [vmem:[#allocation7 + $0x10] sm:$0xff]  ;;  %8988 = vmatmul.mubr.msk.f32.gmra.mxu0 %vm333_vm3, %v7174_v46  ;;  %v8875_v0 = vpop.f32.mrf.mxu0  ;;  %v7031_v23 = vld [vmem:[#allocation3 + $0xa0] sm:$0xff] }
 0x5d0   : > { %v7056_v44 = vld [vmem:[#allocation3 + $0x9f] sm:$0xff]  ;;  %9017 = vmatmul.mubr.msk.f32.gmra.mxu1 %vm333_vm3, %v12860_v63  ;;  %v8966_v6 = vpop.f32.mrf.mxu1  ;;  %7005 = vst.msk [vmem:[#allocation3 + $0xb0] sm:$0xff] %vm333_vm3, %v6977_v56  ;;  %v6866_v59 = vadd.f32 %v6826_v33, %v6509_v48  ;;  %8990 = vmatprep.mubr.msk.f32.mxu0 %vm9299_vm1, %v13357_v25 }
 0x5d1   : > { %v7083_v37 = vmax.f32 %v7029_v42, %v7056_v44  ;;  %9019 = vmatprep.mubr.msk.f32.mxu1 %vm9299_vm1, %v13357_v25  ;;  %v6922_v62 = vld [vmem:[#allocation3 + $0xb8] sm:$0xff]  ;;  %v6474_v53 = vpop.f32.mrf.mxu0  ;;  %v6923_v54 = vld [vmem:[#allocation3 + $0xc0] sm:$0xff] }
 0x5d2   : > { %v6950_v32 = vld [vmem:[#allocation3 + $0xb9] sm:$0xff]  ;;  %v6831_v12 = vpop.f32.mrf.mxu1  ;;  %6895 = vst.msk [vmem:[#allocation3 + $0xd0] sm:$0xff] %vm333_vm3, %v6866_v59  ;;  %v6510_v9 = vadd.f32 %v6474_v53, %v12705_v15 }
 0x5d3   : > { %v7147_v11 = vld [vmem:[#allocation3 + $0x78] ss:$2 sm:$0x7f]  ;;  %7110 = vst.msk [vmem:[#allocation3 + $0x90] sm:$0xff] %vm333_vm3, %v7083_v37  ;;  %v6978_v10 = vmax.f32 %v6922_v62, %v6950_v32  ;;  %v7057_v31 = vld [vmem:[#allocation3 + $0xa7] sm:$0xff]  ;;  %v8878_v29 = vpop.f32.mrf.mxu0 }
 0x5d4   : > { %v7148_v61 = vadd.f32 %v12745_v3, %v7147_v11  ;;  %v8969_v58 = vpop.f32.mrf.mxu1  ;;  %v7084_v50 = vmax.f32 %v7030_v2, %v7057_v31  ;;  %v6867_v14 = vadd.f32 %v6831_v12, %v6510_v9  ;;  %v7032_v52 = vld [vmem:[#allocation3 + $0xa8] sm:$0xff]  ;;  %v7178_v9 = vld [vmem:[#allocation7 + $0x31] sm:$0x1] }
 0x5d5   : > { %7006 = vst.msk [vmem:[#allocation3 + $0xb8] sm:$0xff] %vm333_vm3, %v6978_v10  ;;  %v6951_v7 = vld [vmem:[#allocation3 + $0xc1] sm:$0xff]  ;;  %v6479_v36 = vpop.f32.mrf.mxu0  ;;  %v7426_v2 = vld [vmem:[#allocation7 + $0xf] sm:$0xff] }
 0x5d6   : > { %v7149_v4 = vmax.f32 %v7148_v61, 0.0  ;;  %v6836_v26 = vpop.f32.mrf.mxu1  ;;  %7111 = vst.msk [vmem:[#allocation3 + $0x98] sm:$0xff] %vm333_vm3, %v7084_v50  ;;  %v6979_v51 = vmax.f32 %v6923_v54, %v6951_v7  ;;  %6896 = vst.msk [vmem:[#allocation3 + $0xd8] sm:$0xff] %vm333_vm3, %v6867_v14  ;;  %v6511_v15 = vadd.f32 %v6479_v36, %v12707_v24  ;;  %v6924_v60 = vld [vmem:[#allocation3 + $0xc8] sm:$0xff]  ;;  %v7431_v50 = vld [vmem:[#allocation7 + $0x37] sm:$0x1] }
 0x5d7   : > { %v7058_v38 = vld [vmem:[#allocation3 + $0xaf] sm:$0xff]  ;;  %v8881_v47 = vpop.f32.mrf.mxu0  ;;  %v7570_v14 = vld [vmem:[#allocation7 + $0x38] sm:$0x1] }
 0x5d8   : > { %7150 = vst.msk [vmem:[#allocation7 + $0x1c] sm:$0x7f] %vm7129_vm4, %v7149_v4  ;;  %v8972_v21 = vpop.f32.mrf.mxu1  ;;  %v7085_v39 = vmax.f32 %v7031_v23, %v7058_v38  ;;  %v6868_v22 = vadd.f32 %v6836_v26, %v6511_v15  ;;  %v7033_v41 = vld [vmem:[#allocation3 + $0xb0] sm:$0xff]  ;;  %v7791_v15 = vld [vmem:[%s13145_s4 + $0x38] sm:$0xff]  ;;  %v7799_v47 = vld [vmem:[%s13145_s4 + $0x68] sm:$0xff] }
 0x5d9   : > { %7007 = vst.msk [vmem:[#allocation3 + $0xc0] sm:$0xff] %vm333_vm3, %v6979_v51  ;;  %v6952_v19 = vld [vmem:[#allocation3 + $0xc9] sm:$0xff]  ;;  %v7801_v51 = vld [vmem:[%s13145_s4 + $0x78] sm:$0xff]  ;;  %9108 = vmatprep.subr.mxu1 %v7791_v15 }
 0x5da   : > { %7112 = vst.msk [vmem:[#allocation3 + $0xa0] sm:$0xff] %vm333_vm3, %v7085_v39  ;;  %v6980_v55 = vmax.f32 %v6924_v60, %v6952_v19  ;;  %v6925_v34 = vld [vmem:[#allocation3 + $0xd0] sm:$0xff]  ;;  %9089 = vmatprep.subr.mxu0 %v7801_v51  ;;  %v7789_v21 = vld [vmem:[%s13145_s4 + $0x28] sm:$0xff]  ;;  %v7798_v39 = vld [vmem:[%s13145_s4 + $0x60] sm:$0xff] }
 0x5db   : > { %6898 = vst.msk [vmem:[#allocation3 + $0xe0] sm:$0x1] %vm6897_vm5, %v6868_v22  ;;  %v7800_v23 = vld [vmem:[%s13145_s4 + $0x70] sm:$0xff]  ;;  %v7788_v22 = vld [vmem:[%s13145_s4 + $0x20] sm:$0xff]  ;;  %v7797_v60 = vld [vmem:[%s13145_s4 + $0x58] sm:$0xff] }
 0x5dc   : > { %v7059_v24 = vld [vmem:[#allocation3 + $0xb7] sm:$0xff]  ;;  %7008 = vst.msk [vmem:[#allocation3 + $0xc8] sm:$0xff] %vm333_vm3, %v6980_v55 }
 0x5dd   : > { %v7086_v35 = vmax.f32 %v7032_v52, %v7059_v24  ;;  %v6953_v8 = vld [vmem:[#allocation3 + $0xd1] sm:$0xff]  ;;  %v7795_v24 = vld [vmem:[%s13145_s4 + $0x48] sm:$0xff] }
 0x5de   : > { %v6981_v5 = vmax.f32 %v6925_v34, %v6953_v8  ;;  %v6926_v17 = vld [vmem:[#allocation3 + $0xd8] sm:$0xff]  ;;  %v7790_v38 = vld [vmem:[%s13145_s4 + $0x30] sm:$0xff] }
 0x5df   : > { %v7175_v43 = vld [vmem:[#allocation7 + $0x19] sm:$0xff]  ;;  %7113 = vst.msk [vmem:[#allocation3 + $0xa8] sm:$0xff] %vm333_vm3, %v7086_v35  ;;  %v7034_v16 = vld [vmem:[#allocation3 + $0xb8] sm:$0xff]  ;;  %v7796_v55 = vld [vmem:[%s13145_s4 + $0x50] sm:$0xff] }
 0x5e0   : > { %8991 = vmatmul.mubr.msk.f32.gmra.mxu0 %vm333_vm3, %v7175_v43  ;;  %v12885_v18 = vld [vmem:[#allocation7 + $0x18] sm:$0xff]  ;;  %7009 = vst.msk [vmem:[#allocation3 + $0xd0] sm:$0xff] %vm333_vm3, %v6981_v5  ;;  %v7787_v19 = vld [vmem:[%s13145_s4 + $0x18] sm:$0xff]  ;;  %v7786_v52 = vld [vmem:[%s13145_s4 + $0x10] sm:$0xff] }
 0x5e1   : > { %v7060_v57 = vld [vmem:[#allocation3 + $0xbf] sm:$0xff]  ;;  %9020 = vmatmul.mubr.msk.f32.gmra.mxu1 %vm333_vm3, %v12885_v18  ;;  %8993 = vmatprep.mubr.msk.f32.mxu0 %vm9299_vm1, %v13357_v25  ;;  %v7785_v35 = vld [vmem:[%s13145_s4 + $0x8] sm:$0xff] }
 0x5e2   : > { %v7087_v20 = vmax.f32 %v7033_v41, %v7060_v57  ;;  %9022 = vmatprep.mubr.msk.f32.mxu1 %vm9299_vm1, %v13357_v25  ;;  %v6954_v28 = vld [vmem:[#allocation3 + $0xd9] sm:$0xff] }
 0x5e3   : > { %v7152_v1 = vld [vmem:[#allocation3 + $0x96] ss:$2 sm:$0x7f]  ;;  %v6982_v40 = vmax.f32 %v6926_v17, %v6954_v28  ;;  %v7061_v49 = vld [vmem:[#allocation3 + $0xc7] sm:$0xff] }
 0x5e4   : > { %7114 = vst.msk [vmem:[#allocation3 + $0xb0] sm:$0xff] %vm333_vm3, %v7087_v20  ;;  %v7153_v27 = vadd.f32 %v12745_v3, %v7152_v1  ;;  %v7088_v45 = vmax.f32 %v7034_v16, %v7061_v49  ;;  %v7035_v33 = vld [vmem:[#allocation3 + $0xc0] sm:$0xff]  ;;  %v7036_v46 = vld [vmem:[#allocation3 + $0xc8] sm:$0xff]  ;;  %v13017_v20 = vld [vmem:[%s13145_s4 + $0xb8] sm:$0xff] }
 0x5e5   : > { %7010 = vst.msk [vmem:[#allocation3 + $0xd8] sm:$0xff] %vm333_vm3, %v6982_v40  ;;  %v7427_v31 = vld [vmem:[#allocation7 + $0x17] sm:$0xff] }
 0x5e6   : > { %v7154_v13 = vmax.f32 %v7153_v27, 0.0  ;;  %7115 = vst.msk [vmem:[#allocation3 + $0xb8] sm:$0xff] %vm333_vm3, %v7088_v45  ;;  %v7794_v43 = vld [vmem:[%s13145_s4 + $0x40] sm:$0xff]  ;;  %v13022_v17 = vld [vmem:[%s13145_s4 + $0xf8] sm:$0xff] }
 0x5e7   : > { %v7062_v56 = vld [vmem:[#allocation3 + $0xcf] sm:$0xff]  ;;  %v7784_v5 = vld [vmem:[%s13145_s4] sm:$0xff] }
 0x5e8   : > { %7155 = vst.msk [vmem:[#allocation7 + $0x23] sm:$0x7f] %vm7129_vm4, %v7154_v13  ;;  %v7089_v48 = vmax.f32 %v7035_v33, %v7062_v56  ;;  %v7037_v42 = vld [vmem:[#allocation3 + $0xd0] sm:$0x1] }
 0x5ea   : > { %7116 = vst.msk [vmem:[#allocation3 + $0xc0] sm:$0xff] %vm333_vm3, %v7089_v48 }
 0x5ec   : > { %v7063_v44 = vld [vmem:[#allocation3 + $0xd7] sm:$0xff]  ;;  %v7064_v0 = vld [vmem:[#allocation3 + $0xdf] sm:$0x1] }
 0x5ed   : > { %v7090_v6 = vmax.f32 %v7036_v46, %v7063_v44  ;;  %v7091_v37 = vmax.f32 %v7037_v42, %v7064_v0 }
 0x5ef   : > { %v7176_v59 = vld [vmem:[#allocation7 + $0x21] sm:$0xff]  ;;  %7117 = vst.msk [vmem:[#allocation3 + $0xc8] sm:$0xff] %vm333_vm3, %v7090_v6 }
 0x5f0   : > { %v7165_v62 = vld [vmem:[#allocation7 + $0x20] sm:$0xff]  ;;  %7118 = vst.msk [vmem:[#allocation3 + $0xd0] sm:$0x1] %vm6897_vm5, %v7091_v37  ;;  %8994 = vmatmul.mubr.msk.f32.gmra.mxu0 %vm333_vm3, %v7176_v59 }
 0x5f1   : > { %9023 = vmatmul.mubr.msk.f32.gmra.mxu1 %vm333_vm3, %v7165_v62  ;;  %8996 = vmatprep.mubr.msk.f32.mxu0 %vm9299_vm1, %v13357_v25  ;;  %v7157_v32 = vld [vmem:[#allocation3 + $0xb4] ss:$2 sm:$0x7f] }
 0x5f2   : > { %9025 = vmatprep.mubr.msk.f32.mxu1 %vm9299_vm1, %v13357_v25  ;;  %v7158_v53 = vadd.f32 %v12745_v3, %v7157_v32  ;;  %v7425_v3 = vld [vmem:[#allocation7 + $0x7] sm:$0xff] }
 0x5f4   : > { %v7159_v12 = vmax.f32 %v7158_v53, 0.0 }
 0x5f6   : > { %7160 = vst.msk [vmem:[#allocation7 + $0x2a] sm:$0x7f] %vm7129_vm4, %v7159_v12 }
 0x5fd   : > { %v7177_v11 = vld [vmem:[#allocation7 + $0x29] sm:$0xff] }
 0x5fe   : > { %v7166_v10 = vld [vmem:[#allocation7 + $0x28] sm:$0xff]  ;;  %8997 = vmatmul.mubr.msk.f32.gmra.mxu0 %vm333_vm3, %v7177_v11  ;;  %v7167_v61 = vld [vmem:[#allocation7 + $0x30] sm:$0x1] }
 0x5ff   : > { %9026 = vmatmul.mubr.msk.f32.gmra.mxu1 %vm333_vm3, %v7166_v10  ;;  %8999 = vmatprep.mubr.msk.f32.mxu0 %vm9299_vm1, %v13357_v25  ;;  %v7430_v29 = vld [vmem:[#allocation7 + $0x2f] sm:$0xff] }
 0x600   : > { %9028 = vmatprep.mubr.msk.f32.mxu1 %vm9299_vm1, %v13357_v25  ;;  %v7569_v58 = vld [vmem:[#allocation7 + $0x30] sm:$0xff] }
 0x602   : > { %9000 = vmatmul.mubr.msk.f32.gmra.mxu0 %vm333_vm3, %v7178_v9 }
 0x603   : > { %9029 = vmatmul.mubr.msk.f32.gmra.mxu1 %vm333_vm3, %v7167_v61  ;;  %9039 = vmatprep.mubr.msk.f32.mxu0 %vm9299_vm1, %v13357_v25 }
 0x604   : > { %9068 = vmatprep.mubr.msk.f32.mxu1 %vm9299_vm1, %v13357_v25 }
 0x606   : > { %9040 = vmatmul.mubr.msk.f32.vlgmr.msra.gmra.mxu0 %vm333_vm3, %v7425_v3 }
 0x607   : > { %9069 = vmatmul.mubr.msk.f32.vlgmr.msra.gmra.mxu1 %vm333_vm3, %v12838_v30  ;;  %9042 = vmatprep.mubr.msk.f32.mxu0 %vm9299_vm1, %v13357_v25  ;;  %v7428_v30 = vld [vmem:[#allocation7 + $0x1f] sm:$0xff] }
 0x608   : > { %9071 = vmatprep.mubr.msk.f32.mxu1 %vm9299_vm1, %v13357_v25  ;;  %9090 = vmatpush3.msra.mxu0 %v7801_v51 }
 0x609   : > { %9109 = vmatpush3.msra.mxu1 %v7791_v15  ;;  %9091 = vmatprep.subr.mxu0 %v7800_v23 }
 0x60a   : > { %9043 = vmatmul.mubr.msk.f32.gmra.mxu0 %vm333_vm3, %v7426_v2  ;;  %9110 = vmatprep.subr.mxu1 %v7790_v38 }
 0x60b   : > { %9072 = vmatmul.mubr.msk.f32.gmra.mxu1 %vm333_vm3, %v12860_v63  ;;  %9045 = vmatprep.mubr.msk.f32.mxu0 %vm9299_vm1, %v13357_v25  ;;  %v7429_v63 = vld [vmem:[#allocation7 + $0x27] sm:$0xff] }
 0x60c   : > { %9074 = vmatprep.mubr.msk.f32.mxu1 %vm9299_vm1, %v13357_v25  ;;  %9092 = vmatpush3.msra.mxu0 %v7800_v23 }
 0x60d   : > { %9111 = vmatpush3.msra.mxu1 %v7790_v38  ;;  %9093 = vmatprep.subr.mxu0 %v7799_v47 }
 0x60e   : > { %9046 = vmatmul.mubr.msk.f32.gmra.mxu0 %vm333_vm3, %v7427_v31  ;;  %9112 = vmatprep.subr.mxu1 %v7789_v21 }
 0x60f   : > { %9075 = vmatmul.mubr.msk.f32.gmra.mxu1 %vm333_vm3, %v12885_v18  ;;  %9048 = vmatprep.mubr.msk.f32.mxu0 %vm9299_vm1, %v13357_v25 }
 0x610   : > { %9077 = vmatprep.mubr.msk.f32.mxu1 %vm9299_vm1, %v13357_v25  ;;  %9094 = vmatpush3.msra.mxu0 %v7799_v47 }
 0x611   : > { %9113 = vmatpush3.msra.mxu1 %v7789_v21  ;;  %9095 = vmatprep.subr.mxu0 %v7798_v39 }
 0x612   : > { %9049 = vmatmul.mubr.msk.f32.gmra.mxu0 %vm333_vm3, %v7428_v30  ;;  %9114 = vmatprep.subr.mxu1 %v7788_v22 }
 0x613   : > { %9078 = vmatmul.mubr.msk.f32.gmra.mxu1 %vm333_vm3, %v7165_v62  ;;  %9051 = vmatprep.mubr.msk.f32.mxu0 %vm9299_vm1, %v13357_v25 }
 0x614   : > { %9080 = vmatprep.mubr.msk.f32.mxu1 %vm9299_vm1, %v13357_v25  ;;  %9096 = vmatpush3.msra.mxu0 %v7798_v39 }
 0x615   : > { %9115 = vmatpush3.msra.mxu1 %v7788_v22  ;;  %9097 = vmatprep.subr.mxu0 %v7797_v60 }
 0x616   : > { %9052 = vmatmul.mubr.msk.f32.gmra.mxu0 %vm333_vm3, %v7429_v63  ;;  %9116 = vmatprep.subr.mxu1 %v7787_v19 }
 0x617   : > { %9081 = vmatmul.mubr.msk.f32.gmra.mxu1 %vm333_vm3, %v7166_v10  ;;  %9054 = vmatprep.mubr.msk.f32.mxu0 %vm9299_vm1, %v13357_v25 }
 0x618   : > { %9083 = vmatprep.mubr.msk.f32.mxu1 %vm9299_vm1, %v13357_v25  ;;  %9098 = vmatpush3.msra.mxu0 %v7797_v60 }
 0x619   : > { %9117 = vmatpush3.msra.mxu1 %v7787_v19  ;;  %9099 = vmatprep.subr.mxu0 %v7796_v55 }
 0x61a   : > { %9055 = vmatmul.mubr.msk.f32.gmra.mxu0 %vm333_vm3, %v7430_v29  ;;  %9118 = vmatprep.subr.mxu1 %v7786_v52 }
 0x61b   : > { %9084 = vmatmul.mubr.msk.f32.gmra.mxu1 %vm333_vm3, %v7569_v58  ;;  %9057 = vmatprep.mubr.msk.f32.mxu0 %vm9299_vm1, %v13357_v25 }
 0x61c   : > { %9086 = vmatprep.mubr.msk.f32.mxu1 %vm9299_vm1, %v13357_v25  ;;  %9100 = vmatpush3.msra.mxu0 %v7796_v55 }
 0x61d   : > { %9119 = vmatpush3.msra.mxu1 %v7786_v52  ;;  %9101 = vmatprep.subr.mxu0 %v7795_v24 }
 0x61e   : > { %9058 = vmatmul.mubr.msk.f32.gmra.mxu0 %vm333_vm3, %v7431_v50  ;;  %9120 = vmatprep.subr.mxu1 %v7785_v35 }
 0x61f   : > { %9087 = vmatmul.mubr.msk.f32.gmra.mxu1 %vm333_vm3, %v7570_v14  ;;  %9102 = vmatpush3.msra.mxu0 %v7795_v24 }
 0x620   : > { %9121 = vmatpush3.msra.mxu1 %v7785_v35  ;;  %9103 = vmatprep.subr.mxu0 %v7794_v43 }
 0x621   : > { %9122 = vmatprep.subr.mxu1 %v7784_v5  ;;  %9104 = vmatpush3.msra.mxu0 %v7794_v43 }
 0x622   : > { %9123 = vmatpush3.msra.mxu1 %v7784_v5  ;;  %9127 = vmatprep.subr.mxu0 %v13017_v20 }
 0x623   : > { %9146 = vmatprep.subr.mxu1 %v13022_v17 }
 0x673   : > { %v7270_v4 = vpop.f32.mrf.mxu0 }
 0x674   : > { %v7391_v54 = vpop.f32.mrf.mxu1 }
 0x675   : > { %v12963_v7 = vadd.f32 %v7391_v54, %v7270_v4  ;;  %v8983_v36 = vpop.f32.mrf.mxu0 }
 0x676   : > { %v9012_v26 = vpop.f32.mrf.mxu1 }
 0x683   : > { %v7275_v34 = vpop.f32.mrf.mxu0 }
 0x684   : > { %v7396_v8 = vpop.f32.mrf.mxu1 }
 0x685   : > { %v7397_v18 = vadd.f32 %v7396_v8, %v7275_v34  ;;  %v8986_v41 = vpop.f32.mrf.mxu0 }
 0x686   : > { %v9015_v57 = vpop.f32.mrf.mxu1 }
 0x68f   : > { %v7280_v28 = vpop.f32.mrf.mxu0 }
 0x690   : > { %v7401_v25 = vpop.f32.mrf.mxu1 }
 0x691   : > { %v8989_v1 = vpop.f32.mrf.mxu0  ;;  %v7402_v63 = vadd.f32 %v7401_v25, %v7280_v28 }
 0x692   : > { %v9018_v40 = vpop.f32.mrf.mxu1 }
 0x6a0   : > { %v7285_v27 = vpop.f32.mrf.mxu0 }
 0x6a1   : > { %v7406_v16 = vpop.f32.mrf.mxu1 }
 0x6a2   : > { %v8992_v49 = vpop.f32.mrf.mxu0 }
 0x6a3   : > { %v9021_v45 = vpop.f32.mrf.mxu1 }
 0x6b0   : > { %v7290_v13 = vpop.f32.mrf.mxu0 }
 0x6b1   : > { %v7411_v33 = vpop.f32.mrf.mxu1 }
 0x6b2   : > { %v8995_v56 = vpop.f32.mrf.mxu0  ;;  %v7412_v47 = vadd.f32 %v7411_v33, %v7290_v13 }
 0x6b3   : > { %v9024_v48 = vpop.f32.mrf.mxu1 }
 0x6be   : > { %v7295_v46 = vpop.f32.mrf.mxu0 }
 0x6bf   : > { %v7416_v42 = vpop.f32.mrf.mxu1 }
 0x6c0   : > { %v8998_v44 = vpop.f32.mrf.mxu0  ;;  %v7417_v34 = vadd.f32 %v7416_v42, %v7295_v46 }
 0x6c1   : > { %v9027_v0 = vpop.f32.mrf.mxu1 }
 0x6c2   : > { %v7300_v6 = vpop.f32.mrf.mxu0 }
 0x6c3   : > { %v7421_v37 = vpop.f32.mrf.mxu1 }
 0x6c4   : > { %v9001_v59 = vpop.f32.mrf.mxu0  ;;  %v7422_v40 = vadd.f32 %v7421_v37, %v7300_v6 }
 0x6c5   : > { %v9030_v62 = vpop.f32.mrf.mxu1 }
 0x6c6   : > { %v7523_v32 = vpop.f32.mrf.mxu0 }
 0x6c7   : > { %v7662_v53 = vpop.f32.mrf.mxu1  ;;  %v7557_v12 = vadd.f32 %v7523_v32, %v12963_v7  ;;  %v7407_v7 = vadd.f32 %v7406_v16, %v7285_v27 }
 0x6c8   : > { %v9041_v11 = vpop.f32.mrf.mxu0 }
 0x6c9   : > { %v9070_v10 = vpop.f32.mrf.mxu1  ;;  %v7696_v9 = vadd.f32 %v7662_v53, %v7557_v12 }
 0x6ca   : > { %v7528_v61 = vpop.f32.mrf.mxu0 }
 0x6cb   : > { %v7667_v3 = vpop.f32.mrf.mxu1  ;;  %7704 = vst.msk [vmem:[#allocation4] sm:$0xff] %vm7703_vm7, %v7696_v9  ;;  %v7558_v2 = vadd.f32 %v7528_v61, %v7397_v18 }
 0x6cc   : > { %v9044_v31 = vpop.f32.mrf.mxu0 }
 0x6cd   : > { %v9073_v30 = vpop.f32.mrf.mxu1  ;;  %v7697_v29 = vadd.f32 %v7667_v3, %v7558_v2 }
 0x6ce   : > { %v7533_v58 = vpop.f32.mrf.mxu0 }
 0x6cf   : > { %v7672_v50 = vpop.f32.mrf.mxu1  ;;  %7705 = vst.msk [vmem:[#allocation4 + $0x8] sm:$0xff] %vm7703_vm7, %v7697_v29  ;;  %v7559_v14 = vadd.f32 %v7533_v58, %v7402_v63  ;;  %v8389_v63 = vld [vmem:[%s13148_s7] ss:$0 sm:$0xff] }
 0x6d0   : > { %v9047_v4 = vpop.f32.mrf.mxu0 }
 0x6d1   : > { %v9076_v54 = vpop.f32.mrf.mxu1  ;;  %v7698_v36 = vadd.f32 %v7672_v50, %v7559_v14 }
 0x6d2   : > { %v7538_v26 = vpop.f32.mrf.mxu0  ;;  %v7712_v39 = vld [vmem:[#allocation4] sm:$0xff] }
 0x6d3   : > { %v7677_v51 = vpop.f32.mrf.mxu1  ;;  %7706 = vst.msk [vmem:[#allocation4 + $0x10] sm:$0xff] %vm7703_vm7, %v7698_v36  ;;  %v7560_v15 = vadd.f32 %v7538_v26, %v7407_v7 }
 0x6d4   : > { %v9050_v23 = vpop.f32.mrf.mxu0 }
 0x6d5   : > { %v9079_v38 = vpop.f32.mrf.mxu1  ;;  %v7699_v21 = vadd.f32 %v7677_v51, %v7560_v15 }
 0x6d6   : > { %v7718_v22 = vld [vmem:[#allocation4 + $0x1] sm:$0xff]  ;;  %v7543_v60 = vpop.f32.mrf.mxu0 }
 0x6d7   : > { %v7682_v19 = vpop.f32.mrf.mxu1  ;;  %v7724_v55 = vmax.f32 %v7712_v39, %v7718_v22  ;;  %7707 = vst.msk [vmem:[#allocation4 + $0x18] sm:$0xff] %vm7703_vm7, %v7699_v21  ;;  %v7561_v52 = vadd.f32 %v7543_v60, %v7412_v47  ;;  %v7713_v43 = vld [vmem:[#allocation4 + $0x8] sm:$0xff] }
 0x6d8   : > { %v9053_v24 = vpop.f32.mrf.mxu0 }
 0x6d9   : > { %v9082_v35 = vpop.f32.mrf.mxu1  ;;  %7730 = vst.msk [vmem:[#allocation4] sm:$0xff] %vm7703_vm7, %v7724_v55  ;;  %v7700_v8 = vadd.f32 %v7682_v19, %v7561_v52  ;;  %v7793_v55 = vld [vmem:[#allocation8 + $0x9] sm:$0x1] }
 0x6da   : > { %v7719_v5 = vld [vmem:[#allocation4 + $0x9] sm:$0xff]  ;;  %v7548_v18 = vpop.f32.mrf.mxu0 }
 0x6db   : > { %v7687_v41 = vpop.f32.mrf.mxu1  ;;  %v7725_v57 = vmax.f32 %v7713_v43, %v7719_v5  ;;  %7708 = vst.msk [vmem:[#allocation4 + $0x20] sm:$0xff] %vm7703_vm7, %v7700_v8  ;;  %v7562_v28 = vadd.f32 %v7548_v18, %v7417_v34  ;;  %v7714_v16 = vld [vmem:[#allocation4 + $0x10] sm:$0xff]  ;;  %v7972_v34 = vld [vmem:[%s13145_s4 + $0xb0] sm:$0xff]  ;;  %v7971_v18 = vld [vmem:[%s13145_s4 + $0xa8] sm:$0xff] }
 0x6dc   : > { %v9056_v25 = vpop.f32.mrf.mxu0  ;;  %v8065_v8 = vld [vmem:[%s13145_s4 + $0xf0] sm:$0xff] }
 0x6dd   : > { %v9085_v1 = vpop.f32.mrf.mxu1  ;;  %7731 = vst.msk [vmem:[#allocation4 + $0x8] sm:$0xff] %vm7703_vm7, %v7725_v57  ;;  %v7701_v27 = vadd.f32 %v7687_v41, %v7562_v28  ;;  %v8064_v41 = vld [vmem:[%s13145_s4 + $0xe8] sm:$0xff]  ;;  %v7969_v57 = vld [vmem:[%s13145_s4 + $0x98] sm:$0xff]  ;;  %v7968_v25 = vld [vmem:[%s13145_s4 + $0x90] sm:$0xff] }
 0x6de   : > { %v7720_v49 = vld [vmem:[#allocation4 + $0x11] sm:$0xff]  ;;  %v7553_v45 = vpop.f32.mrf.mxu0  ;;  %v8061_v1 = vld [vmem:[%s13145_s4 + $0xd0] sm:$0xff] }
 0x6df   : > { %v7692_v13 = vpop.f32.mrf.mxu1  ;;  %v7726_v33 = vmax.f32 %v7714_v16, %v7720_v49  ;;  %7709 = vst.msk [vmem:[#allocation4 + $0x28] sm:$0xff] %vm7703_vm7, %v7701_v27  ;;  %v7563_v56 = vadd.f32 %v7553_v45, %v7422_v40  ;;  %v7715_v44 = vld [vmem:[#allocation4 + $0x18] sm:$0xff]  ;;  %v8062_v28 = vld [vmem:[%s13145_s4 + $0xd8] sm:$0xff]  ;;  %v7967_v40 = vld [vmem:[%s13145_s4 + $0x88] sm:$0xff] }
 0x6e0   : > { %v9059_v48 = vpop.f32.mrf.mxu0  ;;  %v7736_v37 = vld [vmem:[#allocation4] sm:$0xff]  ;;  %v7966_v16 = vld [vmem:[%s13145_s4 + $0x80] sm:$0xff]  ;;  %v7965_v45 = vld [vmem:[#allocation8 + $0xb] sm:$0x1] }
 0x6e1   : > { %v9088_v46 = vpop.f32.mrf.mxu1  ;;  %7732 = vst.msk [vmem:[#allocation4 + $0x10] sm:$0xff] %vm7703_vm7, %v7726_v33  ;;  %v7702_v42 = vadd.f32 %v7692_v13, %v7563_v56  ;;  %v8060_v27 = vld [vmem:[%s13145_s4 + $0xc8] sm:$0xff]  ;;  %v8059_v49 = vld [vmem:[%s13145_s4 + $0xc0] sm:$0xff]  ;;  %v8058_v13 = vld [vmem:[#allocation8 + $0xc] sm:$0x1] }
 0x6e2   : > { %v7721_v0 = vld [vmem:[#allocation4 + $0x19] sm:$0xff] }
 0x6e3   : > { %v7727_v6 = vmax.f32 %v7715_v44, %v7721_v0  ;;  %7711 = vst.msk [vmem:[#allocation4 + $0x30] sm:$0x1] %vm7710_vm8, %v7702_v42  ;;  %v7716_v32 = vld [vmem:[#allocation4 + $0x20] sm:$0xff] }
 0x6e4   : > { %v7742_v59 = vld [vmem:[#allocation4 + $0x7] sm:$0xff] }
 0x6e5   : > { %v7748_v62 = vmax.f32 %v7736_v37, %v7742_v59  ;;  %7733 = vst.msk [vmem:[#allocation4 + $0x18] sm:$0xff] %vm7703_vm7, %v7727_v6  ;;  %v7737_v11 = vld [vmem:[#allocation4 + $0x8] sm:$0xff] }
 0x6e6   : > { %v7722_v53 = vld [vmem:[#allocation4 + $0x21] sm:$0xff] }
 0x6e7   : > { %7754 = vst.msk [vmem:[#allocation4] sm:$0xff] %vm7703_vm7, %v7748_v62  ;;  %v7728_v12 = vmax.f32 %v7716_v32, %v7722_v53  ;;  %v7717_v61 = vld [vmem:[#allocation4 + $0x28] sm:$0xff] }
 0x6e8   : > { %v7743_v10 = vld [vmem:[#allocation4 + $0xf] sm:$0xff] }
 0x6e9   : > { %v7749_v9 = vmax.f32 %v7737_v11, %v7743_v10  ;;  %7734 = vst.msk [vmem:[#allocation4 + $0x20] sm:$0xff] %vm7703_vm7, %v7728_v12  ;;  %v7738_v31 = vld [vmem:[#allocation4 + $0x10] sm:$0xff] }
 0x6ea   : > { %v7723_v3 = vld [vmem:[#allocation4 + $0x29] sm:$0xff] }
 0x6eb   : > { %7755 = vst.msk [vmem:[#allocation4 + $0x8] sm:$0xff] %vm7703_vm7, %v7749_v9  ;;  %v7729_v2 = vmax.f32 %v7717_v61, %v7723_v3 }
 0x6ec   : > { %v7744_v30 = vld [vmem:[#allocation4 + $0x17] sm:$0xff] }
 0x6ed   : > { %v7750_v29 = vmax.f32 %v7738_v31, %v7744_v30  ;;  %7735 = vst.msk [vmem:[#allocation4 + $0x28] sm:$0xff] %vm7703_vm7, %v7729_v2  ;;  %v7739_v14 = vld [vmem:[#allocation4 + $0x18] sm:$0xff] }
 0x6ee   : > { %v7761_v58 = vld [vmem:[#allocation4] ss:$2 sm:$0x7]  ;;  %v8160_v2 = vld [vmem:[%s13149_s8] sm:$0x1] }
 0x6ef   : > { %7756 = vst.msk [vmem:[#allocation4 + $0x10] sm:$0xff] %vm7703_vm7, %v7750_v29  ;;  %v7768_v50 = vadd.f32 %v8389_v63, %v7761_v58 }
 0x6f0   : > { %v7745_v4 = vld [vmem:[#allocation4 + $0x1f] sm:$0xff] }
 0x6f1   : > { %v7751_v54 = vmax.f32 %v7739_v14, %v7745_v4  ;;  %v7769_v7 = vmax.f32 %v7768_v50, 0.0  ;;  %v7740_v36 = vld [vmem:[#allocation4 + $0x20] sm:$0xff] }
 0x6f3   : > { %7757 = vst.msk [vmem:[#allocation4 + $0x18] sm:$0xff] %vm7703_vm7, %v7751_v54 }
 0x6f4   : > { %7771 = vst.msk [vmem:[#allocation8] sm:$0x7] %vm7770_vm9, %v7769_v7  ;;  %v7741_v26 = vld [vmem:[#allocation4 + $0x28] sm:$0x1]  ;;  %v7747_v15 = vld [vmem:[#allocation4 + $0x2f] sm:$0x1] }
 0x6f5   : > { %v7746_v51 = vld [vmem:[#allocation4 + $0x27] sm:$0xff]  ;;  %v7753_v38 = vmax.f32 %v7741_v26, %v7747_v15 }
 0x6f6   : > { %v7752_v23 = vmax.f32 %v7740_v36, %v7746_v51  ;;  %v7773_v47 = vld [vmem:[#allocation4 + $0xe] ss:$2 sm:$0x7] }
 0x6f7   : > { %7759 = vst.msk [vmem:[#allocation4 + $0x28] sm:$0x1] %vm7710_vm8, %v7753_v38  ;;  %v7774_v21 = vadd.f32 %v8389_v63, %v7773_v47 }
 0x6f8   : > { %7758 = vst.msk [vmem:[#allocation4 + $0x20] sm:$0xff] %vm7703_vm7, %v7752_v23 }
 0x6f9   : > { %v7775_v39 = vmax.f32 %v7774_v21, 0.0 }
 0x6fb   : > { %7776 = vst.msk [vmem:[#allocation8 + $0x3] sm:$0x7] %vm7770_vm9, %v7775_v39 }
 0x6ff   : > { %v7778_v22 = vld [vmem:[#allocation4 + $0x1c] ss:$2 sm:$0x7] }
 0x700   : > { %v7779_v60 = vadd.f32 %v8389_v63, %v7778_v22 }
 0x702   : > { %v7780_v19 = vmax.f32 %v7779_v60, 0.0 }
 0x704   : > { %7781 = vst.msk [vmem:[#allocation8 + $0x6] sm:$0x7] %vm7770_vm9, %v7780_v19 }
 0x70b   : > { %v7792_v52 = vld [vmem:[#allocation8 + $0x1] sm:$0xff] }
 0x70c   : > { %v7782_v24 = vld [vmem:[#allocation8] sm:$0xff]  ;;  %v7783_v35 = vld [vmem:[#allocation8 + $0x8] sm:$0x1]  ;;  %9105 = vmatprep.mubr.msk.f32.mxu0 %vm7703_vm7, %v7792_v52 }
 0x70d   : > { %9124 = vmatprep.mubr.msk.f32.mxu1 %vm7703_vm7, %v7782_v24  ;;  %9106 = vmatmul.mubr.msk.f32.vlgmr.msra.gmra.mxu0 %vm7703_vm7, %v7793_v55  ;;  %v7964_v43 = vld [vmem:[#allocation8 + $0x3] sm:$0xff] }
 0x70e   : > { %9125 = vmatmul.mubr.msk.f32.vlgmr.msra.gmra.mxu1 %vm7703_vm7, %v7783_v35  ;;  %9128 = vmatpush3.msra.mxu0 %v13017_v20  ;;  %v8057_v5 = vld [vmem:[#allocation8 + $0x4] sm:$0xff]  ;;  %v7970_v20 = vld [vmem:[%s13145_s4 + $0xa0] sm:$0xff] }
 0x70f   : > { %9147 = vmatpush3.msra.mxu1 %v13022_v17  ;;  %9129 = vmatprep.subr.mxu0 %v7972_v34  ;;  %v8063_v17 = vld [vmem:[%s13145_s4 + $0xe0] sm:$0xff] }
 0x710   : > { %9143 = vmatprep.mubr.msk.f32.mxu0 %vm7703_vm7, %v7964_v43  ;;  %9148 = vmatprep.subr.mxu1 %v8065_v8 }
 0x711   : > { %9162 = vmatprep.mubr.msk.f32.mxu1 %vm7703_vm7, %v8057_v5  ;;  %9130 = vmatpush3.msra.mxu0 %v7972_v34 }
 0x712   : > { %9149 = vmatpush3.msra.mxu1 %v8065_v8  ;;  %9131 = vmatprep.subr.mxu0 %v7971_v18 }
 0x713   : > { %9150 = vmatprep.subr.mxu1 %v8064_v41  ;;  %9132 = vmatpush3.msra.mxu0 %v7971_v18 }
 0x714   : > { %9151 = vmatpush3.msra.mxu1 %v8064_v41  ;;  %9133 = vmatprep.subr.mxu0 %v7970_v20 }
 0x715   : > { %9152 = vmatprep.subr.mxu1 %v8063_v17  ;;  %9134 = vmatpush3.msra.mxu0 %v7970_v20 }
 0x716   : > { %9153 = vmatpush3.msra.mxu1 %v8063_v17  ;;  %9135 = vmatprep.subr.mxu0 %v7969_v57 }
 0x717   : > { %9154 = vmatprep.subr.mxu1 %v8062_v28  ;;  %9136 = vmatpush3.msra.mxu0 %v7969_v57 }
 0x718   : > { %9155 = vmatpush3.msra.mxu1 %v8062_v28  ;;  %9137 = vmatprep.subr.mxu0 %v7968_v25 }
 0x719   : > { %9156 = vmatprep.subr.mxu1 %v8061_v1  ;;  %9138 = vmatpush3.msra.mxu0 %v7968_v25 }
 0x71a   : > { %9157 = vmatpush3.msra.mxu1 %v8061_v1  ;;  %9139 = vmatprep.subr.mxu0 %v7967_v40 }
 0x71b   : > { %9158 = vmatprep.subr.mxu1 %v8060_v27  ;;  %9140 = vmatpush3.msra.mxu0 %v7967_v40 }
 0x71c   : > { %9159 = vmatpush3.msra.mxu1 %v8060_v27  ;;  %9141 = vmatprep.subr.mxu0 %v7966_v16 }
 0x71d   : > { %9160 = vmatprep.subr.mxu1 %v8059_v49  ;;  %9142 = vmatpush3.msra.mxu0 %v7966_v16 }
 0x71e   : > { %9161 = vmatpush3.msra.mxu1 %v8059_v49  ;;  %9144 = vmatmul.mubr.msk.f32.vlgmr.msra.gmra.mxu0 %vm7703_vm7, %v7965_v45 }
 0x71f   : > { %9163 = vmatmul.mubr.msk.f32.vlgmr.msra.gmra.mxu1 %vm7703_vm7, %v8058_v13 }
 0x7cd   : > { %v9107_v33 = vpop.f32.mrf.mxu0 }
 0x7ce   : > { %v9126_v56 = vpop.f32.mrf.mxu1 }
 0x7cf   : > { %v7874_v48 = vpop.f32.mrf.mxu0  ;;  %v7961_v42 = vadd.f32 %v9126_v56, %v9107_v33 }
 0x7d0   : > { %v7955_v46 = vpop.f32.mrf.mxu1 }
 0x7d1   : > { %v7956_v6 = vadd.f32 %v7955_v46, %v7874_v48 }
 0x7de   : > { %v9145_v44 = vpop.f32.mrf.mxu0 }
 0x7df   : > { %v9164_v0 = vpop.f32.mrf.mxu1  ;;  %v8056_v37 = vadd.f32 %v9145_v44, %v7961_v42 }
 0x7e0   : > { %v8046_v59 = vpop.f32.mrf.mxu0 }
 0x7e1   : > { %v8149_v62 = vadd.f32 %v9164_v0, %v8056_v37  ;;  %v8055_v32 = vadd.f32 %v8046_v59, %v7956_v6  ;;  %v8139_v53 = vpop.f32.mrf.mxu1 }
 0x7e3   : > { %8151 = vst [vmem:[#allocation5 + $0x8] sm:$0x1] %v8149_v62  ;;  %v8148_v12 = vadd.f32 %v8139_v53, %v8055_v32 }
 0x7e5   : > { %8150 = vst [vmem:[#allocation5] sm:$0xff] %v8148_v12 }
 0x7ec   : > { %v8153_v11 = vld [vmem:[#allocation5 + $0x1] sm:$0xff] }
 0x7ed   : > { %v8154_v10 = vmax.f32 %v8148_v12, %v8153_v11 }
 0x7ef   : > { %8155 = vst [vmem:[#allocation5] sm:$0xff] %v8154_v10 }
 0x7f6   : > { %v8156_v9 = vld [vmem:[#allocation5] sm:$0x1f] }
 0x7f7   : > { %v8157_v61 = vld [vmem:[#allocation5 + $0x3] sm:$0x1f] }
 0x7f8   : > { %v8158_v3 = vmax.f32 %v8156_v9, %v8157_v61 }
 0x7fa   : > { %8159 = vst [vmem:[#allocation5] sm:$0x1f] %v8158_v3 }
 0x801   : > { %v8161_v31 = vld [vmem:[#allocation5] sm:$0x1] }
 0x802   : > { %v8162_v30 = vadd.f32 %v8161_v31, %v8160_v2 }
 0x804   : > { %v8163_v63 = vmax.f32 %v8162_v30, 0.0 }
 0x806   : > { %8165 = vst [vmem:[%s324_s29] sm:$0x1] %v8163_v63 }
 0x807   : > { %9248 = shalt.err (!%p9245_p3)
}
 0x808   : > { %s9249_s27 = scalar_lea.hbm %s8177_s21, 16  ;;  %s9253_s29 = scalar_lea.hbm %s13150_s9, 32 }
 0x809   : > { %p9250_p4 = scmp.ne.s32.totalorder %s8177_s21, %s9249_s27  ;;  %p9254_p9 = scmp.lt.s32.totalorder %s8177_s21, %s13150_s9 }
 0x80a   : > { %p9255_p10 = scmp.lt.s32.totalorder %s9253_s29, %s9249_s27 }
 0x80b   : > { %p9251_p7 = pnand %p9250_p4, %p9389_p5 }
 0x80c   : > { %p9256_p11 = por %p9255_p10, %p9254_p9 }
 0x80d   : > { %p9252_p8 = pneg %p9251_p7 }
 0x80f   : > { %p9257_p12 = pnand %p9256_p11, %p9252_p8 }
 0x811   : > { %9260 = shalt.err (!%p9257_p12)
}
 0x812   : > { %9166 = dma.vmem_to_hbm [thread:$0]  (%p9389_p5), %s8180_s14, 16, %s8177_s21, %s8167_s22  }
 0x813 PF: > { %p9172_p13 = scmp.ge.s32.totalorder %s9295_s12, 2  ;;  %s8191_s25 = sand.u32 1, %s9283_s30  }
 0x814   : > { %s8192_s23 = scalar_lea.sflag [#allocation10], %s8191_s25 }
 0x815   : > { %p9169_p0 = pnand %p9172_p13, %p9393_p6 }
 0x817   : > { %p9170_p1 = pneg %p9169_p0 }
 0x819   : > { %9278 = dma.done.wait (%p9170_p1), %s8192_s23, 16  }
 0x81a   : > { %9280 = vsyncadd (%p9170_p1), %s8192_s23, 4294967280  ;;  %p19_p2 = scmp.ge.s32.totalorder %s9376_s15, 4   ;;  %s13560_s30 = smov %s9287_s10 }
 0x81b   : > { %s13561_s10 = smov %s9291_s11  ;;  %s13562_s11 = smov %s9387_s18 }
 0x81c   : > { %s13563_s12 = smov %s9376_s15  ;;  %21 = sbr.rel (!%p19_p2) target bundleno = 3 (0x3), region = 128 }
 0x821   :  { %8196 = vsyncpa [#allocation10], 1 }
 0x822   :  { %8198 = vsyncpa [#allocation10 + $0x1], 1 }

</bundles_post_ra>
